<compile_context>
chip_gen: v6e
topology: v6e:2x2x1
jax: 0.10.0
libtpu: 0.0.40
codegen_flags: <defaults>
</compile_context>

<pallas_src>
import functools
import math

import jax
import jax.numpy as jnp
from jax.experimental import pallas as pl
from jax.experimental.pallas import tpu as pltpu


# ----------------------------- in-kernel helpers -----------------------------

def _gelu_tanh(x):
    # tanh-approximation of GELU (matches torch.nn.GELU() to ~3e-3 abs);
    # tanh runs on the EUP so the VALU slot is not loaded by a division.
    c = math.sqrt(2.0 / math.pi)
    return 0.5 * x * (1.0 + jnp.tanh(c * (x + 0.044715 * x * x * x)))


_TN_DIMS = (((0,), (0,)), ((), ()))  # contract major dim of both: A^T @ B
_NT_DIMS = (((1,), (1,)), ((), ()))  # contract minor dim of both: A @ B^T


# --------------------------------- fused kernel -------------------------------

def fused_block_kernel(x_ref, lng_ref, lnb_ref,
                       wqkv_ref, bqkv_ref, wout_ref, bout_ref,
                       wf0_ref, bf0_ref, wf1_ref, bf1_ref,
                       o_ref, *, heads, win_tokens, n_win, eps):
    f32 = jnp.float32
    bf16 = jnp.bfloat16
    S = win_tokens

    x = x_ref[...].astype(f32)                     # (C, Tg): channels x tokens
    C = x.shape[0]
    hd = C // heads

    g = lng_ref[...].astype(f32)                   # (C, 1)
    b = lnb_ref[...].astype(f32)                   # (C, 1)

    def layernorm(v):                              # per-token LN over channels
        mean = jnp.mean(v, axis=0, keepdims=True)
        var = jnp.mean((v - mean) ** 2, axis=0, keepdims=True)
        return (v - mean) * jax.lax.rsqrt(var + eps) * g + b

    # Per-head channel masks over the sublane (channel) axis, hoisted out of
    # the window loop (built once per grid step).
    ch = jax.lax.broadcasted_iota(jnp.int32, (C, 1), 0)
    masks_f32 = [((ch >= h * hd) & (ch < (h + 1) * hd)).astype(f32)
                 for h in range(heads)]
    masks_bf = [m.astype(bf16) for m in masks_f32]

    # ---------------- attention branch: LN -> fused QKV -> window attn -> proj
    y = layernorm(x).astype(bf16)                                     # (C, Tg)
    # single fused QKV matmul; softmax scale already folded into the Q rows.
    qkv = jnp.dot(wqkv_ref[...], y, preferred_element_type=f32) + bqkv_ref[...]
    q = qkv[0 * C:1 * C, :].astype(bf16)                              # (C, Tg)
    k = qkv[1 * C:2 * C, :].astype(bf16)
    v = qkv[2 * C:3 * C, :].astype(bf16)

    outs = []
    for w in range(n_win):                         # static unroll over windows
        c0 = w * S
        q_w = q[:, c0:c0 + S]                      # (C, S)
        k_w = k[:, c0:c0 + S]
        v_w = v[:, c0:c0 + S]
        # Stack heads along the query axis so ALL heads of this window go
        # through one MXU op each for scores and PV (channel-mask trick keeps
        # the contraction at K=C instead of K=head_dim).
        q_stack = jnp.concatenate([q_w * m for m in masks_bf], axis=1)   # (C, h*S)
        s_big = jax.lax.dot_general(q_stack, k_w, _TN_DIMS,
                                    preferred_element_type=f32)          # (h*S, S)
        s_big = s_big - jnp.max(s_big, axis=-1, keepdims=True)
        p = jnp.exp(s_big)
        p = p * pl.reciprocal(jnp.sum(p, axis=-1, keepdims=True), approx=True)
        out_big = jax.lax.dot_general(v_w, p.astype(bf16), _NT_DIMS,
                                      preferred_element_type=f32)        # (C, h*S)
        out_w = masks_f32[0] * out_big[:, 0:S]
        for h in range(1, heads):
            out_w = out_w + masks_f32[h] * out_big[:, h * S:(h + 1) * S]
        outs.append(out_w)                                               # (C, S)

    attn = jnp.concatenate(outs, axis=1) if n_win > 1 else outs[0]       # (C, Tg)
    proj = jnp.dot(wout_ref[...], attn.astype(bf16),
                   preferred_element_type=f32) + bout_ref[...]
    x1 = x + proj

    # ---------------- FFN branch: LN -> 1x1 -> GELU -> 1x1 -> +x1
    y2 = layernorm(x1).astype(bf16)
    h0 = jnp.dot(wf0_ref[...], y2, preferred_element_type=f32) + bf0_ref[...]
    h0 = _gelu_tanh(h0)
    ffn = jnp.dot(wf1_ref[...], h0.astype(bf16),
                  preferred_element_type=f32) + bf1_ref[...]

    o_ref[...] = (x1 + ffn).astype(o_ref.dtype)    # lane-dense (C, Tg) store


# ------------------------------ module forward --------------------------------

def _pick_group(n_windows, win_tokens, target_tokens=512):
    """Largest window-group giving >=2 lane-aligned (mult-of-128 token) steps.

    If no divisor gives lane-aligned blocks, fall back to a single grid step
    (block == full array, so no alignment constraint applies)."""
    best = n_windows
    for g in range(1, n_windows):
        if n_windows % g:
            continue
        tg = g * win_tokens
        if tg > target_tokens or tg % 128:
            continue
        best = g
    return best


def self_att_block(x_nchw, params, *, heads=8, window_size=8, shifts=0,
                   exp_ratio=2, eps=1e-5):
    B, C, H, W = x_nchw.shape
    ws = window_size
    assert H % ws == 0 and W % ws == 0 and C % heads == 0
    nh, nw = H // ws, W // ws
    S = ws * ws
    n_windows = B * nh * nw
    T = n_windows * S
    hd = C // heads
    scale = float(hd) ** (-0.5)
    Ce = exp_ratio * C
    f32, bf16 = jnp.float32, jnp.bfloat16

    # ---- one-time weight prep: transposed (out,in) layout, fused QKV, scale fold
    w_inp, b_inp = params["w_inp"], params["b_inp"]          # (C, 3C), (3C,)
    wqkv = jnp.concatenate([w_inp[:, 0:C] * scale,
                            w_inp[:, C:2 * C],
                            w_inp[:, 2 * C:3 * C]], axis=1).T.astype(bf16)   # (3C, C)
    bqkv = jnp.concatenate([b_inp[0:C] * scale, b_inp[C:2 * C],
                            b_inp[2 * C:3 * C]]).reshape(3 * C, 1).astype(f32)
    wout = params["w_out"].T.astype(bf16)                    # (C, C)
    bout = params["b_out"].reshape(C, 1).astype(f32)
    wf0 = params["ffn_w0"].T.astype(bf16)                    # (Ce, C)
    bf0 = params["ffn_b0"].reshape(Ce, 1).astype(f32)
    wf1 = params["ffn_w1"].T.astype(bf16)                    # (C, Ce)
    bf1 = params["ffn_b1"].reshape(C, 1).astype(f32)
    lng = params["ln_g"].reshape(C, 1).astype(f32)
    lnb = params["ln_b"].reshape(C, 1).astype(f32)

    # ---- single XLA-side rearrange: channels on sublanes, window-major tokens
    # on lanes.  (torch.roll / window partition handled here, outside the kernel.)
    x = jnp.transpose(x_nchw, (0, 2, 3, 1))                  # NHWC
    if shifts > 0:
        # TODO(synk): matches the original module, which applies torch.roll with
        # no shifted-window attention mask.
        x = jnp.roll(x, shift=(-shifts, -shifts), axis=(1, 2))
    xw = x.reshape(B, nh, ws, nw, ws, C)
    xw = jnp.transpose(xw, (5, 0, 1, 3, 2, 4)).reshape(C, T)  # (C, tokens)

    group = _pick_group(n_windows, S)
    Tg = group * S
    n_groups = n_windows // group

    tok_spec = pl.BlockSpec((C, Tg), lambda i: (0, i))

    def full_spec(a):
        zeros = (0,) * a.ndim
        return pl.BlockSpec(a.shape, lambda i: zeros)

    kernel = functools.partial(fused_block_kernel, heads=heads, win_tokens=S,
                               n_win=group, eps=eps)
    out = pl.pallas_call(
        kernel,
        out_shape=jax.ShapeDtypeStruct((C, T), x_nchw.dtype),
        grid=(n_groups,),
        in_specs=[tok_spec,
                  full_spec(lng), full_spec(lnb),
                  full_spec(wqkv), full_spec(bqkv),
                  full_spec(wout), full_spec(bout),
                  full_spec(wf0), full_spec(bf0),
                  full_spec(wf1), full_spec(bf1)],
        out_specs=tok_spec,
        compiler_params=pltpu.CompilerParams(
            dimension_semantics=("parallel",)),
    )(xw, lng, lnb, wqkv, bqkv, wout, bout, wf0, bf0, wf1, bf1)

    # ---- single XLA-side inverse rearrange back to NCHW ----
    out = out.reshape(C, B, nh, nw, ws, ws)
    out = jnp.transpose(out, (1, 2, 4, 3, 5, 0)).reshape(B, H, W, C)
    if shifts > 0:
        out = jnp.roll(out, shift=(shifts, shifts), axis=(1, 2))
    return jnp.transpose(out, (0, 3, 1, 2))


# ------------------------------ pure-JAX reference -----------------------------

def _ref_ln(x, g, b, eps=1e-5):
    m = jnp.mean(x, axis=-1, keepdims=True)
    v = jnp.mean((x - m) ** 2, axis=-1, keepdims=True)
    return (x - m) * jax.lax.rsqrt(v + eps) * g + b


def _ref_mm(x, w, b):
    return jnp.dot(x, w, precision=jax.lax.Precision.HIGHEST) + b


def ref_self_att_block(x_nchw, params, *, heads=8, window_size=8, shifts=0, exp_ratio=2):
    B, C, H, W = x_nchw.shape
    ws = window_size
    hd = C // heads
    x = jnp.transpose(x_nchw, (0, 2, 3, 1))

    y = _ref_ln(x, params["ln_g"], params["ln_b"])
    if shifts > 0:
        y = jnp.roll(y, shift=(-shifts, -shifts), axis=(1, 2))
    qkv = _ref_mm(y.reshape(-1, C), params["w_inp"], params["b_inp"])
    nh, nw = H // ws, W // ws
    qkv = qkv.reshape(B, nh, ws, nw, ws, 3, heads, hd)
    qkv = jnp.transpose(qkv, (5, 0, 1, 3, 6, 2, 4, 7)).reshape(3, B * nh * nw, heads, ws * ws, hd)
    q, k, v = qkv[0], qkv[1], qkv[2]
    s = jnp.einsum("whsd,whtd->whst", q, k, precision=jax.lax.Precision.HIGHEST) * (float(hd) ** -0.5)
    p = jax.nn.softmax(s, axis=-1)
    o = jnp.einsum("whst,whtd->whsd", p, v, precision=jax.lax.Precision.HIGHEST)
    o = o.reshape(B, nh, nw, heads, ws, ws, hd)
    o = jnp.transpose(o, (0, 1, 4, 2, 5, 3, 6)).reshape(B, H, W, C)
    o = _ref_mm(o.reshape(-1, C), params["w_out"], params["b_out"]).reshape(B, H, W, C)
    if shifts > 0:
        o = jnp.roll(o, shift=(shifts, shifts), axis=(1, 2))
    x = x + o

    y = _ref_ln(x, params["ln_g"], params["ln_b"]).reshape(-1, C)
    y = jax.nn.gelu(_ref_mm(y, params["ffn_w0"], params["ffn_b0"]), approximate=False)
    y = _ref_mm(y, params["ffn_w1"], params["ffn_b1"]).reshape(B, H, W, C)
    x = x + y
    return jnp.transpose(x, (0, 3, 1, 2))


# ----------------------------------- main --------------------------------------

if __name__ == "__main__":
    C = 32           # inp_channels == out_channels (needed for the residual)
    heads = 8
    window_size = 8
    shifts = 0       # SelfAttBlock default
    exp_ratio = 2    # SelfAttBlock default
    B, H, W = 2, 16, 16

    key = jax.random.PRNGKey(0)
    ks = jax.random.split(key, 11)
    f32 = jnp.float32
    params = {
        "ln_g":   1.0 + 0.1 * jax.random.normal(ks[0], (C,), f32),
        "ln_b":   0.1 * jax.random.normal(ks[1], (C,), f32),
        "w_inp":  0.1 * jax.random.normal(ks[2], (C, 3 * C), f32),
        "b_inp":  0.1 * jax.random.normal(ks[3], (3 * C,), f32),
        "w_out":  0.1 * jax.random.normal(ks[4], (C, C), f32),
        "b_out":  0.1 * jax.random.normal(ks[5], (C,), f32),
        "ffn_w0": 0.1 * jax.random.normal(ks[6], (C, exp_ratio * C), f32),
        "ffn_b0": 0.1 * jax.random.normal(ks[7], (exp_ratio * C,), f32),
        "ffn_w1": 0.1 * jax.random.normal(ks[8], (exp_ratio * C, C), f32),
        "ffn_b1": 0.1 * jax.random.normal(ks[9], (C,), f32),
    }
    x = jax.random.normal(ks[10], (B, C, H, W), f32)

    fwd = jax.jit(functools.partial(
        self_att_block, heads=heads, window_size=window_size,
        shifts=shifts, exp_ratio=exp_ratio))
    out = jax.block_until_ready(fwd(x, params))

    ref = ref_self_att_block(
        x, params, heads=heads, window_size=window_size,
        shifts=shifts, exp_ratio=exp_ratio)
    err = float(jnp.max(jnp.abs(out - ref)))
    assert out.shape == (B, C, H, W) and out.dtype == jnp.float32
    assert err < 5e-2, f"max abs diff vs reference too large: {err}"
    print("KERNEL_OK")
</pallas_src>

<mosaic_0001>
module attributes {stable_mosaic.version = 11 : i64} {
  func.func @fused_block_kernel(%arg0: i32, %arg1: memref<32x256xf32, #tpu.memory_space<vmem>>, %arg2: memref<32x1xf32, #tpu.memory_space<vmem>>, %arg3: memref<32x1xf32, #tpu.memory_space<vmem>>, %arg4: memref<96x32xbf16, #tpu.memory_space<vmem>>, %arg5: memref<96x1xf32, #tpu.memory_space<vmem>>, %arg6: memref<32x32xbf16, #tpu.memory_space<vmem>>, %arg7: memref<32x1xf32, #tpu.memory_space<vmem>>, %arg8: memref<64x32xbf16, #tpu.memory_space<vmem>>, %arg9: memref<64x1xf32, #tpu.memory_space<vmem>>, %arg10: memref<32x64xbf16, #tpu.memory_space<vmem>>, %arg11: memref<32x1xf32, #tpu.memory_space<vmem>>, %arg12: memref<32x256xf32, #tpu.memory_space<vmem>>) attributes {dimension_semantics = [#tpu.dimension_semantics<parallel>], iteration_bounds = array<i64: 2>, scalar_prefetch = 0 : i64, scratch_operands = 0 : i64, tpu.core_type = #tpu.core_type<tc>, window_params = [{transform_indices = @transform_0, window_bounds = array<i64: 32, 256>}, {pipeline_mode = #tpu.pipeline_mode<synchronous>, transform_indices = @transform_1, window_bounds = array<i64: 32, 1>}, {pipeline_mode = #tpu.pipeline_mode<synchronous>, transform_indices = @transform_2, window_bounds = array<i64: 32, 1>}, {pipeline_mode = #tpu.pipeline_mode<synchronous>, transform_indices = @transform_3, window_bounds = array<i64: 96, 32>}, {pipeline_mode = #tpu.pipeline_mode<synchronous>, transform_indices = @transform_4, window_bounds = array<i64: 96, 1>}, {pipeline_mode = #tpu.pipeline_mode<synchronous>, transform_indices = @transform_5, window_bounds = array<i64: 32, 32>}, {pipeline_mode = #tpu.pipeline_mode<synchronous>, transform_indices = @transform_6, window_bounds = array<i64: 32, 1>}, {pipeline_mode = #tpu.pipeline_mode<synchronous>, transform_indices = @transform_7, window_bounds = array<i64: 64, 32>}, {pipeline_mode = #tpu.pipeline_mode<synchronous>, transform_indices = @transform_8, window_bounds = array<i64: 64, 1>}, {pipeline_mode = #tpu.pipeline_mode<synchronous>, transform_indices = @transform_9, window_bounds = array<i64: 32, 64>}, {pipeline_mode = #tpu.pipeline_mode<synchronous>, transform_indices = @transform_10, window_bounds = array<i64: 32, 1>}, {transform_indices = @transform_11, window_bounds = array<i64: 32, 256>}]} {
    %c0 = arith.constant 0 : index
    %c0_0 = arith.constant 0 : index
    %0 = vector.load %arg1[%c0, %c0_0] : memref<32x256xf32, #tpu.memory_space<vmem>>, vector<32x256xf32>
    %c0_1 = arith.constant 0 : index
    %c0_2 = arith.constant 0 : index
    %1 = vector.load %arg2[%c0_1, %c0_2] : memref<32x1xf32, #tpu.memory_space<vmem>>, vector<32x1xf32>
    %c0_3 = arith.constant 0 : index
    %c0_4 = arith.constant 0 : index
    %2 = vector.load %arg3[%c0_3, %c0_4] : memref<32x1xf32, #tpu.memory_space<vmem>>, vector<32x1xf32>
    %3 = tpu.iota {dimensions = array<i32: 0>} : vector<32x1xi32>
    %c0_i32 = arith.constant 0 : i32
    %4 = vector.broadcast %c0_i32 : i32 to vector<32x1xi32>
    %5 = arith.cmpi sge, %3, %4 : vector<32x1xi32>
    %c4_i32 = arith.constant 4 : i32
    %6 = vector.broadcast %c4_i32 : i32 to vector<32x1xi32>
    %7 = arith.cmpi slt, %3, %6 : vector<32x1xi32>
    %8 = arith.andi %5, %7 : vector<32x1xi1>
    %9 = arith.extui %8 : vector<32x1xi1> to vector<32x1xi32>
    %10 = arith.sitofp %9 : vector<32x1xi32> to vector<32x1xf32>
    %c4_i32_5 = arith.constant 4 : i32
    %11 = vector.broadcast %c4_i32_5 : i32 to vector<32x1xi32>
    %12 = arith.cmpi sge, %3, %11 : vector<32x1xi32>
    %c8_i32 = arith.constant 8 : i32
    %13 = vector.broadcast %c8_i32 : i32 to vector<32x1xi32>
    %14 = arith.cmpi slt, %3, %13 : vector<32x1xi32>
    %15 = arith.andi %12, %14 : vector<32x1xi1>
    %16 = arith.extui %15 : vector<32x1xi1> to vector<32x1xi32>
    %17 = arith.sitofp %16 : vector<32x1xi32> to vector<32x1xf32>
    %c8_i32_6 = arith.constant 8 : i32
    %18 = vector.broadcast %c8_i32_6 : i32 to vector<32x1xi32>
    %19 = arith.cmpi sge, %3, %18 : vector<32x1xi32>
    %c12_i32 = arith.constant 12 : i32
    %20 = vector.broadcast %c12_i32 : i32 to vector<32x1xi32>
    %21 = arith.cmpi slt, %3, %20 : vector<32x1xi32>
    %22 = arith.andi %19, %21 : vector<32x1xi1>
    %23 = arith.extui %22 : vector<32x1xi1> to vector<32x1xi32>
    %24 = arith.sitofp %23 : vector<32x1xi32> to vector<32x1xf32>
    %c12_i32_7 = arith.constant 12 : i32
    %25 = vector.broadcast %c12_i32_7 : i32 to vector<32x1xi32>
    %26 = arith.cmpi sge, %3, %25 : vector<32x1xi32>
    %c16_i32 = arith.constant 16 : i32
    %27 = vector.broadcast %c16_i32 : i32 to vector<32x1xi32>
    %28 = arith.cmpi slt, %3, %27 : vector<32x1xi32>
    %29 = arith.andi %26, %28 : vector<32x1xi1>
    %30 = arith.extui %29 : vector<32x1xi1> to vector<32x1xi32>
    %31 = arith.sitofp %30 : vector<32x1xi32> to vector<32x1xf32>
    %c16_i32_8 = arith.constant 16 : i32
    %32 = vector.broadcast %c16_i32_8 : i32 to vector<32x1xi32>
    %33 = arith.cmpi sge, %3, %32 : vector<32x1xi32>
    %c20_i32 = arith.constant 20 : i32
    %34 = vector.broadcast %c20_i32 : i32 to vector<32x1xi32>
    %35 = arith.cmpi slt, %3, %34 : vector<32x1xi32>
    %36 = arith.andi %33, %35 : vector<32x1xi1>
    %37 = arith.extui %36 : vector<32x1xi1> to vector<32x1xi32>
    %38 = arith.sitofp %37 : vector<32x1xi32> to vector<32x1xf32>
    %c20_i32_9 = arith.constant 20 : i32
    %39 = vector.broadcast %c20_i32_9 : i32 to vector<32x1xi32>
    %40 = arith.cmpi sge, %3, %39 : vector<32x1xi32>
    %c24_i32 = arith.constant 24 : i32
    %41 = vector.broadcast %c24_i32 : i32 to vector<32x1xi32>
    %42 = arith.cmpi slt, %3, %41 : vector<32x1xi32>
    %43 = arith.andi %40, %42 : vector<32x1xi1>
    %44 = arith.extui %43 : vector<32x1xi1> to vector<32x1xi32>
    %45 = arith.sitofp %44 : vector<32x1xi32> to vector<32x1xf32>
    %c24_i32_10 = arith.constant 24 : i32
    %46 = vector.broadcast %c24_i32_10 : i32 to vector<32x1xi32>
    %47 = arith.cmpi sge, %3, %46 : vector<32x1xi32>
    %c28_i32 = arith.constant 28 : i32
    %48 = vector.broadcast %c28_i32 : i32 to vector<32x1xi32>
    %49 = arith.cmpi slt, %3, %48 : vector<32x1xi32>
    %50 = arith.andi %47, %49 : vector<32x1xi1>
    %51 = arith.extui %50 : vector<32x1xi1> to vector<32x1xi32>
    %52 = arith.sitofp %51 : vector<32x1xi32> to vector<32x1xf32>
    %c28_i32_11 = arith.constant 28 : i32
    %53 = vector.broadcast %c28_i32_11 : i32 to vector<32x1xi32>
    %54 = arith.cmpi sge, %3, %53 : vector<32x1xi32>
    %c32_i32 = arith.constant 32 : i32
    %55 = vector.broadcast %c32_i32 : i32 to vector<32x1xi32>
    %56 = arith.cmpi slt, %3, %55 : vector<32x1xi32>
    %57 = arith.andi %54, %56 : vector<32x1xi1>
    %58 = arith.extui %57 : vector<32x1xi1> to vector<32x1xi32>
    %59 = arith.sitofp %58 : vector<32x1xi32> to vector<32x1xf32>
    %60 = arith.truncf %10 : vector<32x1xf32> to vector<32x1xbf16>
    %61 = arith.truncf %17 : vector<32x1xf32> to vector<32x1xbf16>
    %62 = arith.truncf %24 : vector<32x1xf32> to vector<32x1xbf16>
    %63 = arith.truncf %31 : vector<32x1xf32> to vector<32x1xbf16>
    %64 = arith.truncf %38 : vector<32x1xf32> to vector<32x1xbf16>
    %65 = arith.truncf %45 : vector<32x1xf32> to vector<32x1xbf16>
    %66 = arith.truncf %52 : vector<32x1xf32> to vector<32x1xbf16>
    %67 = arith.truncf %59 : vector<32x1xf32> to vector<32x1xbf16>
    %cst = arith.constant dense<0.000000e+00> : vector<256xf32>
    %68 = vector.multi_reduction <add>, %0, %cst [0] : vector<32x256xf32> to vector<256xf32>
    %69 = vector.shape_cast %68 : vector<256xf32> to vector<1x256xf32>
    %cst_12 = arith.constant 3.200000e+01 : f32
    %70 = vector.broadcast %cst_12 : f32 to vector<1x256xf32>
    %71 = arith.divf %69, %70 : vector<1x256xf32>
    %72 = vector.broadcast %71 : vector<1x256xf32> to vector<32x256xf32>
    %73 = arith.subf %0, %72 : vector<32x256xf32>
    %74 = arith.mulf %73, %73 : vector<32x256xf32>
    %cst_13 = arith.constant dense<0.000000e+00> : vector<256xf32>
    %75 = vector.multi_reduction <add>, %74, %cst_13 [0] : vector<32x256xf32> to vector<256xf32>
    %76 = vector.shape_cast %75 : vector<256xf32> to vector<1x256xf32>
    %cst_14 = arith.constant 3.200000e+01 : f32
    %77 = vector.broadcast %cst_14 : f32 to vector<1x256xf32>
    %78 = arith.divf %76, %77 : vector<1x256xf32>
    %79 = vector.broadcast %71 : vector<1x256xf32> to vector<32x256xf32>
    %80 = arith.subf %0, %79 : vector<32x256xf32>
    %cst_15 = arith.constant 9.99999974E-6 : f32
    %81 = vector.broadcast %cst_15 : f32 to vector<1x256xf32>
    %82 = arith.addf %78, %81 : vector<1x256xf32>
    %83 = math.rsqrt %82 : vector<1x256xf32>
    %84 = vector.broadcast %83 : vector<1x256xf32> to vector<32x256xf32>
    %85 = arith.mulf %80, %84 : vector<32x256xf32>
    %86 = vector.broadcast %1 : vector<32x1xf32> to vector<32x256xf32>
    %87 = arith.mulf %85, %86 : vector<32x256xf32>
    %88 = vector.broadcast %2 : vector<32x1xf32> to vector<32x256xf32>
    %89 = arith.addf %87, %88 : vector<32x256xf32>
    %90 = arith.truncf %89 : vector<32x256xf32> to vector<32x256xbf16>
    %c0_16 = arith.constant 0 : index
    %c0_17 = arith.constant 0 : index
    %91 = vector.load %arg4[%c0_16, %c0_17] : memref<96x32xbf16, #tpu.memory_space<vmem>>, vector<96x32xbf16>
    %cst_18 = arith.constant dense<0.000000e+00> : vector<96x256xf32>
    %92 = tpu.matmul %91, %90, %cst_18 {dimension_numbers = #tpu.dot_dimension_numbers<[1], [0], [0], [1], [0, 0, 1, 1], [], []>} : vector<96x32xbf16>, vector<32x256xbf16>, vector<96x256xf32> -> vector<96x256xf32>
    %c0_19 = arith.constant 0 : index
    %c0_20 = arith.constant 0 : index
    %93 = vector.load %arg5[%c0_19, %c0_20] : memref<96x1xf32, #tpu.memory_space<vmem>>, vector<96x1xf32>
    %94 = vector.broadcast %93 : vector<96x1xf32> to vector<96x256xf32>
    %95 = arith.addf %92, %94 : vector<96x256xf32>
    %96 = vector.extract_strided_slice %95 {offsets = [0, 0], sizes = [32, 256], strides = [1, 1]} : vector<96x256xf32> to vector<32x256xf32>
    %97 = arith.truncf %96 : vector<32x256xf32> to vector<32x256xbf16>
    %98 = vector.extract_strided_slice %95 {offsets = [32, 0], sizes = [32, 256], strides = [1, 1]} : vector<96x256xf32> to vector<32x256xf32>
    %99 = arith.truncf %98 : vector<32x256xf32> to vector<32x256xbf16>
    %100 = vector.extract_strided_slice %95 {offsets = [64, 0], sizes = [32, 256], strides = [1, 1]} : vector<96x256xf32> to vector<32x256xf32>
    %101 = arith.truncf %100 : vector<32x256xf32> to vector<32x256xbf16>
    %102 = vector.extract_strided_slice %97 {offsets = [0, 0], sizes = [32, 64], strides = [1, 1]} : vector<32x256xbf16> to vector<32x64xbf16>
    %103 = vector.extract_strided_slice %99 {offsets = [0, 0], sizes = [32, 64], strides = [1, 1]} : vector<32x256xbf16> to vector<32x64xbf16>
    %104 = vector.extract_strided_slice %101 {offsets = [0, 0], sizes = [32, 64], strides = [1, 1]} : vector<32x256xbf16> to vector<32x64xbf16>
    %105 = vector.broadcast %60 : vector<32x1xbf16> to vector<32x64xbf16>
    %106 = arith.mulf %102, %105 : vector<32x64xbf16>
    %107 = vector.broadcast %61 : vector<32x1xbf16> to vector<32x64xbf16>
    %108 = arith.mulf %102, %107 : vector<32x64xbf16>
    %109 = vector.broadcast %62 : vector<32x1xbf16> to vector<32x64xbf16>
    %110 = arith.mulf %102, %109 : vector<32x64xbf16>
    %111 = vector.broadcast %63 : vector<32x1xbf16> to vector<32x64xbf16>
    %112 = arith.mulf %102, %111 : vector<32x64xbf16>
    %113 = vector.broadcast %64 : vector<32x1xbf16> to vector<32x64xbf16>
    %114 = arith.mulf %102, %113 : vector<32x64xbf16>
    %115 = vector.broadcast %65 : vector<32x1xbf16> to vector<32x64xbf16>
    %116 = arith.mulf %102, %115 : vector<32x64xbf16>
    %117 = vector.broadcast %66 : vector<32x1xbf16> to vector<32x64xbf16>
    %118 = arith.mulf %102, %117 : vector<32x64xbf16>
    %119 = vector.broadcast %67 : vector<32x1xbf16> to vector<32x64xbf16>
    %120 = arith.mulf %102, %119 : vector<32x64xbf16>
    %121 = tpu.concatenate %106, %108, %110, %112, %114, %116, %118, %120 in 1 : vector<32x64xbf16>, vector<32x64xbf16>, vector<32x64xbf16>, vector<32x64xbf16>, vector<32x64xbf16>, vector<32x64xbf16>, vector<32x64xbf16>, vector<32x64xbf16> -> vector<32x512xbf16>
    %cst_21 = arith.constant dense<0.000000e+00> : vector<512x64xf32>
    %122 = tpu.matmul %121, %103, %cst_21 {dimension_numbers = #tpu.dot_dimension_numbers<[0], [0], [1], [1], [0, 1, 1, 1], [], []>} : vector<32x512xbf16>, vector<32x64xbf16>, vector<512x64xf32> -> vector<512x64xf32>
    %cst_22 = arith.constant dense<0xFF800000> : vector<512xf32>
    %123 = vector.multi_reduction <maximumf>, %122, %cst_22 [1] : vector<512x64xf32> to vector<512xf32>
    %124 = vector.shape_cast %123 : vector<512xf32> to vector<512x1xf32>
    %125 = vector.broadcast %124 : vector<512x1xf32> to vector<512x64xf32>
    %126 = arith.subf %122, %125 : vector<512x64xf32>
    %127 = math.exp %126 : vector<512x64xf32>
    %cst_23 = arith.constant dense<0.000000e+00> : vector<512xf32>
    %128 = vector.multi_reduction <add>, %127, %cst_23 [1] : vector<512x64xf32> to vector<512xf32>
    %129 = vector.shape_cast %128 : vector<512xf32> to vector<512x1xf32>
    %130 = tpu.reciprocal %129 {approx = true} : vector<512x1xf32> -> vector<512x1xf32>
    %131 = vector.broadcast %130 : vector<512x1xf32> to vector<512x64xf32>
    %132 = arith.mulf %127, %131 : vector<512x64xf32>
    %133 = arith.truncf %132 : vector<512x64xf32> to vector<512x64xbf16>
    %cst_24 = arith.constant dense<0.000000e+00> : vector<32x512xf32>
    %134 = tpu.matmul %104, %133, %cst_24 {dimension_numbers = #tpu.dot_dimension_numbers<[1], [1], [0], [0], [0, 0, 1, 0], [], []>} : vector<32x64xbf16>, vector<512x64xbf16>, vector<32x512xf32> -> vector<32x512xf32>
    %135 = vector.extract_strided_slice %134 {offsets = [0, 0], sizes = [32, 64], strides = [1, 1]} : vector<32x512xf32> to vector<32x64xf32>
    %136 = vector.broadcast %10 : vector<32x1xf32> to vector<32x64xf32>
    %137 = arith.mulf %136, %135 : vector<32x64xf32>
    %138 = vector.extract_strided_slice %134 {offsets = [0, 64], sizes = [32, 64], strides = [1, 1]} : vector<32x512xf32> to vector<32x64xf32>
    %139 = vector.broadcast %17 : vector<32x1xf32> to vector<32x64xf32>
    %140 = arith.mulf %139, %138 : vector<32x64xf32>
    %141 = arith.addf %137, %140 : vector<32x64xf32>
    %142 = vector.extract_strided_slice %134 {offsets = [0, 128], sizes = [32, 64], strides = [1, 1]} : vector<32x512xf32> to vector<32x64xf32>
    %143 = vector.broadcast %24 : vector<32x1xf32> to vector<32x64xf32>
    %144 = arith.mulf %143, %142 : vector<32x64xf32>
    %145 = arith.addf %141, %144 : vector<32x64xf32>
    %146 = vector.extract_strided_slice %134 {offsets = [0, 192], sizes = [32, 64], strides = [1, 1]} : vector<32x512xf32> to vector<32x64xf32>
    %147 = vector.broadcast %31 : vector<32x1xf32> to vector<32x64xf32>
    %148 = arith.mulf %147, %146 : vector<32x64xf32>
    %149 = arith.addf %145, %148 : vector<32x64xf32>
    %150 = vector.extract_strided_slice %134 {offsets = [0, 256], sizes = [32, 64], strides = [1, 1]} : vector<32x512xf32> to vector<32x64xf32>
    %151 = vector.broadcast %38 : vector<32x1xf32> to vector<32x64xf32>
    %152 = arith.mulf %151, %150 : vector<32x64xf32>
    %153 = arith.addf %149, %152 : vector<32x64xf32>
    %154 = vector.extract_strided_slice %134 {offsets = [0, 320], sizes = [32, 64], strides = [1, 1]} : vector<32x512xf32> to vector<32x64xf32>
    %155 = vector.broadcast %45 : vector<32x1xf32> to vector<32x64xf32>
    %156 = arith.mulf %155, %154 : vector<32x64xf32>
    %157 = arith.addf %153, %156 : vector<32x64xf32>
    %158 = vector.extract_strided_slice %134 {offsets = [0, 384], sizes = [32, 64], strides = [1, 1]} : vector<32x512xf32> to vector<32x64xf32>
    %159 = vector.broadcast %52 : vector<32x1xf32> to vector<32x64xf32>
    %160 = arith.mulf %159, %158 : vector<32x64xf32>
    %161 = arith.addf %157, %160 : vector<32x64xf32>
    %162 = vector.extract_strided_slice %134 {offsets = [0, 448], sizes = [32, 64], strides = [1, 1]} : vector<32x512xf32> to vector<32x64xf32>
    %163 = vector.broadcast %59 : vector<32x1xf32> to vector<32x64xf32>
    %164 = arith.mulf %163, %162 : vector<32x64xf32>
    %165 = arith.addf %161, %164 : vector<32x64xf32>
    %166 = vector.extract_strided_slice %97 {offsets = [0, 64], sizes = [32, 64], strides = [1, 1]} : vector<32x256xbf16> to vector<32x64xbf16>
    %167 = vector.extract_strided_slice %99 {offsets = [0, 64], sizes = [32, 64], strides = [1, 1]} : vector<32x256xbf16> to vector<32x64xbf16>
    %168 = vector.extract_strided_slice %101 {offsets = [0, 64], sizes = [32, 64], strides = [1, 1]} : vector<32x256xbf16> to vector<32x64xbf16>
    %169 = vector.broadcast %60 : vector<32x1xbf16> to vector<32x64xbf16>
    %170 = arith.mulf %166, %169 : vector<32x64xbf16>
    %171 = vector.broadcast %61 : vector<32x1xbf16> to vector<32x64xbf16>
    %172 = arith.mulf %166, %171 : vector<32x64xbf16>
    %173 = vector.broadcast %62 : vector<32x1xbf16> to vector<32x64xbf16>
    %174 = arith.mulf %166, %173 : vector<32x64xbf16>
    %175 = vector.broadcast %63 : vector<32x1xbf16> to vector<32x64xbf16>
    %176 = arith.mulf %166, %175 : vector<32x64xbf16>
    %177 = vector.broadcast %64 : vector<32x1xbf16> to vector<32x64xbf16>
    %178 = arith.mulf %166, %177 : vector<32x64xbf16>
    %179 = vector.broadcast %65 : vector<32x1xbf16> to vector<32x64xbf16>
    %180 = arith.mulf %166, %179 : vector<32x64xbf16>
    %181 = vector.broadcast %66 : vector<32x1xbf16> to vector<32x64xbf16>
    %182 = arith.mulf %166, %181 : vector<32x64xbf16>
    %183 = vector.broadcast %67 : vector<32x1xbf16> to vector<32x64xbf16>
    %184 = arith.mulf %166, %183 : vector<32x64xbf16>
    %185 = tpu.concatenate %170, %172, %174, %176, %178, %180, %182, %184 in 1 : vector<32x64xbf16>, vector<32x64xbf16>, vector<32x64xbf16>, vector<32x64xbf16>, vector<32x64xbf16>, vector<32x64xbf16>, vector<32x64xbf16>, vector<32x64xbf16> -> vector<32x512xbf16>
    %cst_25 = arith.constant dense<0.000000e+00> : vector<512x64xf32>
    %186 = tpu.matmul %185, %167, %cst_25 {dimension_numbers = #tpu.dot_dimension_numbers<[0], [0], [1], [1], [0, 1, 1, 1], [], []>} : vector<32x512xbf16>, vector<32x64xbf16>, vector<512x64xf32> -> vector<512x64xf32>
    %cst_26 = arith.constant dense<0xFF800000> : vector<512xf32>
    %187 = vector.multi_reduction <maximumf>, %186, %cst_26 [1] : vector<512x64xf32> to vector<512xf32>
    %188 = vector.shape_cast %187 : vector<512xf32> to vector<512x1xf32>
    %189 = vector.broadcast %188 : vector<512x1xf32> to vector<512x64xf32>
    %190 = arith.subf %186, %189 : vector<512x64xf32>
    %191 = math.exp %190 : vector<512x64xf32>
    %cst_27 = arith.constant dense<0.000000e+00> : vector<512xf32>
    %192 = vector.multi_reduction <add>, %191, %cst_27 [1] : vector<512x64xf32> to vector<512xf32>
    %193 = vector.shape_cast %192 : vector<512xf32> to vector<512x1xf32>
    %194 = tpu.reciprocal %193 {approx = true} : vector<512x1xf32> -> vector<512x1xf32>
    %195 = vector.broadcast %194 : vector<512x1xf32> to vector<512x64xf32>
    %196 = arith.mulf %191, %195 : vector<512x64xf32>
    %197 = arith.truncf %196 : vector<512x64xf32> to vector<512x64xbf16>
    %cst_28 = arith.constant dense<0.000000e+00> : vector<32x512xf32>
    %198 = tpu.matmul %168, %197, %cst_28 {dimension_numbers = #tpu.dot_dimension_numbers<[1], [1], [0], [0], [0, 0, 1, 0], [], []>} : vector<32x64xbf16>, vector<512x64xbf16>, vector<32x512xf32> -> vector<32x512xf32>
    %199 = vector.extract_strided_slice %198 {offsets = [0, 0], sizes = [32, 64], strides = [1, 1]} : vector<32x512xf32> to vector<32x64xf32>
    %200 = vector.broadcast %10 : vector<32x1xf32> to vector<32x64xf32>
    %201 = arith.mulf %200, %199 : vector<32x64xf32>
    %202 = vector.extract_strided_slice %198 {offsets = [0, 64], sizes = [32, 64], strides = [1, 1]} : vector<32x512xf32> to vector<32x64xf32>
    %203 = vector.broadcast %17 : vector<32x1xf32> to vector<32x64xf32>
    %204 = arith.mulf %203, %202 : vector<32x64xf32>
    %205 = arith.addf %201, %204 : vector<32x64xf32>
    %206 = vector.extract_strided_slice %198 {offsets = [0, 128], sizes = [32, 64], strides = [1, 1]} : vector<32x512xf32> to vector<32x64xf32>
    %207 = vector.broadcast %24 : vector<32x1xf32> to vector<32x64xf32>
    %208 = arith.mulf %207, %206 : vector<32x64xf32>
    %209 = arith.addf %205, %208 : vector<32x64xf32>
    %210 = vector.extract_strided_slice %198 {offsets = [0, 192], sizes = [32, 64], strides = [1, 1]} : vector<32x512xf32> to vector<32x64xf32>
    %211 = vector.broadcast %31 : vector<32x1xf32> to vector<32x64xf32>
    %212 = arith.mulf %211, %210 : vector<32x64xf32>
    %213 = arith.addf %209, %212 : vector<32x64xf32>
    %214 = vector.extract_strided_slice %198 {offsets = [0, 256], sizes = [32, 64], strides = [1, 1]} : vector<32x512xf32> to vector<32x64xf32>
    %215 = vector.broadcast %38 : vector<32x1xf32> to vector<32x64xf32>
    %216 = arith.mulf %215, %214 : vector<32x64xf32>
    %217 = arith.addf %213, %216 : vector<32x64xf32>
    %218 = vector.extract_strided_slice %198 {offsets = [0, 320], sizes = [32, 64], strides = [1, 1]} : vector<32x512xf32> to vector<32x64xf32>
    %219 = vector.broadcast %45 : vector<32x1xf32> to vector<32x64xf32>
    %220 = arith.mulf %219, %218 : vector<32x64xf32>
    %221 = arith.addf %217, %220 : vector<32x64xf32>
    %222 = vector.extract_strided_slice %198 {offsets = [0, 384], sizes = [32, 64], strides = [1, 1]} : vector<32x512xf32> to vector<32x64xf32>
    %223 = vector.broadcast %52 : vector<32x1xf32> to vector<32x64xf32>
    %224 = arith.mulf %223, %222 : vector<32x64xf32>
    %225 = arith.addf %221, %224 : vector<32x64xf32>
    %226 = vector.extract_strided_slice %198 {offsets = [0, 448], sizes = [32, 64], strides = [1, 1]} : vector<32x512xf32> to vector<32x64xf32>
    %227 = vector.broadcast %59 : vector<32x1xf32> to vector<32x64xf32>
    %228 = arith.mulf %227, %226 : vector<32x64xf32>
    %229 = arith.addf %225, %228 : vector<32x64xf32>
    %230 = vector.extract_strided_slice %97 {offsets = [0, 128], sizes = [32, 64], strides = [1, 1]} : vector<32x256xbf16> to vector<32x64xbf16>
    %231 = vector.extract_strided_slice %99 {offsets = [0, 128], sizes = [32, 64], strides = [1, 1]} : vector<32x256xbf16> to vector<32x64xbf16>
    %232 = vector.extract_strided_slice %101 {offsets = [0, 128], sizes = [32, 64], strides = [1, 1]} : vector<32x256xbf16> to vector<32x64xbf16>
    %233 = vector.broadcast %60 : vector<32x1xbf16> to vector<32x64xbf16>
    %234 = arith.mulf %230, %233 : vector<32x64xbf16>
    %235 = vector.broadcast %61 : vector<32x1xbf16> to vector<32x64xbf16>
    %236 = arith.mulf %230, %235 : vector<32x64xbf16>
    %237 = vector.broadcast %62 : vector<32x1xbf16> to vector<32x64xbf16>
    %238 = arith.mulf %230, %237 : vector<32x64xbf16>
    %239 = vector.broadcast %63 : vector<32x1xbf16> to vector<32x64xbf16>
    %240 = arith.mulf %230, %239 : vector<32x64xbf16>
    %241 = vector.broadcast %64 : vector<32x1xbf16> to vector<32x64xbf16>
    %242 = arith.mulf %230, %241 : vector<32x64xbf16>
    %243 = vector.broadcast %65 : vector<32x1xbf16> to vector<32x64xbf16>
    %244 = arith.mulf %230, %243 : vector<32x64xbf16>
    %245 = vector.broadcast %66 : vector<32x1xbf16> to vector<32x64xbf16>
    %246 = arith.mulf %230, %245 : vector<32x64xbf16>
    %247 = vector.broadcast %67 : vector<32x1xbf16> to vector<32x64xbf16>
    %248 = arith.mulf %230, %247 : vector<32x64xbf16>
    %249 = tpu.concatenate %234, %236, %238, %240, %242, %244, %246, %248 in 1 : vector<32x64xbf16>, vector<32x64xbf16>, vector<32x64xbf16>, vector<32x64xbf16>, vector<32x64xbf16>, vector<32x64xbf16>, vector<32x64xbf16>, vector<32x64xbf16> -> vector<32x512xbf16>
    %cst_29 = arith.constant dense<0.000000e+00> : vector<512x64xf32>
    %250 = tpu.matmul %249, %231, %cst_29 {dimension_numbers = #tpu.dot_dimension_numbers<[0], [0], [1], [1], [0, 1, 1, 1], [], []>} : vector<32x512xbf16>, vector<32x64xbf16>, vector<512x64xf32> -> vector<512x64xf32>
    %cst_30 = arith.constant dense<0xFF800000> : vector<512xf32>
    %251 = vector.multi_reduction <maximumf>, %250, %cst_30 [1] : vector<512x64xf32> to vector<512xf32>
    %252 = vector.shape_cast %251 : vector<512xf32> to vector<512x1xf32>
    %253 = vector.broadcast %252 : vector<512x1xf32> to vector<512x64xf32>
    %254 = arith.subf %250, %253 : vector<512x64xf32>
    %255 = math.exp %254 : vector<512x64xf32>
    %cst_31 = arith.constant dense<0.000000e+00> : vector<512xf32>
    %256 = vector.multi_reduction <add>, %255, %cst_31 [1] : vector<512x64xf32> to vector<512xf32>
    %257 = vector.shape_cast %256 : vector<512xf32> to vector<512x1xf32>
    %258 = tpu.reciprocal %257 {approx = true} : vector<512x1xf32> -> vector<512x1xf32>
    %259 = vector.broadcast %258 : vector<512x1xf32> to vector<512x64xf32>
    %260 = arith.mulf %255, %259 : vector<512x64xf32>
    %261 = arith.truncf %260 : vector<512x64xf32> to vector<512x64xbf16>
    %cst_32 = arith.constant dense<0.000000e+00> : vector<32x512xf32>
    %262 = tpu.matmul %232, %261, %cst_32 {dimension_numbers = #tpu.dot_dimension_numbers<[1], [1], [0], [0], [0, 0, 1, 0], [], []>} : vector<32x64xbf16>, vector<512x64xbf16>, vector<32x512xf32> -> vector<32x512xf32>
    %263 = vector.extract_strided_slice %262 {offsets = [0, 0], sizes = [32, 64], strides = [1, 1]} : vector<32x512xf32> to vector<32x64xf32>
    %264 = vector.broadcast %10 : vector<32x1xf32> to vector<32x64xf32>
    %265 = arith.mulf %264, %263 : vector<32x64xf32>
    %266 = vector.extract_strided_slice %262 {offsets = [0, 64], sizes = [32, 64], strides = [1, 1]} : vector<32x512xf32> to vector<32x64xf32>
    %267 = vector.broadcast %17 : vector<32x1xf32> to vector<32x64xf32>
    %268 = arith.mulf %267, %266 : vector<32x64xf32>
    %269 = arith.addf %265, %268 : vector<32x64xf32>
    %270 = vector.extract_strided_slice %262 {offsets = [0, 128], sizes = [32, 64], strides = [1, 1]} : vector<32x512xf32> to vector<32x64xf32>
    %271 = vector.broadcast %24 : vector<32x1xf32> to vector<32x64xf32>
    %272 = arith.mulf %271, %270 : vector<32x64xf32>
    %273 = arith.addf %269, %272 : vector<32x64xf32>
    %274 = vector.extract_strided_slice %262 {offsets = [0, 192], sizes = [32, 64], strides = [1, 1]} : vector<32x512xf32> to vector<32x64xf32>
    %275 = vector.broadcast %31 : vector<32x1xf32> to vector<32x64xf32>
    %276 = arith.mulf %275, %274 : vector<32x64xf32>
    %277 = arith.addf %273, %276 : vector<32x64xf32>
    %278 = vector.extract_strided_slice %262 {offsets = [0, 256], sizes = [32, 64], strides = [1, 1]} : vector<32x512xf32> to vector<32x64xf32>
    %279 = vector.broadcast %38 : vector<32x1xf32> to vector<32x64xf32>
    %280 = arith.mulf %279, %278 : vector<32x64xf32>
    %281 = arith.addf %277, %280 : vector<32x64xf32>
    %282 = vector.extract_strided_slice %262 {offsets = [0, 320], sizes = [32, 64], strides = [1, 1]} : vector<32x512xf32> to vector<32x64xf32>
    %283 = vector.broadcast %45 : vector<32x1xf32> to vector<32x64xf32>
    %284 = arith.mulf %283, %282 : vector<32x64xf32>
    %285 = arith.addf %281, %284 : vector<32x64xf32>
    %286 = vector.extract_strided_slice %262 {offsets = [0, 384], sizes = [32, 64], strides = [1, 1]} : vector<32x512xf32> to vector<32x64xf32>
    %287 = vector.broadcast %52 : vector<32x1xf32> to vector<32x64xf32>
    %288 = arith.mulf %287, %286 : vector<32x64xf32>
    %289 = arith.addf %285, %288 : vector<32x64xf32>
    %290 = vector.extract_strided_slice %262 {offsets = [0, 448], sizes = [32, 64], strides = [1, 1]} : vector<32x512xf32> to vector<32x64xf32>
    %291 = vector.broadcast %59 : vector<32x1xf32> to vector<32x64xf32>
    %292 = arith.mulf %291, %290 : vector<32x64xf32>
    %293 = arith.addf %289, %292 : vector<32x64xf32>
    %294 = vector.extract_strided_slice %97 {offsets = [0, 192], sizes = [32, 64], strides = [1, 1]} : vector<32x256xbf16> to vector<32x64xbf16>
    %295 = vector.extract_strided_slice %99 {offsets = [0, 192], sizes = [32, 64], strides = [1, 1]} : vector<32x256xbf16> to vector<32x64xbf16>
    %296 = vector.extract_strided_slice %101 {offsets = [0, 192], sizes = [32, 64], strides = [1, 1]} : vector<32x256xbf16> to vector<32x64xbf16>
    %297 = vector.broadcast %60 : vector<32x1xbf16> to vector<32x64xbf16>
    %298 = arith.mulf %294, %297 : vector<32x64xbf16>
    %299 = vector.broadcast %61 : vector<32x1xbf16> to vector<32x64xbf16>
    %300 = arith.mulf %294, %299 : vector<32x64xbf16>
    %301 = vector.broadcast %62 : vector<32x1xbf16> to vector<32x64xbf16>
    %302 = arith.mulf %294, %301 : vector<32x64xbf16>
    %303 = vector.broadcast %63 : vector<32x1xbf16> to vector<32x64xbf16>
    %304 = arith.mulf %294, %303 : vector<32x64xbf16>
    %305 = vector.broadcast %64 : vector<32x1xbf16> to vector<32x64xbf16>
    %306 = arith.mulf %294, %305 : vector<32x64xbf16>
    %307 = vector.broadcast %65 : vector<32x1xbf16> to vector<32x64xbf16>
    %308 = arith.mulf %294, %307 : vector<32x64xbf16>
    %309 = vector.broadcast %66 : vector<32x1xbf16> to vector<32x64xbf16>
    %310 = arith.mulf %294, %309 : vector<32x64xbf16>
    %311 = vector.broadcast %67 : vector<32x1xbf16> to vector<32x64xbf16>
    %312 = arith.mulf %294, %311 : vector<32x64xbf16>
    %313 = tpu.concatenate %298, %300, %302, %304, %306, %308, %310, %312 in 1 : vector<32x64xbf16>, vector<32x64xbf16>, vector<32x64xbf16>, vector<32x64xbf16>, vector<32x64xbf16>, vector<32x64xbf16>, vector<32x64xbf16>, vector<32x64xbf16> -> vector<32x512xbf16>
    %cst_33 = arith.constant dense<0.000000e+00> : vector<512x64xf32>
    %314 = tpu.matmul %313, %295, %cst_33 {dimension_numbers = #tpu.dot_dimension_numbers<[0], [0], [1], [1], [0, 1, 1, 1], [], []>} : vector<32x512xbf16>, vector<32x64xbf16>, vector<512x64xf32> -> vector<512x64xf32>
    %cst_34 = arith.constant dense<0xFF800000> : vector<512xf32>
    %315 = vector.multi_reduction <maximumf>, %314, %cst_34 [1] : vector<512x64xf32> to vector<512xf32>
    %316 = vector.shape_cast %315 : vector<512xf32> to vector<512x1xf32>
    %317 = vector.broadcast %316 : vector<512x1xf32> to vector<512x64xf32>
    %318 = arith.subf %314, %317 : vector<512x64xf32>
    %319 = math.exp %318 : vector<512x64xf32>
    %cst_35 = arith.constant dense<0.000000e+00> : vector<512xf32>
    %320 = vector.multi_reduction <add>, %319, %cst_35 [1] : vector<512x64xf32> to vector<512xf32>
    %321 = vector.shape_cast %320 : vector<512xf32> to vector<512x1xf32>
    %322 = tpu.reciprocal %321 {approx = true} : vector<512x1xf32> -> vector<512x1xf32>
    %323 = vector.broadcast %322 : vector<512x1xf32> to vector<512x64xf32>
    %324 = arith.mulf %319, %323 : vector<512x64xf32>
    %325 = arith.truncf %324 : vector<512x64xf32> to vector<512x64xbf16>
    %cst_36 = arith.constant dense<0.000000e+00> : vector<32x512xf32>
    %326 = tpu.matmul %296, %325, %cst_36 {dimension_numbers = #tpu.dot_dimension_numbers<[1], [1], [0], [0], [0, 0, 1, 0], [], []>} : vector<32x64xbf16>, vector<512x64xbf16>, vector<32x512xf32> -> vector<32x512xf32>
    %327 = vector.extract_strided_slice %326 {offsets = [0, 0], sizes = [32, 64], strides = [1, 1]} : vector<32x512xf32> to vector<32x64xf32>
    %328 = vector.broadcast %10 : vector<32x1xf32> to vector<32x64xf32>
    %329 = arith.mulf %328, %327 : vector<32x64xf32>
    %330 = vector.extract_strided_slice %326 {offsets = [0, 64], sizes = [32, 64], strides = [1, 1]} : vector<32x512xf32> to vector<32x64xf32>
    %331 = vector.broadcast %17 : vector<32x1xf32> to vector<32x64xf32>
    %332 = arith.mulf %331, %330 : vector<32x64xf32>
    %333 = arith.addf %329, %332 : vector<32x64xf32>
    %334 = vector.extract_strided_slice %326 {offsets = [0, 128], sizes = [32, 64], strides = [1, 1]} : vector<32x512xf32> to vector<32x64xf32>
    %335 = vector.broadcast %24 : vector<32x1xf32> to vector<32x64xf32>
    %336 = arith.mulf %335, %334 : vector<32x64xf32>
    %337 = arith.addf %333, %336 : vector<32x64xf32>
    %338 = vector.extract_strided_slice %326 {offsets = [0, 192], sizes = [32, 64], strides = [1, 1]} : vector<32x512xf32> to vector<32x64xf32>
    %339 = vector.broadcast %31 : vector<32x1xf32> to vector<32x64xf32>
    %340 = arith.mulf %339, %338 : vector<32x64xf32>
    %341 = arith.addf %337, %340 : vector<32x64xf32>
    %342 = vector.extract_strided_slice %326 {offsets = [0, 256], sizes = [32, 64], strides = [1, 1]} : vector<32x512xf32> to vector<32x64xf32>
    %343 = vector.broadcast %38 : vector<32x1xf32> to vector<32x64xf32>
    %344 = arith.mulf %343, %342 : vector<32x64xf32>
    %345 = arith.addf %341, %344 : vector<32x64xf32>
    %346 = vector.extract_strided_slice %326 {offsets = [0, 320], sizes = [32, 64], strides = [1, 1]} : vector<32x512xf32> to vector<32x64xf32>
    %347 = vector.broadcast %45 : vector<32x1xf32> to vector<32x64xf32>
    %348 = arith.mulf %347, %346 : vector<32x64xf32>
    %349 = arith.addf %345, %348 : vector<32x64xf32>
    %350 = vector.extract_strided_slice %326 {offsets = [0, 384], sizes = [32, 64], strides = [1, 1]} : vector<32x512xf32> to vector<32x64xf32>
    %351 = vector.broadcast %52 : vector<32x1xf32> to vector<32x64xf32>
    %352 = arith.mulf %351, %350 : vector<32x64xf32>
    %353 = arith.addf %349, %352 : vector<32x64xf32>
    %354 = vector.extract_strided_slice %326 {offsets = [0, 448], sizes = [32, 64], strides = [1, 1]} : vector<32x512xf32> to vector<32x64xf32>
    %355 = vector.broadcast %59 : vector<32x1xf32> to vector<32x64xf32>
    %356 = arith.mulf %355, %354 : vector<32x64xf32>
    %357 = arith.addf %353, %356 : vector<32x64xf32>
    %358 = tpu.concatenate %165, %229, %293, %357 in 1 : vector<32x64xf32>, vector<32x64xf32>, vector<32x64xf32>, vector<32x64xf32> -> vector<32x256xf32>
    %c0_37 = arith.constant 0 : index
    %c0_38 = arith.constant 0 : index
    %359 = vector.load %arg6[%c0_37, %c0_38] : memref<32x32xbf16, #tpu.memory_space<vmem>>, vector<32x32xbf16>
    %360 = arith.truncf %358 : vector<32x256xf32> to vector<32x256xbf16>
    %cst_39 = arith.constant dense<0.000000e+00> : vector<32x256xf32>
    %361 = tpu.matmul %359, %360, %cst_39 {dimension_numbers = #tpu.dot_dimension_numbers<[1], [0], [0], [1], [0, 0, 1, 1], [], []>} : vector<32x32xbf16>, vector<32x256xbf16>, vector<32x256xf32> -> vector<32x256xf32>
    %c0_40 = arith.constant 0 : index
    %c0_41 = arith.constant 0 : index
    %362 = vector.load %arg7[%c0_40, %c0_41] : memref<32x1xf32, #tpu.memory_space<vmem>>, vector<32x1xf32>
    %363 = vector.broadcast %362 : vector<32x1xf32> to vector<32x256xf32>
    %364 = arith.addf %361, %363 : vector<32x256xf32>
    %365 = arith.addf %0, %364 : vector<32x256xf32>
    %cst_42 = arith.constant dense<0.000000e+00> : vector<256xf32>
    %366 = vector.multi_reduction <add>, %365, %cst_42 [0] : vector<32x256xf32> to vector<256xf32>
    %367 = vector.shape_cast %366 : vector<256xf32> to vector<1x256xf32>
    %cst_43 = arith.constant 3.200000e+01 : f32
    %368 = vector.broadcast %cst_43 : f32 to vector<1x256xf32>
    %369 = arith.divf %367, %368 : vector<1x256xf32>
    %370 = vector.broadcast %369 : vector<1x256xf32> to vector<32x256xf32>
    %371 = arith.subf %365, %370 : vector<32x256xf32>
    %372 = arith.mulf %371, %371 : vector<32x256xf32>
    %cst_44 = arith.constant dense<0.000000e+00> : vector<256xf32>
    %373 = vector.multi_reduction <add>, %372, %cst_44 [0] : vector<32x256xf32> to vector<256xf32>
    %374 = vector.shape_cast %373 : vector<256xf32> to vector<1x256xf32>
    %cst_45 = arith.constant 3.200000e+01 : f32
    %375 = vector.broadcast %cst_45 : f32 to vector<1x256xf32>
    %376 = arith.divf %374, %375 : vector<1x256xf32>
    %377 = vector.broadcast %369 : vector<1x256xf32> to vector<32x256xf32>
    %378 = arith.subf %365, %377 : vector<32x256xf32>
    %cst_46 = arith.constant 9.99999974E-6 : f32
    %379 = vector.broadcast %cst_46 : f32 to vector<1x256xf32>
    %380 = arith.addf %376, %379 : vector<1x256xf32>
    %381 = math.rsqrt %380 : vector<1x256xf32>
    %382 = vector.broadcast %381 : vector<1x256xf32> to vector<32x256xf32>
    %383 = arith.mulf %378, %382 : vector<32x256xf32>
    %384 = vector.broadcast %1 : vector<32x1xf32> to vector<32x256xf32>
    %385 = arith.mulf %383, %384 : vector<32x256xf32>
    %386 = vector.broadcast %2 : vector<32x1xf32> to vector<32x256xf32>
    %387 = arith.addf %385, %386 : vector<32x256xf32>
    %388 = arith.truncf %387 : vector<32x256xf32> to vector<32x256xbf16>
    %c0_47 = arith.constant 0 : index
    %c0_48 = arith.constant 0 : index
    %389 = vector.load %arg8[%c0_47, %c0_48] : memref<64x32xbf16, #tpu.memory_space<vmem>>, vector<64x32xbf16>
    %cst_49 = arith.constant dense<0.000000e+00> : vector<64x256xf32>
    %390 = tpu.matmul %389, %388, %cst_49 {dimension_numbers = #tpu.dot_dimension_numbers<[1], [0], [0], [1], [0, 0, 1, 1], [], []>} : vector<64x32xbf16>, vector<32x256xbf16>, vector<64x256xf32> -> vector<64x256xf32>
    %c0_50 = arith.constant 0 : index
    %c0_51 = arith.constant 0 : index
    %391 = vector.load %arg9[%c0_50, %c0_51] : memref<64x1xf32, #tpu.memory_space<vmem>>, vector<64x1xf32>
    %392 = vector.broadcast %391 : vector<64x1xf32> to vector<64x256xf32>
    %393 = arith.addf %390, %392 : vector<64x256xf32>
    %cst_52 = arith.constant 5.000000e-01 : f32
    %394 = vector.broadcast %cst_52 : f32 to vector<64x256xf32>
    %395 = arith.mulf %394, %393 : vector<64x256xf32>
    %cst_53 = arith.constant 4.471500e-02 : f32
    %396 = vector.broadcast %cst_53 : f32 to vector<64x256xf32>
    %397 = arith.mulf %396, %393 : vector<64x256xf32>
    %398 = arith.mulf %397, %393 : vector<64x256xf32>
    %399 = arith.mulf %398, %393 : vector<64x256xf32>
    %400 = arith.addf %393, %399 : vector<64x256xf32>
    %cst_54 = arith.constant 0.797884583 : f32
    %401 = vector.broadcast %cst_54 : f32 to vector<64x256xf32>
    %402 = arith.mulf %401, %400 : vector<64x256xf32>
    %403 = math.tanh %402 : vector<64x256xf32>
    %cst_55 = arith.constant 1.000000e+00 : f32
    %404 = vector.broadcast %cst_55 : f32 to vector<64x256xf32>
    %405 = arith.addf %404, %403 : vector<64x256xf32>
    %406 = arith.mulf %395, %405 : vector<64x256xf32>
    %c0_56 = arith.constant 0 : index
    %c0_57 = arith.constant 0 : index
    %407 = vector.load %arg10[%c0_56, %c0_57] : memref<32x64xbf16, #tpu.memory_space<vmem>>, vector<32x64xbf16>
    %408 = arith.truncf %406 : vector<64x256xf32> to vector<64x256xbf16>
    %cst_58 = arith.constant dense<0.000000e+00> : vector<32x256xf32>
    %409 = tpu.matmul %407, %408, %cst_58 {dimension_numbers = #tpu.dot_dimension_numbers<[1], [0], [0], [1], [0, 0, 1, 1], [], []>} : vector<32x64xbf16>, vector<64x256xbf16>, vector<32x256xf32> -> vector<32x256xf32>
    %c0_59 = arith.constant 0 : index
    %c0_60 = arith.constant 0 : index
    %410 = vector.load %arg11[%c0_59, %c0_60] : memref<32x1xf32, #tpu.memory_space<vmem>>, vector<32x1xf32>
    %411 = vector.broadcast %410 : vector<32x1xf32> to vector<32x256xf32>
    %412 = arith.addf %409, %411 : vector<32x256xf32>
    %413 = arith.addf %365, %412 : vector<32x256xf32>
    %c0_61 = arith.constant 0 : index
    %c0_62 = arith.constant 0 : index
    %414 = vector.load %arg12[%c0_61, %c0_62] : memref<32x256xf32, #tpu.memory_space<vmem>>, vector<32x256xf32>
    tpu.vector_store %arg12[%c0_61, %c0_62], %413 {strides = array<i32>} : memref<32x256xf32, #tpu.memory_space<vmem>>, vector<32x256xf32>,
    return
  }
  func.func @transform_0(%arg0: i32) -> (i32, i32) {
    %c0_i32 = arith.constant 0 : i32
    %c0_i32_0 = arith.constant 0 : i32
    return %c0_i32, %arg0 : i32, i32
  }
  func.func @transform_1(%arg0: i32) -> (i32, i32) {
    %c0_i32 = arith.constant 0 : i32
    %c0_i32_0 = arith.constant 0 : i32
    %c0_i32_1 = arith.constant 0 : i32
    return %c0_i32, %c0_i32_0 : i32, i32
  }
  func.func @transform_2(%arg0: i32) -> (i32, i32) {
    %c0_i32 = arith.constant 0 : i32
    %c0_i32_0 = arith.constant 0 : i32
    %c0_i32_1 = arith.constant 0 : i32
    return %c0_i32, %c0_i32_0 : i32, i32
  }
  func.func @transform_3(%arg0: i32) -> (i32, i32) {
    %c0_i32 = arith.constant 0 : i32
    %c0_i32_0 = arith.constant 0 : i32
    %c0_i32_1 = arith.constant 0 : i32
    return %c0_i32, %c0_i32_0 : i32, i32
  }
  func.func @transform_4(%arg0: i32) -> (i32, i32) {
    %c0_i32 = arith.constant 0 : i32
    %c0_i32_0 = arith.constant 0 : i32
    %c0_i32_1 = arith.constant 0 : i32
    return %c0_i32, %c0_i32_0 : i32, i32
  }
  func.func @transform_5(%arg0: i32) -> (i32, i32) {
    %c0_i32 = arith.constant 0 : i32
    %c0_i32_0 = arith.constant 0 : i32
    %c0_i32_1 = arith.constant 0 : i32
    return %c0_i32, %c0_i32_0 : i32, i32
  }
  func.func @transform_6(%arg0: i32) -> (i32, i32) {
    %c0_i32 = arith.constant 0 : i32
    %c0_i32_0 = arith.constant 0 : i32
    %c0_i32_1 = arith.constant 0 : i32
    return %c0_i32, %c0_i32_0 : i32, i32
  }
  func.func @transform_7(%arg0: i32) -> (i32, i32) {
    %c0_i32 = arith.constant 0 : i32
    %c0_i32_0 = arith.constant 0 : i32
    %c0_i32_1 = arith.constant 0 : i32
    return %c0_i32, %c0_i32_0 : i32, i32
  }
  func.func @transform_8(%arg0: i32) -> (i32, i32) {
    %c0_i32 = arith.constant 0 : i32
    %c0_i32_0 = arith.constant 0 : i32
    %c0_i32_1 = arith.constant 0 : i32
    return %c0_i32, %c0_i32_0 : i32, i32
  }
  func.func @transform_9(%arg0: i32) -> (i32, i32) {
    %c0_i32 = arith.constant 0 : i32
    %c0_i32_0 = arith.constant 0 : i32
    %c0_i32_1 = arith.constant 0 : i32
    return %c0_i32, %c0_i32_0 : i32, i32
  }
  func.func @transform_10(%arg0: i32) -> (i32, i32) {
    %c0_i32 = arith.constant 0 : i32
    %c0_i32_0 = arith.constant 0 : i32
    %c0_i32_1 = arith.constant 0 : i32
    return %c0_i32, %c0_i32_0 : i32, i32
  }
  func.func @transform_11(%arg0: i32) -> (i32, i32) {
    %c0_i32 = arith.constant 0 : i32
    %c0_i32_0 = arith.constant 0 : i32
    return %c0_i32, %arg0 : i32, i32
  }
}

</mosaic_0001>

<bundles_post_ra>
// kernel: self_att_block.1
= control target key start
LH: loop header
LB: loop body
LE: loop exit
PB: predicated region body
PF: predicated region fallthrough
CT: control target
= control target key end

     0   :  { %s10170_s17 = smov 0   ;;  %s10172_s18 = smov 0   ;;  %s15459_s0 = inlined_call_operand.vmem [shape: f32[32,512], index: 0, kind: input, shape index: {}]   ;;  %s15460_s1 = inlined_call_operand.vmem [shape: f32[32,1], index: 1, kind: input, shape index: {}]   ;;  %s15461_s2 = inlined_call_operand.vmem [shape: f32[32,1], index: 2, kind: input, shape index: {}]   ;;  %s15462_s3 = inlined_call_operand.vmem [shape: bf16[96,32], index: 3, kind: input, shape index: {}]   ;;  %s15463_s4 = inlined_call_operand.vmem [shape: f32[96,1], index: 4, kind: input, shape index: {}]   ;;  %s15464_s5 = inlined_call_operand.vmem [shape: bf16[32,32], index: 5, kind: input, shape index: {}]   ;;  %s15465_s6 = inlined_call_operand.vmem [shape: f32[32,1], index: 6, kind: input, shape index: {}]   ;;  %s15466_s7 = inlined_call_operand.vmem [shape: bf16[64,32], index: 7, kind: input, shape index: {}]   ;;  %s15467_s8 = inlined_call_operand.vmem [shape: f32[64,1], index: 8, kind: input, shape index: {}]   ;;  %s15468_s9 = inlined_call_operand.vmem [shape: bf16[32,64], index: 9, kind: input, shape index: {}]   ;;  %s15469_s10 = inlined_call_operand.vmem [shape: f32[32,1], index: 10, kind: input, shape index: {}]   ;;  %s15470_s11 = inlined_call_operand.vmem [shape: f32[32,512], index: 11, kind: output, shape index: {}]  }
   0x1   :  { %s10174_s19 = smov 0  }
   0x2 LB: > { %s8095_s20 = sadd.s32 4294967295, %s10105_s19   ;;  %s10187_s21 = sadd.s32 1, %s10105_s19   ;;  %s10105_s19 = sphi %s10174_s19, %s17041_s19   ;;  %s10101_s18 = sphi %s10172_s18, %s17040_s18   ;;  %s10097_s17 = sphi %s10170_s17, %s17039_s17  }
   0x3   : > { %s25_s22 = ssub.s32 %s10105_s19, %s10187_s21  ;;  %s28_s23 = sadd.s32 1, %s10101_s18 }
   0x4   : > { %p26_p0 = scmp.eq.s32.totalorder %s25_s22, 0  ;;  %p35_p1 = scmp.ne.s32.totalorder %s10101_s18, %s10097_s17 }
   0x5   : > { %p36_p2 = scmp.eq.s32.totalorder %s10105_s19, 0  ;;  %p275_p3 = scmp.eq.s32.totalorder %s8095_s20, 1 }
   0x6   : > { %s10198_s24 = scalar_select %p26_p0, %s10101_s18, %s28_s23  }
   0x7   : > { %p37_p4 = por %p36_p2, %p35_p1  ;;  %p10200_p5 = por %p275_p3, %p35_p1 }
   0x8   : > { %p8098_p6 = scmp.ge.s32.totalorder %s10105_s19, 2 }
   0xa   : > { %327 = sbr.rel (%p8098_p6) target bundleno = 23 (0x17), region = 56 }
   0xf   : > { %330 = sbr.rel (!%p37_p4) target bundleno = 23 (0x17), region = 60  ;;  %s332_s26 = sand.u32 (%p37_p4), 1, %s10101_s18  }
  0x10   : > { %s8290_s27 = sshll.u32 (%p37_p4), %s10105_s19, 4  ;;  %s8099_s28 = sshll.u32 (%p37_p4), %s332_s26, 6 }
  0x11   : > { %s337_s12 = scalar_lea.vmem (%p37_p4), %s15459_s0, %s8290_s27  ;;  %s334_s13 = scalar_lea.vmem (%p37_p4), [#allocation2], %s8099_s28 }
  0x12   : > { %v350_v0 = vld [vmem:[%s337_s12] sm:$0xff] (%p37_p4)  ;;  %v352_v1 = vld [vmem:[%s337_s12 + $0x8] sm:$0xff] (%p37_p4) }
  0x13   : > { %v354_v2 = vld [vmem:[%s337_s12 + $0x20] sm:$0xff] (%p37_p4)  ;;  %351 = vst [vmem:[%s334_s13] sm:$0xff] (%p37_p4), %v350_v0  ;;  %353 = vst [vmem:[%s334_s13 + $0x8] sm:$0xff] (%p37_p4), %v352_v1  ;;  %v356_v3 = vld [vmem:[%s337_s12 + $0x28] sm:$0xff] (%p37_p4) }
  0x14   : > { %355 = vst [vmem:[%s334_s13 + $0x10] sm:$0xff] %v354_v2  ;;  %v358_v4 = vld [vmem:[%s337_s12 + $0x40] sm:$0xff]  ;;  %v360_v5 = vld [vmem:[%s337_s12 + $0x48] sm:$0xff]  ;;  %357 = vst [vmem:[%s334_s13 + $0x18] sm:$0xff] %v356_v3 }
  0x15   : > { %359 = vst [vmem:[%s334_s13 + $0x20] sm:$0xff] %v358_v4  ;;  %361 = vst [vmem:[%s334_s13 + $0x28] sm:$0xff] %v360_v5  ;;  %v362_v6 = vld [vmem:[%s337_s12 + $0x60] sm:$0xff]  ;;  %v364_v7 = vld [vmem:[%s337_s12 + $0x68] sm:$0xff] }
  0x16   : > { %363 = vst [vmem:[%s334_s13 + $0x30] sm:$0xff] %v362_v6  ;;  %365 = vst [vmem:[%s334_s13 + $0x38] sm:$0xff] %v364_v7 }
  0x17 PF: > { %p8102_p7 = scmp.ge.s32.totalorder %s10105_s19, 1  ;;  %p370_p8 = scmp.lt.s32.totalorder %s10105_s19, 3 }
  0x19   : > { %p371_p9 = pnand %p8102_p7, %p370_p8 }
  0x1b   : > { %374 = sbr.rel (%p371_p9) target bundleno = 3750 (0xea6), region = 83 }
  0x20   : > { %v432_v8 = vld [vmem:[%s15461_s2 + $0x10] sm:$0xff]  ;;  %v15471_v10 = vmov 0   ;;  %s377_s23 = sand.u32 1, %s10097_s17   ;;  %v433_v11 = vld [vmem:[%s15461_s2 + $0x18] sm:$0xff]  ;;  %v427_v13 = vld [vmem:[%s15460_s1 + $0x8] sm:$0xff]  ;;  %vm858_vm0 = vcmask 261120  }
  0x21   : > { %v428_v9 = vld [vmem:[%s15460_s1 + $0x10] sm:$0xff]  ;;  %8976 = vset.pattern.permute.xlu1 %v15471_v10  ;;  %8975 = vset.pattern.permute.xlu0 %v15471_v10  ;;  %v429_v12 = vld [vmem:[%s15460_s1 + $0x18] sm:$0xff]  ;;  %s10228_s30 = sshll.u32 %s377_s23, 6  ;;  %v426_v14 = vld [vmem:[%s15460_s1] sm:$0xff]  ;;  %s10109_s29 = smov 64   ;;  %vm1022_vm9 = vcmask 523264  }
  0x22   : > { %724 = vperm.xlu1 %8976, %v432_v8   ;;  %696 = vperm.xlu0 %8975, %v428_v9   ;;  %v431_v15 = vld [vmem:[%s15461_s2 + $0x8] sm:$0xff]  ;;  %v430_v16 = vld [vmem:[%s15461_s2] sm:$0xff]  ;;  %s10243_s23 = scalar_lea.vmem [#allocation2], %s10228_s30  ;;  %v759_v27 = vld [vmem:[%s15463_s4 + $0x18] sm:$0xff] }
  0x23   : > { %909 = vmatprep.mubr.bf16.mxu0 %v15471_v10  ;;  %v419_v17 = vld [vmem:[%s10243_s23 + $0x8] sm:$0xff]  ;;  %v418_v18 = vld [vmem:[%s10243_s23] sm:$0xff]  ;;  %v420_v19 = vld [vmem:[%s10243_s23 + $0x10] sm:$0xff] }
  0x24   : > { %v757_v20 = vld [vmem:[%s15463_s4 + $0x8] sm:$0xff]  ;;  %v756_v21 = vld [vmem:[%s15463_s4] sm:$0xff]  ;;  %v421_v22 = vld [vmem:[%s10243_s23 + $0x18] sm:$0xff]  ;;  %v615_v25 = vadd.f32 %v420_v19, %v418_v18 }
  0x25   : > { %v624_v23 = vadd.f32 %v421_v22, %v419_v17  ;;  %v423_v24 = vld [vmem:[%s10243_s23 + $0x28] sm:$0xff]  ;;  %v422_v26 = vld [vmem:[%s10243_s23 + $0x20] sm:$0xff]  ;;  %v758_v28 = vld [vmem:[%s15463_s4 + $0x10] sm:$0xff] }
  0x26   : > { %729 = vperm.xlu1 %8976, %v433_v11   ;;  %701 = vperm.xlu0 %8975, %v429_v12   ;;  %v425_v30 = vld [vmem:[%s10243_s23 + $0x38] sm:$0xff]  ;;  %v616_v31 = vadd.f32 %v615_v25, %v422_v26  ;;  %v424_v32 = vld [vmem:[%s10243_s23 + $0x30] sm:$0xff]  ;;  %v761_v37 = vld [vmem:[%s15463_s4 + $0x28] sm:$0xff] }
  0x27   : > { %v625_v29 = vadd.f32 %v624_v23, %v423_v24  ;;  %v763_v33 = vld [vmem:[%s15463_s4 + $0x38] sm:$0xff]  ;;  %v762_v34 = vld [vmem:[%s15463_s4 + $0x30] sm:$0xff]  ;;  %v760_v38 = vld [vmem:[%s15463_s4 + $0x20] sm:$0xff] }
  0x28   : > { %v617_v36 = vadd.f32 %v616_v31, %v424_v32 }
  0x29   : > { %v626_v35 = vadd.f32 %v625_v29, %v425_v30 }
  0x2a   : > { %691 = vperm.xlu1 %8976, %v427_v13   ;;  %686 = vperm.xlu0 %8975, %v426_v14   ;;  %v618_v40 = vrot.slane %v617_v36, 4 }
  0x2b   : > { %v627_v39 = vrot.slane %v626_v35, 4 }
  0x2c   : > { %v619_v42 = vadd.f32 %v618_v40, %v617_v36 }
  0x2d   : > { %v628_v41 = vadd.f32 %v627_v39, %v626_v35 }
  0x2e   : > { %719 = vperm.xlu1 %8976, %v431_v15   ;;  %714 = vperm.xlu0 %8975, %v430_v16   ;;  %v620_v44 = vrot.slane %v619_v42, 2 }
  0x2f   : > { %v629_v43 = vrot.slane %v628_v41, 2 }
  0x30   : > { %v621_v46 = vadd.f32 %v620_v44, %v619_v42 }
  0x31   : > { %v630_v45 = vadd.f32 %v629_v43, %v628_v41 }
  0x32   : > { %775 = vperm.xlu1 %8976, %v757_v20   ;;  %770 = vperm.xlu0 %8975, %v756_v21   ;;  %v622_v48 = vrot.slane %v621_v46, 1 }
  0x33   : > { %v631_v47 = vrot.slane %v630_v45, 1 }
  0x34   : > { %v623_v50 = vadd.f32 %v622_v48, %v621_v46 }
  0x35   : > { %v632_v49 = vadd.f32 %v631_v47, %v630_v45 }
  0x36   : > { %785 = vperm.xlu1 %8976, %v759_v27   ;;  %780 = vperm.xlu0 %8975, %v758_v28   ;;  %v634_v52 = vmul.f32 0.03125, %v623_v50 }
  0x37   : > { %v635_v51 = vmul.f32 0.03125, %v632_v49 }
  0x38   : > { %v636_v55 = vsub.f32 %v418_v18, %v634_v52  ;;  %v638_v56 = vsub.f32 %v420_v19, %v634_v52  ;;  %v640_v60 = vsub.f32 %v422_v26, %v634_v52  ;;  %v642_v2 = vsub.f32 %v424_v32, %v634_v52 }
  0x39   : > { %v637_v53 = vsub.f32 %v419_v17, %v635_v51  ;;  %v639_v54 = vsub.f32 %v421_v22, %v635_v51  ;;  %v641_v57 = vsub.f32 %v423_v24, %v635_v51  ;;  %v643_v63 = vsub.f32 %v425_v30, %v635_v51 }
  0x3a   : > { %805 = vperm.xlu1 %8976, %v763_v33   ;;  %800 = vperm.xlu0 %8975, %v762_v34   ;;  %v644_v61 = vmul.f32 %v636_v55, %v636_v55  ;;  %v646_v62 = vmul.f32 %v638_v56, %v638_v56  ;;  %v648_v3 = vmul.f32 %v640_v60, %v640_v60 }
  0x3b   : > { %v645_v58 = vmul.f32 %v637_v53, %v637_v53  ;;  %v647_v59 = vmul.f32 %v639_v54, %v639_v54  ;;  %v649_v0 = vmul.f32 %v641_v57, %v641_v57  ;;  %v651_v5 = vmul.f32 %v643_v63, %v643_v63 }
  0x3c   : > { %v652_v4 = vadd.f32 %v646_v62, %v644_v61  ;;  %v650_v7 = vmul.f32 %v642_v2, %v642_v2 }
  0x3d   : > { %v661_v1 = vadd.f32 %v647_v59, %v645_v58 }
  0x3e   : > { %795 = vperm.xlu1 %8976, %v761_v37   ;;  %790 = vperm.xlu0 %8975, %v760_v38   ;;  %v653_v8 = vadd.f32 %v652_v4, %v648_v3  ;;  %v8998_v3 = vld [vmem:[%s15462_s3 + $0x8] sm:$0xff]   ;;  %v8999_v4 = vld [vmem:[%s15462_s3 + $0x10] sm:$0xff]  }
  0x3f   : > { %v662_v6 = vadd.f32 %v661_v1, %v649_v0 }
  0x40   : > { %v654_v11 = vadd.f32 %v653_v8, %v650_v7 }
  0x41   : > { %v663_v9 = vadd.f32 %v662_v6, %v651_v5  ;;  %v9000_v5 = vld [vmem:[%s15462_s3 + $0x18] sm:$0xff]   ;;  %v434_v6 = vlaneseq }
  0x42   : > { %v655_v13 = vrot.slane %v654_v11, 4 }
  0x43   : > { %v664_v12 = vrot.slane %v663_v9, 4  ;;  %v435_v7 = vshrl.u32 %v434_v6, 7 }
  0x44   : > { %v656_v15 = vadd.f32 %v655_v13, %v654_v11 }
  0x45   : > { %v665_v14 = vadd.f32 %v664_v12, %v663_v9  ;;  %vm459_vm1 = vcmp.ge.s32.totalorder %v435_v7, 4  ;;  %v436_v8 = vadd.s32 8, %v435_v7  ;;  %v10108_v12 = vmov 0.0  }
  0x46   : > { %v657_v17 = vrot.slane %v656_v15, 2  ;;  %v10330_v13 = vsel %vm459_vm1, 1.0, %v10108_v12  ;;  %vm443_vm3 = vcmp.lt.s32.totalorder %v435_v7, 4 }
  0x47   : > { %v666_v16 = vrot.slane %v665_v14, 2  ;;  %15924 = vst [vmem:[#allocation12_spill] sm:$0xff] %v10330_v13  ;;  %vm500_vm2 = vcmp.ge.s32.totalorder %v436_v8, 12  ;;  %vm484_vm4 = vcmp.lt.s32.totalorder %v436_v8, 12 }
  0x48   : > { %v658_v19 = vadd.f32 %v657_v17, %v656_v15 }
  0x49   : > { %v667_v18 = vadd.f32 %v666_v16, %v665_v14 }
  0x4a   : > { %v659_v21 = vrot.slane %v658_v19, 1 }
  0x4b   : > { %v668_v20 = vrot.slane %v667_v18, 1 }
  0x4c   : > { %v660_v23 = vadd.f32 %v659_v21, %v658_v19  ;;  %v601_v19 = vpack.c.bf16 %v10108_v12, %v10330_v13  ;;  %v10335_v21 = vsel %vm500_vm2, 1.0, %v10108_v12 }
  0x4d   : > { %v669_v22 = vadd.f32 %v668_v20, %v667_v18  ;;  %15925 = vst [vmem:[#allocation13_spill] sm:$0xff] %v10335_v21 }
  0x4e   : > { %v670_v25 = vmul.f32 0.03125, %v660_v23 }
  0x4f   : > { %v671_v24 = vmul.f32 0.03125, %v669_v22  ;;  %v10338_v22 = vsel %vm443_vm3, 1.0, %v10108_v12 }
  0x50   : > { %v672_v27 = vadd.f32 1e-05, %v670_v25  ;;  %15926 = vst [vmem:[#allocation14_spill] sm:$0xff] %v10338_v22 }
  0x51   : > { %v673_v26 = vadd.f32 1e-05, %v671_v24  ;;  %v10340_v24 = vadd.s32 16, %v435_v7 }
  0x53   : > { %9011 = vrsqrt.f32 %v673_v26  ;;  %v10342_v26 = vadd.s32 24, %v435_v7  ;;  %vm525_vm5 = vcmp.lt.s32.totalorder %v10340_v24, 20  ;;  %vm541_vm7 = vcmp.ge.s32.totalorder %v10340_v24, 20 }
  0x54   : > { %9013 = vrsqrt.f32 %v672_v27 }
  0x55   : > { %vm566_vm6 = vcmp.lt.s32.totalorder %v10342_v26, 28  ;;  %vm582_vm8 = vcmp.ge.s32.totalorder %v10342_v26, 28 }
  0x60   : > { %v9012_v28 = vpop.eup %9011 }
  0x61   : > { %v9014_v29 = vpop.eup %9013  ;;  %v681_v30 = vmul.f32 %v9012_v28, %v641_v57  ;;  %v683_v34 = vmul.f32 %v9012_v28, %v643_v63  ;;  %v679_v43 = vmul.f32 %v9012_v28, %v639_v54  ;;  %v677_v47 = vmul.f32 %v9012_v28, %v637_v53 }
  0x62   : > { %v680_v33 = vmul.f32 %v9014_v29, %v640_v60  ;;  %v682_v35 = vmul.f32 %v9014_v29, %v642_v2  ;;  %v678_v42 = vmul.f32 %v9014_v29, %v638_v56  ;;  %v676_v44 = vmul.f32 %v9014_v29, %v636_v55  ;;  %v8997_v2 = vld [vmem:[%s15462_s3] sm:$0xff]  }
  0x9d   : > { %v10277_v31 = vpop.permute.xlu1 %724  ;;  %v10279_v32 = vpop.permute.xlu0 %696 }
  0x9e   : > { %15916 = vst [vmem:[#allocation4_spill] sm:$0xff] %v10277_v31  ;;  %15917 = vst [vmem:[#allocation5_spill] sm:$0xff] %v10279_v32  ;;  %v709_v36 = vmul.f32 %v10279_v32, %v681_v30  ;;  %v708_v39 = vmul.f32 %v10279_v32, %v680_v33  ;;  %v605_v30 = vpack.c.bf16 %v10335_v21, %v10108_v12 }
  0x9f   : > { %v10352_v33 = vpack.c.bf16 %v10108_v12, %v10338_v22 }
  0xa0   : > { %v737_v45 = vadd.f32 %v10277_v31, %v709_v36  ;;  %v736_v51 = vadd.f32 %v10277_v31, %v708_v39 }
  0xa1   : > { %v10282_v37 = vpop.permute.xlu1 %729  ;;  %v10284_v38 = vpop.permute.xlu0 %701 }
  0xa2   : > { %15918 = vst [vmem:[#allocation6_spill] sm:$0xff] %v10282_v37  ;;  %15919 = vst [vmem:[#allocation7_spill] sm:$0xff] %v10284_v38  ;;  %v711_v40 = vmul.f32 %v10284_v38, %v683_v34  ;;  %v710_v41 = vmul.f32 %v10284_v38, %v682_v35 }
  0xa4   : > { %v739_v46 = vadd.f32 %v10282_v37, %v711_v40  ;;  %v738_v48 = vadd.f32 %v10282_v37, %v710_v41 }
  0xa5   : > { %v10292_v49 = vpop.permute.xlu1 %691  ;;  %v10294_v50 = vpop.permute.xlu0 %686 }
  0xa6   : > { %15920 = vst [vmem:[#allocation8_spill] sm:$0xff] %v10292_v49  ;;  %15921 = vst [vmem:[#allocation9_spill] sm:$0xff] %v10294_v50  ;;  %v743_v52 = vpack.c.bf16 %v739_v46, %v737_v45  ;;  %v742_v57 = vpack.c.bf16 %v738_v48, %v736_v51  ;;  %v706_v58 = vmul.f32 %v10292_v49, %v678_v42  ;;  %v10378_v51 = vsel %vm566_vm6, 1.0, %v10108_v12 }
  0xa7   : > { %v707_v54 = vmul.f32 %v10292_v49, %v679_v43  ;;  %v704_v55 = vmul.f32 %v10294_v50, %v676_v44  ;;  %v705_v56 = vmul.f32 %v10294_v50, %v677_v47  ;;  %v10366_v43 = vsel %vm484_vm4, 1.0, %v10108_v12  ;;  %15929 = vst [vmem:[#allocation17_spill] sm:$0xff] %v10378_v51 }
  0xa8   : > { %889 = vmatprep.subr.bf16.mxu0 %v743_v52  ;;  %15927 = vst [vmem:[#allocation15_spill] sm:$0xff] %v10366_v43  ;;  %v10369_v44 = vsel %vm525_vm5, 1.0, %v10108_v12 }
  0xa9   : > { %v10301_v53 = vpop.permute.xlu1 %719  ;;  %v10303_v59 = vpop.permute.xlu0 %714  ;;  %890 = vmatpush1.bf16.msra.mxu0 %v742_v57  ;;  %15928 = vst [vmem:[#allocation16_spill] sm:$0xff] %v10369_v44 }
  0xaa   : > { %15922 = vst [vmem:[#allocation10_spill] sm:$0xff] %v10301_v53  ;;  %15923 = vst [vmem:[#allocation11_spill] sm:$0xff] %v10303_v59  ;;  %v734_v60 = vadd.f32 %v10301_v53, %v706_v58  ;;  %v735_v61 = vadd.f32 %v10301_v53, %v707_v54  ;;  %v732_v62 = vadd.f32 %v10303_v59, %v704_v55 }
  0xab   : > { %v733_v63 = vadd.f32 %v10303_v59, %v705_v56  ;;  %v603_v55 = vpack.c.bf16 %v10366_v43, %v10108_v12 }
  0xac   : > { %v740_v1 = vpack.c.bf16 %v734_v60, %v732_v62  ;;  %v608_v60 = vpack.c.bf16 %v10108_v12, %v10369_v44 }
  0xad   : > { %v741_v0 = vpack.c.bf16 %v735_v61, %v733_v63  ;;  %v776_v14 = vpop.permute.xlu1 %775  ;;  %v771_v15 = vpop.permute.xlu0 %770  ;;  %v10390_v61 = vpack.c.bf16 %v10378_v51, %v10108_v12 }
  0xaf   : > { %891 = vmatprep.subr.bf16.mxu0 %v741_v0 }
  0xb0   : > { %892 = vmatpush1.bf16.msra.mxu0 %v740_v1 }
  0xb1   : > { %v786_v27 = vpop.permute.xlu1 %785  ;;  %v781_v34 = vpop.permute.xlu0 %780 }
  0xb3   : > { %8119 = vmatmul.mubr.msk.bf16.vlgmr.msra.gmra.mxu0 %vm858_vm0, %v8997_v2 }
  0xb4   : > { %919 = vmatprep.mubr.bf16.mxu0 %v15471_v10 }
  0xb5   : > { %v10371_v45 = vpop.permute.xlu1 %805  ;;  %v10380_v52 = vpop.permute.xlu0 %800 }
  0xb9   : > { %v796_v1 = vpop.permute.xlu1 %795 }
  0xbb   : > { %8120 = vmatmul.mubr.msk.bf16.gmra.mxu0 %vm858_vm0, %v8998_v3 }
  0xbc   : > { %929 = vmatprep.mubr.bf16.mxu0 %v15471_v10 }
  0xc3   : > { %8121 = vmatmul.mubr.msk.bf16.gmra.mxu0 %vm858_vm0, %v8999_v4  ;;  %v791_v4 = vpop.permute.xlu0 %790 }
  0xc4   : > { %939 = vmatprep.mubr.bf16.mxu0 %v15471_v10 }
  0xcb   : > { %8122 = vmatmul.mubr.msk.bf16.gmra.mxu0 %vm858_vm0, %v9000_v5 }
  0xcc   : > { %949 = vmatprep.mubr.bf16.mxu0 %v15471_v10 }
 0x173   : > { %v911_v9 = vpop.f32.mrf.mxu0 }
 0x174   : > { %v912_v17 = vadd.f32 %v911_v9, %v771_v15 }
 0x175   : > { %v913_v11 = vpop.f32.mrf.mxu0 }
 0x176   : > { %v914_v46 = vadd.f32 %v913_v11, %v771_v15 }
 0x177   : > { %v915_v16 = vpop.f32.mrf.mxu0 }
 0x178   : > { %v916_v18 = vadd.f32 %v915_v16, %v776_v14 }
 0x179   : > { %v917_v20 = vpop.f32.mrf.mxu0 }
 0x17a   : > { %v970_v23 = vpack.c.bf16 %v916_v18, %v912_v17  ;;  %v918_v39 = vadd.f32 %v917_v20, %v776_v14 }
 0x17b   : > { %v921_v25 = vpop.f32.mrf.mxu0 }
 0x17c   : > { %v10344_v28 = vmul.bf16 0.0|0.0, %v970_v23  ;;  %v10346_v29 = vmul.bf16 %v970_v23, %v601_v19  ;;  %v10360_v40 = vmul.bf16 %v970_v23, %v605_v30  ;;  %v10363_v41 = vmul.bf16 %v970_v23, %v10352_v33 }
 0x17d   : > { %v923_v35 = vpop.f32.mrf.mxu0  ;;  %v971_v58 = vpack.c.bf16 %v918_v39, %v914_v46  ;;  %v10403_v2 = vmul.bf16 %v970_v23, %v603_v55  ;;  %v922_v16 = vadd.f32 %v921_v25, %v781_v34  ;;  %v10448_v46 = vsel %vm582_vm8, 1.0, %v10108_v12 }
 0x17e   : > { %1012 = vrot.lane.b32.xlu1 %v10344_v28, %s10109_s29  ;;  %1000 = vrot.lane.b32.xlu0 %v10346_v29, %s10109_s29  ;;  %v924_v47 = vadd.f32 %v923_v35, %v781_v34  ;;  %v10435_v34 = vsel %vm541_vm7, 1.0, %v10108_v12  ;;  %15932 = vst [vmem:[#allocation20_spill] sm:$0xff] %v10448_v46  ;;  %v614_v26 = vpack.c.bf16 %v10448_v46, %v10108_v12 }
 0x17f   : > { %v925_v36 = vpop.f32.mrf.mxu0  ;;  %v10405_v3 = vmul.bf16 %v971_v58, %v601_v19  ;;  %v10411_v9 = vmul.bf16 0.0|0.0, %v971_v58  ;;  %v10419_v18 = vmul.bf16 %v971_v58, %v605_v30  ;;  %v10423_v35 = vmul.bf16 %v971_v58, %v603_v55  ;;  %15931 = vst [vmem:[#allocation19_spill] sm:$0xff] %v10435_v34 }
 0x180   : > { %v926_v14 = vadd.f32 %v925_v36, %v786_v27  ;;  %v610_v24 = vpack.c.bf16 %v10108_v12, %v10435_v34 }
 0x181   : > { %v927_v42 = vpop.f32.mrf.mxu0  ;;  %15930 = vst [vmem:[#allocation18_spill] sm:$0xff] %v10411_v9 }
 0x182   : > { %v928_v48 = vadd.f32 %v927_v42, %v786_v27  ;;  %1006 = vrot.lane.b32.xlu0 %v10360_v40, %s10109_s29  ;;  %2574 = vrot.lane.b32.xlu1 %v10363_v41, %s10109_s29  ;;  %v972_v39 = vpack.c.bf16 %v926_v14, %v922_v16  ;;  %v10441_v42 = vmul.bf16 %v971_v58, %v10352_v33 }
 0x183   : > { %v931_v57 = vpop.f32.mrf.mxu0 }
 0x184   : > { %v10382_v54 = vpack.c.bf16 %v928_v48, %v924_v47  ;;  %v932_v27 = vadd.f32 %v931_v57, %v791_v4  ;;  %v10430_v30 = vmul.bf16 0.0|0.0, %v972_v39  ;;  %v10452_v47 = vmul.bf16 %v972_v39, %v610_v24 }
 0x185   : > { %v933_v56 = vpop.f32.mrf.mxu0  ;;  %v10463_v48 = vmul.bf16 %v972_v39, %v614_v26  ;;  %v991_v12 = vmul.bf16 %v972_v39, %v608_v60  ;;  %v995_v58 = vmul.bf16 %v972_v39, %v10390_v61 }
 0x186   : > { %1018 = vrot.lane.b32.xlu0 %v10344_v28, %s10109_s29  ;;  %2586 = vrot.lane.b32.xlu1 %v10344_v28, %s10109_s29  ;;  %v10398_v63 = vmul.bf16 %v10382_v54, %v10390_v61  ;;  %v10401_v0 = vmul.bf16 %v10382_v54, %v608_v60  ;;  %v934_v6 = vadd.f32 %v933_v56, %v791_v4  ;;  %v10470_v57 = vmul.bf16 0.0|0.0, %v10382_v54 }
 0x187   : > { %v935_v62 = vpop.f32.mrf.mxu0  ;;  %v10461_v33 = vmul.bf16 %v10382_v54, %v614_v26  ;;  %v10485_v55 = vmul.bf16 %v10382_v54, %v610_v24 }
 0x188   : > { %v936_v19 = vadd.f32 %v935_v62, %v796_v1 }
 0x189   : > { %v937_v5 = vpop.f32.mrf.mxu0  ;;  %15933 = vst [vmem:[#allocation21_spill] sm:$0xff] %v10461_v33 }
 0x18a   : > { %v938_v7 = vadd.f32 %v937_v5, %v796_v1  ;;  %2580 = vrot.lane.b32.xlu0 %v10403_v2, %s10109_s29  ;;  %4177 = vrot.lane.b32.xlu1 %v10405_v3, %s10109_s29  ;;  %v974_v25 = vpack.c.bf16 %v936_v19, %v932_v27 }
 0x18b   : > { %v941_v8 = vpop.f32.mrf.mxu0 }
 0x18c   : > { %v10413_v11 = vpack.c.bf16 %v938_v7, %v934_v6  ;;  %v942_v20 = vadd.f32 %v941_v8, %v10380_v52 }
 0x18d   : > { %v943_v15 = vpop.f32.mrf.mxu0 }
 0x18e   : > { %2592 = vrot.lane.b32.xlu0 %v10344_v28, %s10109_s29  ;;  %4189 = vrot.lane.b32.xlu1 %v10411_v9, %s10109_s29  ;;  %v944_v61 = vadd.f32 %v943_v15, %v10380_v52 }
 0x18f   : > { %v945_v17 = vpop.f32.mrf.mxu0 }
 0x190   : > { %v946_v23 = vadd.f32 %v945_v17, %v10371_v45 }
 0x191   : > { %v947_v56 = vpop.f32.mrf.mxu0 }
 0x192   : > { %v976_v36 = vpack.c.bf16 %v946_v23, %v942_v20  ;;  %4183 = vrot.lane.b32.xlu0 %v10419_v18, %s10109_s29  ;;  %5756 = vrot.lane.b32.xlu1 %v10423_v35, %s10109_s29  ;;  %v948_v60 = vadd.f32 %v947_v56, %v10371_v45 }
 0x194   : > { %8588 = vmatprep.subr.bf16.mxu1 %v976_v36  ;;  %v10494_v62 = vpack.c.bf16 %v948_v60, %v944_v61 }
 0x195   : > { %8589 = vmatpush3.bf16.msra.mxu1 %v976_v36 }
 0x196   : > { %8590 = vmatprep.subr.bf16.mxu1 %v974_v25  ;;  %4195 = vrot.lane.b32.xlu0 %v10411_v9, %s10109_s29 }
 0x197   : > { %1002 = vrot.lane.b32.xlu1 %v10430_v30, %s10109_s29 }
 0x199   : > { %8591 = vmatpush3.bf16.msra.mxu1 %v974_v25 }
 0x19a   : > { %5750 = vrot.lane.b32.xlu0 %v10441_v42, %s10109_s29 }
 0x19b   : > { %1008 = vrot.lane.b32.xlu1 %v10430_v30, %s10109_s29 }
 0x19e   : > { %2582 = vrot.lane.b32.xlu0 %v10430_v30, %s10109_s29 }
 0x19f   : > { %1014 = vrot.lane.b32.xlu1 %v10452_v47, %s10109_s29 }
 0x1a2   : > { %4197 = vrot.lane.b32.xlu0 %v10461_v33, %s10109_s29 }
 0x1a3   : > { %1020 = vrot.lane.b32.xlu1 %v10463_v48, %s10109_s29 }
 0x1a6   : > { %5752 = vrot.lane.b32.xlu0 %v10470_v57, %s10109_s29 }
 0x1a7   : > { %2576 = vrot.lane.b32.xlu1 %v10430_v30, %s10109_s29 }
 0x1aa   : > { %2694 = vrot.lane.b32.xlu0 %v974_v25, %s10109_s29 }
 0x1ab   : > { %2588 = vrot.lane.b32.xlu1 %v991_v12, %s10109_s29 }
 0x1af   : > { %2594 = vrot.lane.b32.xlu1 %v995_v58, %s10109_s29 }
 0x1b3   : > { %4179 = vrot.lane.b32.xlu1 %v10470_v57, %s10109_s29 }
 0x1b7   : > { %4185 = vrot.lane.b32.xlu1 %v10470_v57, %s10109_s29 }
 0x1bb   : > { %4191 = vrot.lane.b32.xlu1 %v10485_v55, %s10109_s29 }
 0x1bf   : > { %5758 = vrot.lane.b32.xlu1 %v10470_v57, %s10109_s29 }
 0x1c3   : > { %2696 = vrot.lane.b32.xlu1 %v976_v36, %s10109_s29 }
 0x1c7   : > { %5872 = vrot.lane.b32.xlu1 %v10494_v62, %s10109_s29 }
 0x1f0   : > { %v1013_v54 = vpop.permute.xlu1 %1012  ;;  %v1001_v1 = vpop.permute.xlu0 %1000 }
 0x1f1   : > { %v1025_v4 = vsel %vm1022_vm9, %v10363_v41, %v1001_v1  ;;  %v1041_v36 = vsel %vm1022_vm9, %v10344_v28, %v1013_v54 }
 0x1f2   : > { %1055 = vxpose.xlu0.c.b16.start [1/2] (short) %v1025_v4, 128 }
 0x1f4   : > { %v1007_v5 = vpop.permute.xlu0 %1006  ;;  %v2575_v6 = vpop.permute.xlu1 %2574 }
 0x1f5   : > { %v1033_v45 = vsel %vm1022_vm9, %v10403_v2, %v1007_v5 }
 0x1f6   : > { %1071 = vxpose.xlu1.c.b16.start [1/2] (short) %v1033_v45, 128 }
 0x1f8   : > { %v2587_v52 = vpop.permute.xlu1 %2586  ;;  %v1019_v39 = vpop.permute.xlu0 %1018 }
 0x1f9   : > { %v1049_v56 = vsel %vm1022_vm9, %v10344_v28, %v1019_v39  ;;  %v2614_v39 = vsel %vm1022_vm9, %v2587_v52, %v10344_v28 }
 0x1fc   : > { %v10502_v7 = vpop.permute.xlu1 %4177  ;;  %v2581_v24 = vpop.permute.xlu0 %2580 }
 0x200   : > { %v10504_v8 = vpop.permute.xlu1 %4189  ;;  %v2593_v1 = vpop.permute.xlu0 %2592 }
 0x204   : > { %v10506_v14 = vpop.permute.xlu1 %5756  ;;  %v4184_v54 = vpop.permute.xlu0 %4183 }
 0x209   : > { %v1003_v15 = vpop.permute.xlu1 %1002 }
 0x20a   : > { %v1029_v16 = vsel %vm1022_vm9, %v10430_v30, %v1003_v15  ;;  %v10522_v15 = vpop.permute.xlu0 %4195 }
 0x20b   : > { %1056 = vxpose.xlu0.c.b16.end [2/2] (short) %v1029_v16, 128  ;;  %v2598_v16 = vsel %vm1022_vm9, %v2575_v6, %v10346_v29 }
 0x20d   : > { %v1009_v41 = vpop.permute.xlu1 %1008 }
 0x20e   : > { %v1037_v17 = vsel %vm1022_vm9, %v10430_v30, %v1009_v41 }
 0x20f   : > { %1072 = vxpose.xlu1.c.b16.end [2/2] (short) %v1037_v17, 128 }
 0x211   : > { %v1015_v19 = vpop.permute.xlu1 %1014 }
 0x212   : > { %v1045_v26 = vsel %vm1022_vm9, %v991_v12, %v1015_v19  ;;  %v10524_v12 = vpop.permute.xlu0 %5750 }
 0x215   : > { %v1021_v2 = vpop.permute.xlu1 %1020 }
 0x216   : > { %v1053_v61 = vsel %vm1022_vm9, %v995_v58, %v1021_v2  ;;  %v2606_v58 = vsel %vm1022_vm9, %v2581_v24, %v10360_v40  ;;  %v2583_v17 = vpop.permute.xlu0 %2582  ;;  %v2622_v40 = vsel %vm1022_vm9, %v2593_v1, %v10344_v28 }
 0x217   : > { %v2610_v19 = vsel %vm1022_vm9, %v2583_v17, %v10430_v30 }
 0x219   : > { %v2577_v20 = vpop.permute.xlu1 %2576 }
 0x21a   : > { %v2602_v41 = vsel %vm1022_vm9, %v2577_v20, %v10430_v30  ;;  %v4198_v2 = vpop.permute.xlu0 %4197 }
 0x21d   : > { %v2589_v23 = vpop.permute.xlu1 %2588 }
 0x21e   : > { %v10536_v29 = vpop.permute.xlu0 %5752  ;;  %v2618_v6 = vsel %vm1022_vm9, %v2589_v23, %v10452_v47 }
 0x221   : > { %v2595_v27 = vpop.permute.xlu1 %2594 }
 0x222   : > { %v2695_v20 = vpop.permute.xlu0 %2694  ;;  %v2626_v30 = vsel %vm1022_vm9, %v2595_v27, %v10463_v48 }
 0x224   : > { %1087 = vxpose.xlu0.c.b16.start [1/2] (short) %v1041_v36, 128 }
 0x225   : > { %v4180_v25 = vpop.permute.xlu1 %4179 }
 0x228   : > { %1103 = vxpose.xlu1.c.b16.start [1/2] (short) %v1049_v56, 128  ;;  %1088 = vxpose.xlu0.c.b16.end [2/2] (short) %v1045_v26, 128 }
 0x229   : > { %v4186_v60 = vpop.permute.xlu1 %4185 }
 0x22c   : > { %1104 = vxpose.xlu1.c.b16.end [2/2] (short) %v1053_v61, 128  ;;  %v4201_v61 = vsel %vm1022_vm9, %v10441_v42, %v10502_v7  ;;  %v4213_v42 = vsel %vm1022_vm9, %v10470_v57, %v4186_v60  ;;  %v4225_v60 = vsel %vm1022_vm9, %v10411_v9, %v10522_v15 }
 0x22d   : > { %v10518_v4 = vpop.permute.xlu1 %4191 }
 0x22e   : > { %v4221_v15 = vsel %vm1022_vm9, %v10401_v0, %v10518_v4 }
 0x231   : > { %v10520_v5 = vpop.permute.xlu1 %5758 }
 0x235   : > { %v2697_v45 = vpop.permute.xlu1 %2696 }
 0x236   : > { %8656 = vmatprep.subr.bf16.mxu1 %v2697_v45 }
 0x239   : > { %v10544_v36 = vpop.permute.xlu1 %5872 }
 0x241   : > { %2628 = vxpose.xlu0.c.b16.start [1/2] (short) %v2598_v16, 128  ;;  %v4209_v16 = vsel %vm1022_vm9, %v10423_v35, %v4184_v54 }
 0x245   : > { %2644 = vxpose.xlu1.c.b16.start [1/2] (short) %v2606_v58, 128  ;;  %2629 = vxpose.xlu0.c.b16.end [2/2] (short) %v2602_v41, 128  ;;  %v4205_v58 = vsel %vm1022_vm9, %v10470_v57, %v4180_v25 }
 0x249   : > { %2645 = vxpose.xlu1.c.b16.end [2/2] (short) %v2610_v19, 128 }
 0x25e   : > { %2660 = vxpose.xlu0.c.b16.start [1/2] (short) %v2614_v39, 128 }
 0x262   : > { %2676 = vxpose.xlu1.c.b16.start [1/2] (short) %v2622_v40, 128  ;;  %2661 = vxpose.xlu0.c.b16.end [2/2] (short) %v2618_v6, 128 }
 0x266   : > { %2677 = vxpose.xlu1.c.b16.end [2/2] (short) %v2626_v30, 128  ;;  %v4229_v30 = vsel %vm1022_vm9, %v10398_v63, %v4198_v2 }
 0x269   : > { %v1063_v24 = vpop.trf.xlu0 }
 0x26a   : > { %8592 = vmatprep.mubr.msk.bf16.mxu1 %vm858_vm0, %v1063_v24 }
 0x26d   : > { %v1079_v52 = vpop.trf.xlu1  ;;  %v1064_v26 = vpop.trf.xlu0 }
 0x26e   : > { %8593 = vmatmul.mubr.msk.bf16.vlgmr.msra.gmra.mxu1 %vm858_vm0, %v1064_v26 }
 0x26f   : > { %8657 = vmatpush3.bf16.msra.mxu1 %v2697_v45 }
 0x270   : > { %8658 = vmatprep.subr.bf16.mxu1 %v2695_v20 }
 0x271   : > { %v1080_v28 = vpop.trf.xlu1  ;;  %v1065_v47 = vpop.trf.xlu0 }
 0x272   : > { %8596 = vmatprep.mubr.msk.bf16.mxu1 %vm858_vm0, %v1065_v47 }
 0x273   : > { %8659 = vmatpush3.bf16.msra.mxu1 %v2695_v20  ;;  %v4217_v20 = vsel %vm1022_vm9, %v10411_v9, %v10504_v8 }
 0x274   : > { %8724 = vmatprep.subr.bf16.mxu1 %v10494_v62 }
 0x275   : > { %v1081_v48 = vpop.trf.xlu1  ;;  %v1066_v23 = vpop.trf.xlu0 }
 0x276   : > { %8597 = vmatmul.mubr.msk.bf16.gmra.mxu1 %vm858_vm0, %v1066_v23 }
 0x279   : > { %v1082_v27 = vpop.trf.xlu1  ;;  %v1067_v56 = vpop.trf.xlu0 }
 0x27a   : > { %8600 = vmatprep.mubr.msk.bf16.mxu1 %vm858_vm0, %v1067_v56 }
 0x27b   : > { %4231 = vxpose.xlu0.c.b16.start [1/2] (short) %v4201_v61, 128 }
 0x27d   : > { %v1083_v1 = vpop.trf.xlu1  ;;  %v1068_v45 = vpop.trf.xlu0 }
 0x27e   : > { %8601 = vmatmul.mubr.msk.bf16.gmra.mxu1 %vm858_vm0, %v1068_v45  ;;  %v5778_v45 = vsel %vm1022_vm9, %v10536_v29, %v10470_v57 }
 0x27f   : > { %4247 = vxpose.xlu1.c.b16.start [1/2] (short) %v4209_v16, 128  ;;  %4232 = vxpose.xlu0.c.b16.end [2/2] (short) %v4205_v58, 128 }
 0x281   : > { %v1084_v41 = vpop.trf.xlu1  ;;  %v1069_v17 = vpop.trf.xlu0 }
 0x282   : > { %8604 = vmatprep.mubr.msk.bf16.mxu1 %vm858_vm0, %v1069_v17 }
 0x283   : > { %4248 = vxpose.xlu1.c.b16.end [2/2] (short) %v4213_v42, 128 }
 0x285   : > { %v1085_v7 = vpop.trf.xlu1  ;;  %v1070_v19 = vpop.trf.xlu0 }
 0x286   : > { %8605 = vmatmul.mubr.msk.bf16.gmra.mxu1 %vm858_vm0, %v1070_v19 }
 0x287   : > { %8608 = vmatprep.mubr.msk.bf16.mxu1 %vm858_vm0, %v1079_v52 }
 0x289   : > { %v1086_v35 = vpop.trf.xlu1  ;;  %v1095_v6 = vpop.trf.xlu0 }
 0x28d   : > { %v1111_v25 = vpop.trf.xlu1  ;;  %v1096_v52 = vpop.trf.xlu0 }
 0x28e   : > { %8609 = vmatmul.mubr.msk.bf16.gmra.mxu1 %vm858_vm0, %v1080_v28 }
 0x28f   : > { %8612 = vmatprep.mubr.msk.bf16.mxu1 %vm858_vm0, %v1081_v48 }
 0x291   : > { %v1112_v54 = vpop.trf.xlu1  ;;  %v1097_v47 = vpop.trf.xlu0 }
 0x295   : > { %v1113_v39 = vpop.trf.xlu1  ;;  %v1098_v2 = vpop.trf.xlu0 }
 0x296   : > { %8613 = vmatmul.mubr.msk.bf16.gmra.mxu1 %vm858_vm0, %v1082_v27  ;;  %v5774_v27 = vsel %vm1022_vm9, %v10524_v12, %v10405_v3  ;;  %v5786_v3 = vsel %vm1022_vm9, %v10520_v5, %v10470_v57 }
 0x297   : > { %8616 = vmatprep.mubr.msk.bf16.mxu1 %vm858_vm0, %v1083_v1  ;;  %v5782_v1 = vsel %vm1022_vm9, %v10506_v14, %v10419_v18 }
 0x298   : > { %4279 = vxpose.xlu0.c.b16.start [1/2] (short) %v4225_v60, 128 }
 0x299   : > { %v1114_v40 = vpop.trf.xlu1  ;;  %v1099_v23 = vpop.trf.xlu0 }
 0x29c   : > { %4263 = vxpose.xlu1.c.b16.start [1/2] (short) %v4217_v20, 128  ;;  %4280 = vxpose.xlu0.c.b16.end [2/2] (short) %v4229_v30, 128 }
 0x29d   : > { %v1115_v24 = vpop.trf.xlu1  ;;  %v1100_v61 = vpop.trf.xlu0 }
 0x29e   : > { %8617 = vmatmul.mubr.msk.bf16.gmra.mxu1 %vm858_vm0, %v1084_v41 }
 0x29f   : > { %8620 = vmatprep.mubr.msk.bf16.mxu1 %vm858_vm0, %v1085_v7 }
 0x2a0   : > { %4264 = vxpose.xlu1.c.b16.end [2/2] (short) %v4221_v15, 128 }
 0x2a1   : > { %v1116_v26 = vpop.trf.xlu1  ;;  %v1101_v58 = vpop.trf.xlu0 }
 0x2a5   : > { %v1117_v28 = vpop.trf.xlu1  ;;  %v1102_v14 = vpop.trf.xlu0 }
 0x2a6   : > { %8621 = vmatmul.mubr.msk.bf16.gmra.mxu1 %vm858_vm0, %v1086_v35 }
 0x2a7   : > { %8624 = vmatprep.mubr.msk.bf16.mxu1 %vm858_vm0, %v1095_v6 }
 0x2a9   : > { %v1118_v8 = vpop.trf.xlu1  ;;  %v2636_v7 = vpop.trf.xlu0 }
 0x2ad   : > { %v10584_v48 = vpop.trf.xlu1  ;;  %v2637_v35 = vpop.trf.xlu0 }
 0x2ae   : > { %8625 = vmatmul.mubr.msk.bf16.gmra.mxu1 %vm858_vm0, %v1096_v52 }
 0x2af   : > { %8628 = vmatprep.mubr.msk.bf16.mxu1 %vm858_vm0, %v1097_v47 }
 0x2b1   : > { %v10588_v4 = vpop.trf.xlu1 }
 0x2b5   : > { %v10593_v56 = vpop.trf.xlu1  ;;  %5804 = vxpose.xlu0.c.b16.start [1/2] (short) %v5774_v27, 128 }
 0x2b6   : > { %8629 = vmatmul.mubr.msk.bf16.gmra.mxu1 %vm858_vm0, %v1098_v2 }
 0x2b7   : > { %8632 = vmatprep.mubr.msk.bf16.mxu1 %vm858_vm0, %v1099_v23 }
 0x2b9   : > { %5820 = vxpose.xlu1.c.b16.start [1/2] (short) %v5782_v1, 128  ;;  %v10603_v16 = vpop.trf.xlu1  ;;  %5805 = vxpose.xlu0.c.b16.end [2/2] (short) %v5778_v45, 128 }
 0x2bd   : > { %5821 = vxpose.xlu1.c.b16.end [2/2] (short) %v5786_v3, 128  ;;  %v10608_v12 = vpop.trf.xlu1 }
 0x2be   : > { %8633 = vmatmul.mubr.msk.bf16.gmra.mxu1 %vm858_vm0, %v1100_v61 }
 0x2bf   : > { %8636 = vmatprep.mubr.msk.bf16.mxu1 %vm858_vm0, %v1101_v58 }
 0x2c1   : > { %v10612_v18 = vpop.trf.xlu1 }
 0x2c5   : > { %v2658_v29 = vpop.trf.xlu1 }
 0x2c6   : > { %8637 = vmatmul.mubr.msk.bf16.gmra.mxu1 %vm858_vm0, %v1102_v14 }
 0x2c7   : > { %8640 = vmatprep.mubr.msk.bf16.mxu1 %vm858_vm0, %v1111_v25 }
 0x2c9   : > { %v10616_v41 = vpop.trf.xlu1 }
 0x2cd   : > { %v10618_v17 = vpop.trf.xlu1 }
 0x2ce   : > { %8641 = vmatmul.mubr.msk.bf16.gmra.mxu1 %vm858_vm0, %v1112_v54 }
 0x2cf   : > { %8644 = vmatprep.mubr.msk.bf16.mxu1 %vm858_vm0, %v1113_v39  ;;  %v2638_v39 = vpop.trf.xlu0 }
 0x2d1   : > { %v10622_v57 = vpop.trf.xlu1 }
 0x2d5   : > { %v10624_v5 = vpop.trf.xlu1 }
 0x2d6   : > { %8645 = vmatmul.mubr.msk.bf16.gmra.mxu1 %vm858_vm0, %v1114_v40  ;;  %v2639_v40 = vpop.trf.xlu0 }
 0x2d7   : > { %8648 = vmatprep.mubr.msk.bf16.mxu1 %vm858_vm0, %v1115_v24 }
 0x2d9   : > { %5870 = vrot.lane.b32.xlu1 %v10413_v11, %s10109_s29  ;;  %v10630_v42 = vpop.trf.xlu1 }
 0x2da   : > { %v2640_v20 = vpop.trf.xlu0 }
 0x2dd   : > { %5762 = vrot.lane.b32.xlu1 %v10411_v9, %s10109_s29  ;;  %v10634_v19 = vpop.trf.xlu1 }
 0x2de   : > { %8649 = vmatmul.mubr.msk.bf16.gmra.mxu1 %vm858_vm0, %v1116_v26  ;;  %v2641_v24 = vpop.trf.xlu0 }
 0x2df   : > { %8652 = vmatprep.mubr.msk.bf16.mxu1 %vm858_vm0, %v1117_v28 }
 0x2e1   : > { %5764 = vrot.lane.b32.xlu1 %v10401_v0, %s10109_s29  ;;  %v10640_v25 = vpop.trf.xlu1 }
 0x2e2   : > { %v2642_v52 = vpop.trf.xlu0 }
 0x2e5   : > { %v10642_v54 = vpop.trf.xlu1 }
 0x2e6   : > { %8653 = vmatmul.mubr.msk.bf16.gmra.mxu1 %vm858_vm0, %v1118_v8 }
 0x2e7   : > { %8660 = vmatprep.mubr.msk.bf16.mxu1 %vm858_vm0, %v2636_v7 }
 0x2e9   : > { %v10646_v60 = vpop.trf.xlu1 }
 0x2ed   : > { %v10648_v6 = vpop.trf.xlu1 }
 0x2ee   : > { %8661 = vmatmul.mubr.msk.bf16.vlgmr.msra.gmra.mxu1 %vm858_vm0, %v2637_v35 }
 0x2ef   : > { %8725 = vmatpush3.bf16.msra.mxu1 %v10494_v62  ;;  %8664 = vmatprep.mubr.msk.bf16.mxu1 %vm858_vm0, %v2638_v39 }
 0x2f0   : > { %8726 = vmatprep.subr.bf16.mxu1 %v10413_v11 }
 0x2f1   : > { %v10654_v0 = vpop.trf.xlu1 }
 0x2f3   : > { %8727 = vmatpush3.bf16.msra.mxu1 %v10413_v11  ;;  %v2643_v11 = vpop.trf.xlu0 }
 0x2f4   : > { %8792 = vmatprep.subr.bf16.mxu1 %v10544_v36 }
 0x2f5   : > { %v10658_v30 = vpop.trf.xlu1 }
 0x2f6   : > { %8665 = vmatmul.mubr.msk.bf16.gmra.mxu1 %vm858_vm0, %v2639_v40 }
 0x2f7   : > { %8668 = vmatprep.mubr.msk.bf16.mxu1 %vm858_vm0, %v2640_v20  ;;  %v2668_v27 = vpop.trf.xlu0 }
 0x2f9   : > { %v10662_v15 = vpop.trf.xlu1 }
 0x2fd   : > { %v10664_v62 = vpop.trf.xlu1 }
 0x2fe   : > { %8669 = vmatmul.mubr.msk.bf16.gmra.mxu1 %vm858_vm0, %v2641_v24 }
 0x2ff   : > { %8672 = vmatprep.mubr.msk.bf16.mxu1 %vm858_vm0, %v2642_v52 }
 0x301   : > { %v10668_v26 = vpop.trf.xlu1 }
 0x305   : > { %v10670_v28 = vpop.trf.xlu1 }
 0x306   : > { %8673 = vmatmul.mubr.msk.bf16.gmra.mxu1 %vm858_vm0, %v2643_v11 }
 0x307   : > { %8676 = vmatprep.mubr.msk.bf16.mxu1 %vm858_vm0, %v10584_v48 }
 0x309   : > { %v10675_v47 = vpop.trf.xlu1 }
 0x30d   : > { %v10677_v8 = vpop.trf.xlu1 }
 0x30e   : > { %8677 = vmatmul.mubr.msk.bf16.gmra.mxu1 %vm858_vm0, %v10588_v4  ;;  %v2669_v4 = vpop.trf.xlu0 }
 0x30f   : > { %8680 = vmatprep.mubr.msk.bf16.mxu1 %vm858_vm0, %v10593_v56 }
 0x311   : > { %v10683_v2 = vpop.trf.xlu1 }
 0x312   : > { %v2670_v45 = vpop.trf.xlu0 }
 0x315   : > { %v10685_v23 = vpop.trf.xlu1 }
 0x316   : > { %8681 = vmatmul.mubr.msk.bf16.gmra.mxu1 %vm858_vm0, %v10603_v16  ;;  %v2671_v3 = vpop.trf.xlu0 }
 0x317   : > { %8684 = vmatprep.mubr.msk.bf16.mxu1 %vm858_vm0, %v10608_v12 }
 0x319   : > { %v10691_v48 = vpop.trf.xlu1 }
 0x31d   : > { %v10693_v61 = vpop.trf.xlu1 }
 0x31e   : > { %8685 = vmatmul.mubr.msk.bf16.gmra.mxu1 %vm858_vm0, %v10612_v18 }
 0x31f   : > { %8688 = vmatprep.mubr.msk.bf16.mxu1 %vm858_vm0, %v2658_v29  ;;  %v2672_v29 = vpop.trf.xlu0 }
 0x321   : > { %v10698_v56 = vpop.trf.xlu1 }
 0x323   : > { %v2673_v24 = vpop.trf.xlu0 }
 0x325   : > { %v10700_v1 = vpop.trf.xlu1 }
 0x326   : > { %8689 = vmatmul.mubr.msk.bf16.gmra.mxu1 %vm858_vm0, %v10616_v41 }
 0x327   : > { %8692 = vmatprep.mubr.msk.bf16.mxu1 %vm858_vm0, %v2668_v27  ;;  %v2674_v10 = vpop.trf.xlu0 }
 0x329   : > { %v10705_v16 = vpop.trf.xlu1 }
 0x32b   : > { %v2675_v37 = vpop.trf.xlu0 }
 0x32d   : > { %v10707_v12 = vpop.trf.xlu1 }
 0x32e   : > { %v10709_v58 = vpop.f32.mrf.mxu1  ;;  %8693 = vmatmul.mubr.msk.bf16.gmra.mxu1 %vm858_vm0, %v2669_v4 }
 0x32f   : > { %15934 = vst [vmem:[#allocation22_spill] sm:$0xff] %v10709_v58  ;;  %8696 = vmatprep.mubr.msk.bf16.mxu1 %vm858_vm0, %v2670_v45 }
 0x330   : > { %v10713_v18 = vpop.f32.mrf.mxu1 }
 0x331   : > { %15935 = vst [vmem:[#allocation23_spill] sm:$0xff] %v10713_v18  ;;  %v10715_v14 = vpop.trf.xlu1 }
 0x332   : > { %v10717_v7 = vpop.f32.mrf.mxu1 }
 0x333   : > { %v1513_v41 = vsel %vm1022_vm9, %v10717_v7, -inf }
 0x334   : > { %1514 = vmax.xlane.f32.xlu1 %v1513_v41  ;;  %v10721_v35 = vpop.f32.mrf.mxu1 }
 0x335   : > { %v10723_v39 = vpop.trf.xlu1  ;;  %v1507_v40 = vsel %vm1022_vm9, %v10721_v35, -inf }
 0x336   : > { %v10727_v20 = vpop.f32.mrf.mxu1  ;;  %8697 = vmatmul.mubr.msk.bf16.gmra.mxu1 %vm858_vm0, %v2671_v3 }
 0x337   : > { %8700 = vmatprep.mubr.msk.bf16.mxu1 %vm858_vm0, %v2672_v29 }
 0x338   : > { %1508 = vmax.xlane.f32.xlu1 %v1507_v40  ;;  %v10731_v52 = vpop.f32.mrf.mxu1 }
 0x339   : > { %15936 = vst [vmem:[#allocation24_spill] sm:$0xff] %v10731_v52  ;;  %v10733_v11 = vpop.trf.xlu1 }
 0x33a   : > { %v10735_v27 = vpop.f32.mrf.mxu1 }
 0x33b   : > { %15937 = vst [vmem:[#allocation25_spill] sm:$0xff] %v10735_v27  ;;  %v1525_v4 = vsel %vm1022_vm9, %v10735_v27, -inf }
 0x33c   : > { %1526 = vmax.xlane.f32.xlu1 %v1525_v4  ;;  %v10739_v45 = vpop.f32.mrf.mxu1 }
 0x33d   : > { %v10741_v41 = vpop.trf.xlu1 }
 0x33e   : > { %v10743_v3 = vpop.f32.mrf.mxu1  ;;  %8701 = vmatmul.mubr.msk.bf16.gmra.mxu1 %vm858_vm0, %v2673_v24 }
 0x33f   : > { %15938 = vst [vmem:[#allocation26_spill] sm:$0xff] %v10743_v3  ;;  %v1534_v29 = vsel %vm1022_vm9, %v10743_v3, -inf  ;;  %8704 = vmatprep.mubr.msk.bf16.mxu1 %vm858_vm0, %v2674_v10 }
 0x340   : > { %1535 = vmax.xlane.f32.xlu1 %v1534_v29  ;;  %v10749_v40 = vpop.f32.mrf.mxu1 }
 0x341   : > { %15939 = vst [vmem:[#allocation27_spill] sm:$0xff] %v10749_v40  ;;  %v10751_v53 = vpop.trf.xlu1  ;;  %v1528_v4 = vsel %vm1022_vm9, %v10749_v40, -inf }
 0x342   : > { %v10755_v59 = vpop.f32.mrf.mxu1 }
 0x344   : > { %1529 = vmax.xlane.f32.xlu1 %v1528_v4  ;;  %v10757_v31 = vpop.f32.mrf.mxu1 }
 0x345   : > { %v10759_v24 = vpop.trf.xlu1 }
 0x346   : > { %v10761_v49 = vpop.f32.mrf.mxu1  ;;  %8705 = vmatmul.mubr.msk.bf16.gmra.mxu1 %vm858_vm0, %v2675_v37 }
 0x347   : > { %8708 = vmatprep.mubr.msk.bf16.mxu1 %vm858_vm0, %v10618_v17 }
 0x348   : > { %v10766_v10 = vpop.f32.mrf.mxu1 }
 0x349   : > { %15940 = vst [vmem:[#allocation28_spill] sm:$0xff] %v10766_v10  ;;  %v10768_v29 = vpop.trf.xlu1  ;;  %v1540_v50 = vsel %vm1022_vm9, %v10766_v10, -inf }
 0x34a   : > { %15941 = vst [vmem:[#allocation29_spill] sm:$0xff] %v10768_v29  ;;  %1541 = vmax.xlane.f32.xlu1 %v1540_v50  ;;  %v10772_v4 = vpop.f32.mrf.mxu1 }
 0x34b   : > { %15942 = vst [vmem:[#allocation30_spill] sm:$0xff] %v10772_v4  ;;  %v1549_v32 = vsel %vm1022_vm9, %v10772_v4, -inf }
 0x34c   : > { %v10776_v38 = vpop.f32.mrf.mxu1 }
 0x34d   : > { %v5871_v51 = vpop.permute.xlu1 %5870 }
 0x34e   : > { %1550 = vmax.xlane.f32.xlu1 %v1549_v32  ;;  %v10778_v37 = vpop.f32.mrf.mxu1  ;;  %8709 = vmatmul.mubr.msk.bf16.gmra.mxu1 %vm858_vm0, %v10622_v57 }
 0x34f   : > { %15943 = vst [vmem:[#allocation31_spill] sm:$0xff] %v10778_v37  ;;  %8712 = vmatprep.mubr.msk.bf16.mxu1 %vm858_vm0, %v10624_v5 }
 0x350   : > { %v10784_v17 = vpop.f32.mrf.mxu1 }
 0x351   : > { %15944 = vst [vmem:[#allocation32_spill] sm:$0xff] %v10784_v17  ;;  %v5763_v50 = vpop.permute.xlu1 %5762 }
 0x352   : > { %v5790_v43 = vsel %vm1022_vm9, %v5763_v50, %v10411_v9  ;;  %v10788_v22 = vpop.f32.mrf.mxu1 }
 0x353   : > { %15945 = vst [vmem:[#allocation33_spill] sm:$0xff] %v10788_v22  ;;  %5836 = vxpose.xlu0.c.b16.start [1/2] (short) %v5790_v43, 128  ;;  %v1561_v32 = vsel %vm1022_vm9, %v10788_v22, -inf }
 0x354   : > { %1562 = vmax.xlane.f32.xlu1 %v1561_v32  ;;  %v10792_v44 = vpop.f32.mrf.mxu1  ;;  %v4239_v32 = vpop.trf.xlu0 }
 0x355   : > { %15946 = vst [vmem:[#allocation34_spill] sm:$0xff] %v10792_v44  ;;  %v5765_v46 = vpop.permute.xlu1 %5764  ;;  %v1555_v43 = vsel %vm1022_vm9, %v10792_v44, -inf }
 0x356   : > { %v5794_v57 = vsel %vm1022_vm9, %v5765_v46, %v10485_v55  ;;  %v10796_v5 = vpop.f32.mrf.mxu1  ;;  %8713 = vmatmul.mubr.msk.bf16.gmra.mxu1 %vm858_vm0, %v10630_v42 }
 0x357   : > { %5837 = vxpose.xlu0.c.b16.end [2/2] (short) %v5794_v57, 128  ;;  %8716 = vmatprep.mubr.msk.bf16.mxu1 %vm858_vm0, %v10634_v19 }
 0x358   : > { %1556 = vmax.xlane.f32.xlu1 %v1555_v43  ;;  %v10804_v50 = vpop.f32.mrf.mxu1  ;;  %v4240_v42 = vpop.trf.xlu0 }
 0x35a   : > { %v10806_v34 = vpop.f32.mrf.mxu1 }
 0x35c   : > { %v10808_v21 = vpop.f32.mrf.mxu1  ;;  %v4241_v33 = vpop.trf.xlu0 }
 0x35e   : > { %v10810_v46 = vpop.f32.mrf.mxu1  ;;  %8717 = vmatmul.mubr.msk.bf16.gmra.mxu1 %vm858_vm0, %v10640_v25 }
 0x35f   : > { %15947 = vst [vmem:[#allocation35_spill] sm:$0xff] %v10810_v46  ;;  %8720 = vmatprep.mubr.msk.bf16.mxu1 %vm858_vm0, %v10642_v54  ;;  %v1582_v55 = vsel %vm1022_vm9, %v10810_v46, -inf }
 0x360   : > { %1583 = vmax.xlane.f32.xlu1 %v1582_v55  ;;  %v10818_v19 = vpop.f32.mrf.mxu1 }
 0x361   : > { %15948 = vst [vmem:[#allocation36_spill] sm:$0xff] %v10818_v19  ;;  %v1576_v43 = vsel %vm1022_vm9, %v10818_v19, -inf  ;;  %v4242_v19 = vpop.trf.xlu0 }
 0x362   : > { %v10820_v57 = vpop.f32.mrf.mxu1 }
 0x364   : > { %1577 = vmax.xlane.f32.xlu1 %v1576_v43  ;;  %v10824_v13 = vpop.f32.mrf.mxu1 }
 0x366   : > { %v10826_v25 = vpop.f32.mrf.mxu1  ;;  %8721 = vmatmul.mubr.msk.bf16.gmra.mxu1 %vm858_vm0, %v10646_v60 }
 0x367   : > { %8728 = vmatprep.mubr.msk.bf16.mxu1 %vm858_vm0, %v4239_v32 }
 0x368   : > { %v10831_v54 = vpop.f32.mrf.mxu1 }
 0x369   : > { %15949 = vst [vmem:[#allocation37_spill] sm:$0xff] %v10831_v54  ;;  %v1588_v55 = vsel %vm1022_vm9, %v10831_v54, -inf  ;;  %v4243_v54 = vpop.trf.xlu0 }
 0x36a   : > { %1589 = vmax.xlane.f32.xlu1 %v1588_v55  ;;  %v10835_v46 = vpop.f32.mrf.mxu1 }
 0x36c   : > { %v10837_v43 = vpop.f32.mrf.mxu1 }
 0x36e   : > { %v10839_v44 = vpop.f32.mrf.mxu1  ;;  %8729 = vmatmul.mubr.msk.bf16.vlgmr.msra.gmra.mxu1 %vm858_vm0, %v4240_v42  ;;  %v4244_v42 = vpop.trf.xlu0 }
 0x36f   : > { %15950 = vst [vmem:[#allocation38_spill] sm:$0xff] %v10839_v44  ;;  %8793 = vmatpush3.bf16.msra.mxu1 %v10544_v36  ;;  %v1606_v60 = vsel %vm1022_vm9, %v10839_v44, -inf  ;;  %8732 = vmatprep.mubr.msk.bf16.mxu1 %vm858_vm0, %v4241_v33 }
 0x370   : > { %8794 = vmatprep.subr.bf16.mxu1 %v5871_v51  ;;  %v10846_v32 = vpop.f32.mrf.mxu1  ;;  %1607 = vmax.xlane.f32.xlu1 %v1606_v60 }
 0x371   : > { %15951 = vst [vmem:[#allocation39_spill] sm:$0xff] %v10846_v32  ;;  %v1600_v55 = vsel %vm1022_vm9, %v10846_v32, -inf }
 0x372   : > { %v10850_v22 = vpop.f32.mrf.mxu1 }
 0x373   : > { %15952 = vst [vmem:[#allocation40_spill] sm:$0xff] %v10850_v22  ;;  %8795 = vmatpush3.bf16.msra.mxu1 %v5871_v51 }
 0x374   : > { %v10852_v4 = vpop.f32.mrf.mxu1  ;;  %1601 = vmax.xlane.f32.xlu1 %v1600_v55 }
 0x375   : > { %15953 = vst [vmem:[#allocation41_spill] sm:$0xff] %v10852_v4 }
 0x376   : > { %v10854_v36 = vpop.f32.mrf.mxu1  ;;  %8733 = vmatmul.mubr.msk.bf16.gmra.mxu1 %vm858_vm0, %v4242_v19  ;;  %v4245_v19 = vpop.trf.xlu0 }
 0x377   : > { %15954 = vst [vmem:[#allocation42_spill] sm:$0xff] %v10854_v36  ;;  %v1618_v33 = vsel %vm1022_vm9, %v10854_v36, -inf  ;;  %8736 = vmatprep.mubr.msk.bf16.mxu1 %vm858_vm0, %v4243_v54 }
 0x378   : > { %v10860_v60 = vpop.f32.mrf.mxu1  ;;  %5768 = vrot.lane.b32.xlu0 %v10411_v9, %s10109_s29  ;;  %1619 = vmax.xlane.f32.xlu1 %v1618_v33 }
 0x379   : > { %15955 = vst [vmem:[#allocation43_spill] sm:$0xff] %v10860_v60  ;;  %v1612_v51 = vsel %vm1022_vm9, %v10860_v60, -inf }
 0x37a   : > { %v10866_v55 = vpop.f32.mrf.mxu1  ;;  %v4246_v60 = vpop.trf.xlu0 }
 0x37c   : > { %v10868_v32 = vpop.f32.mrf.mxu1  ;;  %5770 = vrot.lane.b32.xlu0 %v10398_v63, %s10109_s29  ;;  %1613 = vmax.xlane.f32.xlu1 %v1612_v51 }
 0x37d   : > { %15956 = vst [vmem:[#allocation44_spill] sm:$0xff] %v10868_v32 }
 0x37e   : > { %v10872_v54 = vpop.f32.mrf.mxu1  ;;  %8737 = vmatmul.mubr.msk.bf16.gmra.mxu1 %vm858_vm0, %v4244_v42 }
 0x37f   : > { %8740 = vmatprep.mubr.msk.bf16.mxu1 %vm858_vm0, %v4245_v19  ;;  %v10893_v19 = vpop.trf.xlu0 }
 0x380   : > { %v10876_v44 = vpop.f32.mrf.mxu1 }
 0x381   : > { %15957 = vst [vmem:[#allocation45_spill] sm:$0xff] %v10876_v44 }
 0x382   : > { %v10878_v33 = vpop.f32.mrf.mxu1 }
 0x384   : > { %v10880_v36 = vpop.f32.mrf.mxu1 }
 0x386   : > { %v10882_v9 = vpop.f32.mrf.mxu1  ;;  %8741 = vmatmul.mubr.msk.bf16.gmra.mxu1 %vm858_vm0, %v4246_v60 }
 0x387   : > { %15958 = vst [vmem:[#allocation46_spill] sm:$0xff] %v10882_v9  ;;  %8744 = vmatprep.mubr.msk.bf16.mxu1 %vm858_vm0, %v10648_v6  ;;  %v1642_v63 = vsel %vm1022_vm9, %v10882_v9, -inf  ;;  %v10905_v6 = vpop.trf.xlu0 }
 0x388   : > { %v10889_v42 = vpop.f32.mrf.mxu1  ;;  %1643 = vmax.xlane.f32.xlu1 %v1642_v63 }
 0x38a   : > { %v10891_v51 = vpop.f32.mrf.mxu1 }
 0x38b   : > { %v10917_v27 = vpop.trf.xlu0 }
 0x38c   : > { %v10895_v10 = vpop.f32.mrf.mxu1 }
 0x38d   : > { %15959 = vst [vmem:[#allocation47_spill] sm:$0xff] %v10895_v10  ;;  %v1639_v40 = vsel %vm1022_vm9, %v10895_v10, -inf }
 0x38e   : > { %1640 = vmax.xlane.f32.xlu1 %v1639_v40  ;;  %v10899_v60 = vpop.f32.mrf.mxu1  ;;  %8745 = vmatmul.mubr.msk.bf16.gmra.mxu1 %vm858_vm0, %v10654_v0 }
 0x38f   : > { %15960 = vst [vmem:[#allocation48_spill] sm:$0xff] %v10899_v60  ;;  %8748 = vmatprep.mubr.msk.bf16.mxu1 %vm858_vm0, %v10658_v30  ;;  %v1654_v9 = vsel %vm1022_vm9, %v10899_v60, -inf }
 0x390   : > { %v10907_v63 = vpop.f32.mrf.mxu1 }
 0x391   : > { %15961 = vst [vmem:[#allocation49_spill] sm:$0xff] %v10907_v63  ;;  %v1648_v40 = vsel %vm1022_vm9, %v10907_v63, -inf }
 0x392   : > { %1655 = vmax.xlane.f32.xlu1 %v1654_v9  ;;  %v10911_v3 = vpop.f32.mrf.mxu1  ;;  %v1510_v9 = vsel %vm1022_vm9, %v10709_v58, -inf }
 0x393   : > { %15962 = vst [vmem:[#allocation50_spill] sm:$0xff] %v10911_v3 }
 0x394   : > { %v10913_v10 = vpop.f32.mrf.mxu1 }
 0x395   : > { %15963 = vst [vmem:[#allocation51_spill] sm:$0xff] %v10913_v10 }
 0x396   : > { %1649 = vmax.xlane.f32.xlu1 %v1648_v40  ;;  %v10919_v0 = vpop.f32.mrf.mxu1  ;;  %8749 = vmatmul.mubr.msk.bf16.gmra.mxu1 %vm858_vm0, %v10662_v15  ;;  %v10933_v40 = vpop.trf.xlu0 }
 0x397   : > { %15964 = vst [vmem:[#allocation52_spill] sm:$0xff] %v10919_v0  ;;  %8752 = vmatprep.mubr.msk.bf16.mxu1 %vm858_vm0, %v10664_v62  ;;  %v1666_v60 = vsel %vm1022_vm9, %v10919_v0, -inf  ;;  %v1504_v0 = vsel %vm1022_vm9, %v10713_v18, -inf  ;;  %v1516_v18 = vsel %vm1022_vm9, %v10731_v52, -inf }
 0x398   : > { %v10925_v30 = vpop.f32.mrf.mxu1 }
 0x399   : > { %15965 = vst [vmem:[#allocation53_spill] sm:$0xff] %v10925_v30  ;;  %v1660_v15 = vsel %vm1022_vm9, %v10925_v30, -inf }
 0x39a   : > { %1667 = vmax.xlane.f32.xlu1 %v1666_v60  ;;  %v10931_v63 = vpop.f32.mrf.mxu1  ;;  %v10953_v30 = vpop.trf.xlu0 }
 0x39b   : > { %15966 = vst [vmem:[#allocation54_spill] sm:$0xff] %v10931_v63  ;;  %1511 = vmax.xlane.f32.xlu0 %v1510_v9  ;;  %v1522_v9 = vsel %vm1022_vm9, %v10727_v20, -inf }
 0x39c   : > { %v10935_v29 = vpop.f32.mrf.mxu1 }
 0x39e   : > { %1661 = vmax.xlane.f32.xlu1 %v1660_v15  ;;  %v10939_v62 = vpop.f32.mrf.mxu1  ;;  %8753 = vmatmul.mubr.msk.bf16.gmra.mxu1 %vm858_vm0, %v10668_v26  ;;  %v1669_v15 = vsel %vm1022_vm9, %v10931_v63, -inf }
 0x39f   : > { %1505 = vmax.xlane.f32.xlu0 %v1504_v0  ;;  %8756 = vmatprep.mubr.msk.bf16.mxu1 %vm858_vm0, %v10670_v28 }
 0x3a0   : > { %v10947_v60 = vpop.f32.mrf.mxu1 }
 0x3a1   : > { %15967 = vst [vmem:[#allocation55_spill] sm:$0xff] %v10947_v60 }
 0x3a2   : > { %1670 = vmax.xlane.f32.xlu1 %v1669_v15  ;;  %v10955_v58 = vpop.f32.mrf.mxu1  ;;  %v10969_v15 = vpop.trf.xlu0 }
 0x3a3   : > { %1523 = vmax.xlane.f32.xlu0 %v1522_v9 }
 0x3a4   : > { %v10957_v26 = vpop.f32.mrf.mxu1 }
 0x3a5   : > { %15968 = vst [vmem:[#allocation56_spill] sm:$0xff] %v10957_v26  ;;  %v1675_v0 = vsel %vm1022_vm9, %v10957_v26, -inf }
 0x3a6   : > { %1676 = vmax.xlane.f32.xlu1 %v1675_v0  ;;  %v10961_v28 = vpop.f32.mrf.mxu1  ;;  %8757 = vmatmul.mubr.msk.bf16.gmra.mxu1 %vm858_vm0, %v10675_v47  ;;  %v1519_v47 = vsel %vm1022_vm9, %v10739_v45, -inf }
 0x3a7   : > { %15969 = vst [vmem:[#allocation57_spill] sm:$0xff] %v10961_v28  ;;  %1517 = vmax.xlane.f32.xlu0 %v1516_v18  ;;  %8760 = vmatprep.mubr.msk.bf16.mxu1 %vm858_vm0, %v10677_v8  ;;  %v1690_v63 = vsel %vm1022_vm9, %v10961_v28, -inf  ;;  %v10983_v8 = vpop.trf.xlu0 }
 0x3a8   : > { %v10971_v9 = vpop.f32.mrf.mxu1 }
 0x3aa   : > { %1691 = vmax.xlane.f32.xlu1 %v1690_v63  ;;  %v10975_v0 = vpop.f32.mrf.mxu1  ;;  %v1537_v63 = vsel %vm1022_vm9, %v10755_v59, -inf }
 0x3ab   : > { %15970 = vst [vmem:[#allocation58_spill] sm:$0xff] %v10975_v0  ;;  %1520 = vmax.xlane.f32.xlu0 %v1519_v47  ;;  %v1693_v18 = vsel %vm1022_vm9, %v10975_v0, -inf  ;;  %v1531_v0 = vsel %vm1022_vm9, %v10757_v31, -inf }
 0x3ac   : > { %v10979_v26 = vpop.f32.mrf.mxu1 }
 0x3ae   : > { %1694 = vmax.xlane.f32.xlu1 %v1693_v18  ;;  %v10985_v52 = vpop.f32.mrf.mxu1  ;;  %8761 = vmatmul.mubr.msk.bf16.gmra.mxu1 %vm858_vm0, %v10683_v2  ;;  %v10999_v18 = vpop.trf.xlu0 }
 0x3af   : > { %15971 = vst [vmem:[#allocation59_spill] sm:$0xff] %v10985_v52  ;;  %1538 = vmax.xlane.f32.xlu0 %v1537_v63  ;;  %8764 = vmatprep.mubr.msk.bf16.mxu1 %vm858_vm0, %v10685_v23  ;;  %v1546_v23 = vsel %vm1022_vm9, %v10761_v49, -inf }
 0x3b0   : > { %v10993_v47 = vpop.f32.mrf.mxu1 }
 0x3b1   : > { %15972 = vst [vmem:[#allocation60_spill] sm:$0xff] %v10993_v47 }
 0x3b2   : > { %v10995_v28 = vpop.f32.mrf.mxu1  ;;  %v11015_v47 = vpop.trf.xlu0 }
 0x3b3   : > { %15973 = vst [vmem:[#allocation61_spill] sm:$0xff] %v10995_v28  ;;  %1532 = vmax.xlane.f32.xlu0 %v1531_v0 }
 0x3b4   : > { %v11001_v52 = vpop.f32.mrf.mxu1 }
 0x3b5   : > { %15974 = vst [vmem:[#allocation62_spill] sm:$0xff] %v11001_v52 }
 0x3b6   : > { %v11003_v2 = vpop.f32.mrf.mxu1  ;;  %8765 = vmatmul.mubr.msk.bf16.gmra.mxu1 %vm858_vm0, %v10691_v48  ;;  %v1543_v48 = vsel %vm1022_vm9, %v10776_v38, -inf }
 0x3b7   : > { %15975 = vst [vmem:[#allocation63_spill] sm:$0xff] %v11003_v2  ;;  %1547 = vmax.xlane.f32.xlu0 %v1546_v23  ;;  %8768 = vmatprep.mubr.msk.bf16.mxu1 %vm858_vm0, %v10693_v61  ;;  %v3103_v63 = vsel %vm1022_vm9, %v11003_v2, -inf }
 0x3b8   : > { %3104 = vmax.xlane.f32.xlu1 %v3103_v63  ;;  %v11013_v0 = vpop.f32.mrf.mxu1 }
 0x3b9   : > { %15976 = vst [vmem:[#allocation64_spill] sm:$0xff] %v11013_v0  ;;  %v1558_v0 = vsel %vm1022_vm9, %v10778_v37, -inf }
 0x3ba   : > { %v11017_v28 = vpop.f32.mrf.mxu1 }
 0x3bb   : > { %15977 = vst [vmem:[#allocation65_spill] sm:$0xff] %v11017_v28  ;;  %1544 = vmax.xlane.f32.xlu0 %v1543_v48  ;;  %v3106_v23 = vsel %vm1022_vm9, %v11017_v28, -inf  ;;  %v11034_v48 = vpop.trf.xlu0 }
 0x3bc   : > { %3107 = vmax.xlane.f32.xlu1 %v3106_v23  ;;  %v11023_v52 = vpop.f32.mrf.mxu1 }
 0x3bd   : > { %15978 = vst [vmem:[#allocation66_spill] sm:$0xff] %v11023_v52  ;;  %v1515_v61 = vpop.xlane.xlu1 %1514 }
 0x3be   : > { %v1699_v2 = vsub.f32 %v10717_v7, %v1515_v61  ;;  %v11026_v63 = vpop.f32.mrf.mxu1  ;;  %8769 = vmatmul.mubr.msk.bf16.gmra.mxu1 %vm858_vm0, %v10698_v56  ;;  %v1552_v56 = vsel %vm1022_vm9, %v10784_v17, -inf  ;;  %v1579_v17 = vsel %vm1022_vm9, %v10824_v13, -inf }
 0x3bf   : > { %15979 = vst [vmem:[#allocation67_spill] sm:$0xff] %v11026_v63  ;;  %1559 = vmax.xlane.f32.xlu0 %v1558_v0  ;;  %8772 = vmatprep.mubr.msk.bf16.mxu1 %vm858_vm0, %v10700_v1 }
 0x3c0   : > { %v1766_v23 = vmul.f32 1.442695, %v1699_v2  ;;  %v11036_v28 = vpop.f32.mrf.mxu1 }
 0x3c1   : > { %15980 = vst [vmem:[#allocation68_spill] sm:$0xff] %v11036_v28  ;;  %v1509_v52 = vpop.xlane.xlu1 %1508  ;;  %v11049_v28 = vpop.trf.xlu0 }
 0x3c2   : > { %v1697_v7 = vsub.f32 %v10721_v35, %v1509_v52  ;;  %v11039_v61 = vpop.f32.mrf.mxu1  ;;  %9015 = vpow2.f32 %v1766_v23  ;;  %v1570_v52 = vsel %vm1022_vm9, %v10796_v5, -inf }
 0x3c3   : > { %15981 = vst [vmem:[#allocation69_spill] sm:$0xff] %v11039_v61  ;;  %1553 = vmax.xlane.f32.xlu0 %v1552_v56  ;;  %v3118_v0 = vsel %vm1022_vm9, %v11039_v61, -inf  ;;  %v1564_v56 = vsel %vm1022_vm9, %v10804_v50, -inf }
 0x3c4   : > { %v1762_v63 = vmul.f32 1.442695, %v1697_v7  ;;  %3119 = vmax.xlane.f32.xlu1 %v3118_v0  ;;  %v11045_v1 = vpop.f32.mrf.mxu1 }
 0x3c5   : > { %15982 = vst [vmem:[#allocation70_spill] sm:$0xff] %v11045_v1  ;;  %v3112_v2 = vsel %vm1022_vm9, %v11045_v1, -inf  ;;  %v11067_v0 = vpop.trf.xlu0 }
 0x3c6   : > { %v11051_v35 = vpop.f32.mrf.mxu1  ;;  %8773 = vmatmul.mubr.msk.bf16.gmra.mxu1 %vm858_vm0, %v10705_v16  ;;  %9017 = vpow2.f32 %v1762_v63 }
 0x3c7   : > { %1571 = vmax.xlane.f32.xlu0 %v1570_v52  ;;  %8776 = vmatprep.mubr.msk.bf16.mxu1 %vm858_vm0, %v10893_v19  ;;  %v1573_v52 = vsel %vm1022_vm9, %v10806_v34, -inf }
 0x3c8   : > { %3113 = vmax.xlane.f32.xlu1 %v3112_v2  ;;  %v11059_v23 = vpop.f32.mrf.mxu1 }
 0x3c9   : > { %15983 = vst [vmem:[#allocation71_spill] sm:$0xff] %v11059_v23  ;;  %v5816_v1 = vpop.trf.xlu0 }
 0x3ca   : > { %v11061_v7 = vpop.f32.mrf.mxu1 }
 0x3cb   : > { %15984 = vst [vmem:[#allocation72_spill] sm:$0xff] %v11061_v7  ;;  %1565 = vmax.xlane.f32.xlu0 %v1564_v56  ;;  %v3130_v16 = vsel %vm1022_vm9, %v11061_v7, -inf }
 0x3cc   : > { %3131 = vmax.xlane.f32.xlu1 %v3130_v16  ;;  %v11069_v63 = vpop.f32.mrf.mxu1 }
 0x3cd   : > { %15985 = vst [vmem:[#allocation73_spill] sm:$0xff] %v11069_v63  ;;  %v3124_v19 = vsel %vm1022_vm9, %v11069_v63, -inf  ;;  %v1567_v63 = vsel %vm1022_vm9, %v10808_v21, -inf }
 0x3ce   : > { %v11073_v2 = vpop.f32.mrf.mxu1  ;;  %8777 = vmatmul.mubr.msk.bf16.gmra.mxu1 %vm858_vm0, %v10905_v6 }
 0x3cf   : > { %15986 = vst [vmem:[#allocation74_spill] sm:$0xff] %v11073_v2  ;;  %1574 = vmax.xlane.f32.xlu0 %v1573_v52  ;;  %8780 = vmatprep.mubr.msk.bf16.mxu1 %vm858_vm0, %v10917_v27  ;;  %v11081_v56 = vpop.eup %9015 }
 0x3d0   : > { %15987 = vst [vmem:[#allocation75_spill] sm:$0xff] %v11081_v56  ;;  %3125 = vmax.xlane.f32.xlu1 %v3124_v19  ;;  %v11083_v16 = vpop.f32.mrf.mxu1  ;;  %v1897_v6 = vsel %vm1022_vm9, %v11081_v56, 0.0  ;;  %v1585_v19 = vsel %vm1022_vm9, %v10820_v57, -inf  ;;  %v5817_v56 = vpop.trf.xlu0 }
 0x3d1   : > { %15988 = vst [vmem:[#allocation76_spill] sm:$0xff] %v11083_v16 }
 0x3d2   : > { %v11085_v61 = vpop.f32.mrf.mxu1 }
 0x3d3   : > { %15989 = vst [vmem:[#allocation77_spill] sm:$0xff] %v11085_v61  ;;  %1568 = vmax.xlane.f32.xlu0 %v1567_v63  ;;  %v11091_v7 = vpop.eup %9017 }
 0x3d4   : > { %15990 = vst [vmem:[#allocation78_spill] sm:$0xff] %v11091_v7  ;;  %1898 = vadd.xlane.f32.xlu1 %v1897_v6  ;;  %v11093_v52 = vpop.f32.mrf.mxu1  ;;  %v1891_v63 = vsel %vm1022_vm9, %v11091_v7, 0.0 }
 0x3d5   : > { %15991 = vst [vmem:[#allocation79_spill] sm:$0xff] %v11093_v52 }
 0x3d6   : > { %v11095_v27 = vpop.f32.mrf.mxu1  ;;  %8781 = vmatmul.mubr.msk.bf16.gmra.mxu1 %vm858_vm0, %v10933_v40 }
 0x3d7   : > { %15992 = vst [vmem:[#allocation80_spill] sm:$0xff] %v11095_v27  ;;  %1586 = vmax.xlane.f32.xlu0 %v1585_v19  ;;  %8784 = vmatprep.mubr.msk.bf16.mxu1 %vm858_vm0, %v10953_v30  ;;  %v3151_v40 = vsel %vm1022_vm9, %v11095_v27, -inf  ;;  %v5818_v30 = vpop.trf.xlu0 }
 0x3d8   : > { %1892 = vadd.xlane.f32.xlu1 %v1891_v63  ;;  %v11105_v6 = vpop.f32.mrf.mxu1  ;;  %v1594_v63 = vsel %vm1022_vm9, %v10826_v25, -inf }
 0x3d9   : > { %15993 = vst [vmem:[#allocation81_spill] sm:$0xff] %v11105_v6 }
 0x3da   : > { %v11107_v16 = vpop.f32.mrf.mxu1 }
 0x3db   : > { %15994 = vst [vmem:[#allocation82_spill] sm:$0xff] %v11107_v16  ;;  %1580 = vmax.xlane.f32.xlu0 %v1579_v17  ;;  %v5819_v27 = vpop.trf.xlu0 }
 0x3dc   : > { %3152 = vmax.xlane.f32.xlu1 %v3151_v40  ;;  %v11113_v19 = vpop.f32.mrf.mxu1  ;;  %v1597_v40 = vsel %vm1022_vm9, %v10835_v46, -inf }
 0x3dd   : > { %15995 = vst [vmem:[#allocation83_spill] sm:$0xff] %v11113_v19 }
 0x3de   : > { %v11115_v52 = vpop.f32.mrf.mxu1  ;;  %8785 = vmatmul.mubr.msk.bf16.gmra.mxu1 %vm858_vm0, %v10969_v15  ;;  %v1591_v15 = vsel %vm1022_vm9, %v10837_v43, -inf }
 0x3df   : > { %15996 = vst [vmem:[#allocation84_spill] sm:$0xff] %v11115_v52  ;;  %1595 = vmax.xlane.f32.xlu0 %v1594_v63  ;;  %8788 = vmatprep.mubr.msk.bf16.mxu1 %vm858_vm0, %v10983_v8  ;;  %v1609_v63 = vsel %vm1022_vm9, %v10850_v22, -inf }
 0x3e0   : > { %v11123_v17 = vpop.f32.mrf.mxu1 }
 0x3e1   : > { %15997 = vst [vmem:[#allocation85_spill] sm:$0xff] %v11123_v17 }
 0x3e2   : > { %v11125_v7 = vpop.f32.mrf.mxu1 }
 0x3e3   : > { %15998 = vst [vmem:[#allocation86_spill] sm:$0xff] %v11125_v7  ;;  %1598 = vmax.xlane.f32.xlu0 %v1597_v40  ;;  %v11143_v40 = vpop.trf.xlu0 }
 0x3e4   : > { %v11129_v52 = vpop.f32.mrf.mxu1 }
 0x3e5   : > { %15999 = vst [vmem:[#allocation87_spill] sm:$0xff] %v11129_v52 }
 0x3e6   : > { %v11131_v23 = vpop.f32.mrf.mxu1  ;;  %8789 = vmatmul.mubr.msk.bf16.gmra.mxu1 %vm858_vm0, %v10999_v18  ;;  %v1603_v18 = vsel %vm1022_vm9, %v10852_v4, -inf }
 0x3e7   : > { %1592 = vmax.xlane.f32.xlu0 %v1591_v15  ;;  %8796 = vmatprep.mubr.msk.bf16.mxu1 %vm858_vm0, %v11015_v47  ;;  %v11157_v47 = vpop.trf.xlu0 }
 0x3e8   : > { %v11139_v8 = vpop.f32.mrf.mxu1 }
 0x3ea   : > { %v11145_v17 = vpop.f32.mrf.mxu1 }
 0x3eb   : > { %1610 = vmax.xlane.f32.xlu0 %v1609_v63  ;;  %v1621_v63 = vsel %vm1022_vm9, %v10866_v55, -inf }
 0x3ec   : > { %v11147_v37 = vpop.f32.mrf.mxu1 }
 0x3ed   : > { %16000 = vst [vmem:[#allocation88_spill] sm:$0xff] %v11147_v37 }
 0x3ee   : > { %v11151_v61 = vpop.f32.mrf.mxu1  ;;  %8797 = vmatmul.mubr.msk.bf16.vlgmr.msra.gmra.mxu1 %vm858_vm0, %v11034_v48  ;;  %v11169_v48 = vpop.trf.xlu0 }
 0x3ef   : > { %16001 = vst [vmem:[#allocation89_spill] sm:$0xff] %v11151_v61  ;;  %1604 = vmax.xlane.f32.xlu0 %v1603_v18  ;;  %8800 = vmatprep.mubr.msk.bf16.mxu1 %vm858_vm0, %v11049_v28  ;;  %v1615_v61 = vsel %vm1022_vm9, %v10868_v32, -inf }
 0x3f0   : > { %v11159_v15 = vpop.f32.mrf.mxu1 }
 0x3f1   : > { %16002 = vst [vmem:[#allocation90_spill] sm:$0xff] %v11159_v15 }
 0x3f2   : > { %v11163_v22 = vpop.f32.mrf.mxu1 }
 0x3f3   : > { %16003 = vst [vmem:[#allocation91_spill] sm:$0xff] %v11163_v22  ;;  %1622 = vmax.xlane.f32.xlu0 %v1621_v63  ;;  %v1630_v63 = vsel %vm1022_vm9, %v10872_v54, -inf }
 0x3f4   : > { %v11165_v4 = vpop.f32.mrf.mxu1 }
 0x3f5   : > { %16004 = vst [vmem:[#allocation92_spill] sm:$0xff] %v11165_v4  ;;  %v11182_v4 = vpop.trf.xlu0 }
 0x3f6   : > { %v11171_v18 = vpop.f32.mrf.mxu1  ;;  %8801 = vmatmul.mubr.msk.bf16.gmra.mxu1 %vm858_vm0, %v11067_v0 }
 0x3f7   : > { %16005 = vst [vmem:[#allocation93_spill] sm:$0xff] %v11171_v18  ;;  %1616 = vmax.xlane.f32.xlu0 %v1615_v61  ;;  %8804 = vmatprep.mubr.msk.bf16.mxu1 %vm858_vm0, %v5816_v1  ;;  %v1624_v18 = vsel %vm1022_vm9, %v10876_v44, -inf  ;;  %v1633_v1 = vsel %vm1022_vm9, %v10878_v33, -inf }
 0x3f8   : > { %v11176_v28 = vpop.f32.mrf.mxu1 }
 0x3f9   : > { %16006 = vst [vmem:[#allocation94_spill] sm:$0xff] %v11176_v28  ;;  %v11196_v0 = vpop.trf.xlu0  ;;  %v1627_v28 = vsel %vm1022_vm9, %v10880_v36, -inf }
 0x3fa   : > { %v11180_v15 = vpop.f32.mrf.mxu1 }
 0x3fb   : > { %16007 = vst [vmem:[#allocation95_spill] sm:$0xff] %v11180_v15  ;;  %1631 = vmax.xlane.f32.xlu0 %v1630_v63 }
 0x3fc   : > { %v11184_v22 = vpop.f32.mrf.mxu1 }
 0x3fd   : > { %16008 = vst [vmem:[#allocation96_spill] sm:$0xff] %v11184_v22 }
 0x3fe   : > { %v11188_v32 = vpop.f32.mrf.mxu1  ;;  %8805 = vmatmul.mubr.msk.bf16.gmra.mxu1 %vm858_vm0, %v5817_v56  ;;  %v11209_v56 = vpop.trf.xlu0 }
 0x3ff   : > { %16009 = vst [vmem:[#allocation97_spill] sm:$0xff] %v11188_v32  ;;  %1625 = vmax.xlane.f32.xlu0 %v1624_v18  ;;  %8808 = vmatprep.mubr.msk.bf16.mxu1 %vm858_vm0, %v5818_v30  ;;  %v1636_v18 = vsel %vm1022_vm9, %v10889_v42, -inf }
 0x400   : > { %v11192_v61 = vpop.f32.mrf.mxu1 }
 0x401   : > { %16010 = vst [vmem:[#allocation98_spill] sm:$0xff] %v11192_v61  ;;  %v1645_v61 = vsel %vm1022_vm9, %v10891_v51, -inf }
 0x402   : > { %v11198_v63 = vpop.f32.mrf.mxu1 }
 0x403   : > { %16011 = vst [vmem:[#allocation99_spill] sm:$0xff] %v11198_v63  ;;  %1634 = vmax.xlane.f32.xlu0 %v1633_v1 }
 0x404   : > { %v11200_v22 = vpop.f32.mrf.mxu1 }
 0x405   : > { %16012 = vst [vmem:[#allocation100_spill] sm:$0xff] %v11200_v22 }
 0x406   : > { %v11204_v15 = vpop.f32.mrf.mxu1  ;;  %8809 = vmatmul.mubr.msk.bf16.gmra.mxu1 %vm858_vm0, %v5819_v27  ;;  %v11221_v27 = vpop.trf.xlu0 }
 0x407   : > { %16013 = vst [vmem:[#allocation101_spill] sm:$0xff] %v11204_v15  ;;  %1628 = vmax.xlane.f32.xlu0 %v1627_v28  ;;  %8812 = vmatprep.mubr.msk.bf16.mxu1 %vm858_vm0, %v10707_v12 }
 0x408   : > { %v11211_v30 = vpop.f32.mrf.mxu1 }
 0x409   : > { %16014 = vst [vmem:[#allocation102_spill] sm:$0xff] %v11211_v30 }
 0x40a   : > { %v11215_v1 = vpop.f32.mrf.mxu1  ;;  %v11235_v63 = vpop.trf.xlu0 }
 0x40b   : > { %1637 = vmax.xlane.f32.xlu0 %v1636_v18  ;;  %v1657_v18 = vsel %vm1022_vm9, %v10911_v3, -inf }
 0x40c   : > { %v11217_v22 = vpop.f32.mrf.mxu1 }
 0x40d   : > { %16015 = vst [vmem:[#allocation103_spill] sm:$0xff] %v11217_v22 }
 0x40e   : > { %v11223_v28 = vpop.f32.mrf.mxu1  ;;  %8813 = vmatmul.mubr.msk.bf16.gmra.mxu1 %vm858_vm0, %v10715_v14  ;;  %v1651_v14 = vsel %vm1022_vm9, %v10913_v10, -inf  ;;  %v16026_v10 = vld [vmem:[#allocation25_spill] sm:$0xff] }
 0x40f   : > { %16016 = vst [vmem:[#allocation104_spill] sm:$0xff] %v11223_v28  ;;  %1646 = vmax.xlane.f32.xlu0 %v1645_v61  ;;  %8816 = vmatprep.mubr.msk.bf16.mxu1 %vm858_vm0, %v10723_v39  ;;  %v11245_v39 = vpop.permute.xlu0 %5768 }
 0x410   : > { %v11229_v12 = vpop.f32.mrf.mxu1 }
 0x411   : > { %16017 = vst [vmem:[#allocation105_spill] sm:$0xff] %v11229_v12  ;;  %v1527_v12 = vpop.xlane.xlu1 %1526 }
 0x412   : > { %v11231_v30 = vpop.f32.mrf.mxu1 }
 0x413   : > { %16018 = vst [vmem:[#allocation106_spill] sm:$0xff] %v11231_v30  ;;  %1658 = vmax.xlane.f32.xlu0 %v1657_v18  ;;  %v1663_v18 = vsel %vm1022_vm9, %v10935_v29, -inf }
 0x414   : > { %v11237_v32 = vpop.f32.mrf.mxu1 }
 0x415   : > { %16019 = vst [vmem:[#allocation107_spill] sm:$0xff] %v11237_v32  ;;  %v1536_v28 = vpop.xlane.xlu1 %1535 }
 0x416   : > { %8817 = vmatmul.mubr.msk.bf16.gmra.mxu1 %vm858_vm0, %v10733_v11  ;;  %v11247_v61 = vpop.f32.mrf.mxu1  ;;  %v1678_v11 = vsel %vm1022_vm9, %v10939_v62, -inf }
 0x417   : > { %1652 = vmax.xlane.f32.xlu0 %v1651_v14  ;;  %8820 = vmatprep.mubr.msk.bf16.mxu1 %vm858_vm0, %v10741_v41  ;;  %16020 = vst [vmem:[#allocation108_spill] sm:$0xff] %v11247_v61  ;;  %v11259_v41 = vpop.permute.xlu0 %5770 }
 0x418   : > { %v11251_v32 = vpop.f32.mrf.mxu1 }
 0x419   : > { %16021 = vst [vmem:[#allocation109_spill] sm:$0xff] %v11251_v32 }
 0x41a   : > { %v11261_v14 = vpop.f32.mrf.mxu1 }
 0x41b   : > { %1664 = vmax.xlane.f32.xlu0 %v1663_v18  ;;  %16022 = vst [vmem:[#allocation110_spill] sm:$0xff] %v11261_v14  ;;  %v1672_v18 = vsel %vm1022_vm9, %v10947_v60, -inf  ;;  %v1530_v14 = vpop.xlane.xlu1 %1529 }
 0x41c   : > { %v11267_v32 = vpop.f32.mrf.mxu1 }
 0x41d   : > { %16023 = vst [vmem:[#allocation111_spill] sm:$0xff] %v11267_v32  ;;  %v1703_v32 = vsub.f32 %v16026_v10, %v1527_v12 }
 0x41e   : > { %8821 = vmatmul.mubr.msk.bf16.gmra.mxu1 %vm858_vm0, %v10751_v53  ;;  %v16024_v53 = vld [vmem:[#allocation29_spill] sm:$0xff]  ;;  %v11277_v61 = vpop.f32.mrf.mxu1 }
 0x41f   : > { %1679 = vmax.xlane.f32.xlu0 %v1678_v11  ;;  %8824 = vmatprep.mubr.msk.bf16.mxu1 %vm858_vm0, %v10759_v24  ;;  %v1681_v11 = vsel %vm1022_vm9, %v10955_v58, -inf  ;;  %16025 = vst [vmem:[#allocation29_spill] sm:$0xff] %v11277_v61  ;;  %v1774_v61 = vmul.f32 1.442695, %v1703_v32 }
 0x423   : > { %1673 = vmax.xlane.f32.xlu0 %v1672_v18  ;;  %v1684_v18 = vsel %vm1022_vm9, %v10971_v9, -inf }
 0x424   : > { %v11265_v30 = vpop.xlane.xlu0 %1511 }
 0x426   : > { %8825 = vmatmul.mubr.msk.bf16.gmra.mxu1 %vm858_vm0, %v16024_v53  ;;  %v11282_v53 = vpop.xlane.xlu1 %1541 }
 0x427   : > { %1682 = vmax.xlane.f32.xlu0 %v1681_v11  ;;  %8828 = vmatprep.mubr.msk.bf16.mxu1 %vm858_vm0, %v11143_v40  ;;  %v11285_v11 = vpop.f32.mrf.mxu1  ;;  %v1687_v40 = vsel %vm1022_vm9, %v10979_v26, -inf }
 0x428   : > { %v11275_v24 = vpop.xlane.xlu0 %1505  ;;  %16027 = vst [vmem:[#allocation25_spill] sm:$0xff] %v11285_v11 }
 0x429   : > { %v11295_v12 = vpop.f32.mrf.mxu1 }
 0x42a   : > { %16028 = vst [vmem:[#allocation112_spill] sm:$0xff] %v11295_v12 }
 0x42b   : > { %1685 = vmax.xlane.f32.xlu0 %v1684_v18  ;;  %v11300_v18 = vpop.f32.mrf.mxu1 }
 0x42c   : > { %v1524_v60 = vpop.xlane.xlu0 %1523  ;;  %16029 = vst [vmem:[#allocation113_spill] sm:$0xff] %v11300_v18 }
 0x42d   : > { %v1702_v44 = vsub.f32 %v10727_v20, %v1524_v60  ;;  %v11297_v20 = vpop.xlane.xlu1 %1550  ;;  %v11310_v12 = vpop.f32.mrf.mxu1 }
 0x42e   : > { %8829 = vmatmul.mubr.msk.bf16.gmra.mxu1 %vm858_vm0, %v11157_v47 }
 0x42f   : > { %v1772_v3 = vmul.f32 1.442695, %v1702_v44  ;;  %1688 = vmax.xlane.f32.xlu0 %v1687_v40  ;;  %8832 = vmatprep.mubr.msk.bf16.mxu1 %vm858_vm0, %v11169_v48  ;;  %v16030_v44 = vld [vmem:[#allocation26_spill] sm:$0xff] }
 0x430   : > { %v11293_v10 = vpop.xlane.xlu0 %1517  ;;  %v1706_v32 = vsub.f32 %v16030_v44, %v1536_v28  ;;  %16031 = vst [vmem:[#allocation26_spill] sm:$0xff] %v11310_v12  ;;  %v11318_v44 = vpop.f32.mrf.mxu1 }
 0x431   : > { %9019 = vpow2.f32 %v1772_v3  ;;  %v11305_v40 = vpop.xlane.xlu1 %1562 }
 0x432   : > { %9021 = vpow2.f32 %v1774_v61 }
 0x434   : > { %v1521_v60 = vpop.xlane.xlu0 %1520 }
 0x435   : > { %v1701_v47 = vsub.f32 %v10739_v45, %v1521_v60  ;;  %v1780_v45 = vmul.f32 1.442695, %v1706_v32  ;;  %v16032_v60 = vld [vmem:[#allocation27_spill] sm:$0xff] }
 0x436   : > { %8833 = vmatmul.mubr.msk.bf16.gmra.mxu1 %vm858_vm0, %v11182_v4  ;;  %v1704_v18 = vsub.f32 %v16032_v60, %v1530_v14  ;;  %v11313_v4 = vpop.xlane.xlu1 %1556 }
 0x437   : > { %v1770_v48 = vmul.f32 1.442695, %v1701_v47  ;;  %8836 = vmatprep.mubr.msk.bf16.mxu1 %vm858_vm0, %v11196_v0 }
 0x438   : > { %v1539_v3 = vpop.xlane.xlu0 %1538 }
 0x439   : > { %9023 = vpow2.f32 %v1770_v48  ;;  %v1707_v61 = vsub.f32 %v10755_v59, %v1539_v3  ;;  %v1776_v59 = vmul.f32 1.442695, %v1704_v18 }
 0x43b   : > { %v1782_v11 = vmul.f32 1.442695, %v1707_v61 }
 0x43c   : > { %v1533_v22 = vpop.xlane.xlu0 %1532 }
 0x43d   : > { %9025 = vpow2.f32 %v1782_v11  ;;  %v1705_v28 = vsub.f32 %v10757_v31, %v1533_v22  ;;  %v11328_v22 = vpop.xlane.xlu1 %1583  ;;  %v11330_v11 = vpop.f32.mrf.mxu1 }
 0x43e   : > { %v11316_v47 = vpop.eup %9019  ;;  %8837 = vmatmul.mubr.msk.bf16.gmra.mxu1 %vm858_vm0, %v11209_v56  ;;  %9027 = vpow2.f32 %v1780_v45  ;;  %16035 = vst [vmem:[#allocation115_spill] sm:$0xff] %v11330_v11 }
 0x43f   : > { %16033 = vst [vmem:[#allocation27_spill] sm:$0xff] %v11316_v47  ;;  %v1778_v0 = vmul.f32 1.442695, %v1705_v28  ;;  %8840 = vmatprep.mubr.msk.bf16.mxu1 %vm858_vm0, %v11221_v27  ;;  %v1906_v14 = vsel %vm1022_vm9, %v11316_v47, 0.0  ;;  %v11326_v32 = vpop.eup %9021  ;;  %v11338_v61 = vpop.f32.mrf.mxu1 }
 0x440   : > { %16034 = vst [vmem:[#allocation114_spill] sm:$0xff] %v11326_v32  ;;  %1907 = vadd.xlane.f32.xlu0 %v1906_v14  ;;  %v1548_v31 = vpop.xlane.xlu0 %1547  ;;  %v1909_v18 = vsel %vm1022_vm9, %v11326_v32, 0.0 }
 0x441   : > { %9029 = vpow2.f32 %v1778_v0  ;;  %v1710_v56 = vsub.f32 %v10761_v49, %v1548_v31  ;;  %v11342_v45 = vpop.xlane.xlu1 %1577 }
 0x442   : > { %9031 = vpow2.f32 %v1776_v59 }
 0x443   : > { %v1788_v60 = vmul.f32 1.442695, %v1710_v56 }
 0x444   : > { %1910 = vadd.xlane.f32.xlu0 %v1909_v18  ;;  %v1545_v27 = vpop.xlane.xlu0 %1544 }
 0x445   : > { %v1709_v48 = vsub.f32 %v10776_v38, %v1545_v27  ;;  %v16038_v38 = vld [vmem:[#allocation28_spill] sm:$0xff]  ;;  %v11352_v31 = vpop.xlane.xlu1 %1589 }
 0x446   : > { %v11336_v3 = vpop.eup %9023  ;;  %8841 = vmatmul.mubr.msk.bf16.gmra.mxu1 %vm858_vm0, %v11235_v63  ;;  %v1708_v14 = vsub.f32 %v16038_v38, %v11282_v53  ;;  %v3154_v63 = vsel %vm1022_vm9, %v11107_v16, -inf  ;;  %v16041_v53 = vld [vmem:[#allocation30_spill] sm:$0xff] }
 0x447   : > { %16036 = vst [vmem:[#allocation116_spill] sm:$0xff] %v11336_v3  ;;  %v1786_v28 = vmul.f32 1.442695, %v1709_v48  ;;  %v1903_v49 = vsel %vm1022_vm9, %v11336_v3, 0.0 }
 0x448   : > { %1904 = vadd.xlane.f32.xlu1 %v1903_v49  ;;  %v11346_v59 = vpop.xlane.xlu0 %1559  ;;  %v1711_v49 = vsub.f32 %v16041_v53, %v11297_v20 }
 0x449   : > { %9033 = vpow2.f32 %v1786_v28  ;;  %v1784_v28 = vmul.f32 1.442695, %v1708_v14  ;;  %v11366_v38 = vpop.xlane.xlu1 %1607 }
 0x44a   : > { %v11348_v0 = vpop.eup %9025  ;;  %9035 = vpow2.f32 %v1788_v60  ;;  %v1790_v14 = vmul.f32 1.442695, %v1711_v49 }
 0x44b   : > { %16037 = vst [vmem:[#allocation117_spill] sm:$0xff] %v11348_v0  ;;  %v1921_v56 = vsel %vm1022_vm9, %v11348_v0, 0.0  ;;  %v11358_v18 = vpop.eup %9027  ;;  %9037 = vpow2.f32 %v1784_v28 }
 0x44c   : > { %16039 = vst [vmem:[#allocation28_spill] sm:$0xff] %v11358_v18  ;;  %3155 = vmax.xlane.f32.xlu1 %v3154_v63  ;;  %1922 = vadd.xlane.f32.xlu0 %v1921_v56  ;;  %v11360_v27 = vpop.xlane.xlu0 %1553  ;;  %v1918_v60 = vsel %vm1022_vm9, %v11358_v18, 0.0 }
 0x44d   : > { %v11379_v32 = vpop.xlane.xlu1 %1601 }
 0x44e   : > { %v11362_v48 = vpop.eup %9029  ;;  %16043 = vst [vmem:[#allocation119_spill] sm:$0xff] %v11379_v32 }
 0x44f   : > { %16040 = vst [vmem:[#allocation118_spill] sm:$0xff] %v11362_v48  ;;  %v1915_v16 = vsel %vm1022_vm9, %v11362_v48, 0.0  ;;  %v11372_v3 = vpop.eup %9031 }
 0x450   : > { %16042 = vst [vmem:[#allocation30_spill] sm:$0xff] %v11372_v3  ;;  %1919 = vadd.xlane.f32.xlu1 %v1918_v60  ;;  %1916 = vadd.xlane.f32.xlu0 %v1915_v16  ;;  %v1572_v63 = vpop.xlane.xlu0 %1571  ;;  %v1912_v20 = vsel %vm1022_vm9, %v11372_v3, 0.0  ;;  %v16044_v16 = vld [vmem:[#allocation33_spill] sm:$0xff] }
 0x451   : > { %v1718_v56 = vsub.f32 %v10796_v5, %v1572_v63  ;;  %v1715_v60 = vsub.f32 %v16044_v16, %v11305_v40  ;;  %v3166_v5 = vsel %vm1022_vm9, %v11125_v7, -inf  ;;  %v11394_v3 = vpop.xlane.xlu1 %1619 }
 0x453   : > { %v1804_v47 = vmul.f32 1.442695, %v1718_v56 }
 0x454   : > { %1913 = vadd.xlane.f32.xlu1 %v1912_v20  ;;  %v11377_v53 = vpop.xlane.xlu0 %1565 }
 0x455   : > { %9039 = vpow2.f32 %v1804_v47  ;;  %v16045_v47 = vld [vmem:[#allocation34_spill] sm:$0xff] }
 0x456   : > { %v11381_v48 = vpop.eup %9033  ;;  %9041 = vpow2.f32 %v1790_v14  ;;  %v1713_v20 = vsub.f32 %v16045_v47, %v11313_v4  ;;  %v1798_v14 = vmul.f32 1.442695, %v1715_v60  ;;  %v9001_v60 = vld [vmem:[%s15462_s3 + $0x20] sm:$0xff]  }
 0x457   : > { %v1927_v28 = vsel %vm1022_vm9, %v11381_v48, 0.0  ;;  %v11389_v49 = vpop.eup %9035  ;;  %8123 = vmatmul.mubr.msk.bf16.gmra.mxu0 %vm858_vm0, %v9001_v60 }
 0x458   : > { %3167 = vmax.xlane.f32.xlu1 %v3166_v5  ;;  %1928 = vadd.xlane.f32.xlu0 %v1927_v28  ;;  %v1575_v63 = vpop.xlane.xlu0 %1574  ;;  %v1930_v16 = vsel %vm1022_vm9, %v11389_v49, 0.0  ;;  %v1794_v32 = vmul.f32 1.442695, %v1713_v20  ;;  %v11398_v0 = vpop.eup %9037 }
 0x459   : > { %v1719_v56 = vsub.f32 %v10806_v34, %v1575_v63  ;;  %v3160_v34 = vsel %vm1022_vm9, %v11129_v52, -inf  ;;  %v11406_v28 = vpop.xlane.xlu1 %1613  ;;  %v1924_v47 = vsel %vm1022_vm9, %v11398_v0, 0.0 }
 0x45b   : > { %v1806_v40 = vmul.f32 1.442695, %v1719_v56 }
 0x45c   : > { %1931 = vadd.xlane.f32.xlu1 %v1930_v16  ;;  %v1569_v7 = vpop.xlane.xlu0 %1568 }
 0x45d   : > { %9043 = vpow2.f32 %v1806_v40  ;;  %v1717_v5 = vsub.f32 %v10808_v21, %v1569_v7  ;;  %v16047_v7 = vld [vmem:[#allocation35_spill] sm:$0xff] }
 0x45e   : > { %9045 = vpow2.f32 %v1798_v14  ;;  %v1722_v20 = vsub.f32 %v16047_v7, %v11328_v22  ;;  %v16049_v22 = vld [vmem:[#allocation36_spill] sm:$0xff] }
 0x45f   : > { %9047 = vpow2.f32 %v1794_v32  ;;  %v1802_v14 = vmul.f32 1.442695, %v1717_v5  ;;  %v11421_v32 = vpop.xlane.xlu1 %1643  ;;  %v1720_v5 = vsub.f32 %v16049_v22, %v11342_v45 }
 0x460   : > { %3161 = vmax.xlane.f32.xlu1 %v3160_v34  ;;  %v1587_v4 = vpop.xlane.xlu0 %1586  ;;  %v16048_v34 = vmov 0   ;;  %v1812_v52 = vmul.f32 1.442695, %v1722_v20 }
 0x461   : > { %v1723_v63 = vsub.f32 %v10820_v57, %v1587_v4  ;;  %959 = vmatprep.mubr.bf16.mxu0 %v16048_v34 }
 0x462   : > { %v11409_v56 = vpop.eup %9039 }
 0x463   : > { %16046 = vst [vmem:[#allocation33_spill] sm:$0xff] %v11409_v56  ;;  %v11414_v21 = vpop.eup %9041  ;;  %v1814_v40 = vmul.f32 1.442695, %v1723_v63  ;;  %v1954_v16 = vsel %vm1022_vm9, %v11409_v56, 0.0 }
 0x464   : > { %1925 = vadd.xlane.f32.xlu1 %v1924_v47  ;;  %1955 = vadd.xlane.f32.xlu0 %v1954_v16  ;;  %v1581_v57 = vpop.xlane.xlu0 %1580  ;;  %v1933_v60 = vsel %vm1022_vm9, %v11414_v21, 0.0  ;;  %v3172_v16 = vsel %vm1022_vm9, %v11147_v37, -inf }
 0x465   : > { %9049 = vpow2.f32 %v1814_v40  ;;  %v1721_v4 = vsub.f32 %v10824_v13, %v1581_v57  ;;  %v1808_v40 = vmul.f32 1.442695, %v1720_v5  ;;  %v11432_v13 = vpop.xlane.xlu1 %1640 }
 0x466   : > { %9051 = vpow2.f32 %v1802_v14 }
 0x467   : > { %v1810_v63 = vmul.f32 1.442695, %v1721_v4  ;;  %v16052_v4 = vld [vmem:[#allocation37_spill] sm:$0xff] }
 0x468   : > { %1934 = vadd.xlane.f32.xlu1 %v1933_v60  ;;  %v1596_v7 = vpop.xlane.xlu0 %1595  ;;  %v1724_v60 = vsub.f32 %v16052_v4, %v11352_v31 }
 0x469   : > { %9053 = vpow2.f32 %v1810_v63  ;;  %v1726_v57 = vsub.f32 %v10826_v25, %v1596_v7  ;;  %v11445_v63 = vpop.xlane.xlu1 %1655 }
 0x46a   : > { %v11428_v47 = vpop.eup %9043  ;;  %9055 = vpow2.f32 %v1812_v52 }
 0x46b   : > { %16050 = vst [vmem:[#allocation34_spill] sm:$0xff] %v11428_v47  ;;  %v1957_v20 = vsel %vm1022_vm9, %v11428_v47, 0.0  ;;  %v11437_v45 = vpop.eup %9045  ;;  %9057 = vpow2.f32 %v1808_v40  ;;  %v1820_v52 = vmul.f32 1.442695, %v1726_v57 }
 0x46c   : > { %16051 = vst [vmem:[#allocation35_spill] sm:$0xff] %v11437_v45  ;;  %3173 = vmax.xlane.f32.xlu1 %v3172_v16  ;;  %1958 = vadd.xlane.f32.xlu0 %v1957_v20  ;;  %v1599_v14 = vpop.xlane.xlu0 %1598  ;;  %v11441_v22 = vpop.eup %9047  ;;  %v1945_v5 = vsel %vm1022_vm9, %v11437_v45, 0.0  ;;  %v1816_v16 = vmul.f32 1.442695, %v1724_v60 }
 0x46d   : > { %16053 = vst [vmem:[#allocation36_spill] sm:$0xff] %v11441_v22  ;;  %v1939_v20 = vsel %vm1022_vm9, %v11441_v22, 0.0  ;;  %9059 = vpow2.f32 %v1820_v52  ;;  %v1727_v31 = vsub.f32 %v10835_v46, %v1599_v14  ;;  %v11461_v60 = vpop.xlane.xlu1 %1649 }
 0x46e   : > { %16057 = vst [vmem:[#allocation122_spill] sm:$0xff] %v11461_v60 }
 0x470   : > { %1946 = vadd.xlane.f32.xlu1 %v1945_v5  ;;  %v1593_v25 = vpop.xlane.xlu0 %1592 }
 0x471   : > { %v1725_v7 = vsub.f32 %v10837_v43, %v1593_v25  ;;  %v1822_v25 = vmul.f32 1.442695, %v1727_v31 }
 0x472   : > { %v11448_v34 = vpop.eup %9049 }
 0x473   : > { %16054 = vst [vmem:[#allocation37_spill] sm:$0xff] %v11448_v34  ;;  %v1818_v40 = vmul.f32 1.442695, %v1725_v7  ;;  %v1969_v57 = vsel %vm1022_vm9, %v11448_v34, 0.0  ;;  %v11455_v4 = vpop.eup %9051 }
 0x474   : > { %16055 = vst [vmem:[#allocation120_spill] sm:$0xff] %v11455_v4  ;;  %1940 = vadd.xlane.f32.xlu1 %v1939_v20  ;;  %1970 = vadd.xlane.f32.xlu0 %v1969_v57  ;;  %v11457_v5 = vpop.xlane.xlu0 %1610  ;;  %v1951_v46 = vsel %vm1022_vm9, %v11455_v4, 0.0 }
 0x475   : > { %9061 = vpow2.f32 %v1818_v40  ;;  %v11477_v40 = vpop.xlane.xlu1 %1667 }
 0x476   : > { %v11459_v43 = vpop.eup %9053  ;;  %9063 = vpow2.f32 %v1816_v16 }
 0x477   : > { %16056 = vst [vmem:[#allocation121_spill] sm:$0xff] %v11459_v43  ;;  %v1963_v14 = vsel %vm1022_vm9, %v11459_v43, 0.0  ;;  %v11467_v52 = vpop.eup %9055  ;;  %9065 = vpow2.f32 %v1822_v25 }
 0x478   : > { %16058 = vst [vmem:[#allocation123_spill] sm:$0xff] %v11467_v52  ;;  %1952 = vadd.xlane.f32.xlu1 %v1951_v46  ;;  %1964 = vadd.xlane.f32.xlu0 %v1963_v14  ;;  %v11469_v7 = vpop.xlane.xlu0 %1604  ;;  %v1966_v20 = vsel %vm1022_vm9, %v11467_v52, 0.0  ;;  %v11473_v16 = vpop.eup %9057 }
 0x479   : > { %16059 = vst [vmem:[#allocation124_spill] sm:$0xff] %v11469_v7  ;;  %16060 = vst [vmem:[#allocation125_spill] sm:$0xff] %v11473_v16  ;;  %v1960_v57 = vsel %vm1022_vm9, %v11473_v16, 0.0  ;;  %v11487_v25 = vpop.xlane.xlu1 %1661  ;;  %v16062_v16 = vld [vmem:[#allocation46_spill] sm:$0xff] }
 0x47a   : > { %v11481_v22 = vpop.eup %9059  ;;  %v1742_v18 = vsub.f32 %v16062_v16, %v11421_v32  ;;  %v3145_v32 = vsel %vm1022_vm9, %v11105_v6, -inf }
 0x47b   : > { %v1978_v45 = vsel %vm1022_vm9, %v11481_v22, 0.0 }
 0x47c   : > { %1967 = vadd.xlane.f32.xlu1 %v1966_v20  ;;  %v11475_v31 = vpop.xlane.xlu0 %1622 }
 0x47d   : > { %v11502_v43 = vpop.xlane.xlu1 %1670 }
 0x480   : > { %1961 = vadd.xlane.f32.xlu1 %v1960_v57  ;;  %v11483_v46 = vpop.xlane.xlu0 %1616 }
 0x482   : > { %v11485_v14 = vpop.eup %9061 }
 0x483   : > { %v1975_v20 = vsel %vm1022_vm9, %v11485_v14, 0.0  ;;  %v11493_v4 = vpop.eup %9063 }
 0x484   : > { %1979 = vadd.xlane.f32.xlu1 %v1978_v45  ;;  %1976 = vadd.xlane.f32.xlu0 %v1975_v20  ;;  %v1632_v37 = vpop.xlane.xlu0 %1631  ;;  %v1972_v56 = vsel %vm1022_vm9, %v11493_v4, 0.0  ;;  %v11498_v47 = vpop.eup %9065 }
 0x485   : > { %v1738_v7 = vsub.f32 %v10872_v54, %v1632_v37  ;;  %v1981_v45 = vsel %vm1022_vm9, %v11498_v47, 0.0  ;;  %v11509_v20 = vpop.xlane.xlu1 %1676 }
 0x487   : > { %v1844_v57 = vmul.f32 1.442695, %v1738_v7  ;;  %v1852_v7 = vmul.f32 1.442695, %v1742_v18  ;;  %v16064_v18 = vld [vmem:[#allocation47_spill] sm:$0xff] }
 0x488   : > { %1973 = vadd.xlane.f32.xlu1 %v1972_v56  ;;  %v11500_v60 = vpop.xlane.xlu0 %1625  ;;  %v16063_v56 = vld [vmem:[#allocation66_spill] sm:$0xff] }
 0x489   : > { %16061 = vst [vmem:[#allocation126_spill] sm:$0xff] %v11500_v60  ;;  %9067 = vpow2.f32 %v1844_v57  ;;  %v3100_v60 = vsel %vm1022_vm9, %v16063_v56, -inf  ;;  %v1692_v57 = vpop.xlane.xlu1 %1691 }
 0x48c   : > { %1982 = vadd.xlane.f32.xlu1 %v1981_v45  ;;  %v1635_v37 = vpop.xlane.xlu0 %1634  ;;  %v1741_v45 = vsub.f32 %v16064_v18, %v11432_v13 }
 0x48d   : > { %v1739_v54 = vsub.f32 %v10878_v33, %v1635_v37 }
 0x48e   : > { %v1850_v6 = vmul.f32 1.442695, %v1741_v45 }
 0x48f   : > { %v1846_v34 = vmul.f32 1.442695, %v1739_v54  ;;  %v3148_v54 = vsel %vm1022_vm9, %v11113_v19, -inf }
 0x490   : > { %3101 = vmax.xlane.f32.xlu1 %v3100_v60  ;;  %v11513_v52 = vpop.xlane.xlu0 %1628 }
 0x491   : > { %9069 = vpow2.f32 %v1846_v34 }
 0x492   : > { %9071 = vpow2.f32 %v1852_v7 }
 0x494   : > { %3146 = vmax.xlane.f32.xlu1 %v3145_v32  ;;  %v1638_v16 = vpop.xlane.xlu0 %1637  ;;  %v1695_v32 = vpop.xlane.xlu1 %1694 }
 0x495   : > { %v1740_v33 = vsub.f32 %v10889_v42, %v1638_v16 }
 0x496   : > { %v11522_v60 = vpop.eup %9067 }
 0x497   : > { %v1848_v37 = vmul.f32 1.442695, %v1740_v33  ;;  %16065 = vst [vmem:[#allocation46_spill] sm:$0xff] %v11522_v60  ;;  %v2014_v42 = vsel %vm1022_vm9, %v11522_v60, 0.0 }
 0x498   : > { %3149 = vmax.xlane.f32.xlu1 %v3148_v54  ;;  %v1647_v34 = vpop.xlane.xlu0 %1646  ;;  %v11531_v33 = vpop.xlane.xlu1 %3104 }
 0x499   : > { %9073 = vpow2.f32 %v1848_v37  ;;  %v1743_v7 = vsub.f32 %v10891_v51, %v1647_v34  ;;  %16067 = vst [vmem:[#allocation127_spill] sm:$0xff] %v11531_v33 }
 0x49b   : > { %v1854_v56 = vmul.f32 1.442695, %v1743_v7 }
 0x49c   : > { %2015 = vadd.xlane.f32.xlu1 %v2014_v42  ;;  %v11527_v16 = vpop.xlane.xlu0 %1658 }
 0x49d   : > { %9075 = vpow2.f32 %v1854_v56  ;;  %v11543_v56 = vpop.xlane.xlu1 %3107 }
 0x49e   : > { %v11529_v13 = vpop.eup %9069  ;;  %9077 = vpow2.f32 %v1850_v6  ;;  %16070 = vst [vmem:[#allocation130_spill] sm:$0xff] %v11543_v56  ;;  %v16075_v56 = vld [vmem:[#allocation57_spill] sm:$0xff] }
 0x49f   : > { %16066 = vst [vmem:[#allocation47_spill] sm:$0xff] %v11529_v13  ;;  %v2017_v18 = vsel %vm1022_vm9, %v11529_v13, 0.0  ;;  %v11535_v37 = vpop.eup %9071 }
 0x4a0   : > { %16068 = vst [vmem:[#allocation128_spill] sm:$0xff] %v11535_v37  ;;  %2018 = vadd.xlane.f32.xlu1 %v2017_v18  ;;  %v11537_v51 = vpop.xlane.xlu0 %1652  ;;  %v2026_v45 = vsel %vm1022_vm9, %v11535_v37, 0.0 }
 0x4a1   : > { %16069 = vst [vmem:[#allocation129_spill] sm:$0xff] %v11537_v51  ;;  %v11549_v42 = vpop.xlane.xlu1 %3119  ;;  %v16078_v51 = vld [vmem:[#allocation21_spill] sm:$0xff] }
 0x4a2   : > { %16072 = vst [vmem:[#allocation132_spill] sm:$0xff] %v11549_v42 }
 0x4a4   : > { %2027 = vadd.xlane.f32.xlu1 %v2026_v45  ;;  %v11541_v54 = vpop.xlane.xlu0 %1664 }
 0x4a6   : > { %v11545_v34 = vpop.eup %9073 }
 0x4a7   : > { %16071 = vst [vmem:[#allocation131_spill] sm:$0xff] %v11545_v34  ;;  %v2020_v6 = vsel %vm1022_vm9, %v11545_v34, 0.0  ;;  %v1758_v34 = vsub.f32 %v16075_v56, %v1692_v57  ;;  %v5802_v57 = vsel %vm1022_vm9, %v11259_v41, %v16078_v51 }
 0x4a8   : > { %2021 = vadd.xlane.f32.xlu1 %v2020_v6  ;;  %v1680_v7 = vpop.xlane.xlu0 %1679  ;;  %v11561_v6 = vpop.xlane.xlu1 %3113 }
 0x4a9   : > { %v1754_v18 = vsub.f32 %v10939_v62, %v1680_v7  ;;  %16076 = vst [vmem:[#allocation57_spill] sm:$0xff] %v11561_v6  ;;  %v16077_v62 = vld [vmem:[#allocation18_spill] sm:$0xff] }
 0x4aa   : > { %v11552_v60 = vpop.eup %9075  ;;  %v5798_v7 = vsel %vm1022_vm9, %v11245_v39, %v16077_v62  ;;  %v16079_v39 = vld [vmem:[#allocation58_spill] sm:$0xff] }
 0x4ab   : > { %16073 = vst [vmem:[#allocation133_spill] sm:$0xff] %v11552_v60  ;;  %v1876_v13 = vmul.f32 1.442695, %v1754_v18  ;;  %v2029_v45 = vsel %vm1022_vm9, %v11552_v60, 0.0  ;;  %v11556_v37 = vpop.eup %9077 }
 0x4ac   : > { %16074 = vst [vmem:[#allocation134_spill] sm:$0xff] %v11556_v37  ;;  %2030 = vadd.xlane.f32.xlu1 %v2029_v45  ;;  %v11558_v19 = vpop.xlane.xlu0 %1673  ;;  %v2023_v33 = vsel %vm1022_vm9, %v11556_v37, 0.0  ;;  %v1884_v45 = vmul.f32 1.442695, %v1758_v34  ;;  %v11572_v56 = vpop.xlane.xlu1 %3131 }
 0x4ad   : > { %9079 = vpow2.f32 %v1876_v13 }
 0x4b0   : > { %2024 = vadd.xlane.f32.xlu1 %v2023_v33  ;;  %v1683_v18 = vpop.xlane.xlu0 %1682  ;;  %v1759_v33 = vsub.f32 %v16079_v39, %v1695_v32  ;;  %v16086_v39 = vld [vmem:[#allocation24_spill] sm:$0xff] }
 0x4b1   : > { %v1755_v60 = vsub.f32 %v10955_v58, %v1683_v18  ;;  %5852 = vxpose.xlu0.c.b16.start [1/2] (short) %v5798_v7, 128 }
 0x4b2   : > { %v1886_v34 = vmul.f32 1.442695, %v1759_v33  ;;  %v1700_v33 = vsub.f32 %v16086_v39, %v11293_v10  ;;  %v16091_v39 = vld [vmem:[#allocation59_spill] sm:$0xff] }
 0x4b3   : > { %v1878_v42 = vmul.f32 1.442695, %v1755_v60  ;;  %v11578_v60 = vpop.xlane.xlu1 %3125 }
 0x4b4   : > { %v1686_v13 = vpop.xlane.xlu0 %1685 }
 0x4b5   : > { %9081 = vpow2.f32 %v1878_v42  ;;  %v1756_v37 = vsub.f32 %v10971_v9, %v1686_v13  ;;  %5853 = vxpose.xlu0.c.b16.end [2/2] (short) %v5802_v57, 128 }
 0x4b6   : > { %9083 = vpow2.f32 %v1884_v45  ;;  %v1737_v45 = vsub.f32 %v10880_v36, %v11513_v52  ;;  %v1768_v36 = vmul.f32 1.442695, %v1700_v33  ;;  %v1716_v52 = vsub.f32 %v10804_v50, %v11377_v53  ;;  %v16092_v53 = vld [vmem:[#allocation42_spill] sm:$0xff] }
 0x4b7   : > { %v1880_v62 = vmul.f32 1.442695, %v1756_v37  ;;  %v11583_v42 = vpop.xlane.xlu1 %1898  ;;  %v3127_v50 = vsel %vm1022_vm9, %v11051_v35, -inf }
 0x4b8   : > { %v1689_v6 = vpop.xlane.xlu0 %1688 }
 0x4b9   : > { %9085 = vpow2.f32 %v1880_v62  ;;  %v1757_v41 = vsub.f32 %v10979_v26, %v1689_v6 }
 0x4ba   : > { %v11576_v58 = vpop.eup %9079  ;;  %9087 = vpow2.f32 %v1886_v34  ;;  %v16088_v34 = vld [vmem:[#allocation56_spill] sm:$0xff] }
 0x4bb   : > { %16080 = vst [vmem:[#allocation18_spill] sm:$0xff] %v11576_v58  ;;  %v2062_v51 = vsel %vm1022_vm9, %v11576_v58, 0.0  ;;  %v1882_v9 = vmul.f32 1.442695, %v1757_v41  ;;  %v11591_v18 = vpop.xlane.xlu1 %1892  ;;  %v1753_v41 = vsub.f32 %v16088_v34, %v11509_v20  ;;  %v1800_v20 = vmul.f32 1.442695, %v1716_v52 }
 0x4bc   : > { %2063 = vadd.xlane.f32.xlu1 %v2062_v51  ;;  %16083 = vst [vmem:[#allocation135_spill] sm:$0xff] %v11591_v18  ;;  %v1842_v51 = vmul.f32 1.442695, %v1737_v45  ;;  %v3091_v34 = vsel %vm1022_vm9, %v16091_v39, -inf  ;;  %v3178_v58 = vsel %vm1022_vm9, %v11145_v17, -inf }
 0x4bd   : > { %9089 = vpow2.f32 %v1882_v9 }
 0x4be   : > { %9091 = vpow2.f32 %v1842_v51  ;;  %v3139_v51 = vsel %vm1022_vm9, %v11073_v2, -inf }
 0x4bf   : > { %v11605_v62 = vpop.xlane.xlu1 %3152  ;;  %9093 = vpow2.f32 %v1768_v36 }
 0x4c0   : > { %16087 = vst [vmem:[#allocation24_spill] sm:$0xff] %v11605_v62 }
 0x4c2   : > { %v11585_v7 = vpop.eup %9081 }
 0x4c3   : > { %16081 = vst [vmem:[#allocation21_spill] sm:$0xff] %v11585_v7  ;;  %v2065_v32 = vsel %vm1022_vm9, %v11585_v7, 0.0  ;;  %v11589_v37 = vpop.eup %9083 }
 0x4c4   : > { %16082 = vst [vmem:[#allocation58_spill] sm:$0xff] %v11589_v37  ;;  %2066 = vadd.xlane.f32.xlu1 %v2065_v32  ;;  %v2074_v26 = vsel %vm1022_vm9, %v11589_v37, 0.0 }
 0x4c6   : > { %v11595_v6 = vpop.eup %9085 }
 0x4c7   : > { %16084 = vst [vmem:[#allocation136_spill] sm:$0xff] %v11595_v6  ;;  %v2068_v57 = vsel %vm1022_vm9, %v11595_v6, 0.0  ;;  %v11601_v13 = vpop.eup %9087 }
 0x4c8   : > { %2075 = vadd.xlane.f32.xlu1 %v2074_v26  ;;  %16085 = vst [vmem:[#allocation137_spill] sm:$0xff] %v11601_v13  ;;  %v2077_v9 = vsel %vm1022_vm9, %v11601_v13, 0.0  ;;  %v16118_v13 = vld [vmem:[#allocation44_spill] sm:$0xff] }
 0x4ca   : > { %v11611_v32 = vpop.eup %9089 }
 0x4cb   : > { %16089 = vst [vmem:[#allocation56_spill] sm:$0xff] %v11611_v32  ;;  %v2071_v10 = vsel %vm1022_vm9, %v11611_v32, 0.0 }
 0x4cc   : > { %2069 = vadd.xlane.f32.xlu1 %v2068_v57  ;;  %v1874_v57 = vmul.f32 1.442695, %v1753_v41  ;;  %v1734_v41 = vsub.f32 %v16092_v53, %v11394_v3 }
 0x4ce   : > { %9095 = vpow2.f32 %v1874_v57  ;;  %v3175_v57 = vsel %vm1022_vm9, %v11131_v23, -inf }
 0x4cf   : > { %9097 = vpow2.f32 %v1800_v20  ;;  %v1735_v20 = vsub.f32 %v10866_v55, %v11475_v31  ;;  %v16097_v55 = vld [vmem:[#allocation52_spill] sm:$0xff] }
 0x4d0   : > { %2078 = vadd.xlane.f32.xlu1 %v2077_v9  ;;  %v16093_v9 = vld [vmem:[#allocation22_spill] sm:$0xff]  ;;  %v1750_v31 = vsub.f32 %v16097_v55, %v11477_v40 }
 0x4d1   : > { %v11615_v26 = vpop.xlane.xlu1 %1904  ;;  %v1698_v36 = vsub.f32 %v16093_v9, %v11265_v30 }
 0x4d2   : > { %v1868_v40 = vmul.f32 1.442695, %v1750_v31  ;;  %v16101_v31 = vld [vmem:[#allocation62_spill] sm:$0xff] }
 0x4d3   : > { %v1764_v53 = vmul.f32 1.442695, %v1698_v36 }
 0x4d4   : > { %2072 = vadd.xlane.f32.xlu1 %v2071_v10  ;;  %v1836_v10 = vmul.f32 1.442695, %v1734_v41  ;;  %v1838_v41 = vmul.f32 1.442695, %v1735_v20  ;;  %v16099_v20 = vld [vmem:[#allocation54_spill] sm:$0xff] }
 0x4d5   : > { %v11619_v45 = vpop.xlane.xlu1 %3155  ;;  %v1751_v55 = vsub.f32 %v16099_v20, %v11502_v43  ;;  %v16102_v43 = vld [vmem:[#allocation23_spill] sm:$0xff] }
 0x4d6   : > { %16090 = vst [vmem:[#allocation138_spill] sm:$0xff] %v11619_v45  ;;  %9099 = vpow2.f32 %v1836_v10 }
 0x4d7   : > { %9101 = vpow2.f32 %v1764_v53 }
 0x4d8   : > { %3092 = vmax.xlane.f32.xlu1 %v3091_v34  ;;  %v16094_v34 = vld [vmem:[#allocation77_spill] sm:$0xff]  ;;  %9103 = vpow2.f32 %v1838_v41  ;;  %v1696_v41 = vsub.f32 %v16102_v43, %v11275_v24  ;;  %v3169_v43 = vsel %vm1022_vm9, %v11139_v8, -inf }
 0x4d9   : > { %v11623_v33 = vpop.xlane.xlu1 %1919  ;;  %v3142_v3 = vsel %vm1022_vm9, %v16094_v34, -inf }
 0x4da   : > { %3128 = vmax.xlane.f32.xlu0 %v3127_v50  ;;  %v11641_v50 = vpop.eup %9091  ;;  %v1760_v32 = vmul.f32 1.442695, %v1696_v41 }
 0x4db   : > { %16095 = vst [vmem:[#allocation42_spill] sm:$0xff] %v11641_v50 }
 0x4dc   : > { %3140 = vmax.xlane.f32.xlu1 %v3139_v51  ;;  %v16096_v51 = vld [vmem:[#allocation31_spill] sm:$0xff] }
 0x4dd   : > { %v11633_v52 = vpop.xlane.xlu1 %1913  ;;  %v1714_v30 = vsub.f32 %v16096_v51, %v11346_v59  ;;  %v11657_v51 = vpop.xlane.xlu0 %1907 }
 0x4de   : > { %3176 = vmax.xlane.f32.xlu0 %v3175_v57  ;;  %v11649_v57 = vpop.eup %9093 }
 0x4df   : > { %v11655_v36 = vpop.eup %9095  ;;  %v1796_v59 = vmul.f32 1.442695, %v1714_v30 }
 0x4e0   : > { %3143 = vmax.xlane.f32.xlu1 %v3142_v3  ;;  %v2011_v3 = vsel %vm1022_vm9, %v11641_v50, 0.0  ;;  %16098 = vst [vmem:[#allocation22_spill] sm:$0xff] %v11655_v36  ;;  %v11663_v10 = vpop.eup %9097  ;;  %v1870_v50 = vmul.f32 1.442695, %v1751_v55 }
 0x4e1   : > { %v11645_v9 = vpop.xlane.xlu1 %3167  ;;  %9105 = vpow2.f32 %v1796_v59  ;;  %v1948_v30 = vsel %vm1022_vm9, %v11663_v10, 0.0  ;;  %v11673_v6 = vpop.xlane.xlu0 %1910  ;;  %v16103_v59 = vld [vmem:[#allocation71_spill] sm:$0xff] }
 0x4e2   : > { %3179 = vmax.xlane.f32.xlu0 %v3178_v58  ;;  %v1900_v58 = vsel %vm1022_vm9, %v11649_v57, 0.0  ;;  %9107 = vpow2.f32 %v1868_v40  ;;  %v16104_v40 = vld [vmem:[#allocation79_spill] sm:$0xff] }
 0x4e3   : > { %9109 = vpow2.f32 %v1870_v50  ;;  %v3136_v55 = vsel %vm1022_vm9, %v16104_v40, -inf  ;;  %v11701_v40 = vpop.f32.mrf.mxu1 }
 0x4e4   : > { %2012 = vadd.xlane.f32.xlu1 %v2011_v3  ;;  %v2059_v3 = vsel %vm1022_vm9, %v11655_v36, 0.0  ;;  %16109 = vst [vmem:[#allocation71_spill] sm:$0xff] %v11701_v40  ;;  %9111 = vpow2.f32 %v1760_v32  ;;  %v16113_v40 = vld [vmem:[#allocation43_spill] sm:$0xff] }
 0x4e5   : > { %v11659_v7 = vpop.xlane.xlu1 %1931  ;;  %v11683_v36 = vpop.xlane.xlu0 %1922 }
 0x4e6   : > { %1901 = vadd.xlane.f32.xlu0 %v1900_v58  ;;  %v3088_v58 = vsel %vm1022_vm9, %v16101_v31, -inf  ;;  %v11715_v39 = vpop.f32.mrf.mxu1 }
 0x4e7   : > { %16112 = vst [vmem:[#allocation140_spill] sm:$0xff] %v11715_v39  ;;  %v16117_v39 = vld [vmem:[#allocation67_spill] sm:$0xff] }
 0x4e8   : > { %2060 = vadd.xlane.f32.xlu1 %v2059_v3  ;;  %v3121_v3 = vsel %vm1022_vm9, %v16103_v59, -inf  ;;  %v11729_v37 = vpop.f32.mrf.mxu1  ;;  %v3115_v62 = vsel %vm1022_vm9, %v16117_v39, -inf }
 0x4e9   : > { %v11669_v53 = vpop.xlane.xlu1 %3161  ;;  %16115 = vst [vmem:[#allocation141_spill] sm:$0xff] %v11729_v37 }
 0x4ea   : > { %16100 = vst [vmem:[#allocation31_spill] sm:$0xff] %v11669_v53  ;;  %1949 = vadd.xlane.f32.xlu0 %v1948_v30  ;;  %v11687_v30 = vpop.eup %9099  ;;  %v16120_v53 = vld [vmem:[#allocation84_spill] sm:$0xff] }
 0x4eb   : > { %16105 = vst [vmem:[#allocation52_spill] sm:$0xff] %v11687_v30  ;;  %v11695_v34 = vpop.eup %9101  ;;  %v2002_v50 = vsel %vm1022_vm9, %v11687_v30, 0.0 }
 0x4ec   : > { %3089 = vmax.xlane.f32.xlu1 %v3088_v58  ;;  %v16106_v58 = vld [vmem:[#allocation32_spill] sm:$0xff]  ;;  %16107 = vst [vmem:[#allocation54_spill] sm:$0xff] %v11695_v34 }
 0x4ed   : > { %v11679_v20 = vpop.xlane.xlu1 %1925  ;;  %v1712_v31 = vsub.f32 %v16106_v58, %v11360_v27  ;;  %v1894_v58 = vsel %vm1022_vm9, %v11695_v34, 0.0 }
 0x4ee   : > { %3122 = vmax.xlane.f32.xlu0 %v3121_v3  ;;  %v11699_v3 = vpop.eup %9103 }
 0x4ef   : > { %16108 = vst [vmem:[#allocation23_spill] sm:$0xff] %v11699_v3  ;;  %v1792_v41 = vmul.f32 1.442695, %v1712_v31  ;;  %v11709_v2 = vpop.eup %9105 }
 0x4f0   : > { %3137 = vmax.xlane.f32.xlu1 %v3136_v55  ;;  %v11703_v55 = vpop.xlane.xlu0 %1916  ;;  %16110 = vst [vmem:[#allocation32_spill] sm:$0xff] %v11709_v2  ;;  %v11713_v30 = vpop.eup %9107 }
 0x4f1   : > { %v11691_v24 = vpop.xlane.xlu1 %1934  ;;  %16111 = vst [vmem:[#allocation139_spill] sm:$0xff] %v11713_v30  ;;  %9113 = vpow2.f32 %v1792_v41  ;;  %v11727_v45 = vpop.eup %9109 }
 0x4f2   : > { %3170 = vmax.xlane.f32.xlu0 %v3169_v43  ;;  %v2005_v43 = vsel %vm1022_vm9, %v11699_v3, 0.0  ;;  %v2050_v3 = vsel %vm1022_vm9, %v11713_v30, 0.0  ;;  %16114 = vst [vmem:[#allocation43_spill] sm:$0xff] %v11727_v45  ;;  %v11741_v30 = vpop.f32.mrf.mxu1 }
 0x4f3   : > { %16119 = vst [vmem:[#allocation67_spill] sm:$0xff] %v11741_v30 }
 0x4f4   : > { %2003 = vadd.xlane.f32.xlu1 %v2002_v50  ;;  %v11717_v32 = vpop.xlane.xlu0 %1928  ;;  %v1942_v50 = vsel %vm1022_vm9, %v11709_v2, 0.0  ;;  %v3163_v2 = vsel %vm1022_vm9, %v16120_v53, -inf }
 0x4f5   : > { %v11705_v27 = vpop.xlane.xlu1 %3173 }
 0x4f6   : > { %1895 = vadd.xlane.f32.xlu0 %v1894_v58  ;;  %v1732_v58 = vsub.f32 %v16113_v40, %v11406_v28  ;;  %v1733_v28 = vsub.f32 %v16118_v13, %v11483_v46  ;;  %v2053_v40 = vsel %vm1022_vm9, %v11727_v45, 0.0  ;;  %v11755_v45 = vpop.f32.mrf.mxu1 }
 0x4f7   : > { %16122 = vst [vmem:[#allocation44_spill] sm:$0xff] %v11755_v45 }
 0x4f8   : > { %2006 = vadd.xlane.f32.xlu1 %v2005_v43  ;;  %v11731_v41 = vpop.xlane.xlu0 %1955  ;;  %v1834_v13 = vmul.f32 1.442695, %v1733_v28  ;;  %v11767_v28 = vpop.f32.mrf.mxu1 }
 0x4f9   : > { %v11719_v31 = vpop.xlane.xlu1 %1946  ;;  %16123 = vst [vmem:[#allocation84_spill] sm:$0xff] %v11767_v28  ;;  %v16128_v28 = vld [vmem:[#allocation85_spill] sm:$0xff] }
 0x4fa   : > { %1943 = vadd.xlane.f32.xlu0 %v1942_v50  ;;  %v1832_v50 = vmul.f32 1.442695, %v1732_v58  ;;  %v3223_v58 = vsel %vm1022_vm9, %v11204_v15, -inf }
 0x4fc   : > { %2051 = vadd.xlane.f32.xlu1 %v2050_v3  ;;  %v11743_v37 = vpop.xlane.xlu0 %1958  ;;  %9115 = vpow2.f32 %v1832_v50  ;;  %v3226_v50 = vsel %vm1022_vm9, %v11215_v1, -inf }
 0x4fd   : > { %v11733_v43 = vpop.xlane.xlu1 %1940  ;;  %9117 = vpow2.f32 %v1834_v13 }
 0x4fe   : > { %16116 = vst [vmem:[#allocation142_spill] sm:$0xff] %v11733_v43  ;;  %3116 = vmax.xlane.f32.xlu0 %v3115_v62  ;;  %v11749_v43 = vpop.eup %9111  ;;  %v16121_v62 = vld [vmem:[#allocation53_spill] sm:$0xff] }
 0x4ff   : > { %v1748_v46 = vsub.f32 %v16121_v62, %v11487_v25  ;;  %v1888_v34 = vsel %vm1022_vm9, %v11749_v43, 0.0  ;;  %v11761_v18 = vpop.eup %9113 }
 0x500   : > { %2054 = vadd.xlane.f32.xlu1 %v2053_v40  ;;  %v11757_v40 = vpop.xlane.xlu0 %1970 }
 0x501   : > { %v11745_v3 = vpop.xlane.xlu1 %1952  ;;  %v1864_v25 = vmul.f32 1.442695, %v1748_v46  ;;  %v16125_v46 = vld [vmem:[#allocation68_spill] sm:$0xff] }
 0x502   : > { %3164 = vmax.xlane.f32.xlu0 %v3163_v2  ;;  %v1749_v2 = vsub.f32 %v10935_v29, %v11541_v54  ;;  %v3271_v29 = vsel %vm1022_vm9, %v11310_v12, -inf  ;;  %v11777_v54 = vpop.f32.mrf.mxu1  ;;  %v3109_v13 = vsel %vm1022_vm9, %v16125_v46, -inf  ;;  %v16131_v12 = vld [vmem:[#allocation64_spill] sm:$0xff] }
 0x503   : > { %9119 = vpow2.f32 %v1864_v25  ;;  %16124 = vst [vmem:[#allocation53_spill] sm:$0xff] %v11777_v54  ;;  %v3157_v54 = vsel %vm1022_vm9, %v16128_v28, -inf }
 0x504   : > { %3224 = vmax.xlane.f32.xlu1 %v3223_v58  ;;  %v1936_v58 = vsel %vm1022_vm9, %v11761_v18, 0.0  ;;  %v1866_v45 = vmul.f32 1.442695, %v1749_v2  ;;  %v11773_v15 = vpop.xlane.xlu0 %1964  ;;  %v3274_v2 = vsel %vm1022_vm9, %v11330_v11, -inf }
 0x505   : > { %v1968_v30 = vpop.xlane.xlu1 %1967 }
 0x506   : > { %1889 = vadd.xlane.f32.xlu0 %v1888_v34  ;;  %9121 = vpow2.f32 %v1866_v45 }
 0x507   : > { %9123 = vrcp.f32 %v11691_v24 }
 0x508   : > { %3227 = vmax.xlane.f32.xlu1 %v3226_v50  ;;  %9125 = vrcp.f32 %v11659_v7 }
 0x509   : > { %v11769_v62 = vpop.xlane.xlu1 %1961  ;;  %v11784_v25 = vpop.eup %9115 }
 0x50a   : > { %1937 = vadd.xlane.f32.xlu0 %v1936_v58  ;;  %16126 = vst [vmem:[#allocation68_spill] sm:$0xff] %v11784_v25  ;;  %v11786_v58 = vpop.f32.mrf.mxu1  ;;  %v1996_v45 = vsel %vm1022_vm9, %v11784_v25, 0.0 }
 0x50b   : > { %16127 = vst [vmem:[#allocation143_spill] sm:$0xff] %v11786_v58 }
 0x50c   : > { %3272 = vmax.xlane.f32.xlu1 %v3271_v29  ;;  %v11798_v7 = vpop.f32.mrf.mxu1 }
 0x50d   : > { %v1980_v34 = vpop.xlane.xlu1 %1979  ;;  %v1977_v50 = vpop.xlane.xlu0 %1976 }
 0x50e   : > { %3110 = vmax.xlane.f32.xlu0 %v3109_v13  ;;  %9127 = vrcp.f32 %v1980_v34  ;;  %v11793_v13 = vpop.eup %9117 }
 0x50f   : > { %16129 = vst [vmem:[#allocation85_spill] sm:$0xff] %v11793_v13  ;;  %v1999_v34 = vsel %vm1022_vm9, %v11793_v13, 0.0 }
 0x510   : > { %3275 = vmax.xlane.f32.xlu1 %v3274_v2  ;;  %v16130_v2 = vld [vmem:[#allocation38_spill] sm:$0xff] }
 0x511   : > { %v1974_v29 = vpop.xlane.xlu1 %1973  ;;  %v1730_v58 = vsub.f32 %v16130_v2, %v11366_v38 }
 0x512   : > { %3158 = vmax.xlane.f32.xlu0 %v3157_v54  ;;  %9129 = vrcp.f32 %v1974_v29  ;;  %v3097_v54 = vsel %vm1022_vm9, %v16131_v12, -inf  ;;  %v11804_v29 = vpop.eup %9119 }
 0x513   : > { %v5860_v24 = vpop.trf.xlu0  ;;  %9131 = vrcp.f32 %v1977_v50  ;;  %16132 = vst [vmem:[#allocation38_spill] sm:$0xff] %v11804_v29  ;;  %v1828_v38 = vmul.f32 1.442695, %v1730_v58 }
 0x514   : > { %1997 = vadd.xlane.f32.xlu1 %v1996_v45  ;;  %8844 = vmatprep.mubr.msk.bf16.mxu1 %vm858_vm0, %v5860_v24  ;;  %v11808_v45 = vpop.f32.mrf.mxu1  ;;  %v16135_v24 = vld [vmem:[#allocation40_spill] sm:$0xff] }
 0x515   : > { %v1983_v11 = vpop.xlane.xlu1 %1982  ;;  %16133 = vst [vmem:[#allocation64_spill] sm:$0xff] %v11808_v45  ;;  %v1731_v2 = vsub.f32 %v16135_v24, %v11457_v5 }
 0x516   : > { %9133 = vrcp.f32 %v1983_v11  ;;  %3098 = vmax.xlane.f32.xlu0 %v3097_v54  ;;  %v11813_v11 = vpop.eup %9121  ;;  %v2044_v54 = vsel %vm1022_vm9, %v11804_v29, 0.0 }
 0x517   : > { %v5861_v25 = vpop.trf.xlu0  ;;  %9135 = vrcp.f32 %v11679_v20  ;;  %16134 = vst [vmem:[#allocation144_spill] sm:$0xff] %v11813_v11  ;;  %v9124_v20 = vpop.eup %9123  ;;  %v1830_v24 = vmul.f32 1.442695, %v1731_v2  ;;  %v2047_v29 = vsel %vm1022_vm9, %v11813_v11, 0.0 }
 0x518   : > { %2000 = vadd.xlane.f32.xlu1 %v1999_v34  ;;  %8845 = vmatmul.mubr.msk.bf16.gmra.mxu1 %vm858_vm0, %v5861_v25  ;;  %9137 = vrcp.f32 %v11717_v32  ;;  %v11820_v25 = vpop.f32.mrf.mxu1  ;;  %v9126_v32 = vpop.eup %9125  ;;  %v16137_v34 = vld [vmem:[#allocation48_spill] sm:$0xff] }
 0x519   : > { %v11810_v50 = vpop.xlane.xlu1 %3101  ;;  %9139 = vrcp.f32 %v1968_v30  ;;  %16136 = vst [vmem:[#allocation40_spill] sm:$0xff] %v11820_v25  ;;  %v1746_v5 = vsub.f32 %v16137_v34, %v11445_v63  ;;  %v2159_v30 = vmul.f32 %v9124_v20, %v11414_v21  ;;  %v2158_v63 = vmul.f32 %v9126_v32, %v11389_v49  ;;  %v16139_v34 = vld [vmem:[#allocation103_spill] sm:$0xff] }
 0x51a   : > { %9141 = vpow2.f32 %v1828_v38  ;;  %v11832_v38 = vpop.f32.mrf.mxu1  ;;  %v3220_v21 = vsel %vm1022_vm9, %v16139_v34, -inf }
 0x51b   : > { %v5862_v13 = vpop.trf.xlu0  ;;  %9143 = vrcp.f32 %v11757_v40  ;;  %v9128_v45 = vpop.eup %9127  ;;  %16138 = vst [vmem:[#allocation48_spill] sm:$0xff] %v11832_v38  ;;  %v1860_v11 = vmul.f32 1.442695, %v1746_v5 }
 0x51c   : > { %2045 = vadd.xlane.f32.xlu1 %v2044_v54  ;;  %8848 = vmatprep.mubr.msk.bf16.mxu1 %vm858_vm0, %v5862_v13  ;;  %9145 = vrcp.f32 %v11623_v33  ;;  %v16140_v33 = vld [vmem:[#allocation50_spill] sm:$0xff]  ;;  %v2174_v38 = vmul.f32 %v9128_v45, %v11481_v22  ;;  %v11847_v34 = vpop.f32.mrf.mxu1 }
 0x51d   : > { %v11822_v58 = vpop.xlane.xlu1 %3146  ;;  %9147 = vrcp.f32 %v11683_v36 }
 0x51e   : > { %9149 = vpow2.f32 %v1830_v24 }
 0x51f   : > { %v5863_v54 = vpop.trf.xlu0  ;;  %v9130_v13 = vpop.eup %9129  ;;  %9151 = vrcp.f32 %v11769_v62 }
 0x520   : > { %2048 = vadd.xlane.f32.xlu1 %v2047_v29  ;;  %8849 = vmatmul.mubr.msk.bf16.gmra.mxu1 %vm858_vm0, %v5863_v54  ;;  %v9132_v2 = vpop.eup %9131  ;;  %v1747_v29 = vsub.f32 %v16140_v33, %v11527_v16  ;;  %v2215_v54 = vpack.c.bf16 %v2159_v30, %v2158_v63  ;;  %v2172_v36 = vmul.f32 %v9130_v13, %v11493_v4  ;;  %9153 = vrcp.f32 %v11773_v15 }
 0x521   : > { %v11834_v40 = vpop.xlane.xlu1 %3149  ;;  %v2173_v16 = vmul.f32 %v9132_v2, %v11485_v14  ;;  %9155 = vpow2.f32 %v1860_v11  ;;  %v765_v11 = vld [vmem:[%s15463_s4 + $0x48] sm:$0xff] }
 0x522   : > { %v1862_v62 = vmul.f32 1.442695, %v1747_v29  ;;  %9157 = vrcp.f32 %v11633_v52  ;;  %v2268_v4 = vsel %vm1022_vm9, %v2215_v54, 0 }
 0x523   : > { %v9134_v20 = vpop.eup %9133  ;;  %v5864_v25 = vpop.trf.xlu0  ;;  %v2222_v15 = vpack.c.bf16 %v2173_v16, %v2172_v36  ;;  %9159 = vrcp.f32 %v11703_v55  ;;  %v16148_v16 = vld [vmem:[#allocation28_spill] sm:$0xff] }
 0x524   : > { %3221 = vmax.xlane.f32.xlu1 %v3220_v21  ;;  %v2175_v49 = vmul.f32 %v9134_v20, %v11498_v47  ;;  %8852 = vmatprep.mubr.msk.bf16.mxu1 %vm858_vm0, %v5864_v25  ;;  %v9136_v32 = vpop.eup %9135  ;;  %v3265_v47 = vsel %vm1022_vm9, %v11318_v44, -inf  ;;  %v11859_v25 = vpop.f32.mrf.mxu1  ;;  %9161 = vpow2.f32 %v1862_v62  ;;  %v16143_v21 = vld [vmem:[#allocation123_spill] sm:$0xff] }
 0x525   : > { %v9138_v24 = vpop.eup %9137  ;;  %v11851_v30 = vpop.xlane.xlu1 %2015  ;;  %v2156_v45 = vmul.f32 %v9136_v32, %v11398_v0  ;;  %v3268_v0 = vsel %vm1022_vm9, %v11338_v61, -inf  ;;  %9163 = vrcp.f32 %v11743_v37 }
 0x526   : > { %v2223_v5 = vpack.c.bf16 %v2175_v49, %v2174_v38  ;;  %16141 = vst [vmem:[#allocation50_spill] sm:$0xff] %v11851_v30  ;;  %v9140_v14 = vpop.eup %9139  ;;  %v2157_v52 = vmul.f32 %v9138_v24, %v11381_v48  ;;  %v11874_v29 = vpop.f32.mrf.mxu1  ;;  %9165 = vrcp.f32 %v11731_v41  ;;  %v16146_v48 = vld [vmem:[#allocation37_spill] sm:$0xff] }
 0x527   : > { %v5865_v22 = vpop.trf.xlu0  ;;  %v11865_v13 = vpop.eup %9141  ;;  %v2170_v20 = vmul.f32 %v9140_v14, %v16143_v21  ;;  %16144 = vst [vmem:[#allocation123_spill] sm:$0xff] %v11874_v29  ;;  %9167 = vrcp.f32 %v11673_v6  ;;  %v16150_v41 = vld [vmem:[#allocation117_spill] sm:$0xff]  ;;  %v16156_v21 = vld [vmem:[#allocation126_spill] sm:$0xff] }
 0x528   : > { %8876 = vmatprep.subr.msk.bf16.mxu0 %vm1022_vm9, %v2223_v5  ;;  %3266 = vmax.xlane.f32.xlu1 %v3265_v47  ;;  %16142 = vst [vmem:[#allocation145_spill] sm:$0xff] %v11865_v13  ;;  %v9144_v38 = vpop.eup %9143  ;;  %v2214_v2 = vpack.c.bf16 %v2157_v52, %v2156_v45  ;;  %v1990_v37 = vsel %vm1022_vm9, %v11865_v13, 0.0  ;;  %9169 = vrcp.f32 %v11657_v51  ;;  %v16152_v45 = vld [vmem:[#allocation39_spill] sm:$0xff] }
 0x529   : > { %8327 = vmatpush3.bf16.xpose.msra.mxu0 %v2268_v4  ;;  %8853 = vmatmul.mubr.msk.bf16.gmra.mxu1 %vm858_vm0, %v5865_v22  ;;  %v9146_v33 = vpop.eup %9145  ;;  %v11876_v55 = vpop.xlane.xlu1 %2018  ;;  %v2171_v54 = vmul.f32 %v9144_v38, %v16146_v48  ;;  %v16158_v48 = vld [vmem:[#allocation121_spill] sm:$0xff] }
 0x52a   : > { %8877 = vmatprep.subr.msk.bf16.mxu0 %vm1022_vm9, %v2222_v15  ;;  %16145 = vst [vmem:[#allocation146_spill] sm:$0xff] %v11876_v55  ;;  %v9148_v49 = vpop.eup %9147  ;;  %v2265_v32 = vsel %vm1022_vm9, %v2214_v2, 0  ;;  %v2154_v24 = vmul.f32 %v9146_v33, %v16148_v16  ;;  %v11888_v22 = vpop.f32.mrf.mxu1  ;;  %v16151_v15 = vld [vmem:[#allocation119_spill] sm:$0xff] }
 0x52b   : > { %v5866_v63 = vpop.trf.xlu0  ;;  %v11883_v36 = vpop.eup %9149  ;;  %v2221_v5 = vpack.c.bf16 %v2171_v54, %v2170_v20  ;;  %16149 = vst [vmem:[#allocation28_spill] sm:$0xff] %v11888_v22  ;;  %v2155_v4 = vmul.f32 %v9148_v49, %v16150_v41  ;;  %v1728_v14 = vsub.f32 %v16152_v45, %v16151_v15  ;;  %v16157_v20 = vld [vmem:[#allocation45_spill] sm:$0xff] }
 0x52c   : > { %815 = vperm.xlu0 %8975, %v765_v11   ;;  %3269 = vmax.xlane.f32.xlu1 %v3268_v0  ;;  %16147 = vst [vmem:[#allocation37_spill] sm:$0xff] %v11883_v36  ;;  %v9152_v47 = vpop.eup %9151  ;;  %v1993_v52 = vsel %vm1022_vm9, %v11883_v36, 0.0  ;;  %v1736_v33 = vsub.f32 %v16157_v20, %v16156_v21  ;;  %v16165_v21 = vld [vmem:[#allocation118_spill] sm:$0xff] }
 0x52d   : > { %8856 = vmatprep.mubr.msk.bf16.mxu1 %vm858_vm0, %v5866_v63  ;;  %v9154_v6 = vpop.eup %9153  ;;  %v11896_v11 = vpop.xlane.xlu1 %2027  ;;  %v2213_v0 = vpack.c.bf16 %v2155_v4, %v2154_v24  ;;  %v16155_v63 = vld [vmem:[#allocation125_spill] sm:$0xff]  ;;  %v16162_v4 = vld [vmem:[#allocation30_spill] sm:$0xff] }
 0x52e   : > { %16153 = vst [vmem:[#allocation117_spill] sm:$0xff] %v11896_v11  ;;  %v11900_v38 = vpop.eup %9155  ;;  %v2168_v2 = vmul.f32 %v9152_v47, %v16155_v63  ;;  %v2169_v54 = vmul.f32 %v9154_v6, %v16158_v48  ;;  %v1840_v6 = vmul.f32 1.442695, %v1736_v33  ;;  %v16193_v36 = vld [vmem:[#allocation102_spill] sm:$0xff]  ;;  %v16252_v11 = vld [vmem:[#allocation89_spill] sm:$0xff] }
 0x52f   : > { %v5867_v62 = vpop.trf.xlu0  ;;  %16154 = vst [vmem:[#allocation119_spill] sm:$0xff] %v11900_v38  ;;  %v9158_v51 = vpop.eup %9157  ;;  %v2262_v24 = vsel %vm1022_vm9, %v2213_v0, 0 }
 0x530   : > { %1991 = vadd.xlane.f32.xlu1 %v1990_v37  ;;  %v9160_v49 = vpop.eup %9159  ;;  %v1824_v37 = vmul.f32 1.442695, %v1728_v14  ;;  %v2220_v47 = vpack.c.bf16 %v2169_v54, %v2168_v2  ;;  %v2152_v15 = vmul.f32 %v9158_v51, %v16162_v4  ;;  %v16164_v14 = vld [vmem:[#allocation55_spill] sm:$0xff]  ;;  %v16166_v51 = vld [vmem:[#allocation34_spill] sm:$0xff] }
 0x531   : > { %8329 = vmatpush3.bf16.xpose.msra.mxu0 %v2265_v32  ;;  %8857 = vmatmul.mubr.msk.bf16.gmra.mxu1 %vm858_vm0, %v5867_v62  ;;  %v16159_v32 = vld [vmem:[#allocation122_spill] sm:$0xff]  ;;  %v2038_v62 = vsel %vm1022_vm9, %v11900_v38, 0.0  ;;  %v11910_v41 = vpop.eup %9161  ;;  %v1752_v63 = vsub.f32 %v16164_v14, %v11558_v19  ;;  %v2153_v20 = vmul.f32 %v9160_v49, %v16165_v21  ;;  %v16169_v49 = vld [vmem:[#allocation97_spill] sm:$0xff]  ;;  %v3217_v38 = vsel %vm1022_vm9, %v16193_v36, -inf }
 0x532   : > { %8878 = vmatprep.subr.msk.bf16.mxu0 %vm1022_vm9, %v2221_v5  ;;  %v16160_v5 = vld [vmem:[#allocation49_spill] sm:$0xff]  ;;  %16161 = vst [vmem:[#allocation39_spill] sm:$0xff] %v11910_v41  ;;  %v9164_v45 = vpop.eup %9163  ;;  %9171 = vpow2.f32 %v1824_v37  ;;  %v2041_v0 = vsel %vm1022_vm9, %v11910_v41, 0.0  ;;  %v3211_v37 = vsel %vm1022_vm9, %v16169_v49, -inf  ;;  %v16170_v14 = vld [vmem:[#allocation114_spill] sm:$0xff] }
 0x533   : > { %v1744_v16 = vsub.f32 %v16160_v5, %v16159_v32  ;;  %v9166_v48 = vpop.eup %9165  ;;  %v2212_v2 = vpack.c.bf16 %v2153_v20, %v2152_v15  ;;  %v2167_v54 = vmul.f32 %v9164_v45, %v16166_v51  ;;  %9173 = vpow2.f32 %v1840_v6  ;;  %v16171_v45 = vld [vmem:[#allocation27_spill] sm:$0xff] }
 0x534   : > { %1994 = vadd.xlane.f32.xlu1 %v1993_v52  ;;  %v11914_v52 = vpop.xlane.xlu1 %2021  ;;  %v9168_v5 = vpop.eup %9167  ;;  %v1872_v33 = vmul.f32 1.442695, %v1752_v63  ;;  %v16172_v63 = vld [vmem:[#allocation99_spill] sm:$0xff] }
 0x535   : > { %16163 = vst [vmem:[#allocation125_spill] sm:$0xff] %v11914_v52  ;;  %v1856_v32 = vmul.f32 1.442695, %v1744_v16  ;;  %v9170_v19 = vpop.eup %9169  ;;  %v2259_v16 = vsel %vm1022_vm9, %v2212_v2, 0  ;;  %v2151_v15 = vmul.f32 %v9168_v5, %v16170_v14  ;;  %v3214_v21 = vsel %vm1022_vm9, %v16172_v63, -inf  ;;  %v16177_v5 = vld [vmem:[#allocation61_spill] sm:$0xff] }
 0x536   : > { %v2150_v6 = vmul.f32 %v9170_v19, %v16171_v45 }
 0x537   : > { %9175 = vpow2.f32 %v1856_v32  ;;  %v16174_v32 = vld [vmem:[#allocation29_spill] sm:$0xff] }
 0x538   : > { %2039 = vadd.xlane.f32.xlu1 %v2038_v62  ;;  %v16167_v62 = vld [vmem:[#allocation33_spill] sm:$0xff]  ;;  %9177 = vpow2.f32 %v1872_v33  ;;  %v2211_v20 = vpack.c.bf16 %v2151_v15, %v2150_v6  ;;  %v3094_v33 = vsel %vm1022_vm9, %v16177_v5, -inf }
 0x539   : > { %8331 = vmatpush3.bf16.xpose.msra.mxu0 %v2262_v24  ;;  %v2166_v24 = vmul.f32 %v9166_v48, %v16167_v62 }
 0x53a   : > { %8879 = vmatprep.subr.msk.bf16.mxu0 %vm1022_vm9, %v2220_v47  ;;  %v11924_v47 = vpop.xlane.xlu1 %2030  ;;  %v2256_v51 = vsel %vm1022_vm9, %v2211_v20, 0 }
 0x53b   : > { %16168 = vst [vmem:[#allocation126_spill] sm:$0xff] %v11924_v47  ;;  %v2219_v4 = vpack.c.bf16 %v2167_v54, %v2166_v24  ;;  %v16253_v47 = vld [vmem:[#allocation78_spill] sm:$0xff] }
 0x53c   : > { %2042 = vadd.xlane.f32.xlu1 %v2041_v0  ;;  %v3259_v0 = vsel %vm1022_vm9, %v16174_v32, -inf }
 0x53e   : > { %v11934_v48 = vpop.xlane.xlu1 %2024 }
 0x53f   : > { %16173 = vst [vmem:[#allocation45_spill] sm:$0xff] %v11934_v48  ;;  %v11938_v2 = vpop.eup %9171  ;;  %v16213_v48 = vld [vmem:[#allocation108_spill] sm:$0xff] }
 0x540   : > { %3212 = vmax.xlane.f32.xlu1 %v3211_v37  ;;  %16175 = vst [vmem:[#allocation121_spill] sm:$0xff] %v11938_v2  ;;  %v11945_v62 = vpop.eup %9173  ;;  %v1984_v24 = vsel %vm1022_vm9, %v11938_v2, 0.0 }
 0x541   : > { %8333 = vmatpush3.bf16.xpose.msra.mxu0 %v2259_v16  ;;  %16178 = vst [vmem:[#allocation49_spill] sm:$0xff] %v11945_v62  ;;  %v16181_v16 = vld [vmem:[#allocation124_spill] sm:$0xff]  ;;  %v2008_v15 = vsel %vm1022_vm9, %v11945_v62, 0.0 }
 0x542   : > { %8880 = vmatprep.subr.msk.bf16.mxu0 %vm1022_vm9, %v2219_v4  ;;  %v16182_v4 = vld [vmem:[#allocation41_spill] sm:$0xff] }
 0x543   : > { %v1729_v14 = vsub.f32 %v16182_v4, %v16181_v16  ;;  %v16186_v16 = vld [vmem:[#allocation98_spill] sm:$0xff] }
 0x544   : > { %3215 = vmax.xlane.f32.xlu1 %v3214_v21  ;;  %v11949_v19 = vpop.eup %9175  ;;  %v3205_v4 = vsel %vm1022_vm9, %v16186_v16, -inf }
 0x545   : > { %v11941_v54 = vpop.xlane.xlu1 %2063  ;;  %16179 = vst [vmem:[#allocation30_spill] sm:$0xff] %v11949_v19  ;;  %v11957_v45 = vpop.eup %9177  ;;  %v2032_v6 = vsel %vm1022_vm9, %v11949_v19, 0.0  ;;  %v1826_v20 = vmul.f32 1.442695, %v1729_v14  ;;  %v16188_v19 = vld [vmem:[#allocation60_spill] sm:$0xff]  ;;  %v16189_v14 = vld [vmem:[#allocation25_spill] sm:$0xff] }
 0x546   : > { %16176 = vst [vmem:[#allocation122_spill] sm:$0xff] %v11941_v54  ;;  %16183 = vst [vmem:[#allocation118_spill] sm:$0xff] %v11957_v45  ;;  %v3253_v13 = vsel %vm1022_vm9, %v16189_v14, -inf }
 0x547   : > { %9179 = vpow2.f32 %v1826_v20  ;;  %v16192_v20 = vld [vmem:[#allocation72_spill] sm:$0xff] }
 0x548   : > { %3260 = vmax.xlane.f32.xlu1 %v3259_v0  ;;  %v16184_v0 = vld [vmem:[#allocation129_spill] sm:$0xff] }
 0x549   : > { %8335 = vmatpush3.bf16.xpose.msra.mxu0 %v2256_v51  ;;  %v16185_v51 = vld [vmem:[#allocation51_spill] sm:$0xff] }
 0x54b   : > { %3095 = vmax.xlane.f32.xlu0 %v3094_v33  ;;  %v1745_v33 = vsub.f32 %v16185_v51, %v16184_v0  ;;  %v16190_v51 = vld [vmem:[#allocation76_spill] sm:$0xff] }
 0x54c   : > { %1985 = vadd.xlane.f32.xlu1 %v1984_v24  ;;  %v2056_v24 = vsel %vm1022_vm9, %v11957_v45, 0.0 }
 0x54d   : > { %v11951_v37 = vpop.xlane.xlu1 %2066 }
 0x54e   : > { %16180 = vst [vmem:[#allocation55_spill] sm:$0xff] %v11951_v37  ;;  %v16198_v37 = vld [vmem:[#allocation100_spill] sm:$0xff] }
 0x54f   : > { %2009 = vadd.xlane.f32.xlu0 %v2008_v15  ;;  %v1858_v15 = vmul.f32 1.442695, %v1745_v33  ;;  %v3292_v33 = vsub.f32 %v16192_v20, %v11572_v56 }
 0x550   : > { %2033 = vadd.xlane.f32.xlu1 %v2032_v6  ;;  %v3085_v6 = vsel %vm1022_vm9, %v16188_v19, -inf }
 0x551   : > { %v11961_v21 = vpop.xlane.xlu1 %2075  ;;  %9181 = vpow2.f32 %v1858_v15  ;;  %v3371_v41 = vmul.f32 1.442695, %v3292_v33 }
 0x553   : > { %2057 = vadd.xlane.f32.xlu0 %v2056_v24  ;;  %v3133_v24 = vsel %vm1022_vm9, %v16190_v51, -inf  ;;  %9183 = vpow2.f32 %v3371_v41 }
 0x554   : > { %3206 = vmax.xlane.f32.xlu1 %v3205_v4  ;;  %v11989_v15 = vpop.eup %9179 }
 0x555   : > { %v11969_v2 = vpop.xlane.xlu1 %2069  ;;  %16195 = vst [vmem:[#allocation97_spill] sm:$0xff] %v11989_v15  ;;  %v1987_v20 = vsel %vm1022_vm9, %v11989_v15, 0.0 }
 0x556   : > { %16187 = vst [vmem:[#allocation34_spill] sm:$0xff] %v11969_v2  ;;  %v16214_v2 = vld [vmem:[#allocation95_spill] sm:$0xff] }
 0x557   : > { %3086 = vmax.xlane.f32.xlu0 %v3085_v6 }
 0x558   : > { %3254 = vmax.xlane.f32.xlu1 %v3253_v13  ;;  %v16194_v13 = vld [vmem:[#allocation112_spill] sm:$0xff] }
 0x559   : > { %v11975_v0 = vpop.xlane.xlu1 %2078  ;;  %v3262_v62 = vsel %vm1022_vm9, %v16194_v13, -inf }
 0x55b   : > { %3134 = vmax.xlane.f32.xlu0 %v3133_v24 }
 0x55d   : > { %v11979_v4 = vpop.xlane.xlu1 %2072 }
 0x55e   : > { %16191 = vst [vmem:[#allocation33_spill] sm:$0xff] %v11979_v4 }
 0x55f   : > { %3218 = vmax.xlane.f32.xlu0 %v3217_v38  ;;  %v11996_v38 = vpop.eup %9181 }
 0x560   : > { %16196 = vst [vmem:[#allocation114_spill] sm:$0xff] %v11996_v38 }
 0x561   : > { %v11985_v6 = vpop.xlane.xlu1 %3092 }
 0x563   : > { %3263 = vmax.xlane.f32.xlu0 %v3262_v62  ;;  %v3129_v45 = vpop.xlane.xlu0 %3128 }
 0x564   : > { %v3291_v24 = vsub.f32 %v11051_v35, %v3129_v45  ;;  %v2035_v35 = vsel %vm1022_vm9, %v11996_v38, 0.0 }
 0x565   : > { %v11992_v30 = vpop.xlane.xlu1 %3140 }
 0x566   : > { %v3369_v56 = vmul.f32 1.442695, %v3291_v24 }
 0x567   : > { %1988 = vadd.xlane.f32.xlu0 %v1987_v20  ;;  %v3177_v33 = vpop.xlane.xlu0 %3176  ;;  %v3208_v20 = vsel %vm1022_vm9, %v16198_v37, -inf }
 0x568   : > { %9185 = vpow2.f32 %v3369_v56  ;;  %v3307_v55 = vsub.f32 %v11131_v23, %v3177_v33  ;;  %v16200_v56 = vld [vmem:[#allocation73_spill] sm:$0xff] }
 0x569   : > { %v11999_v54 = vpop.xlane.xlu1 %3143  ;;  %v3290_v33 = vsub.f32 %v16200_v56, %v11578_v60 }
 0x56a   : > { %v3401_v62 = vmul.f32 1.442695, %v3307_v55 }
 0x56b   : > { %2036 = vadd.xlane.f32.xlu0 %v2035_v35  ;;  %v3180_v45 = vpop.xlane.xlu0 %3179  ;;  %v12016_v35 = vpop.eup %9183 }
 0x56c   : > { %9187 = vpow2.f32 %v3401_v62  ;;  %v3308_v41 = vsub.f32 %v11145_v17, %v3180_v45  ;;  %v16201_v17 = vld [vmem:[#allocation113_spill] sm:$0xff]  ;;  %16202 = vst [vmem:[#allocation29_spill] sm:$0xff] %v12016_v35  ;;  %v3514_v60 = vsel %vm1022_vm9, %v12016_v35, 0.0 }
 0x56d   : > { %v12004_v24 = vpop.xlane.xlu1 %2012  ;;  %9189 = vrcp.f32 %v11615_v26  ;;  %v3256_v62 = vsel %vm1022_vm9, %v16201_v17, -inf }
 0x56e   : > { %16197 = vst [vmem:[#allocation27_spill] sm:$0xff] %v12004_v24  ;;  %v3403_v15 = vmul.f32 1.442695, %v3308_v41 }
 0x56f   : > { %3209 = vmax.xlane.f32.xlu0 %v3208_v20  ;;  %v1902_v23 = vpop.xlane.xlu0 %1901  ;;  %v16204_v20 = vld [vmem:[#allocation88_spill] sm:$0xff] }
 0x570   : > { %9191 = vpow2.f32 %v3403_v15  ;;  %v3367_v15 = vmul.f32 1.442695, %v3290_v33 }
 0x571   : > { %9193 = vrcp.f32 %v1902_v23  ;;  %v12009_v55 = vpop.xlane.xlu1 %2060  ;;  %v3306_v23 = vsub.f32 %v16204_v20, %v11705_v27 }
 0x572   : > { %16199 = vst [vmem:[#allocation99_spill] sm:$0xff] %v12009_v55  ;;  %9195 = vrcp.f32 %v11745_v3  ;;  %v16208_v55 = vld [vmem:[#allocation93_spill] sm:$0xff] }
 0x573   : > { %3257 = vmax.xlane.f32.xlu0 %v3256_v62  ;;  %v1950_v45 = vpop.xlane.xlu0 %1949  ;;  %v3399_v33 = vmul.f32 1.442695, %v3306_v23 }
 0x574   : > { %9197 = vrcp.f32 %v1950_v45 }
 0x575   : > { %v12018_v26 = vpop.eup %9185  ;;  %v12020_v41 = vpop.xlane.xlu1 %3089  ;;  %9199 = vpow2.f32 %v3367_v15  ;;  %v3199_v15 = vsel %vm1022_vm9, %v16208_v55, -inf }
 0x576   : > { %16203 = vst [vmem:[#allocation61_spill] sm:$0xff] %v12018_v26  ;;  %v3511_v3 = vsel %vm1022_vm9, %v12018_v26, 0.0 }
 0x577   : > { %3515 = vadd.xlane.f32.xlu0 %v3514_v60  ;;  %3512 = vadd.xlane.f32.xlu1 %v3511_v3  ;;  %v3123_v56 = vpop.xlane.xlu0 %3122 }
 0x578   : > { %v3289_v62 = vsub.f32 %v16103_v59, %v3123_v56 }
 0x579   : > { %v12029_v45 = vpop.eup %9187  ;;  %v12031_v38 = vpop.xlane.xlu1 %3137 }
 0x57a   : > { %16205 = vst [vmem:[#allocation124_spill] sm:$0xff] %v12029_v45  ;;  %v3365_v24 = vmul.f32 1.442695, %v3289_v62  ;;  %v3559_v27 = vsel %vm1022_vm9, %v12029_v45, 0.0  ;;  %v9190_v35 = vpop.eup %9189 }
 0x57b   : > { %3560 = vadd.xlane.f32.xlu1 %v3559_v27  ;;  %v3171_v20 = vpop.xlane.xlu0 %3170  ;;  %v16209_v27 = vld [vmem:[#allocation116_spill] sm:$0xff] }
 0x57c   : > { %9201 = vpow2.f32 %v3365_v24  ;;  %v3305_v60 = vsub.f32 %v11139_v8, %v3171_v20  ;;  %v2149_v20 = vmul.f32 %v9190_v35, %v16209_v27 }
 0x57d   : > { %v12036_v3 = vpop.eup %9191  ;;  %v12038_v26 = vpop.xlane.xlu1 %2003  ;;  %9203 = vpow2.f32 %v3399_v33  ;;  %v16210_v33 = vld [vmem:[#allocation132_spill] sm:$0xff] }
 0x57e   : > { %16206 = vst [vmem:[#allocation41_spill] sm:$0xff] %v12036_v3  ;;  %16207 = vst [vmem:[#allocation129_spill] sm:$0xff] %v12038_v26  ;;  %v9194_v59 = vpop.eup %9193  ;;  %v3397_v56 = vmul.f32 1.442695, %v3305_v60  ;;  %v3562_v23 = vsel %vm1022_vm9, %v12036_v3, 0.0  ;;  %9205 = vrcp.f32 %v11583_v42  ;;  %v16211_v60 = vld [vmem:[#allocation69_spill] sm:$0xff] }
 0x57f   : > { %v9196_v62 = vpop.eup %9195  ;;  %3200 = vmax.xlane.f32.xlu1 %v3199_v15  ;;  %3563 = vadd.xlane.f32.xlu0 %v3562_v23  ;;  %v1896_v24 = vpop.xlane.xlu0 %1895  ;;  %v2148_v8 = vmul.f32 %v9194_v59, %v11649_v57  ;;  %v3288_v26 = vsub.f32 %v16211_v60, %v16210_v33  ;;  %v3247_v3 = vsel %vm1022_vm9, %v16213_v48, -inf  ;;  %v3202_v42 = vsel %vm1022_vm9, %v16214_v2, -inf  ;;  %v16215_v59 = vld [vmem:[#allocation120_spill] sm:$0xff]  ;;  %v9002_v33 = vld [vmem:[%s15462_s3 + $0x28] sm:$0xff]   ;;  %v16217_v60 = vld [vmem:[#allocation86_spill] sm:$0xff] }
 0x580   : > { %9207 = vpow2.f32 %v3397_v56  ;;  %v2165_v56 = vmul.f32 %v9196_v62, %v16215_v59  ;;  %8124 = vmatmul.mubr.msk.bf16.gmra.mxu0 %vm858_vm0, %v9002_v33  ;;  %v16230_v2 = vld [vmem:[#allocation94_spill] sm:$0xff] }
 0x581   : > { %v9198_v45 = vpop.eup %9197  ;;  %9209 = vrcp.f32 %v1896_v24  ;;  %v12049_v52 = vpop.xlane.xlu1 %2006  ;;  %v2210_v35 = vpack.c.bf16 %v2149_v20, %v2148_v8  ;;  %v3363_v24 = vmul.f32 1.442695, %v3288_v26 }
 0x582   : > { %16212 = vst [vmem:[#allocation51_spill] sm:$0xff] %v12049_v52  ;;  %9211 = vrcp.f32 %v11719_v31  ;;  %v2164_v57 = vmul.f32 %v9198_v45, %v11663_v10  ;;  %v3304_v31 = vsub.f32 %v16217_v60, %v11645_v9  ;;  %v16218_v10 = vld [vmem:[#allocation110_spill] sm:$0xff]  ;;  %v12069_v62 = vpop.eup %9199  ;;  %v16231_v52 = vld [vmem:[#allocation75_spill] sm:$0xff] }
 0x583   : > { %3248 = vmax.xlane.f32.xlu1 %v3247_v3  ;;  %3203 = vmax.xlane.f32.xlu0 %v3202_v42  ;;  %v1944_v15 = vpop.xlane.xlu0 %1943  ;;  %v3250_v45 = vsel %vm1022_vm9, %v16218_v10, -inf  ;;  %v2253_v3 = vsel %vm1022_vm9, %v2210_v35, 0  ;;  %16219 = vst [vmem:[#allocation60_spill] sm:$0xff] %v12069_v62  ;;  %v3508_v59 = vsel %vm1022_vm9, %v12069_v62, 0.0  ;;  %v16261_v10 = vld [vmem:[#allocation80_spill] sm:$0xff] }
 0x584   : > { %9213 = vrcp.f32 %v1944_v15  ;;  %v2218_v23 = vpack.c.bf16 %v2165_v56, %v2164_v57  ;;  %v3395_v42 = vmul.f32 1.442695, %v3304_v31  ;;  %v12083_v15 = vpop.f32.mrf.mxu1 }
 0x585   : > { %v12058_v27 = vpop.xlane.xlu1 %2051  ;;  %9215 = vpow2.f32 %v3363_v24  ;;  %16223 = vst [vmem:[#allocation102_spill] sm:$0xff] %v12083_v15 }
 0x586   : > { %16216 = vst [vmem:[#allocation98_spill] sm:$0xff] %v12058_v27  ;;  %8881 = vmatprep.subr.msk.bf16.mxu0 %vm1022_vm9, %v2218_v23 }
 0x587   : > { %3251 = vmax.xlane.f32.xlu0 %v3250_v45  ;;  %8337 = vmatpush3.bf16.xpose.msra.mxu0 %v2253_v3  ;;  %v3117_v26 = vpop.xlane.xlu0 %3116 }
 0x588   : > { %v3287_v8 = vsub.f32 %v16117_v39, %v3117_v26 }
 0x589   : > { %v12073_v20 = vpop.eup %9201  ;;  %v12075_v9 = vpop.xlane.xlu1 %2054 }
 0x58a   : > { %16220 = vst [vmem:[#allocation25_spill] sm:$0xff] %v12073_v20  ;;  %16221 = vst [vmem:[#allocation76_spill] sm:$0xff] %v12075_v9  ;;  %v3361_v57 = vmul.f32 1.442695, %v3287_v8  ;;  %v3505_v56 = vsel %vm1022_vm9, %v12073_v20, 0.0  ;;  %v12081_v35 = vpop.eup %9203  ;;  %v16232_v9 = vld [vmem:[#allocation142_spill] sm:$0xff] }
 0x58b   : > { %16222 = vst [vmem:[#allocation72_spill] sm:$0xff] %v12081_v35  ;;  %3509 = vadd.xlane.f32.xlu0 %v3508_v59  ;;  %3506 = vadd.xlane.f32.xlu1 %v3505_v56  ;;  %v3165_v39 = vpop.xlane.xlu0 %3164  ;;  %v9206_v23 = vpop.eup %9205  ;;  %v3556_v3 = vsel %vm1022_vm9, %v12081_v35, 0.0  ;;  %v16226_v56 = vld [vmem:[#allocation135_spill] sm:$0xff] }
 0x58c   : > { %9217 = vpow2.f32 %v3361_v57  ;;  %v3303_v24 = vsub.f32 %v16120_v53, %v3165_v39  ;;  %v12094_v59 = vpop.f32.mrf.mxu1  ;;  %v16227_v57 = vld [vmem:[#allocation54_spill] sm:$0xff]  ;;  %v2147_v27 = vmul.f32 %v9206_v23, %v16231_v52 }
 0x58d   : > { %v12086_v33 = vpop.eup %9207  ;;  %v12088_v60 = vpop.xlane.xlu1 %3224  ;;  %9219 = vpow2.f32 %v3395_v42  ;;  %16225 = vst [vmem:[#allocation100_spill] sm:$0xff] %v12094_v59  ;;  %v16228_v42 = vld [vmem:[#allocation57_spill] sm:$0xff] }
 0x58e   : > { %16224 = vst [vmem:[#allocation112_spill] sm:$0xff] %v12086_v33  ;;  %v9210_v31 = vpop.eup %9209  ;;  %v3393_v45 = vmul.f32 1.442695, %v3303_v24  ;;  %v3553_v26 = vsel %vm1022_vm9, %v12086_v33, 0.0  ;;  %9221 = vrcp.f32 %v16226_v56  ;;  %v16229_v24 = vld [vmem:[#allocation70_spill] sm:$0xff]  ;;  %v3193_v33 = vsel %vm1022_vm9, %v16230_v2, -inf  ;;  %v12110_v4 = vpop.f32.mrf.mxu1 }
 0x58f   : > { %v9212_v8 = vpop.eup %9211  ;;  %3557 = vadd.xlane.f32.xlu0 %v3556_v3  ;;  %3554 = vadd.xlane.f32.xlu1 %v3553_v26  ;;  %v1890_v53 = vpop.xlane.xlu0 %1889  ;;  %v2146_v39 = vmul.f32 %v9210_v31, %v16227_v57  ;;  %v3286_v20 = vsub.f32 %v16229_v24, %v16228_v42  ;;  %v16233_v3 = vld [vmem:[#allocation96_spill] sm:$0xff]  ;;  %16236 = vst [vmem:[#allocation73_spill] sm:$0xff] %v12110_v4  ;;  %v16255_v2 = vld [vmem:[#allocation65_spill] sm:$0xff] }
 0x590   : > { %9223 = vpow2.f32 %v3393_v45  ;;  %v3196_v26 = vsel %vm1022_vm9, %v16233_v3, -inf  ;;  %v16234_v56 = vld [vmem:[#allocation32_spill] sm:$0xff]  ;;  %v16235_v45 = vld [vmem:[#allocation35_spill] sm:$0xff]  ;;  %v16254_v3 = vld [vmem:[#allocation130_spill] sm:$0xff] }
 0x591   : > { %v9214_v62 = vpop.eup %9213  ;;  %9225 = vrcp.f32 %v1890_v53  ;;  %v12100_v35 = vpop.xlane.xlu1 %3227  ;;  %v2163_v57 = vmul.f32 %v9212_v8, %v16235_v45  ;;  %v2209_v42 = vpack.c.bf16 %v2147_v27, %v2146_v39  ;;  %v3359_v52 = vmul.f32 1.442695, %v3286_v20  ;;  %v16240_v45 = vld [vmem:[#allocation111_spill] sm:$0xff] }
 0x592   : > { %9227 = vrcp.f32 %v16232_v9  ;;  %v2162_v31 = vmul.f32 %v9214_v62, %v16234_v56  ;;  %v12116_v23 = vpop.eup %9215  ;;  %v16238_v62 = vld [vmem:[#allocation31_spill] sm:$0xff]  ;;  %v12125_v39 = vpop.f32.mrf.mxu1 }
 0x593   : > { %9229 = vrcp.f32 %v11975_v0  ;;  %3197 = vmax.xlane.f32.xlu0 %v3196_v26  ;;  %3194 = vmax.xlane.f32.xlu1 %v3193_v33  ;;  %v1938_v53 = vpop.xlane.xlu0 %1937  ;;  %16237 = vst [vmem:[#allocation113_spill] sm:$0xff] %v12116_v23  ;;  %v16239_v56 = vld [vmem:[#allocation87_spill] sm:$0xff]  ;;  %v3244_v0 = vsel %vm1022_vm9, %v16240_v45, -inf  ;;  %v16241_v33 = vld [vmem:[#allocation109_spill] sm:$0xff]  ;;  %16242 = vst [vmem:[#allocation88_spill] sm:$0xff] %v12125_v39 }
 0x594   : > { %9231 = vrcp.f32 %v1938_v53  ;;  %v2217_v24 = vpack.c.bf16 %v2163_v57, %v2162_v31  ;;  %v3302_v8 = vsub.f32 %v16239_v56, %v16238_v62  ;;  %v3241_v27 = vsel %vm1022_vm9, %v16241_v33, -inf  ;;  %v16250_v45 = vld [vmem:[#allocation63_spill] sm:$0xff] }
 0x595   : > { %9233 = vrcp.f32 %v11961_v21  ;;  %v12114_v9 = vpop.xlane.xlu1 %3272  ;;  %v2250_v21 = vsel %vm1022_vm9, %v2209_v42, 0  ;;  %v3502_v62 = vsel %vm1022_vm9, %v12116_v23, 0.0  ;;  %v12139_v42 = vpop.f32.mrf.mxu1 }
 0x596   : > { %8882 = vmatprep.subr.msk.bf16.mxu0 %vm1022_vm9, %v2217_v24  ;;  %9235 = vpow2.f32 %v3359_v52  ;;  %v3391_v53 = vmul.f32 1.442695, %v3302_v8  ;;  %16245 = vst [vmem:[#allocation69_spill] sm:$0xff] %v12139_v42 }
 0x597   : > { %3245 = vmax.xlane.f32.xlu0 %v3244_v0  ;;  %3242 = vmax.xlane.f32.xlu1 %v3241_v27  ;;  %v3111_v20 = vpop.xlane.xlu0 %3110 }
 0x598   : > { %8339 = vmatpush3.bf16.xpose.msra.mxu0 %v2250_v21  ;;  %v3285_v26 = vsub.f32 %v16125_v46, %v3111_v20 }
 0x599   : > { %v12129_v31 = vpop.eup %9217  ;;  %v12131_v57 = vpop.xlane.xlu1 %3275 }
 0x59a   : > { %16243 = vst [vmem:[#allocation116_spill] sm:$0xff] %v12129_v31  ;;  %v3357_v24 = vmul.f32 1.442695, %v3285_v26  ;;  %v3499_v56 = vsel %vm1022_vm9, %v12129_v31, 0.0  ;;  %v12137_v0 = vpop.eup %9219 }
 0x59b   : > { %16244 = vst [vmem:[#allocation132_spill] sm:$0xff] %v12137_v0  ;;  %3503 = vadd.xlane.f32.xlu0 %v3502_v62  ;;  %3500 = vadd.xlane.f32.xlu1 %v3499_v56  ;;  %v3159_v46 = vpop.xlane.xlu0 %3158  ;;  %v9222_v27 = vpop.eup %9221  ;;  %v3550_v23 = vsel %vm1022_vm9, %v12137_v0, 0.0  ;;  %v3187_v0 = vsel %vm1022_vm9, %v16252_v11, -inf }
 0x59c   : > { %9237 = vpow2.f32 %v3357_v24  ;;  %v3301_v52 = vsub.f32 %v16128_v28, %v3159_v46  ;;  %v12150_v56 = vpop.f32.mrf.mxu1 }
 0x59d   : > { %v12142_v21 = vpop.eup %9223  ;;  %v12144_v8 = vpop.xlane.xlu1 %1997  ;;  %9239 = vpow2.f32 %v3391_v53  ;;  %16248 = vst [vmem:[#allocation135_spill] sm:$0xff] %v12150_v56 }
 0x59e   : > { %16246 = vst [vmem:[#allocation120_spill] sm:$0xff] %v12142_v21  ;;  %16247 = vst [vmem:[#allocation86_spill] sm:$0xff] %v12144_v8  ;;  %v9226_v20 = vpop.eup %9225  ;;  %v3389_v26 = vmul.f32 1.442695, %v3301_v52  ;;  %v3547_v31 = vsel %vm1022_vm9, %v12142_v21, 0.0  ;;  %v16249_v8 = vld [vmem:[#allocation127_spill] sm:$0xff]  ;;  %v2145_v21 = vmul.f32 %v9222_v27, %v16253_v47  ;;  %v12166_v59 = vpop.f32.mrf.mxu1 }
 0x59f   : > { %v9228_v62 = vpop.eup %9227  ;;  %3551 = vadd.xlane.f32.xlu0 %v3550_v23  ;;  %3548 = vadd.xlane.f32.xlu1 %v3547_v31  ;;  %v2144_v28 = vmul.f32 %v9226_v20, %v11749_v43  ;;  %v3283_v53 = vsub.f32 %v16250_v45, %v16249_v8  ;;  %v3284_v23 = vsub.f32 %v16255_v2, %v16254_v3  ;;  %v16256_v31 = vld [vmem:[#allocation91_spill] sm:$0xff]  ;;  %v16259_v8 = vld [vmem:[#allocation137_spill] sm:$0xff]  ;;  %v16260_v27 = vld [vmem:[#allocation24_spill] sm:$0xff] }
 0x5a0   : > { %v9230_v24 = vpop.eup %9229  ;;  %9241 = vpow2.f32 %v3389_v26  ;;  %v3190_v43 = vsel %vm1022_vm9, %v16256_v31, -inf  ;;  %v16257_v26 = vld [vmem:[#allocation36_spill] sm:$0xff]  ;;  %16258 = vst [vmem:[#allocation57_spill] sm:$0xff] %v12166_v59  ;;  %v3299_v48 = vsub.f32 %v16261_v10, %v16260_v27  ;;  %v16262_v3 = vld [vmem:[#allocation58_spill] sm:$0xff] }
 0x5a1   : > { %v9232_v46 = vpop.eup %9231  ;;  %v12155_v52 = vpop.xlane.xlu1 %2000  ;;  %v2161_v39 = vmul.f32 %v9228_v62, %v16257_v26  ;;  %v2208_v45 = vpack.c.bf16 %v2145_v21, %v2144_v28  ;;  %v3353_v47 = vmul.f32 1.442695, %v3283_v53  ;;  %v16264_v62 = vld [vmem:[#allocation138_spill] sm:$0xff] }
 0x5a2   : > { %16251 = vst [vmem:[#allocation54_spill] sm:$0xff] %v12155_v52  ;;  %v9234_v33 = vpop.eup %9233  ;;  %v2160_v20 = vmul.f32 %v9232_v46, %v11761_v18  ;;  %v2207_v52 = vmul.f32 %v9230_v24, %v16259_v8  ;;  %v3355_v18 = vmul.f32 1.442695, %v3284_v23  ;;  %v16265_v46 = vld [vmem:[#allocation82_spill] sm:$0xff]  ;;  %v12183_v24 = vpop.f32.mrf.mxu1  ;;  %v3385_v23 = vmul.f32 1.442695, %v3299_v48 }
 0x5a3   : > { %3191 = vmax.xlane.f32.xlu0 %v3190_v43  ;;  %3188 = vmax.xlane.f32.xlu1 %v3187_v0  ;;  %v2206_v31 = vmul.f32 %v9234_v33, %v16262_v3  ;;  %v12174_v55 = vpop.eup %9235  ;;  %v3300_v26 = vsub.f32 %v16265_v46, %v16264_v62  ;;  %v16266_v0 = vld [vmem:[#allocation106_spill] sm:$0xff]  ;;  %16268 = vst [vmem:[#allocation75_spill] sm:$0xff] %v12183_v24  ;;  %v2247_v10 = vsel %vm1022_vm9, %v2208_v45, 0  ;;  %9243 = vpow2.f32 %v3353_v47 }
 0x5a4   : > { %v2216_v11 = vpack.c.bf16 %v2161_v39, %v2160_v20  ;;  %16263 = vst [vmem:[#allocation70_spill] sm:$0xff] %v12174_v55  ;;  %v3238_v21 = vsel %vm1022_vm9, %v16266_v0, -inf  ;;  %v16267_v39 = vld [vmem:[#allocation104_spill] sm:$0xff]  ;;  %9245 = vpow2.f32 %v3355_v18  ;;  %v3496_v20 = vsel %vm1022_vm9, %v12174_v55, 0.0  ;;  %v3099_v18 = vpop.xlane.xlu0 %3098  ;;  %v16273_v62 = vld [vmem:[#allocation66_spill] sm:$0xff] }
 0x5a5   : > { %v12171_v2 = vpop.xlane.xlu1 %2045  ;;  %v3235_v28 = vsel %vm1022_vm9, %v16267_v39, -inf  ;;  %v2239_v33 = vpack.c.bf16 %v2207_v52, %v2206_v31  ;;  %v3387_v43 = vmul.f32 1.442695, %v3300_v26  ;;  %v12197_v52 = vpop.f32.mrf.mxu1  ;;  %9247 = vpow2.f32 %v3385_v23 }
 0x5a6   : > { %8883 = vmatprep.subr.msk.bf16.mxu0 %vm1022_vm9, %v2216_v11  ;;  %v3282_v46 = vsub.f32 %v16273_v62, %v11810_v50  ;;  %v3281_v26 = vsub.f32 %v16131_v12, %v3099_v18  ;;  %v16279_v12 = vld [vmem:[#allocation83_spill] sm:$0xff] }
 0x5a7   : > { %3239 = vmax.xlane.f32.xlu0 %v3238_v21  ;;  %3236 = vmax.xlane.f32.xlu1 %v3235_v28  ;;  %9249 = vpow2.f32 %v3387_v43  ;;  %v12207_v3 = vpop.f32.mrf.mxu1  ;;  %v16274_v21 = vld [vmem:[#allocation92_spill] sm:$0xff]  ;;  %v3298_v50 = vsub.f32 %v16279_v12, %v11834_v40  ;;  %v16280_v62 = vld [vmem:[#allocation107_spill] sm:$0xff] }
 0x5a8   : > { %8341 = vmatpush3.bf16.xpose.msra.mxu0 %v2247_v10  ;;  %16272 = vst [vmem:[#allocation31_spill] sm:$0xff] %v12207_v3  ;;  %v3184_v28 = vsel %vm1022_vm9, %v16274_v21, -inf  ;;  %v16275_v10 = vld [vmem:[#allocation90_spill] sm:$0xff]  ;;  %v3349_v18 = vmul.f32 1.442695, %v3281_v26  ;;  %v3232_v55 = vsel %vm1022_vm9, %v16280_v62, -inf }
 0x5a9   : > { %v12186_v53 = vpop.eup %9237  ;;  %8884 = vmatprep.subr.msk.bf16.mxu0 %vm1022_vm9, %v2239_v33  ;;  %v12189_v11 = vpop.xlane.xlu1 %2048  ;;  %v3181_v33 = vsel %vm1022_vm9, %v16275_v10, -inf }
 0x5aa   : > { %16269 = vst [vmem:[#allocation142_spill] sm:$0xff] %v12186_v53  ;;  %v3493_v8 = vsel %vm1022_vm9, %v12186_v53, 0.0  ;;  %v12195_v27 = vpop.eup %9239  ;;  %v12216_v23 = vpop.f32.mrf.mxu1  ;;  %v16281_v53 = vld [vmem:[#allocation105_spill] sm:$0xff] }
 0x5ab   : > { %16270 = vst [vmem:[#allocation32_spill] sm:$0xff] %v12195_v27  ;;  %3497 = vadd.xlane.f32.xlu0 %v3496_v20  ;;  %3494 = vadd.xlane.f32.xlu1 %v3493_v8  ;;  %v3544_v45 = vsel %vm1022_vm9, %v12195_v27, 0.0  ;;  %16276 = vst [vmem:[#allocation87_spill] sm:$0xff] %v12216_v23  ;;  %v3351_v20 = vmul.f32 1.442695, %v3282_v46  ;;  %v16277_v8 = vld [vmem:[#allocation81_spill] sm:$0xff] }
 0x5ac   : > { %v3229_v27 = vsel %vm1022_vm9, %v16281_v53, -inf }
 0x5ad   : > { %v12199_v31 = vpop.eup %9241  ;;  %v12201_v48 = vpop.xlane.xlu1 %3221  ;;  %9251 = vpow2.f32 %v3351_v20 }
 0x5ae   : > { %16271 = vst [vmem:[#allocation35_spill] sm:$0xff] %v12199_v31  ;;  %v3541_v47 = vsel %vm1022_vm9, %v12199_v31, 0.0  ;;  %9253 = vpow2.f32 %v3349_v18 }
 0x5af   : > { %3545 = vadd.xlane.f32.xlu0 %v3544_v45  ;;  %3542 = vadd.xlane.f32.xlu1 %v3541_v47  ;;  %v3297_v45 = vsub.f32 %v16277_v8, %v11822_v58  ;;  %v3383_v8 = vmul.f32 1.442695, %v3298_v50  ;;  %v16287_v50 = vld [vmem:[#allocation59_spill] sm:$0xff] }
 0x5b0   : > { %v12222_v47 = vpop.eup %9243  ;;  %v3279_v18 = vsub.f32 %v16287_v50, %v11985_v6 }
 0x5b1   : > { %v12218_v43 = vpop.xlane.xlu1 %3266  ;;  %16278 = vst [vmem:[#allocation127_spill] sm:$0xff] %v12222_v47  ;;  %v3381_v58 = vmul.f32 1.442695, %v3297_v45  ;;  %v3487_v12 = vsel %vm1022_vm9, %v12222_v47, 0.0 }
 0x5b3   : > { %3185 = vmax.xlane.f32.xlu0 %v3184_v28  ;;  %3182 = vmax.xlane.f32.xlu1 %v3181_v33  ;;  %v12230_v28 = vpop.eup %9245  ;;  %v12232_v33 = vpop.f32.mrf.mxu1  ;;  %9255 = vpow2.f32 %v3381_v58  ;;  %v4722_v58 = vsel %vm1022_vm9, %v11847_v34, -inf }
 0x5b4   : > { %16282 = vst [vmem:[#allocation63_spill] sm:$0xff] %v12230_v28  ;;  %16283 = vst [vmem:[#allocation78_spill] sm:$0xff] %v12232_v33  ;;  %v12234_v46 = vpop.eup %9247  ;;  %v3490_v26 = vsel %vm1022_vm9, %v12230_v28, 0.0  ;;  %9257 = vpow2.f32 %v3383_v8  ;;  %v3345_v28 = vmul.f32 1.442695, %v3279_v18 }
 0x5b5   : > { %16284 = vst [vmem:[#allocation130_spill] sm:$0xff] %v12234_v46  ;;  %v12236_v40 = vpop.xlane.xlu1 %3269  ;;  %v12242_v31 = vpop.eup %9249 }
 0x5b6   : > { %16285 = vst [vmem:[#allocation65_spill] sm:$0xff] %v12242_v31  ;;  %v12244_v62 = vpop.f32.mrf.mxu1  ;;  %9259 = vpow2.f32 %v3345_v28 }
 0x5b7   : > { %3233 = vmax.xlane.f32.xlu0 %v3232_v55  ;;  %3230 = vmax.xlane.f32.xlu1 %v3229_v27  ;;  %v3538_v55 = vsel %vm1022_vm9, %v12242_v31, 0.0  ;;  %v3535_v27 = vsel %vm1022_vm9, %v12234_v46, 0.0  ;;  %v4770_v50 = vsel %vm1022_vm9, %v12244_v62, -inf }
 0x5b8   : > { %v12250_v20 = vpop.f32.mrf.mxu1 }
 0x5b9   : > { %v12252_v45 = vpop.xlane.xlu1 %1991 }
 0x5ba   : > { %16286 = vst [vmem:[#allocation36_spill] sm:$0xff] %v12252_v45  ;;  %v12260_v8 = vpop.f32.mrf.mxu1 }
 0x5bb   : > { %3491 = vadd.xlane.f32.xlu0 %v3490_v26  ;;  %3488 = vadd.xlane.f32.xlu1 %v3487_v12  ;;  %v4725_v26 = vsel %vm1022_vm9, %v11874_v29, -inf  ;;  %16288 = vst [vmem:[#allocation137_spill] sm:$0xff] %v12260_v8  ;;  %v12262_v12 = vpop.eup %9251  ;;  %v4773_v6 = vsel %vm1022_vm9, %v12260_v8, -inf }
 0x5bc   : > { %16289 = vst [vmem:[#allocation24_spill] sm:$0xff] %v12262_v12  ;;  %v12272_v31 = vpop.eup %9253  ;;  %v3484_v18 = vsel %vm1022_vm9, %v12262_v12, 0.0  ;;  %v4719_v12 = vsel %vm1022_vm9, %v11888_v22, -inf }
 0x5bd   : > { %v12266_v47 = vpop.xlane.xlu1 %1994  ;;  %16291 = vst [vmem:[#allocation80_spill] sm:$0xff] %v12272_v31 }
 0x5bf   : > { %3539 = vadd.xlane.f32.xlu0 %v3538_v55  ;;  %3536 = vadd.xlane.f32.xlu1 %v3535_v27  ;;  %v16290_v55 = vld [vmem:[#allocation74_spill] sm:$0xff] }
 0x5c0   : > { %v3295_v27 = vsub.f32 %v16290_v55, %v11992_v30  ;;  %v3481_v30 = vsel %vm1022_vm9, %v12272_v31, 0.0 }
 0x5c1   : > { %v12282_v46 = vpop.xlane.xlu1 %2039 }
 0x5c3   : > { %4726 = vmax.xlane.f32.xlu0 %v4725_v26  ;;  %4723 = vmax.xlane.f32.xlu1 %v4722_v58  ;;  %v12274_v26 = vpop.eup %9255  ;;  %v3377_v58 = vmul.f32 1.442695, %v3295_v27  ;;  %v12288_v27 = vpop.permute.xlu0 %815 }
 0x5c4   : > { %16292 = vst [vmem:[#allocation58_spill] sm:$0xff] %v12274_v26  ;;  %v12280_v55 = vpop.eup %9257  ;;  %v3529_v28 = vsel %vm1022_vm9, %v12274_v26, 0.0  ;;  %16294 = vst [vmem:[#allocation82_spill] sm:$0xff] %v12288_v27  ;;  %v4764_v26 = vsel %vm1022_vm9, %v12250_v20, -inf }
 0x5c5   : > { %16293 = vst [vmem:[#allocation138_spill] sm:$0xff] %v12280_v55  ;;  %9261 = vpow2.f32 %v3377_v58  ;;  %v16296_v58 = vld [vmem:[#allocation77_spill] sm:$0xff]  ;;  %v12305_v22 = vpop.eup %9259 }
 0x5c6   : > { %v3296_v31 = vsub.f32 %v16296_v58, %v11999_v54  ;;  %16297 = vst [vmem:[#allocation66_spill] sm:$0xff] %v12305_v22 }
 0x5c7   : > { %4774 = vmax.xlane.f32.xlu0 %v4773_v6  ;;  %4771 = vmax.xlane.f32.xlu1 %v4770_v50  ;;  %v3532_v6 = vsel %vm1022_vm9, %v12280_v55, 0.0  ;;  %v12290_v50 = vpop.xlane.xlu1 %2042 }
 0x5c8   : > { %v3379_v8 = vmul.f32 1.442695, %v3296_v31 }
 0x5cb   : > { %3485 = vadd.xlane.f32.xlu0 %v3484_v18  ;;  %3482 = vadd.xlane.f32.xlu1 %v3481_v30  ;;  %v4716_v18 = vsel %vm1022_vm9, %v11859_v25, -inf  ;;  %v12296_v30 = vpop.f32.mrf.mxu1  ;;  %v12307_v21 = vpop.xlane.xlu1 %3212 }
 0x5cc   : > { %16295 = vst [vmem:[#allocation104_spill] sm:$0xff] %v12296_v30 }
 0x5cf   : > { %3533 = vadd.xlane.f32.xlu0 %v3532_v6  ;;  %3530 = vadd.xlane.f32.xlu1 %v3529_v28  ;;  %v4767_v28 = vsel %vm1022_vm9, %v12296_v30, -inf }
 0x5d3   : > { %4720 = vmax.xlane.f32.xlu0 %v4719_v12  ;;  %4717 = vmax.xlane.f32.xlu1 %v4716_v18  ;;  %v12313_v12 = vpop.eup %9261  ;;  %v12317_v18 = vpop.xlane.xlu1 %3215 }
 0x5d4   : > { %v3096_v55 = vpop.xlane.xlu0 %3095  ;;  %16298 = vst [vmem:[#allocation90_spill] sm:$0xff] %v12313_v12  ;;  %v3523_v31 = vsel %vm1022_vm9, %v12313_v12, 0.0 }
 0x5d5   : > { %v3280_v6 = vsub.f32 %v16177_v5, %v3096_v55  ;;  %v3475_v5 = vsel %vm1022_vm9, %v12305_v22, 0.0 }
 0x5d7   : > { %v3347_v29 = vmul.f32 1.442695, %v3280_v6  ;;  %4768 = vmax.xlane.f32.xlu0 %v4767_v28  ;;  %4765 = vmax.xlane.f32.xlu1 %v4764_v26  ;;  %v16299_v26 = vld [vmem:[#allocation62_spill] sm:$0xff]  ;;  %v4710_v28 = vsel %vm1022_vm9, %v11798_v7, -inf  ;;  %v12328_v0 = vpop.xlane.xlu1 %3260 }
 0x5d8   : > { %v12309_v54 = vpop.xlane.xlu0 %2009  ;;  %v3278_v58 = vsub.f32 %v16299_v26, %v12020_v41 }
 0x5d9   : > { %9263 = vpow2.f32 %v3347_v29 }
 0x5da   : > { %9265 = vpow2.f32 %v3379_v8  ;;  %v3343_v22 = vmul.f32 1.442695, %v3278_v58  ;;  %v16300_v8 = vld [vmem:[#allocation79_spill] sm:$0xff] }
 0x5db   : > { %3476 = vadd.xlane.f32.xlu1 %v3475_v5  ;;  %v3294_v5 = vsub.f32 %v16300_v8, %v12031_v38 }
 0x5dc   : > { %v12315_v55 = vpop.xlane.xlu0 %2057 }
 0x5df   : > { %3524 = vadd.xlane.f32.xlu1 %v3523_v31  ;;  %v3375_v31 = vmul.f32 1.442695, %v3294_v5 }
 0x5e0   : > { %v3087_v6 = vpop.xlane.xlu0 %3086 }
 0x5e1   : > { %v3277_v29 = vsub.f32 %v16188_v19, %v3087_v6  ;;  %v4758_v19 = vsel %vm1022_vm9, %v12197_v52, -inf }
 0x5e3   : > { %v3341_v30 = vmul.f32 1.442695, %v3277_v29  ;;  %4711 = vmax.xlane.f32.xlu1 %v4710_v28  ;;  %v3324_v28 = vsub.f32 %v11215_v1, %v12100_v35  ;;  %v4761_v1 = vsel %vm1022_vm9, %v12216_v23, -inf }
 0x5e4   : > { %v3135_v45 = vpop.xlane.xlu0 %3134 }
 0x5e5   : > { %9267 = vpow2.f32 %v3341_v30  ;;  %v3293_v12 = vsub.f32 %v16190_v51, %v3135_v45  ;;  %v12339_v30 = vpop.xlane.xlu1 %1985  ;;  %v12341_v51 = vpop.f32.mrf.mxu1  ;;  %v16304_v45 = vld [vmem:[#allocation101_spill] sm:$0xff] }
 0x5e6   : > { %v12331_v41 = vpop.eup %9263  ;;  %9269 = vpow2.f32 %v3343_v22  ;;  %16303 = vst [vmem:[#allocation105_spill] sm:$0xff] %v12341_v51  ;;  %v3323_v29 = vsub.f32 %v16304_v45, %v12088_v60 }
 0x5e7   : > { %16301 = vst [vmem:[#allocation81_spill] sm:$0xff] %v12331_v41  ;;  %v3373_v26 = vmul.f32 1.442695, %v3293_v12  ;;  %4759 = vmax.xlane.f32.xlu1 %v4758_v19  ;;  %v3478_v38 = vsel %vm1022_vm9, %v12331_v41, 0.0  ;;  %v12337_v58 = vpop.eup %9265  ;;  %v12351_v8 = vpop.f32.mrf.mxu1  ;;  %v16306_v19 = vld [vmem:[#allocation26_spill] sm:$0xff] }
 0x5e8   : > { %16302 = vst [vmem:[#allocation83_spill] sm:$0xff] %v12337_v58  ;;  %3479 = vadd.xlane.f32.xlu0 %v3478_v38  ;;  %v3219_v6 = vpop.xlane.xlu0 %3218  ;;  %v3526_v22 = vsel %vm1022_vm9, %v12337_v58, 0.0  ;;  %16305 = vst [vmem:[#allocation59_spill] sm:$0xff] %v12351_v8  ;;  %v3433_v5 = vmul.f32 1.442695, %v3323_v29  ;;  %v16307_v38 = vld [vmem:[#allocation40_spill] sm:$0xff] }
 0x5e9   : > { %9271 = vpow2.f32 %v3373_v26  ;;  %v3339_v26 = vsub.f32 %v16306_v19, %v12114_v9  ;;  %v12357_v41 = vpop.xlane.xlu1 %2033  ;;  %v12365_v35 = vpop.f32.mrf.mxu1  ;;  %v16310_v9 = vld [vmem:[#allocation115_spill] sm:$0xff] }
 0x5ea   : > { %9273 = vpow2.f32 %v3375_v31  ;;  %v4713_v31 = vsel %vm1022_vm9, %v16307_v38, -inf  ;;  %16309 = vst [vmem:[#allocation77_spill] sm:$0xff] %v12365_v35  ;;  %v3340_v19 = vsub.f32 %v16310_v9, %v12131_v57  ;;  %v16393_v38 = vld [vmem:[#allocation96_spill] sm:$0xff] }
 0x5eb   : > { %9275 = vpow2.f32 %v3433_v5  ;;  %v3465_v29 = vmul.f32 1.442695, %v3339_v26  ;;  %v12379_v35 = vpop.f32.mrf.mxu1 }
 0x5ec   : > { %3527 = vadd.xlane.f32.xlu0 %v3526_v22  ;;  %v12347_v12 = vpop.xlane.xlu0 %3263  ;;  %v3435_v22 = vmul.f32 1.442695, %v3324_v28  ;;  %16313 = vst [vmem:[#allocation101_spill] sm:$0xff] %v12379_v35  ;;  %v3467_v5 = vmul.f32 1.442695, %v3340_v19  ;;  %v16316_v19 = vld [vmem:[#allocation64_spill] sm:$0xff] }
 0x5ed   : > { %v12377_v51 = vpop.xlane.xlu1 %3206 }
 0x5ee   : > { %9277 = vpow2.f32 %v3435_v22  ;;  %v3321_v22 = vsub.f32 %v16193_v36, %v3219_v6  ;;  %v3337_v36 = vsub.f32 %v11318_v44, %v12218_v43 }
 0x5ef   : > { %9279 = vpow2.f32 %v3465_v29 }
 0x5f0   : > { %4714 = vmax.xlane.f32.xlu0 %v4713_v31  ;;  %v12359_v60 = vpop.xlane.xlu0 %1988  ;;  %9281 = vpow2.f32 %v3467_v5  ;;  %v3429_v6 = vmul.f32 1.442695, %v3321_v22  ;;  %v16319_v5 = vld [vmem:[#allocation48_spill] sm:$0xff]  ;;  %v3461_v43 = vmul.f32 1.442695, %v3337_v36  ;;  %v3338_v22 = vsub.f32 %v11338_v61, %v12236_v40 }
 0x5f2   : > { %v12361_v45 = vpop.eup %9267  ;;  %9283 = vpow2.f32 %v3429_v6  ;;  %v3463_v36 = vmul.f32 1.442695, %v3338_v22 }
 0x5f3   : > { %16308 = vst [vmem:[#allocation74_spill] sm:$0xff] %v12361_v45  ;;  %v3469_v58 = vsel %vm1022_vm9, %v12361_v45, 0.0  ;;  %v12371_v8 = vpop.eup %9269  ;;  %v4704_v45 = vsel %vm1022_vm9, %v16316_v19, -inf  ;;  %v4752_v19 = vsel %vm1022_vm9, %v12207_v3, -inf }
 0x5f4   : > { %16311 = vst [vmem:[#allocation62_spill] sm:$0xff] %v12371_v8  ;;  %4762 = vmax.xlane.f32.xlu0 %v4761_v1  ;;  %3470 = vadd.xlane.f32.xlu1 %v3469_v58  ;;  %v12373_v31 = vpop.xlane.xlu0 %2036  ;;  %v3472_v57 = vsel %vm1022_vm9, %v12371_v8, 0.0  ;;  %v12389_v1 = vpop.f32.mrf.mxu1 }
 0x5f5   : > { %16315 = vst [vmem:[#allocation115_spill] sm:$0xff] %v12389_v1  ;;  %v12396_v8 = vpop.xlane.xlu1 %3254 }
 0x5f6   : > { %v12375_v28 = vpop.eup %9271  ;;  %v12402_v35 = vpop.f32.mrf.mxu1 }
 0x5f7   : > { %16312 = vst [vmem:[#allocation79_spill] sm:$0xff] %v12375_v28  ;;  %v3517_v26 = vsel %vm1022_vm9, %v12375_v28, 0.0  ;;  %v12385_v9 = vpop.eup %9273 }
 0x5f8   : > { %16314 = vst [vmem:[#allocation26_spill] sm:$0xff] %v12385_v9  ;;  %3473 = vadd.xlane.f32.xlu0 %v3472_v57  ;;  %3518 = vadd.xlane.f32.xlu1 %v3517_v26  ;;  %v12387_v58 = vpop.xlane.xlu0 %3209  ;;  %v3520_v29 = vsel %vm1022_vm9, %v12385_v9, 0.0  ;;  %v16317_v57 = vld [vmem:[#allocation103_spill] sm:$0xff]  ;;  %v4707_v9 = vsel %vm1022_vm9, %v16319_v5, -inf  ;;  %v12410_v23 = vpop.eup %9275 }
 0x5f9   : > { %v3322_v26 = vsub.f32 %v16317_v57, %v12201_v48  ;;  %16318 = vst [vmem:[#allocation103_spill] sm:$0xff] %v12402_v35  ;;  %16320 = vst [vmem:[#allocation147_spill] sm:$0xff] %v12410_v23  ;;  %v12418_v44 = vpop.f32.mrf.mxu1  ;;  %v3607_v3 = vsel %vm1022_vm9, %v12410_v23, 0.0 }
 0x5fa   : > { %16323 = vst [vmem:[#allocation150_spill] sm:$0xff] %v12418_v44 }
 0x5fb   : > { %v3431_v48 = vmul.f32 1.442695, %v3322_v26  ;;  %v12416_v57 = vpop.eup %9277  ;;  %v12430_v26 = vpop.f32.mrf.mxu1 }
 0x5fc   : > { %3521 = vadd.xlane.f32.xlu0 %v3520_v29  ;;  %4705 = vmax.xlane.f32.xlu1 %v4704_v45  ;;  %v12400_v28 = vpop.xlane.xlu0 %3257  ;;  %v4755_v29 = vsel %vm1022_vm9, %v12232_v33, -inf  ;;  %16322 = vst [vmem:[#allocation149_spill] sm:$0xff] %v12416_v57  ;;  %v12424_v5 = vpop.eup %9279  ;;  %16326 = vst [vmem:[#allocation153_spill] sm:$0xff] %v12430_v26  ;;  %v3610_v61 = vsel %vm1022_vm9, %v12416_v57, 0.0 }
 0x5fd   : > { %16324 = vst [vmem:[#allocation151_spill] sm:$0xff] %v12424_v5  ;;  %9285 = vpow2.f32 %v3431_v48  ;;  %v3655_v40 = vsel %vm1022_vm9, %v12424_v5, 0.0  ;;  %v12436_v6 = vpop.eup %9281  ;;  %v3319_v48 = vsub.f32 %v16169_v49, %v12307_v21  ;;  %v16331_v49 = vld [vmem:[#allocation53_spill] sm:$0xff] }
 0x5fe   : > { %9287 = vpow2.f32 %v3461_v43  ;;  %16327 = vst [vmem:[#allocation154_spill] sm:$0xff] %v12436_v6  ;;  %v16329_v43 = vld [vmem:[#allocation44_spill] sm:$0xff]  ;;  %v4701_v21 = vsel %vm1022_vm9, %v16331_v49, -inf }
 0x5ff   : > { %9289 = vpow2.f32 %v3463_v36  ;;  %v4698_v22 = vsel %vm1022_vm9, %v16329_v43, -inf  ;;  %v3425_v5 = vmul.f32 1.442695, %v3319_v48  ;;  %v3335_v36 = vsub.f32 %v16174_v32, %v12328_v0  ;;  %v12462_v43 = vpop.eup %9283 }
 0x600   : > { %v12412_v45 = vpop.xlane.xlu1 %3512  ;;  %4708 = vmax.xlane.f32.xlu0 %v4707_v9  ;;  %4753 = vmax.xlane.f32.xlu1 %v4752_v19  ;;  %v12426_v9 = vpop.xlane.xlu0 %3515  ;;  %16332 = vst [vmem:[#allocation157_spill] sm:$0xff] %v12462_v43  ;;  %v3601_v49 = vsel %vm1022_vm9, %v12462_v43, 0.0 }
 0x601   : > { %16321 = vst [vmem:[#allocation148_spill] sm:$0xff] %v12412_v45  ;;  %16325 = vst [vmem:[#allocation152_spill] sm:$0xff] %v12426_v9  ;;  %9291 = vpow2.f32 %v3425_v5  ;;  %v3457_v0 = vmul.f32 1.442695, %v3335_v36 }
 0x604   : > { %v12428_v19 = vpop.xlane.xlu1 %3560  ;;  %4756 = vmax.xlane.f32.xlu0 %v4755_v29  ;;  %3608 = vadd.xlane.f32.xlu1 %v3607_v3  ;;  %v12442_v3 = vpop.f32.mrf.mxu1  ;;  %v3658_v29 = vsel %vm1022_vm9, %v12436_v6, 0.0  ;;  %v4746_v6 = vsel %vm1022_vm9, %v12139_v42, -inf  ;;  %v3336_v42 = vsub.f32 %v16194_v13, %v12347_v12 }
 0x605   : > { %16328 = vst [vmem:[#allocation155_spill] sm:$0xff] %v12442_v3 }
 0x606   : > { %v12454_v57 = vpop.f32.mrf.mxu1  ;;  %v3459_v5 = vmul.f32 1.442695, %v3336_v42 }
 0x607   : > { %16330 = vst [vmem:[#allocation156_spill] sm:$0xff] %v12454_v57 }
 0x608   : > { %3611 = vadd.xlane.f32.xlu0 %v3610_v61  ;;  %3656 = vadd.xlane.f32.xlu1 %v3655_v40  ;;  %v12438_v23 = vpop.xlane.xlu0 %3563  ;;  %v12440_v9 = vpop.xlane.xlu1 %3200  ;;  %v3320_v40 = vsub.f32 %v16172_v63, %v12317_v18  ;;  %v4749_v18 = vsel %vm1022_vm9, %v12166_v59, -inf }
 0x609   : > { %v12472_v32 = vpop.f32.mrf.mxu1 }
 0x60a   : > { %v3427_v63 = vmul.f32 1.442695, %v3320_v40  ;;  %v12470_v48 = vpop.eup %9285  ;;  %16334 = vst [vmem:[#allocation159_spill] sm:$0xff] %v12472_v32 }
 0x60b   : > { %16333 = vst [vmem:[#allocation158_spill] sm:$0xff] %v12470_v48  ;;  %v12484_v59 = vpop.f32.mrf.mxu1  ;;  %v3604_v36 = vsel %vm1022_vm9, %v12470_v48, 0.0 }
 0x60c   : > { %3659 = vadd.xlane.f32.xlu0 %v3658_v29  ;;  %4699 = vmax.xlane.f32.xlu1 %v4698_v22  ;;  %v12450_v61 = vpop.xlane.xlu0 %3203  ;;  %v12464_v29 = vpop.xlane.xlu1 %3248  ;;  %9293 = vpow2.f32 %v3427_v63  ;;  %16338 = vst [vmem:[#allocation163_spill] sm:$0xff] %v12484_v59  ;;  %v3317_v63 = vsub.f32 %v16186_v16, %v12377_v51  ;;  %v3318_v16 = vsub.f32 %v16198_v37, %v12387_v58  ;;  %v16345_v51 = vld [vmem:[#allocation143_spill] sm:$0xff] }
 0x60d   : > { %9295 = vpow2.f32 %v3457_v0  ;;  %v16343_v0 = vld [vmem:[#allocation84_spill] sm:$0xff] }
 0x60e   : > { %9297 = vpow2.f32 %v3459_v5  ;;  %v4692_v48 = vsel %vm1022_vm9, %v16343_v0, -inf  ;;  %v4695_v5 = vsel %vm1022_vm9, %v16345_v51, -inf  ;;  %v3423_v58 = vmul.f32 1.442695, %v3318_v16 }
 0x610   : > { %4702 = vmax.xlane.f32.xlu0 %v4701_v21  ;;  %4747 = vmax.xlane.f32.xlu1 %v4746_v6  ;;  %v12466_v22 = vpop.xlane.xlu0 %3251  ;;  %v12478_v21 = vpop.eup %9287 }
 0x611   : > { %16335 = vst [vmem:[#allocation160_spill] sm:$0xff] %v12478_v21  ;;  %v3649_v13 = vsel %vm1022_vm9, %v12478_v21, 0.0  ;;  %v12490_v12 = vpop.eup %9289 }
 0x612   : > { %16339 = vst [vmem:[#allocation164_spill] sm:$0xff] %v12490_v12  ;;  %v3652_v42 = vsel %vm1022_vm9, %v12490_v12, 0.0  ;;  %v4740_v12 = vsel %vm1022_vm9, %v12150_v56, -inf  ;;  %v12518_v0 = vpop.eup %9291  ;;  %v3334_v56 = vsub.f32 %v16201_v17, %v12400_v28 }
 0x613   : > { %16346 = vst [vmem:[#allocation169_spill] sm:$0xff] %v12518_v0  ;;  %v3595_v51 = vsel %vm1022_vm9, %v12518_v0, 0.0 }
 0x614   : > { %v12480_v6 = vpop.xlane.xlu1 %3506  ;;  %4750 = vmax.xlane.f32.xlu0 %v4749_v18  ;;  %3602 = vadd.xlane.f32.xlu1 %v3601_v49  ;;  %v12482_v40 = vpop.xlane.xlu0 %3509 }
 0x615   : > { %16336 = vst [vmem:[#allocation161_spill] sm:$0xff] %v12480_v6  ;;  %16337 = vst [vmem:[#allocation162_spill] sm:$0xff] %v12482_v40  ;;  %v12496_v18 = vpop.f32.mrf.mxu1  ;;  %v3421_v6 = vmul.f32 1.442695, %v3317_v63 }
 0x616   : > { %16342 = vst [vmem:[#allocation167_spill] sm:$0xff] %v12496_v18 }
 0x617   : > { %v12510_v40 = vpop.f32.mrf.mxu1  ;;  %9299 = vpow2.f32 %v3421_v6  ;;  %v3455_v6 = vmul.f32 1.442695, %v3334_v56 }
 0x618   : > { %v12492_v43 = vpop.xlane.xlu1 %3554  ;;  %3605 = vadd.xlane.f32.xlu0 %v3604_v36  ;;  %3650 = vadd.xlane.f32.xlu1 %v3649_v13  ;;  %v12494_v49 = vpop.xlane.xlu0 %3557  ;;  %v3333_v13 = vsub.f32 %v16189_v14, %v12396_v8  ;;  %16344 = vst [vmem:[#allocation168_spill] sm:$0xff] %v12510_v40  ;;  %v4743_v8 = vsel %vm1022_vm9, %v12183_v24, -inf }
 0x619   : > { %16340 = vst [vmem:[#allocation165_spill] sm:$0xff] %v12492_v43  ;;  %16341 = vst [vmem:[#allocation166_spill] sm:$0xff] %v12494_v49  ;;  %v12526_v63 = vpop.eup %9293  ;;  %v12528_v37 = vpop.f32.mrf.mxu1 }
 0x61a   : > { %v3453_v14 = vmul.f32 1.442695, %v3333_v13  ;;  %16347 = vst [vmem:[#allocation170_spill] sm:$0xff] %v12526_v63  ;;  %16348 = vst [vmem:[#allocation171_spill] sm:$0xff] %v12528_v37  ;;  %v3598_v16 = vsel %vm1022_vm9, %v12526_v63, 0.0 }
 0x61b   : > { %v12540_v24 = vpop.f32.mrf.mxu1 }
 0x61c   : > { %v12504_v21 = vpop.xlane.xlu1 %3194  ;;  %3653 = vadd.xlane.f32.xlu0 %v3652_v42  ;;  %4693 = vmax.xlane.f32.xlu1 %v4692_v48  ;;  %v12506_v36 = vpop.xlane.xlu0 %3197  ;;  %9301 = vpow2.f32 %v3453_v14  ;;  %v16356_v14 = vld [vmem:[#allocation71_spill] sm:$0xff] }
 0x61d   : > { %9303 = vpow2.f32 %v3423_v58  ;;  %v4686_v56 = vsel %vm1022_vm9, %v16356_v14, -inf  ;;  %v3314_v59 = vsub.f32 %v16393_v38, %v12506_v36 }
 0x61e   : > { %9305 = vpow2.f32 %v3455_v6 }
 0x620   : > { %v12520_v48 = vpop.xlane.xlu1 %3242  ;;  %4696 = vmax.xlane.f32.xlu0 %v4695_v5  ;;  %4741 = vmax.xlane.f32.xlu1 %v4740_v12  ;;  %v12522_v42 = vpop.xlane.xlu0 %3245 }
 0x621   : > { %v12534_v5 = vpop.eup %9295 }
 0x622   : > { %16349 = vst [vmem:[#allocation172_spill] sm:$0xff] %v12534_v5  ;;  %v3643_v17 = vsel %vm1022_vm9, %v12534_v5, 0.0  ;;  %v12546_v28 = vpop.eup %9297 }
 0x623   : > { %16352 = vst [vmem:[#allocation175_spill] sm:$0xff] %v12546_v28  ;;  %v3646_v58 = vsel %vm1022_vm9, %v12546_v28, 0.0 }
 0x624   : > { %v12536_v12 = vpop.xlane.xlu1 %3500  ;;  %4744 = vmax.xlane.f32.xlu0 %v4743_v8  ;;  %3596 = vadd.xlane.f32.xlu1 %v3595_v51  ;;  %v12538_v13 = vpop.xlane.xlu0 %3503 }
 0x625   : > { %16350 = vst [vmem:[#allocation173_spill] sm:$0xff] %v12536_v12  ;;  %16351 = vst [vmem:[#allocation174_spill] sm:$0xff] %v12538_v13  ;;  %v12552_v8 = vpop.f32.mrf.mxu1  ;;  %v12568_v12 = vpop.eup %9299 }
 0x626   : > { %16355 = vst [vmem:[#allocation178_spill] sm:$0xff] %v12552_v8  ;;  %16359 = vst [vmem:[#allocation180_spill] sm:$0xff] %v12568_v12 }
 0x627   : > { %v12562_v13 = vpop.f32.mrf.mxu1 }
 0x628   : > { %v12548_v0 = vpop.xlane.xlu1 %3548  ;;  %3599 = vadd.xlane.f32.xlu0 %v3598_v16  ;;  %3644 = vadd.xlane.f32.xlu1 %v3643_v17  ;;  %v12550_v51 = vpop.xlane.xlu0 %3551  ;;  %16357 = vst [vmem:[#allocation179_spill] sm:$0xff] %v12562_v13  ;;  %v4734_v16 = vsel %vm1022_vm9, %v12083_v15, -inf  ;;  %v16358_v17 = vld [vmem:[#allocation141_spill] sm:$0xff]  ;;  %v3589_v13 = vsel %vm1022_vm9, %v12568_v12, 0.0  ;;  %v4737_v15 = vsel %vm1022_vm9, %v12110_v4, -inf }
 0x629   : > { %16353 = vst [vmem:[#allocation176_spill] sm:$0xff] %v12548_v0  ;;  %16354 = vst [vmem:[#allocation177_spill] sm:$0xff] %v12550_v51  ;;  %v4689_v6 = vsel %vm1022_vm9, %v16358_v17, -inf  ;;  %v16366_v0 = vld [vmem:[#allocation93_spill] sm:$0xff] }
 0x62a   : > { %v3315_v49 = vsub.f32 %v16366_v0, %v12440_v9 }
 0x62c   : > { %v12558_v63 = vpop.xlane.xlu1 %3188  ;;  %4687 = vmax.xlane.f32.xlu1 %v4686_v56  ;;  %3647 = vadd.xlane.f32.xlu0 %v3646_v58  ;;  %v12560_v5 = vpop.xlane.xlu0 %3191 }
 0x62d   : > { %v12574_v56 = vpop.eup %9301  ;;  %v12576_v58 = vpop.f32.mrf.mxu1 }
 0x62e   : > { %16360 = vst [vmem:[#allocation181_spill] sm:$0xff] %v12574_v56  ;;  %16361 = vst [vmem:[#allocation182_spill] sm:$0xff] %v12576_v58  ;;  %v12582_v51 = vpop.eup %9303  ;;  %v3637_v58 = vsel %vm1022_vm9, %v12574_v56, 0.0 }
 0x62f   : > { %16362 = vst [vmem:[#allocation183_spill] sm:$0xff] %v12582_v51  ;;  %v3592_v12 = vsel %vm1022_vm9, %v12582_v51, 0.0  ;;  %v12596_v4 = vpop.eup %9305 }
 0x630   : > { %v12570_v14 = vpop.xlane.xlu1 %3236  ;;  %4735 = vmax.xlane.f32.xlu1 %v4734_v16  ;;  %4690 = vmax.xlane.f32.xlu0 %v4689_v6  ;;  %v12572_v28 = vpop.xlane.xlu0 %3239  ;;  %16367 = vst [vmem:[#allocation93_spill] sm:$0xff] %v12596_v4  ;;  %v3640_v0 = vsel %vm1022_vm9, %v12596_v4, 0.0  ;;  %v16376_v4 = vld [vmem:[#allocation67_spill] sm:$0xff] }
 0x631   : > { %v12588_v6 = vpop.f32.mrf.mxu1  ;;  %v4683_v45 = vsel %vm1022_vm9, %v16376_v4, -inf  ;;  %v16383_v4 = vld [vmem:[#allocation88_spill] sm:$0xff] }
 0x632   : > { %16365 = vst [vmem:[#allocation186_spill] sm:$0xff] %v12588_v6  ;;  %v3417_v6 = vmul.f32 1.442695, %v3315_v49 }
 0x634   : > { %v12584_v17 = vpop.xlane.xlu1 %3494  ;;  %3590 = vadd.xlane.f32.xlu1 %v3589_v13  ;;  %4738 = vmax.xlane.f32.xlu0 %v4737_v15  ;;  %v12586_v16 = vpop.xlane.xlu0 %3497  ;;  %9307 = vpow2.f32 %v3417_v6 }
 0x635   : > { %16363 = vst [vmem:[#allocation184_spill] sm:$0xff] %v12584_v17  ;;  %16364 = vst [vmem:[#allocation185_spill] sm:$0xff] %v12586_v16  ;;  %v12602_v13 = vpop.f32.mrf.mxu1  ;;  %v16371_v16 = vld [vmem:[#allocation108_spill] sm:$0xff] }
 0x636   : > { %16370 = vst [vmem:[#allocation189_spill] sm:$0xff] %v12602_v13  ;;  %v3331_v9 = vsub.f32 %v16371_v16, %v12464_v29 }
 0x637   : > { %v12612_v17 = vpop.f32.mrf.mxu1 }
 0x638   : > { %v12598_v43 = vpop.xlane.xlu1 %3542  ;;  %3638 = vadd.xlane.f32.xlu1 %v3637_v58  ;;  %3593 = vadd.xlane.f32.xlu0 %v3592_v12  ;;  %v12600_v15 = vpop.xlane.xlu0 %3545  ;;  %16372 = vst [vmem:[#allocation108_spill] sm:$0xff] %v12612_v17  ;;  %v3449_v12 = vmul.f32 1.442695, %v3331_v9  ;;  %v16373_v58 = vld [vmem:[#allocation110_spill] sm:$0xff] }
 0x639   : > { %16368 = vst [vmem:[#allocation187_spill] sm:$0xff] %v12598_v43  ;;  %16369 = vst [vmem:[#allocation188_spill] sm:$0xff] %v12600_v15  ;;  %v3332_v15 = vsub.f32 %v16373_v58, %v12466_v22  ;;  %v16374_v43 = vld [vmem:[#allocation140_spill] sm:$0xff]  ;;  %v12622_v16 = vpop.f32.mrf.mxu1 }
 0x63a   : > { %v4680_v49 = vsel %vm1022_vm9, %v16374_v43, -inf  ;;  %16375 = vst [vmem:[#allocation110_spill] sm:$0xff] %v12622_v16  ;;  %9309 = vpow2.f32 %v3449_v12  ;;  %v764_v22 = vld [vmem:[%s15463_s4 + $0x40] sm:$0xff] }
 0x63b   : > { %v16379_v58 = vld [vmem:[#allocation100_spill] sm:$0xff]  ;;  %v12635_v43 = vpop.f32.mrf.mxu1 }
 0x63c   : > { %v12608_v56 = vpop.xlane.xlu1 %3182  ;;  %3641 = vadd.xlane.f32.xlu0 %v3640_v0  ;;  %v12610_v51 = vpop.xlane.xlu0 %3185  ;;  %v3451_v0 = vmul.f32 1.442695, %v3332_v15  ;;  %16380 = vst [vmem:[#allocation192_spill] sm:$0xff] %v12635_v43 }
 0x63e   : > { %9311 = vpow2.f32 %v3451_v0  ;;  %v12648_v0 = vpop.f32.mrf.mxu1 }
 0x63f   : > { %16385 = vst [vmem:[#allocation196_spill] sm:$0xff] %v12648_v0 }
 0x640   : > { %v12618_v8 = vpop.xlane.xlu1 %3230  ;;  %4681 = vmax.xlane.f32.xlu0 %v4680_v49  ;;  %v12620_v29 = vpop.xlane.xlu0 %3233  ;;  %v4728_v49 = vsel %vm1022_vm9, %v16379_v58, -inf }
 0x644   : > { %v12626_v6 = vpop.xlane.xlu1 %3488  ;;  %4684 = vmax.xlane.f32.xlu0 %v4683_v45  ;;  %v12628_v9 = vpop.xlane.xlu0 %3491  ;;  %v766_v45 = vld [vmem:[%s15463_s4 + $0x50] sm:$0xff] }
 0x645   : > { %16377 = vst [vmem:[#allocation190_spill] sm:$0xff] %v12626_v6  ;;  %16378 = vst [vmem:[#allocation191_spill] sm:$0xff] %v12628_v9  ;;  %v4731_v9 = vsel %vm1022_vm9, %v16383_v4, -inf  ;;  %v12646_v6 = vpop.eup %9307  ;;  %v16388_v4 = vld [vmem:[#allocation94_spill] sm:$0xff] }
 0x646   : > { %16384 = vst [vmem:[#allocation195_spill] sm:$0xff] %v12646_v6  ;;  %v3313_v43 = vsub.f32 %v16388_v4, %v12504_v21 }
 0x648   : > { %v12637_v12 = vpop.xlane.xlu1 %3536  ;;  %4729 = vmax.xlane.f32.xlu0 %v4728_v49  ;;  %v12639_v15 = vpop.xlane.xlu0 %3539  ;;  %v3413_v44 = vmul.f32 1.442695, %v3313_v43  ;;  %v4818_v43 = vsel %vm1022_vm9, %v12496_v18, -inf }
 0x649   : > { %16381 = vst [vmem:[#allocation193_spill] sm:$0xff] %v12637_v12  ;;  %16382 = vst [vmem:[#allocation194_spill] sm:$0xff] %v12639_v15  ;;  %810 = vperm.xlu1 %8976, %v764_v22   ;;  %v3583_v22 = vsel %vm1022_vm9, %v12646_v6, 0.0  ;;  %v12656_v49 = vpop.eup %9309  ;;  %v12658_v15 = vpop.f32.mrf.mxu1 }
 0x64a   : > { %16386 = vst [vmem:[#allocation197_spill] sm:$0xff] %v12656_v49  ;;  %16387 = vst [vmem:[#allocation198_spill] sm:$0xff] %v12658_v15  ;;  %v3631_v26 = vsel %vm1022_vm9, %v12656_v49, 0.0  ;;  %9313 = vpow2.f32 %v3413_v44  ;;  %v3415_v49 = vmul.f32 1.442695, %v3314_v59 }
 0x64c   : > { %v12650_v58 = vpop.xlane.xlu1 %4723  ;;  %4732 = vmax.xlane.f32.xlu0 %v4731_v9  ;;  %v12652_v12 = vpop.xlane.xlu0 %4726  ;;  %9315 = vpow2.f32 %v3415_v49  ;;  %v16400_v49 = vld [vmem:[#allocation89_spill] sm:$0xff] }
 0x64d   : > { %820 = vperm.xlu1 %8976, %v766_v45   ;;  %v12666_v9 = vpop.eup %9311  ;;  %v12668_v45 = vpop.f32.mrf.mxu1 }
 0x64e   : > { %16389 = vst [vmem:[#allocation94_spill] sm:$0xff] %v12666_v9  ;;  %16390 = vst [vmem:[#allocation199_spill] sm:$0xff] %v12668_v45  ;;  %v16395_v45 = vld [vmem:[#allocation109_spill] sm:$0xff] }
 0x64f   : > { %v12678_v4 = vpop.f32.mrf.mxu1 }
 0x650   : > { %v12660_v33 = vpop.xlane.xlu1 %4771  ;;  %3584 = vadd.xlane.f32.xlu0 %v3583_v22  ;;  %v12672_v6 = vpop.xlane.xlu0 %4774  ;;  %v3634_v22 = vsel %vm1022_vm9, %v12666_v9, 0.0  ;;  %16394 = vst [vmem:[#allocation96_spill] sm:$0xff] %v12678_v4 }
 0x651   : > { %16392 = vst [vmem:[#allocation201_spill] sm:$0xff] %v12672_v6  ;;  %v12688_v6 = vpop.f32.mrf.mxu1 }
 0x652   : > { %16397 = vst [vmem:[#allocation202_spill] sm:$0xff] %v12688_v6 }
 0x653   : > { %v12694_v44 = vpop.f32.mrf.mxu1 }
 0x654   : > { %v12670_v16 = vpop.xlane.xlu1 %3482  ;;  %3632 = vadd.xlane.f32.xlu0 %v3631_v26  ;;  %v12684_v26 = vpop.xlane.xlu0 %3485  ;;  %16398 = vst [vmem:[#allocation203_spill] sm:$0xff] %v12694_v44 }
 0x655   : > { %16391 = vst [vmem:[#allocation200_spill] sm:$0xff] %v12670_v16  ;;  %v3329_v16 = vsub.f32 %v16395_v45, %v12520_v48  ;;  %16396 = vst [vmem:[#allocation109_spill] sm:$0xff] %v12684_v26  ;;  %v4866_v45 = vsel %vm1022_vm9, %v12688_v6, -inf  ;;  %v12702_v9 = vpop.f32.mrf.mxu1  ;;  %v3327_v6 = vsub.f32 %v16267_v39, %v12570_v14 }
 0x656   : > { %16399 = vst [vmem:[#allocation204_spill] sm:$0xff] %v12702_v9 }
 0x657   : > { %v3445_v36 = vmul.f32 1.442695, %v3329_v16  ;;  %v3311_v16 = vsub.f32 %v16400_v49, %v12558_v63  ;;  %v12712_v18 = vpop.eup %9313 }
 0x658   : > { %v12680_v21 = vpop.xlane.xlu1 %3530  ;;  %3635 = vadd.xlane.f32.xlu0 %v3634_v22  ;;  %v4821_v22 = vsel %vm1022_vm9, %v12528_v37, -inf  ;;  %v12696_v59 = vpop.xlane.xlu0 %3533  ;;  %16402 = vst [vmem:[#allocation205_spill] sm:$0xff] %v12712_v18 }
 0x659   : > { %9317 = vpow2.f32 %v3445_v36  ;;  %v3409_v36 = vmul.f32 1.442695, %v3311_v16  ;;  %v12718_v26 = vpop.eup %9315 }
 0x65a   : > { %16403 = vst [vmem:[#allocation206_spill] sm:$0xff] %v12718_v26 }
 0x65b   : > { %9319 = vpow2.f32 %v3409_v36  ;;  %v4812_v36 = vsel %vm1022_vm9, %v12510_v40, -inf }
 0x65c   : > { %v12690_v38 = vpop.xlane.xlu1 %4717  ;;  %4819 = vmax.xlane.f32.xlu0 %v4818_v43  ;;  %v12706_v43 = vpop.xlane.xlu0 %4720 }
 0x660   : > { %4822 = vmax.xlane.f32.xlu0 %v4821_v22  ;;  %v12698_v48 = vpop.xlane.xlu1 %4765  ;;  %v4869_v22 = vsel %vm1022_vm9, %v12702_v9, -inf  ;;  %v12720_v63 = vpop.xlane.xlu0 %4768  ;;  %v3580_v9 = vsel %vm1022_vm9, %v12718_v26, 0.0  ;;  %v3325_v26 = vsub.f32 %v16281_v53, %v12618_v8 }
 0x664   : > { %4867 = vmax.xlane.f32.xlu0 %v4866_v45  ;;  %v12708_v37 = vpop.xlane.xlu1 %3476  ;;  %v3577_v45 = vsel %vm1022_vm9, %v12712_v18, 0.0 }
 0x665   : > { %16401 = vst [vmem:[#allocation89_spill] sm:$0xff] %v12708_v37  ;;  %v3441_v37 = vmul.f32 1.442695, %v3327_v6  ;;  %v3309_v6 = vsub.f32 %v16275_v10, %v12608_v56  ;;  %v3437_v56 = vmul.f32 1.442695, %v3325_v26  ;;  %v4886_v26 = vsub.f32 %v11847_v34, %v12650_v58 }
 0x667   : > { %9321 = vpow2.f32 %v3441_v37  ;;  %v3405_v37 = vmul.f32 1.442695, %v3309_v6 }
 0x668   : > { %4870 = vmax.xlane.f32.xlu0 %v4869_v22  ;;  %v12722_v49 = vpop.xlane.xlu1 %3524  ;;  %v12726_v22 = vpop.eup %9317 }
 0x669   : > { %16404 = vst [vmem:[#allocation207_spill] sm:$0xff] %v12726_v22  ;;  %v3625_v14 = vsel %vm1022_vm9, %v12726_v22, 0.0  ;;  %v12748_v22 = vpop.eup %9319  ;;  %9323 = vpow2.f32 %v3405_v37  ;;  %v4806_v37 = vsel %vm1022_vm9, %v12442_v3, -inf }
 0x66a   : > { %16406 = vst [vmem:[#allocation209_spill] sm:$0xff] %v12748_v22  ;;  %9325 = vpow2.f32 %v3437_v56  ;;  %v4964_v56 = vmul.f32 1.442695, %v4886_v26 }
 0x66c   : > { %3578 = vadd.xlane.f32.xlu0 %v3577_v45  ;;  %v12730_v39 = vpop.xlane.xlu1 %4711  ;;  %9327 = vpow2.f32 %v4964_v56  ;;  %v4800_v56 = vsel %vm1022_vm9, %v12454_v57, -inf }
 0x670   : > { %3581 = vadd.xlane.f32.xlu0 %v3580_v9  ;;  %v12740_v18 = vpop.xlane.xlu1 %4759 }
 0x671   : > { %v12728_v16 = vpop.xlane.xlu0 %3479 }
 0x672   : > { %16405 = vst [vmem:[#allocation208_spill] sm:$0xff] %v12728_v16 }
 0x674   : > { %3626 = vadd.xlane.f32.xlu0 %v3625_v14  ;;  %v4860_v14 = vsel %vm1022_vm9, %v12694_v44, -inf  ;;  %v12756_v40 = vpop.eup %9321 }
 0x675   : > { %v12734_v45 = vpop.xlane.xlu0 %3527  ;;  %16408 = vst [vmem:[#allocation211_spill] sm:$0xff] %v12756_v40  ;;  %v3619_v8 = vsel %vm1022_vm9, %v12756_v40, 0.0  ;;  %v4902_v40 = vsub.f32 %v12244_v62, %v12660_v33 }
 0x677   : > { %v4996_v58 = vmul.f32 1.442695, %v4902_v40  ;;  %v4884_v40 = vsub.f32 %v11859_v25, %v12690_v38 }
 0x678   : > { %4813 = vmax.xlane.f32.xlu0 %v4812_v36  ;;  %v3571_v36 = vsel %vm1022_vm9, %v12748_v22, 0.0 }
 0x679   : > { %v12742_v9 = vpop.xlane.xlu0 %4714  ;;  %9329 = vpow2.f32 %v4996_v58  ;;  %v4960_v58 = vmul.f32 1.442695, %v4884_v40 }
 0x67b   : > { %9331 = vpow2.f32 %v4960_v58  ;;  %v4794_v58 = vsel %vm1022_vm9, %v12389_v1, -inf }
 0x67c   : > { %4861 = vmax.xlane.f32.xlu0 %v4860_v14 }
 0x67d   : > { %v12750_v16 = vpop.xlane.xlu1 %3470  ;;  %v12752_v10 = vpop.xlane.xlu0 %4762 }
 0x67e   : > { %16407 = vst [vmem:[#allocation210_spill] sm:$0xff] %v12750_v16  ;;  %v12780_v16 = vpop.eup %9323 }
 0x67f   : > { %16412 = vst [vmem:[#allocation215_spill] sm:$0xff] %v12780_v16  ;;  %v12788_v3 = vpop.eup %9325 }
 0x680   : > { %3572 = vadd.xlane.f32.xlu0 %v3571_v36  ;;  %16414 = vst [vmem:[#allocation217_spill] sm:$0xff] %v12788_v3  ;;  %v3613_v33 = vsel %vm1022_vm9, %v12788_v3, 0.0  ;;  %v4900_v3 = vsub.f32 %v12250_v20, %v12698_v48 }
 0x681   : > { %v12758_v6 = vpop.xlane.xlu1 %3518  ;;  %v12760_v53 = vpop.xlane.xlu0 %3473 }
 0x682   : > { %16409 = vst [vmem:[#allocation212_spill] sm:$0xff] %v12758_v6  ;;  %16410 = vst [vmem:[#allocation213_spill] sm:$0xff] %v12760_v53  ;;  %v4992_v38 = vmul.f32 1.442695, %v4900_v3  ;;  %v4882_v3 = vsub.f32 %v11798_v7, %v12730_v39  ;;  %v16450_v6 = vld [vmem:[#allocation50_spill] sm:$0xff] }
 0x684   : > { %3620 = vadd.xlane.f32.xlu0 %v3619_v8  ;;  %v4854_v8 = vsel %vm1022_vm9, %v12648_v0, -inf  ;;  %9333 = vpow2.f32 %v4992_v38  ;;  %v4956_v38 = vmul.f32 1.442695, %v4882_v3 }
 0x685   : > { %v12764_v14 = vpop.xlane.xlu1 %4705  ;;  %v12766_v44 = vpop.xlane.xlu0 %3521 }
 0x686   : > { %16411 = vst [vmem:[#allocation214_spill] sm:$0xff] %v12766_v44  ;;  %9335 = vpow2.f32 %v4956_v38 }
 0x688   : > { %4807 = vmax.xlane.f32.xlu0 %v4806_v37  ;;  %v3565_v37 = vsel %vm1022_vm9, %v12780_v16, 0.0 }
 0x689   : > { %v12772_v36 = vpop.xlane.xlu1 %4753  ;;  %v12774_v22 = vpop.xlane.xlu0 %4708 }
 0x68c   : > { %4855 = vmax.xlane.f32.xlu0 %v4854_v8 }
 0x68d   : > { %v12782_v53 = vpop.xlane.xlu1 %3608  ;;  %v12784_v34 = vpop.xlane.xlu0 %4756 }
 0x68e   : > { %16413 = vst [vmem:[#allocation216_spill] sm:$0xff] %v12782_v53  ;;  %v12812_v53 = vpop.eup %9327 }
 0x68f   : > { %16418 = vst [vmem:[#allocation221_spill] sm:$0xff] %v12812_v53  ;;  %v12820_v57 = vpop.eup %9329 }
 0x690   : > { %3566 = vadd.xlane.f32.xlu0 %v3565_v37  ;;  %16420 = vst [vmem:[#allocation223_spill] sm:$0xff] %v12820_v57  ;;  %v5154_v48 = vsel %vm1022_vm9, %v12820_v57, 0.0  ;;  %v4898_v57 = vsub.f32 %v12197_v52, %v12740_v18  ;;  %v16429_v18 = vld [vmem:[#allocation126_spill] sm:$0xff] }
 0x691   : > { %v12790_v26 = vpop.xlane.xlu1 %3656  ;;  %v12792_v62 = vpop.xlane.xlu0 %3611  ;;  %9337 = vrcp.f32 %v16429_v18 }
 0x692   : > { %16415 = vst [vmem:[#allocation218_spill] sm:$0xff] %v12790_v26  ;;  %16416 = vst [vmem:[#allocation219_spill] sm:$0xff] %v12792_v62  ;;  %v4988_v39 = vmul.f32 1.442695, %v4898_v57  ;;  %v16449_v26 = vld [vmem:[#allocation133_spill] sm:$0xff] }
 0x694   : > { %3614 = vadd.xlane.f32.xlu0 %v3613_v33  ;;  %v4848_v33 = vsel %vm1022_vm9, %v12658_v15, -inf  ;;  %9339 = vpow2.f32 %v4988_v39 }
 0x695   : > { %v12796_v8 = vpop.xlane.xlu1 %4699  ;;  %v12798_v0 = vpop.xlane.xlu0 %3659 }
 0x696   : > { %16417 = vst [vmem:[#allocation220_spill] sm:$0xff] %v12798_v0 }
 0x698   : > { %4801 = vmax.xlane.f32.xlu0 %v4800_v56  ;;  %v5106_v56 = vsel %vm1022_vm9, %v12812_v53, 0.0 }
 0x699   : > { %v12804_v37 = vpop.xlane.xlu1 %4747  ;;  %v12806_v16 = vpop.xlane.xlu0 %4702 }
 0x69c   : > { %4849 = vmax.xlane.f32.xlu0 %v4848_v33 }
 0x69d   : > { %v12814_v62 = vpop.xlane.xlu1 %3602  ;;  %v12816_v25 = vpop.xlane.xlu0 %4750 }
 0x69e   : > { %16419 = vst [vmem:[#allocation222_spill] sm:$0xff] %v12814_v62  ;;  %v12844_v62 = vpop.eup %9331 }
 0x69f   : > { %16424 = vst [vmem:[#allocation227_spill] sm:$0xff] %v12844_v62  ;;  %v12852_v1 = vpop.eup %9333 }
 0x6a0   : > { %5107 = vadd.xlane.f32.xlu0 %v5106_v56  ;;  %16426 = vst [vmem:[#allocation229_spill] sm:$0xff] %v12852_v1 }
 0x6a1   : > { %v12822_v40 = vpop.xlane.xlu1 %3650  ;;  %v12824_v20 = vpop.xlane.xlu0 %3605 }
 0x6a2   : > { %16421 = vst [vmem:[#allocation224_spill] sm:$0xff] %v12822_v40  ;;  %16422 = vst [vmem:[#allocation225_spill] sm:$0xff] %v12824_v20 }
 0x6a4   : > { %5155 = vadd.xlane.f32.xlu0 %v5154_v48  ;;  %v4842_v48 = vsel %vm1022_vm9, %v12602_v13, -inf  ;;  %v16430_v13 = vld [vmem:[#allocation117_spill] sm:$0xff] }
 0x6a5   : > { %v12828_v33 = vpop.xlane.xlu1 %4693  ;;  %v12830_v15 = vpop.xlane.xlu0 %3653  ;;  %9341 = vrcp.f32 %v16430_v13  ;;  %v4836_v13 = vsel %vm1022_vm9, %v12612_v17, -inf  ;;  %v16445_v17 = vld [vmem:[#allocation122_spill] sm:$0xff] }
 0x6a6   : > { %16423 = vst [vmem:[#allocation226_spill] sm:$0xff] %v12830_v15  ;;  %v16448_v15 = vld [vmem:[#allocation146_spill] sm:$0xff] }
 0x6a8   : > { %4795 = vmax.xlane.f32.xlu0 %v4794_v58  ;;  %v5100_v58 = vsel %vm1022_vm9, %v12844_v62, 0.0  ;;  %v16433_v62 = vld [vmem:[#allocation33_spill] sm:$0xff] }
 0x6a9   : > { %v12836_v56 = vpop.xlane.xlu1 %4741  ;;  %v12838_v53 = vpop.xlane.xlu0 %4696  ;;  %9343 = vrcp.f32 %v16433_v62  ;;  %v16439_v62 = vld [vmem:[#allocation125_spill] sm:$0xff] }
 0x6ac   : > { %4843 = vmax.xlane.f32.xlu0 %v4842_v48  ;;  %v5148_v48 = vsel %vm1022_vm9, %v12852_v1, 0.0  ;;  %v16437_v1 = vld [vmem:[#allocation45_spill] sm:$0xff] }
 0x6ad   : > { %v12846_v20 = vpop.xlane.xlu1 %3596  ;;  %v12848_v7 = vpop.xlane.xlu0 %4744 }
 0x6ae   : > { %16425 = vst [vmem:[#allocation228_spill] sm:$0xff] %v12846_v20  ;;  %v16434_v20 = vld [vmem:[#allocation34_spill] sm:$0xff] }
 0x6af   : > { %9345 = vrcp.f32 %v16434_v20 }
 0x6b0   : > { %5101 = vadd.xlane.f32.xlu0 %v5100_v58  ;;  %v4788_v58 = vsel %vm1022_vm9, %v12402_v35, -inf  ;;  %9347 = vrcp.f32 %v16437_v1  ;;  %v16442_v35 = vld [vmem:[#allocation55_spill] sm:$0xff] }
 0x6b1   : > { %v12854_v3 = vpop.xlane.xlu1 %3644  ;;  %v12856_v52 = vpop.xlane.xlu0 %3599  ;;  %9349 = vrcp.f32 %v16439_v62 }
 0x6b2   : > { %16427 = vst [vmem:[#allocation230_spill] sm:$0xff] %v12854_v3  ;;  %16428 = vst [vmem:[#allocation231_spill] sm:$0xff] %v12856_v52  ;;  %v951_v52 = vpop.f32.mrf.mxu0  ;;  %9351 = vrcp.f32 %v16442_v35 }
 0x6b3   : > { %9353 = vrcp.f32 %v16445_v17 }
 0x6b4   : > { %5149 = vadd.xlane.f32.xlu0 %v5148_v48  ;;  %v12877_v48 = vpop.eup %9335  ;;  %v12889_v40 = vpop.f32.mrf.mxu0  ;;  %9355 = vrcp.f32 %v16448_v15 }
 0x6b5   : > { %v12862_v57 = vpop.xlane.xlu1 %4687  ;;  %v12864_v38 = vpop.xlane.xlu0 %3647  ;;  %16438 = vst [vmem:[#allocation45_spill] sm:$0xff] %v12877_v48  ;;  %16444 = vst [vmem:[#allocation233_spill] sm:$0xff] %v12889_v40  ;;  %9357 = vrcp.f32 %v16450_v6  ;;  %v16453_v40 = vld [vmem:[#allocation128_spill] sm:$0xff]  ;;  %v16455_v6 = vld [vmem:[#allocation99_spill] sm:$0xff] }
 0x6b6   : > { %16431 = vst [vmem:[#allocation126_spill] sm:$0xff] %v12862_v57  ;;  %16432 = vst [vmem:[#allocation117_spill] sm:$0xff] %v12864_v38  ;;  %v9338_v20 = vpop.eup %9337  ;;  %v5094_v38 = vsel %vm1022_vm9, %v12877_v48, 0.0  ;;  %9359 = vrcp.f32 %v12315_v55 }
 0x6b7   : > { %v12887_v1 = vpop.eup %9339  ;;  %v2191_v0 = vmul.f32 %v9338_v20, %v16449_v26  ;;  %v16454_v26 = vld [vmem:[#allocation56_spill] sm:$0xff]  ;;  %9361 = vrcp.f32 %v16455_v6 }
 0x6b8   : > { %4789 = vmax.xlane.f32.xlu0 %v4788_v58  ;;  %16443 = vst [vmem:[#allocation55_spill] sm:$0xff] %v12887_v1  ;;  %v5142_v35 = vsel %vm1022_vm9, %v12887_v1, 0.0  ;;  %9363 = vrcp.f32 %v12309_v54  ;;  %v16460_v54 = vld [vmem:[#allocation76_spill] sm:$0xff] }
 0x6b9   : > { %v12870_v18 = vpop.xlane.xlu1 %4735  ;;  %v12872_v39 = vpop.xlane.xlu0 %4690 }
 0x6ba   : > { %16435 = vst [vmem:[#allocation33_spill] sm:$0xff] %v12870_v18  ;;  %16436 = vst [vmem:[#allocation34_spill] sm:$0xff] %v12872_v39 }
 0x6bc   : > { %4837 = vmax.xlane.f32.xlu0 %v4836_v13 }
 0x6bd   : > { %v12880_v3 = vpop.xlane.xlu1 %3590  ;;  %v12882_v58 = vpop.xlane.xlu0 %4738 }
 0x6be   : > { %16440 = vst [vmem:[#allocation125_spill] sm:$0xff] %v12880_v3  ;;  %16441 = vst [vmem:[#allocation232_spill] sm:$0xff] %v12882_v58  ;;  %v9342_v3 = vpop.eup %9341  ;;  %v955_v58 = vpop.f32.mrf.mxu0 }
 0x6bf   : > { %v9344_v48 = vpop.eup %9343  ;;  %v956_v18 = vadd.f32 %v955_v58, %v12288_v27 }
 0x6c0   : > { %5095 = vadd.xlane.f32.xlu0 %v5094_v38  ;;  %v2205_v20 = vmul.f32 %v9344_v48, %v16454_v26  ;;  %v16458_v48 = vld [vmem:[#allocation27_spill] sm:$0xff]  ;;  %v16461_v26 = vld [vmem:[#allocation21_spill] sm:$0xff] }
 0x6c1   : > { %v12892_v13 = vpop.xlane.xlu1 %3638  ;;  %v12894_v62 = vpop.xlane.xlu0 %3593  ;;  %9365 = vrcp.f32 %v16458_v48  ;;  %v16464_v48 = vld [vmem:[#allocation51_spill] sm:$0xff] }
 0x6c2   : > { %16446 = vst [vmem:[#allocation122_spill] sm:$0xff] %v12892_v13  ;;  %16447 = vst [vmem:[#allocation234_spill] sm:$0xff] %v12894_v62  ;;  %v2190_v13 = vmul.f32 %v9342_v3, %v16453_v40  ;;  %v9346_v62 = vpop.eup %9345  ;;  %v16457_v3 = vld [vmem:[#allocation134_spill] sm:$0xff]  ;;  %9367 = vrcp.f32 %v16460_v54 }
 0x6c3   : > { %v9348_v39 = vpop.eup %9347 }
 0x6c4   : > { %5143 = vadd.xlane.f32.xlu0 %v5142_v35  ;;  %v2231_v1 = vpack.c.bf16 %v2191_v0, %v2190_v13  ;;  %v9350_v40 = vpop.eup %9349  ;;  %v16459_v13 = vld [vmem:[#allocation131_spill] sm:$0xff] }
 0x6c5   : > { %v12901_v38 = vpop.permute.xlu1 %810  ;;  %v12903_v17 = vpop.xlane.xlu0 %3641 }
 0x6c6   : > { %16451 = vst [vmem:[#allocation146_spill] sm:$0xff] %v12901_v38  ;;  %16452 = vst [vmem:[#allocation133_spill] sm:$0xff] %v12903_v17  ;;  %v952_v15 = vadd.f32 %v951_v52, %v12901_v38  ;;  %v16456_v17 = vld [vmem:[#allocation136_spill] sm:$0xff]  ;;  %v2316_v55 = vsel %vm1022_vm9, %v2231_v1, 0  ;;  %v2189_v52 = vmul.f32 %v9348_v39, %v16457_v3 }
 0x6c7   : > { %v2204_v57 = vmul.f32 %v9346_v62, %v16456_v17  ;;  %v2188_v62 = vmul.f32 %v9350_v40, %v16459_v13  ;;  %v16465_v40 = vld [vmem:[#allocation47_spill] sm:$0xff] }
 0x6c8   : > { %v12910_v35 = vpack.c.bf16 %v956_v18, %v952_v15  ;;  %v9352_v18 = vpop.eup %9351 }
 0x6c9   : > { %v12913_v44 = vpop.xlane.xlu0 %4681  ;;  %v2238_v0 = vpack.c.bf16 %v2205_v20, %v2204_v57  ;;  %v9354_v17 = vpop.eup %9353  ;;  %v2230_v15 = vpack.c.bf16 %v2189_v52, %v2188_v62  ;;  %v2203_v6 = vmul.f32 %v9352_v18, %v16461_v26  ;;  %v16462_v57 = vld [vmem:[#allocation98_spill] sm:$0xff]  ;;  %v16466_v52 = vld [vmem:[#allocation129_spill] sm:$0xff]  ;;  %v16467_v18 = vld [vmem:[#allocation95_spill] sm:$0xff] }
 0x6ca   : > { %3823 = vrot.lane.b32.xlu1 %v12910_v35, %s10109_s29  ;;  %8342 = vmatprep.mubr.msk.bf16.mxu0 %vm1022_vm9, %v12910_v35  ;;  %v9356_v1 = vpop.eup %9355  ;;  %9369 = vrcp.f32 %v16462_v57  ;;  %v16463_v20 = vld [vmem:[#allocation18_spill] sm:$0xff]  ;;  %v3316_v62 = vsub.f32 %v16467_v18, %v12450_v61 }
 0x6cb   : > { %8343 = vmatmul.mubr.msk.bf16.vlgmr.msra.gmra.mxu0 %vm1022_vm9, %v12910_v35  ;;  %v9358_v3 = vpop.eup %9357  ;;  %9371 = vrcp.f32 %v16464_v48  ;;  %v2187_v13 = vmul.f32 %v9356_v1, %v16465_v40  ;;  %v16469_v1 = vld [vmem:[#allocation118_spill] sm:$0xff] }
 0x6cc   : > { %8347 = vmatpush3.bf16.xpose.msra.mxu0 %v2316_v55  ;;  %v2202_v55 = vmul.f32 %v9354_v17, %v16463_v20  ;;  %v9360_v38 = vpop.eup %9359  ;;  %9373 = vrcp.f32 %v16466_v52  ;;  %v16468_v17 = vld [vmem:[#allocation46_spill] sm:$0xff]  ;;  %v3419_v61 = vmul.f32 1.442695, %v3316_v62 }
 0x6cd   : > { %8885 = vmatprep.subr.msk.bf16.mxu0 %vm1022_vm9, %v2238_v0  ;;  %v12927_v58 = vpop.xlane.xlu0 %4684  ;;  %v2313_v0 = vsel %vm1022_vm9, %v2230_v15, 0  ;;  %v2186_v26 = vmul.f32 %v9358_v3, %v16468_v17  ;;  %v9362_v57 = vpop.eup %9361  ;;  %9375 = vrcp.f32 %v12189_v11  ;;  %v767_v15 = vld [vmem:[%s15463_s4 + $0x58] sm:$0xff]  ;;  %v2200_v20 = vmul.f32 %v9360_v38, %v16469_v1  ;;  %v16471_v3 = vld [vmem:[#allocation22_spill] sm:$0xff]  ;;  %v16473_v17 = vld [vmem:[#allocation49_spill] sm:$0xff] }
 0x6ce   : > { %v2237_v27 = vpack.c.bf16 %v2203_v6, %v2202_v55  ;;  %v9364_v55 = vpop.eup %9363  ;;  %9377 = vrcp.f32 %v12171_v2  ;;  %v2201_v40 = vmul.f32 %v9362_v57, %v16471_v3  ;;  %v16472_v11 = vld [vmem:[#allocation54_spill] sm:$0xff] }
 0x6cf   : > { %v2229_v6 = vpack.c.bf16 %v2187_v13, %v2186_v26  ;;  %v9366_v52 = vpop.eup %9365  ;;  %9379 = vrcp.f32 %v16472_v11  ;;  %v2184_v38 = vmul.f32 %v9364_v55, %v16473_v17  ;;  %v16474_v1 = vld [vmem:[#allocation86_spill] sm:$0xff]  ;;  %v16479_v17 = vld [vmem:[#allocation36_spill] sm:$0xff] }
 0x6d0   : > { %v2236_v13 = vpack.c.bf16 %v2201_v40, %v2200_v20  ;;  %v9368_v26 = vpop.eup %9367  ;;  %9381 = vrcp.f32 %v16474_v1  ;;  %v16475_v62 = vld [vmem:[#allocation42_spill] sm:$0xff]  ;;  %v16481_v1 = vld [vmem:[#allocation52_spill] sm:$0xff] }
 0x6d1   : > { %v12933_v39 = vpop.xlane.xlu0 %4729  ;;  %v2310_v18 = vsel %vm1022_vm9, %v2229_v6, 0  ;;  %9383 = vpow2.f32 %v3419_v61  ;;  %v2185_v57 = vmul.f32 %v9366_v52, %v16475_v62  ;;  %v16476_v6 = vld [vmem:[#allocation43_spill] sm:$0xff] }
 0x6d2   : > { %9385 = vrcp.f32 %v12290_v50  ;;  %v2199_v20 = vmul.f32 %v9368_v26, %v16476_v6  ;;  %v16477_v61 = vld [vmem:[#allocation139_spill] sm:$0xff] }
 0x6d3   : > { %9387 = vrcp.f32 %v12282_v46 }
 0x6d4   : > { %8349 = vmatpush3.bf16.xpose.msra.mxu0 %v2313_v0 }
 0x6d5   : > { %8886 = vmatprep.subr.msk.bf16.mxu0 %vm1022_vm9, %v2237_v27  ;;  %v12943_v54 = vpop.xlane.xlu0 %4732  ;;  %v16470_v27 = vld [vmem:[#allocation111_spill] sm:$0xff] }
 0x6d6   : > { %v3330_v48 = vsub.f32 %v16470_v27, %v12522_v42  ;;  %v2228_v27 = vpack.c.bf16 %v2185_v57, %v2184_v38  ;;  %v16480_v38 = vld [vmem:[#allocation91_spill] sm:$0xff]  ;;  %v16482_v57 = vld [vmem:[#allocation144_spill] sm:$0xff] }
 0x6d7   : > { %v3312_v46 = vsub.f32 %v16480_v38, %v12560_v5 }
 0x6d8   : > { %v3447_v2 = vmul.f32 1.442695, %v3330_v48  ;;  %v2307_v11 = vsel %vm1022_vm9, %v2228_v27, 0 }
 0x6d9   : > { %v12954_v0 = vpop.xlane.xlu0 %3584 }
 0x6da   : > { %825 = vperm.xlu0 %8975, %v767_v15   ;;  %v9370_v15 = vpop.eup %9369  ;;  %9389 = vpow2.f32 %v3447_v2 }
 0x6db   : > { %v9372_v3 = vpop.eup %9371  ;;  %v2198_v48 = vmul.f32 %v9370_v15, %v16477_v61  ;;  %9391 = vrcp.f32 %v12266_v47 }
 0x6dc   : > { %8351 = vmatpush3.bf16.xpose.msra.mxu0 %v2310_v18  ;;  %v9374_v40 = vpop.eup %9373  ;;  %v16478_v18 = vld [vmem:[#allocation23_spill] sm:$0xff]  ;;  %9393 = vrcp.f32 %v16479_v17 }
 0x6dd   : > { %8887 = vmatprep.subr.msk.bf16.mxu0 %vm1022_vm9, %v2236_v13  ;;  %v12962_v42 = vpop.xlane.xlu0 %3632  ;;  %v2235_v52 = vpack.c.bf16 %v2199_v20, %v2198_v48  ;;  %v2183_v13 = vmul.f32 %v9372_v3, %v16478_v18  ;;  %v9376_v50 = vpop.eup %9375  ;;  %v2182_v2 = vmul.f32 %v9374_v40, %v16481_v1  ;;  %9395 = vrcp.f32 %v12373_v31  ;;  %v16483_v3 = vld [vmem:[#allocation106_spill] sm:$0xff]  ;;  %v16485_v18 = vld [vmem:[#allocation85_spill] sm:$0xff] }
 0x6de   : > { %v9378_v62 = vpop.eup %9377  ;;  %v2197_v15 = vmul.f32 %v9376_v50, %v16482_v57  ;;  %9397 = vrcp.f32 %v12357_v41  ;;  %v3411_v20 = vmul.f32 1.442695, %v3312_v46  ;;  %v3328_v5 = vsub.f32 %v16483_v3, %v12572_v28  ;;  %v16484_v48 = vld [vmem:[#allocation38_spill] sm:$0xff] }
 0x6df   : > { %v2227_v47 = vpack.c.bf16 %v2183_v13, %v2182_v2  ;;  %v9380_v27 = vpop.eup %9379  ;;  %9399 = vrcp.f32 %v12359_v60  ;;  %v16486_v60 = vld [vmem:[#allocation68_spill] sm:$0xff] }
 0x6e0   : > { %v9382_v6 = vpop.eup %9381  ;;  %v2181_v13 = vmul.f32 %v9380_v27, %v16485_v18  ;;  %9401 = vrcp.f32 %v12339_v30  ;;  %v3443_v28 = vmul.f32 1.442695, %v3328_v5  ;;  %v16488_v30 = vld [vmem:[#allocation39_spill] sm:$0xff]  ;;  %v4815_v18 = vsel %vm1022_vm9, %v12540_v24, -inf }
 0x6e1   : > { %v12968_v55 = vpop.xlane.xlu0 %3635  ;;  %v2304_v31 = vsel %vm1022_vm9, %v2227_v47, 0  ;;  %9403 = vpow2.f32 %v3411_v20  ;;  %v2180_v46 = vmul.f32 %v9382_v6, %v16486_v60  ;;  %v16489_v27 = vld [vmem:[#allocation119_spill] sm:$0xff]  ;;  %v16493_v60 = vld [vmem:[#allocation114_spill] sm:$0xff] }
 0x6e2   : > { %9405 = vrcp.f32 %v12438_v23  ;;  %v16490_v23 = vld [vmem:[#allocation37_spill] sm:$0xff] }
 0x6e3   : > { %v2226_v2 = vpack.c.bf16 %v2181_v13, %v2180_v46  ;;  %9407 = vrcp.f32 %v12428_v19  ;;  %v16492_v13 = vld [vmem:[#allocation145_spill] sm:$0xff] }
 0x6e4   : > { %8353 = vmatpush3.bf16.xpose.msra.mxu0 %v2307_v11  ;;  %v2196_v11 = vmul.f32 %v9378_v62, %v16484_v48  ;;  %9409 = vpow2.f32 %v3443_v28  ;;  %v13021_v28 = vpop.f32.mrf.mxu1 }
 0x6e5   : > { %8888 = vmatprep.subr.msk.bf16.mxu0 %vm1022_vm9, %v2235_v52  ;;  %v12978_v26 = vpop.xlane.xlu0 %4819  ;;  %v12989_v52 = vpop.eup %9383  ;;  %v2301_v3 = vsel %vm1022_vm9, %v2226_v2, 0 }
 0x6e6   : > { %v2234_v40 = vpack.c.bf16 %v2197_v15, %v2196_v11  ;;  %v9386_v50 = vpop.eup %9385  ;;  %v3586_v38 = vsel %vm1022_vm9, %v12989_v52, 0.0 }
 0x6e7   : > { %v9388_v41 = vpop.eup %9387  ;;  %v2195_v62 = vmul.f32 %v9386_v50, %v16488_v30 }
 0x6e8   : > { %v13001_v1 = vpop.eup %9389  ;;  %v2194_v20 = vmul.f32 %v9388_v41, %v16489_v27  ;;  %v4863_v27 = vsel %vm1022_vm9, %v13021_v28, -inf }
 0x6e9   : > { %v12986_v61 = vpop.xlane.xlu0 %4822  ;;  %16487 = vst [vmem:[#allocation50_spill] sm:$0xff] %v13001_v1  ;;  %v9392_v47 = vpop.eup %9391  ;;  %v3628_v15 = vsel %vm1022_vm9, %v13001_v1, 0.0 }
 0x6ea   : > { %v9394_v6 = vpop.eup %9393  ;;  %v2233_v5 = vpack.c.bf16 %v2195_v62, %v2194_v20  ;;  %v2179_v48 = vmul.f32 %v9392_v47, %v16490_v23  ;;  %v16495_v20 = vld [vmem:[#allocation30_spill] sm:$0xff] }
 0x6eb   : > { %v9396_v11 = vpop.eup %9395  ;;  %v2178_v50 = vmul.f32 %v9394_v6, %v16492_v13 }
 0x6ec   : > { %8355 = vmatpush3.bf16.xpose.msra.mxu0 %v2304_v31  ;;  %v16491_v31 = vld [vmem:[#allocation92_spill] sm:$0xff]  ;;  %v9398_v41 = vpop.eup %9397  ;;  %v2193_v46 = vmul.f32 %v9396_v11, %v16493_v60 }
 0x6ed   : > { %8889 = vmatprep.subr.msk.bf16.mxu0 %vm1022_vm9, %v2234_v40  ;;  %v12996_v17 = vpop.xlane.xlu0 %4867  ;;  %v3310_v19 = vsub.f32 %v16491_v31, %v12610_v51  ;;  %v9400_v2 = vpop.eup %9399  ;;  %v16494_v51 = vld [vmem:[#allocation107_spill] sm:$0xff]  ;;  %v2192_v6 = vmul.f32 %v9398_v41, %v16495_v20 }
 0x6ee   : > { %3587 = vadd.xlane.f32.xlu1 %v3586_v38  ;;  %v2225_v38 = vpack.c.bf16 %v2179_v48, %v2178_v50  ;;  %v9402_v30 = vpop.eup %9401  ;;  %v3326_v47 = vsub.f32 %v16494_v51, %v12620_v29  ;;  %v16497_v48 = vld [vmem:[#allocation97_spill] sm:$0xff] }
 0x6ef   : > { %v3407_v62 = vmul.f32 1.442695, %v3310_v19  ;;  %v2232_v23 = vpack.c.bf16 %v2193_v46, %v2192_v6  ;;  %v2177_v11 = vmul.f32 %v9400_v2, %v16497_v48  ;;  %v16498_v50 = vld [vmem:[#allocation121_spill] sm:$0xff]  ;;  %v4809_v48 = vsel %vm1022_vm9, %v12472_v32, -inf }
 0x6f0   : > { %v3439_v29 = vmul.f32 1.442695, %v3326_v47  ;;  %v2176_v41 = vmul.f32 %v9402_v30, %v16498_v50  ;;  %v16500_v46 = vld [vmem:[#allocation41_spill] sm:$0xff]  ;;  %v16501_v47 = vld [vmem:[#allocation124_spill] sm:$0xff]  ;;  %v16502_v30 = vld [vmem:[#allocation123_spill] sm:$0xff] }
 0x6f1   : > { %v13006_v57 = vpop.xlane.xlu0 %4870  ;;  %9411 = vpow2.f32 %v3407_v62 }
 0x6f2   : > { %3629 = vadd.xlane.f32.xlu1 %v3628_v15  ;;  %9413 = vpow2.f32 %v3439_v29  ;;  %v16505_v29 = vld [vmem:[#allocation137_spill] sm:$0xff] }
 0x6f4   : > { %8357 = vmatpush3.bf16.xpose.msra.mxu0 %v2301_v3  ;;  %v13031_v3 = vpop.eup %9403 }
 0x6f5   : > { %8890 = vmatprep.subr.msk.bf16.mxu0 %vm1022_vm9, %v2233_v5  ;;  %v13016_v40 = vpop.xlane.xlu0 %3578  ;;  %16496 = vst [vmem:[#allocation128_spill] sm:$0xff] %v13031_v3  ;;  %v2298_v5 = vsel %vm1022_vm9, %v2225_v38, 0  ;;  %v9406_v31 = vpop.eup %9405  ;;  %v3574_v13 = vsel %vm1022_vm9, %v13031_v3, 0.0  ;;  %v2224_v38 = vpack.c.bf16 %v2177_v11, %v2176_v41  ;;  %v16507_v41 = vld [vmem:[#allocation199_spill] sm:$0xff] }
 0x6f6   : > { %4816 = vmax.xlane.f32.xlu1 %v4815_v18  ;;  %v9408_v19 = vpop.eup %9407  ;;  %v3756_v2 = vmul.f32 %v9406_v31, %v16500_v46  ;;  %v13057_v11 = vpop.f32.mrf.mxu1 }
 0x6f7   : > { %v13041_v60 = vpop.eup %9409  ;;  %v2295_v20 = vsel %vm1022_vm9, %v2224_v38, 0  ;;  %16503 = vst [vmem:[#allocation99_spill] sm:$0xff] %v13057_v11  ;;  %v4857_v38 = vsel %vm1022_vm9, %v16507_v41, -inf }
 0x6f8   : > { %16499 = vst [vmem:[#allocation56_spill] sm:$0xff] %v13041_v60  ;;  %v3622_v62 = vsel %vm1022_vm9, %v13041_v60, 0.0  ;;  %v13067_v46 = vpop.f32.mrf.mxu1 }
 0x6f9   : > { %v13026_v15 = vpop.xlane.xlu0 %3581  ;;  %16509 = vst [vmem:[#allocation27_spill] sm:$0xff] %v13067_v46 }
 0x6fa   : > { %4864 = vmax.xlane.f32.xlu1 %v4863_v27  ;;  %v3755_v27 = vmul.f32 %v9408_v19, %v16501_v47  ;;  %v16504_v19 = vld [vmem:[#allocation201_spill] sm:$0xff] }
 0x6fc   : > { %8359 = vmatpush3.bf16.xpose.msra.mxu0 %v2298_v5  ;;  %v3804_v6 = vpack.c.bf16 %v3756_v2, %v3755_v27  ;;  %v4887_v5 = vsub.f32 %v16502_v30, %v12652_v12 }
 0x6fd   : > { %8891 = vmatprep.subr.msk.bf16.mxu0 %vm1022_vm9, %v2232_v23  ;;  %v13036_v18 = vpop.xlane.xlu0 %3626 }
 0x6fe   : > { %3575 = vadd.xlane.f32.xlu1 %v3574_v13  ;;  %v4966_v31 = vmul.f32 1.442695, %v4887_v5  ;;  %v4903_v13 = vsub.f32 %v16505_v29, %v16504_v19  ;;  %v13065_v12 = vpop.eup %9411  ;;  %v16515_v29 = vld [vmem:[#allocation163_spill] sm:$0xff] }
 0x6ff   : > { %16508 = vst [vmem:[#allocation134_spill] sm:$0xff] %v13065_v12  ;;  %v3568_v47 = vsel %vm1022_vm9, %v13065_v12, 0.0  ;;  %v13073_v27 = vpop.eup %9413 }
 0x700   : > { %9415 = vpow2.f32 %v4966_v31  ;;  %v4998_v2 = vmul.f32 1.442695, %v4903_v13  ;;  %16510 = vst [vmem:[#allocation131_spill] sm:$0xff] %v13073_v27  ;;  %v3616_v30 = vsel %vm1022_vm9, %v13073_v27, 0.0  ;;  %v4803_v13 = vsel %vm1022_vm9, %v16515_v29, -inf }
 0x701   : > { %v13044_v51 = vpop.xlane.xlu0 %4813 }
 0x702   : > { %3623 = vadd.xlane.f32.xlu1 %v3622_v62  ;;  %9417 = vpow2.f32 %v4998_v2 }
 0x704   : > { %8361 = vmatpush3.bf16.xpose.msra.mxu0 %v2295_v20  ;;  %v13075_v20 = vpop.f32.mrf.mxu1 }
 0x705   : > { %8892 = vmatprep.subr.msk.bf16.mxu0 %vm1022_vm9, %v3804_v6  ;;  %v13053_v23 = vpop.xlane.xlu0 %4861  ;;  %16511 = vst [vmem:[#allocation76_spill] sm:$0xff] %v13075_v20 }
 0x706   : > { %4810 = vmax.xlane.f32.xlu1 %v4809_v48  ;;  %v13081_v5 = vpop.f32.mrf.mxu1  ;;  %v16513_v48 = vld [vmem:[#allocation28_spill] sm:$0xff] }
 0x707   : > { %16512 = vst [vmem:[#allocation21_spill] sm:$0xff] %v13081_v5  ;;  %v4885_v31 = vsub.f32 %v16513_v48, %v12706_v43 }
 0x709   : > { %v13061_v50 = vpop.xlane.xlu0 %3572  ;;  %v4962_v2 = vmul.f32 1.442695, %v4885_v31 }
 0x70a   : > { %16506 = vst [vmem:[#allocation136_spill] sm:$0xff] %v13061_v50  ;;  %4858 = vmax.xlane.f32.xlu1 %v4857_v38  ;;  %v13089_v38 = vpop.f32.mrf.mxu1 }
 0x70b   : > { %16516 = vst [vmem:[#allocation18_spill] sm:$0xff] %v13089_v38  ;;  %9419 = vpow2.f32 %v4962_v2  ;;  %v16594_v38 = vld [vmem:[#allocation59_spill] sm:$0xff] }
 0x70c   : > { %v13099_v43 = vpop.f32.mrf.mxu1 }
 0x70d   : > { %v13069_v62 = vpop.xlane.xlu0 %3620  ;;  %v13097_v5 = vpop.eup %9415  ;;  %16520 = vst [vmem:[#allocation129_spill] sm:$0xff] %v13099_v43 }
 0x70e   : > { %3569 = vadd.xlane.f32.xlu1 %v3568_v47  ;;  %v16517_v47 = vld [vmem:[#allocation104_spill] sm:$0xff]  ;;  %16519 = vst [vmem:[#allocation47_spill] sm:$0xff] %v13097_v5  ;;  %v5109_v31 = vsel %vm1022_vm9, %v13097_v5, 0.0  ;;  %v16528_v5 = vld [vmem:[#allocation150_spill] sm:$0xff] }
 0x70f   : > { %v4901_v46 = vsub.f32 %v16517_v47, %v12720_v63  ;;  %v13107_v63 = vpop.f32.mrf.mxu1  ;;  %v4797_v29 = vsel %vm1022_vm9, %v16528_v5, -inf }
 0x710   : > { %16523 = vst [vmem:[#allocation118_spill] sm:$0xff] %v13107_v63  ;;  %v16592_v63 = vld [vmem:[#allocation72_spill] sm:$0xff] }
 0x711   : > { %v13077_v6 = vpop.xlane.xlu0 %4807  ;;  %v4994_v48 = vmul.f32 1.442695, %v4901_v46  ;;  %v13113_v12 = vpop.f32.mrf.mxu1  ;;  %v16526_v46 = vld [vmem:[#allocation40_spill] sm:$0xff] }
 0x712   : > { %3617 = vadd.xlane.f32.xlu1 %v3616_v30  ;;  %v4851_v30 = vsel %vm1022_vm9, %v12678_v4, -inf  ;;  %16525 = vst [vmem:[#allocation22_spill] sm:$0xff] %v13113_v12  ;;  %v4883_v2 = vsub.f32 %v16526_v46, %v12742_v9 }
 0x713   : > { %9421 = vpow2.f32 %v4994_v48  ;;  %v13121_v27 = vpop.f32.mrf.mxu1 }
 0x714   : > { %16529 = vst [vmem:[#allocation49_spill] sm:$0xff] %v13121_v27  ;;  %v4958_v48 = vmul.f32 1.442695, %v4883_v2 }
 0x715   : > { %v13085_v19 = vpop.xlane.xlu0 %4855  ;;  %v13131_v9 = vpop.f32.mrf.mxu1 }
 0x716   : > { %16514 = vst [vmem:[#allocation98_spill] sm:$0xff] %v13085_v19  ;;  %4804 = vmax.xlane.f32.xlu1 %v4803_v13  ;;  %v13105_v13 = vpop.eup %9417  ;;  %9423 = vpow2.f32 %v4958_v48  ;;  %v16539_v48 = vld [vmem:[#allocation153_spill] sm:$0xff]  ;;  %v16579_v19 = vld [vmem:[#allocation44_spill] sm:$0xff] }
 0x717   : > { %16522 = vst [vmem:[#allocation46_spill] sm:$0xff] %v13105_v13  ;;  %v5157_v4 = vsel %vm1022_vm9, %v13105_v13, 0.0  ;;  %v16532_v13 = vld [vmem:[#allocation110_spill] sm:$0xff] }
 0x718   : > { %v13129_v12 = vpop.eup %9419 }
 0x719   : > { %v13093_v20 = vpop.xlane.xlu0 %3566  ;;  %16533 = vst [vmem:[#allocation42_spill] sm:$0xff] %v13129_v12 }
 0x71a   : > { %16518 = vst [vmem:[#allocation51_spill] sm:$0xff] %v13093_v20  ;;  %4852 = vmax.xlane.f32.xlu1 %v4851_v30 }
 0x71d   : > { %v13101_v11 = vpop.xlane.xlu0 %3614 }
 0x71e   : > { %16521 = vst [vmem:[#allocation95_spill] sm:$0xff] %v13101_v11  ;;  %5110 = vadd.xlane.f32.xlu1 %v5109_v31  ;;  %v16530_v31 = vld [vmem:[#allocation87_spill] sm:$0xff] }
 0x71f   : > { %v4899_v43 = vsub.f32 %v16530_v31, %v12752_v10  ;;  %v13139_v10 = vpop.f32.mrf.mxu1 }
 0x720   : > { %v13137_v2 = vpop.eup %9421  ;;  %16536 = vst [vmem:[#allocation23_spill] sm:$0xff] %v13139_v10 }
 0x721   : > { %v13109_v47 = vpop.xlane.xlu0 %4801  ;;  %v4990_v46 = vmul.f32 1.442695, %v4899_v43  ;;  %16535 = vst [vmem:[#allocation139_spill] sm:$0xff] %v13137_v2 }
 0x722   : > { %16524 = vst [vmem:[#allocation111_spill] sm:$0xff] %v13109_v47  ;;  %5158 = vadd.xlane.f32.xlu1 %v5157_v4  ;;  %v4845_v4 = vsel %vm1022_vm9, %v16532_v13, -inf  ;;  %v5151_v13 = vsel %vm1022_vm9, %v13137_v2, 0.0 }
 0x723   : > { %9425 = vpow2.f32 %v4990_v46 }
 0x725   : > { %v13117_v30 = vpop.xlane.xlu0 %4849 }
 0x726   : > { %16527 = vst [vmem:[#allocation54_spill] sm:$0xff] %v13117_v30  ;;  %4798 = vmax.xlane.f32.xlu1 %v4797_v29  ;;  %v5103_v29 = vsel %vm1022_vm9, %v13129_v12, 0.0  ;;  %v13145_v30 = vpop.f32.mrf.mxu1 }
 0x728   : > { %v13151_v12 = vpop.f32.mrf.mxu1 }
 0x729   : > { %v13125_v47 = vpop.xlane.xlu0 %5107  ;;  %16540 = vst [vmem:[#allocation52_spill] sm:$0xff] %v13151_v12 }
 0x72a   : > { %16531 = vst [vmem:[#allocation86_spill] sm:$0xff] %v13125_v47  ;;  %4846 = vmax.xlane.f32.xlu1 %v4845_v4  ;;  %v4791_v4 = vsel %vm1022_vm9, %v16539_v48, -inf  ;;  %v13159_v3 = vpop.f32.mrf.mxu1 }
 0x72b   : > { %16544 = vst [vmem:[#allocation38_spill] sm:$0xff] %v13159_v3 }
 0x72d   : > { %v13133_v5 = vpop.xlane.xlu0 %5155 }
 0x72e   : > { %16534 = vst [vmem:[#allocation43_spill] sm:$0xff] %v13133_v5  ;;  %5104 = vadd.xlane.f32.xlu1 %v5103_v29  ;;  %v16542_v29 = vld [vmem:[#allocation192_spill] sm:$0xff] }
 0x72f   : > { %v4839_v46 = vsel %vm1022_vm9, %v16542_v29, -inf  ;;  %v16549_v29 = vld [vmem:[#allocation48_spill] sm:$0xff] }
 0x730   : > { %v4881_v60 = vsub.f32 %v16549_v29, %v12774_v22  ;;  %v16556_v29 = vld [vmem:[#allocation77_spill] sm:$0xff] }
 0x731   : > { %v13141_v31 = vpop.xlane.xlu0 %4795 }
 0x732   : > { %16537 = vst [vmem:[#allocation36_spill] sm:$0xff] %v13141_v31  ;;  %5152 = vadd.xlane.f32.xlu1 %v5151_v13  ;;  %v13157_v31 = vpop.eup %9423  ;;  %v16545_v13 = vld [vmem:[#allocation64_spill] sm:$0xff] }
 0x733   : > { %16543 = vst [vmem:[#allocation106_spill] sm:$0xff] %v13157_v31  ;;  %v4880_v2 = vsub.f32 %v16545_v13, %v12764_v14  ;;  %v5097_v48 = vsel %vm1022_vm9, %v13157_v31, 0.0  ;;  %v13167_v5 = vpop.eup %9425  ;;  %v4954_v13 = vmul.f32 1.442695, %v4881_v60  ;;  %v16552_v31 = vld [vmem:[#allocation78_spill] sm:$0xff]  ;;  %v16559_v60 = vld [vmem:[#allocation152_spill] sm:$0xff] }
 0x734   : > { %16547 = vst [vmem:[#allocation68_spill] sm:$0xff] %v13167_v5 }
 0x735   : > { %v13147_v43 = vpop.xlane.xlu0 %4843 }
 0x736   : > { %16538 = vst [vmem:[#allocation91_spill] sm:$0xff] %v13147_v43  ;;  %4792 = vmax.xlane.f32.xlu1 %v4791_v4  ;;  %v13169_v4 = vpop.f32.mrf.mxu1 }
 0x737   : > { %16548 = vst [vmem:[#allocation39_spill] sm:$0xff] %v13169_v4 }
 0x738   : > { %v13177_v14 = vpop.f32.mrf.mxu1 }
 0x739   : > { %v13153_v47 = vpop.xlane.xlu0 %5101  ;;  %16551 = vst [vmem:[#allocation37_spill] sm:$0xff] %v13177_v14 }
 0x73a   : > { %16541 = vst [vmem:[#allocation144_spill] sm:$0xff] %v13153_v47  ;;  %4840 = vmax.xlane.f32.xlu1 %v4839_v46  ;;  %v4952_v47 = vmul.f32 1.442695, %v4880_v2  ;;  %v5145_v46 = vsel %vm1022_vm9, %v13167_v5, 0.0  ;;  %v13185_v11 = vpop.f32.mrf.mxu1 }
 0x73b   : > { %16555 = vst [vmem:[#allocation145_spill] sm:$0xff] %v13185_v11 }
 0x73c   : > { %9427 = vpow2.f32 %v4952_v47  ;;  %v13189_v5 = vpop.f32.mrf.mxu1  ;;  %v16558_v47 = vld [vmem:[#allocation148_spill] sm:$0xff] }
 0x73d   : > { %v13163_v43 = vpop.xlane.xlu0 %5149  ;;  %9429 = vpow2.f32 %v4954_v13  ;;  %16557 = vst [vmem:[#allocation114_spill] sm:$0xff] %v13189_v5 }
 0x73e   : > { %16546 = vst [vmem:[#allocation85_spill] sm:$0xff] %v13163_v43  ;;  %5098 = vadd.xlane.f32.xlu1 %v5097_v48  ;;  %v4897_v43 = vsub.f32 %v16552_v31, %v12784_v34  ;;  %v16554_v48 = vld [vmem:[#allocation105_spill] sm:$0xff]  ;;  %9431 = vrcp.f32 %v16558_v47  ;;  %v13195_v31 = vpop.f32.mrf.mxu0  ;;  %v13199_v13 = vpop.f32.mrf.mxu1 }
 0x73f   : > { %v4782_v2 = vsel %vm1022_vm9, %v16554_v48, -inf  ;;  %9433 = vrcp.f32 %v16559_v60  ;;  %16561 = vst [vmem:[#allocation30_spill] sm:$0xff] %v13195_v31  ;;  %16563 = vst [vmem:[#allocation97_spill] sm:$0xff] %v13199_v13  ;;  %v16565_v48 = vld [vmem:[#allocation166_spill] sm:$0xff] }
 0x740   : > { %v4986_v22 = vmul.f32 1.442695, %v4897_v43  ;;  %v16564_v43 = vld [vmem:[#allocation165_spill] sm:$0xff] }
 0x741   : > { %v13173_v20 = vpop.xlane.xlu0 %4789 }
 0x742   : > { %16550 = vst [vmem:[#allocation119_spill] sm:$0xff] %v13173_v20  ;;  %5146 = vadd.xlane.f32.xlu1 %v5145_v46  ;;  %v4785_v20 = vsel %vm1022_vm9, %v16556_v29, -inf  ;;  %9435 = vpow2.f32 %v4986_v22  ;;  %v16562_v46 = vld [vmem:[#allocation178_spill] sm:$0xff]  ;;  %v961_v29 = vpop.f32.mrf.mxu0  ;;  %v16570_v22 = vld [vmem:[#allocation161_spill] sm:$0xff] }
 0x743   : > { %9437 = vrcp.f32 %v16564_v43  ;;  %v13215_v43 = vpop.permute.xlu1 %820 }
 0x744   : > { %9439 = vrcp.f32 %v16565_v48  ;;  %16573 = vst [vmem:[#allocation201_spill] sm:$0xff] %v13215_v43  ;;  %v962_v11 = vadd.f32 %v961_v29, %v13215_v43  ;;  %v16586_v43 = vld [vmem:[#allocation53_spill] sm:$0xff] }
 0x745   : > { %v13181_v41 = vpop.xlane.xlu0 %4837  ;;  %9441 = vrcp.f32 %v16570_v22 }
 0x746   : > { %16553 = vst [vmem:[#allocation92_spill] sm:$0xff] %v13181_v41  ;;  %4783 = vmax.xlane.f32.xlu1 %v4782_v2  ;;  %v4830_v2 = vsel %vm1022_vm9, %v16562_v46, -inf  ;;  %v13209_v41 = vpop.f32.mrf.mxu1  ;;  %v16571_v46 = vld [vmem:[#allocation162_spill] sm:$0xff] }
 0x747   : > { %16569 = vst [vmem:[#allocation124_spill] sm:$0xff] %v13209_v41  ;;  %9443 = vrcp.f32 %v16571_v46  ;;  %v16577_v46 = vld [vmem:[#allocation176_spill] sm:$0xff] }
 0x748   : > { %v13225_v22 = vpop.f32.mrf.mxu1  ;;  %9445 = vrcp.f32 %v16577_v46  ;;  %v16583_v46 = vld [vmem:[#allocation174_spill] sm:$0xff] }
 0x749   : > { %v13193_v34 = vpop.xlane.xlu0 %5095  ;;  %v13207_v5 = vpop.eup %9427  ;;  %16576 = vst [vmem:[#allocation104_spill] sm:$0xff] %v13225_v22 }
 0x74a   : > { %4786 = vmax.xlane.f32.xlu1 %v4785_v20  ;;  %16560 = vst [vmem:[#allocation107_spill] sm:$0xff] %v13193_v34  ;;  %v16567_v20 = vld [vmem:[#allocation182_spill] sm:$0xff]  ;;  %16568 = vst [vmem:[#allocation41_spill] sm:$0xff] %v13207_v5  ;;  %v5088_v13 = vsel %vm1022_vm9, %v13207_v5, 0.0  ;;  %v16578_v34 = vld [vmem:[#allocation177_spill] sm:$0xff]  ;;  %v4878_v5 = vsub.f32 %v16579_v19, %v12796_v8 }
 0x74b   : > { %v4833_v60 = vsel %vm1022_vm9, %v16567_v20, -inf  ;;  %v13221_v20 = vpop.eup %9429  ;;  %9447 = vrcp.f32 %v16578_v34 }
 0x74c   : > { %16575 = vst [vmem:[#allocation28_spill] sm:$0xff] %v13221_v20  ;;  %v5091_v1 = vsel %vm1022_vm9, %v13221_v20, 0.0 }
 0x74d   : > { %v13203_v47 = vpop.xlane.xlu0 %5143 }
 0x74e   : > { %4831 = vmax.xlane.f32.xlu1 %v4830_v2  ;;  %16566 = vst [vmem:[#allocation121_spill] sm:$0xff] %v13203_v47  ;;  %v13213_v2 = vpop.f32.mrf.mxu0 }
 0x74f   : > { %16572 = vst [vmem:[#allocation123_spill] sm:$0xff] %v13213_v2 }
 0x750   : > { %v965_v31 = vpop.f32.mrf.mxu0 }
 0x752   : > { %4834 = vmax.xlane.f32.xlu1 %v4833_v60  ;;  %v9432_v60 = vpop.eup %9431 }
 0x753   : > { %v9434_v2 = vpop.eup %9433 }
 0x754   : > { %v13235_v29 = vpop.eup %9435 }
 0x755   : > { %v13217_v48 = vpop.permute.xlu0 %825  ;;  %16580 = vst [vmem:[#allocation40_spill] sm:$0xff] %v13235_v29  ;;  %v9438_v34 = vpop.eup %9437 }
 0x756   : > { %16574 = vst [vmem:[#allocation137_spill] sm:$0xff] %v13217_v48  ;;  %v966_v41 = vadd.f32 %v965_v31, %v13217_v48  ;;  %5089 = vadd.xlane.f32.xlu1 %v5088_v13  ;;  %v16581_v31 = vld [vmem:[#allocation173_spill] sm:$0xff]  ;;  %v13240_v13 = vpop.f32.mrf.mxu1  ;;  %v4879_v48 = vsub.f32 %v16586_v43, %v12806_v16  ;;  %v16591_v16 = vld [vmem:[#allocation112_spill] sm:$0xff] }
 0x757   : > { %9449 = vrcp.f32 %v16581_v31  ;;  %16582 = vst [vmem:[#allocation87_spill] sm:$0xff] %v13240_v13  ;;  %v9440_v31 = vpop.eup %9439  ;;  %v16589_v13 = vld [vmem:[#allocation188_spill] sm:$0xff]  ;;  %v3753_v43 = vmul.f32 %v9438_v34, %v16591_v16 }
 0x758   : > { %v13229_v47 = vpack.c.bf16 %v966_v41, %v962_v11  ;;  %9451 = vrcp.f32 %v16583_v46  ;;  %v16584_v11 = vld [vmem:[#allocation61_spill] sm:$0xff]  ;;  %v5139_v46 = vsel %vm1022_vm9, %v13235_v29, 0.0  ;;  %v9442_v20 = vpop.eup %9441  ;;  %v3754_v32 = vmul.f32 %v9440_v31, %v16592_v63  ;;  %v16599_v34 = vld [vmem:[#allocation60_spill] sm:$0xff] }
 0x759   : > { %v3739_v8 = vmul.f32 %v9432_v60, %v16584_v11  ;;  %v16585_v41 = vld [vmem:[#allocation29_spill] sm:$0xff]  ;;  %v13255_v60 = vpop.f32.mrf.mxu1  ;;  %v4950_v50 = vmul.f32 1.442695, %v4879_v48 }
 0x75a   : > { %5092 = vadd.xlane.f32.xlu1 %v5091_v1  ;;  %3825 = vrot.lane.b32.xlu0 %v13229_v47, %s10109_s29  ;;  %v3740_v19 = vmul.f32 %v9434_v2, %v16585_v41  ;;  %v4948_v1 = vmul.f32 1.442695, %v4878_v5  ;;  %16587 = vst [vmem:[#allocation64_spill] sm:$0xff] %v13255_v60  ;;  %v16588_v2 = vld [vmem:[#allocation187_spill] sm:$0xff]  ;;  %v9444_v41 = vpop.eup %9443  ;;  %v16593_v29 = vld [vmem:[#allocation69_spill] sm:$0xff]  ;;  %v4776_v60 = vsel %vm1022_vm9, %v16594_v38, -inf }
 0x75b   : > { %8344 = vmatprep.mubr.msk.bf16.mxu0 %vm1022_vm9, %v13229_v47  ;;  %9453 = vrcp.f32 %v16588_v2  ;;  %v16590_v5 = vld [vmem:[#allocation31_spill] sm:$0xff]  ;;  %v16595_v2 = vld [vmem:[#allocation184_spill] sm:$0xff]  ;;  %v9446_v63 = vpop.eup %9445 }
 0x75c   : > { %8345 = vmatmul.mubr.msk.bf16.gmra.mxu0 %vm1022_vm9, %v13229_v47  ;;  %v3796_v11 = vpack.c.bf16 %v3740_v19, %v3739_v8  ;;  %9455 = vrcp.f32 %v16589_v13  ;;  %v4896_v22 = vsub.f32 %v16590_v5, %v12772_v36  ;;  %v13268_v8 = vpop.f32.mrf.mxu1  ;;  %v16597_v13 = vld [vmem:[#allocation185_spill] sm:$0xff]  ;;  %v3738_v5 = vmul.f32 %v9444_v41, %v16599_v34  ;;  %v16607_v34 = vld [vmem:[#allocation179_spill] sm:$0xff] }
 0x75d   : > { %8362 = vmatprep.mubr.msk.bf16.mxu0 %vm1022_vm9, %v12910_v35  ;;  %9457 = vpow2.f32 %v4948_v1  ;;  %16596 = vst [vmem:[#allocation48_spill] sm:$0xff] %v13268_v8  ;;  %v16598_v36 = vld [vmem:[#allocation25_spill] sm:$0xff] }
 0x75e   : > { %5140 = vadd.xlane.f32.xlu1 %v5139_v46  ;;  %v4894_v46 = vsub.f32 %v16593_v29, %v12804_v37  ;;  %9459 = vrcp.f32 %v16595_v2  ;;  %v3737_v19 = vmul.f32 %v9442_v20, %v16598_v36  ;;  %v4984_v31 = vmul.f32 1.442695, %v4896_v22  ;;  %v16600_v1 = vld [vmem:[#allocation57_spill] sm:$0xff] }
 0x75f   : > { %9461 = vrcp.f32 %v16597_v13  ;;  %v4895_v37 = vsub.f32 %v16600_v1, %v12816_v25  ;;  %v3855_v48 = vsel %vm1022_vm9, %v3796_v11, 0  ;;  %v3803_v29 = vpack.c.bf16 %v3754_v32, %v3753_v43  ;;  %v16601_v20 = vld [vmem:[#allocation101_spill] sm:$0xff]  ;;  %v16604_v11 = vld [vmem:[#allocation194_spill] sm:$0xff]  ;;  %v16606_v13 = vld [vmem:[#allocation132_spill] sm:$0xff] }
 0x760   : > { %v4980_v16 = vmul.f32 1.442695, %v4894_v46  ;;  %9463 = vpow2.f32 %v4950_v50  ;;  %v4779_v41 = vsel %vm1022_vm9, %v16601_v20, -inf  ;;  %v16602_v22 = vld [vmem:[#allocation193_spill] sm:$0xff]  ;;  %v3795_v32 = vpack.c.bf16 %v3738_v5, %v3737_v19  ;;  %v16605_v46 = vld [vmem:[#allocation120_spill] sm:$0xff] }
 0x761   : > { %9465 = vrcp.f32 %v16602_v22  ;;  %v4982_v50 = vmul.f32 1.442695, %v4895_v37  ;;  %v3751_v2 = vmul.f32 %v9446_v63, %v16605_v46  ;;  %v4824_v1 = vsel %vm1022_vm9, %v16607_v34, -inf  ;;  %v16610_v22 = vld [vmem:[#allocation116_spill] sm:$0xff]  ;;  %v16611_v5 = vld [vmem:[#allocation113_spill] sm:$0xff]  ;;  %v13297_v63 = vpop.permute.xlu1 %3823 }
 0x762   : > { %4777 = vmax.xlane.f32.xlu1 %v4776_v60  ;;  %v9448_v60 = vpop.eup %9447  ;;  %9467 = vrcp.f32 %v16604_v11  ;;  %v16612_v46 = vld [vmem:[#allocation84_spill] sm:$0xff] }
 0x763   : > { %9469 = vpow2.f32 %v4984_v31  ;;  %v3752_v36 = vmul.f32 %v9448_v60, %v16606_v13  ;;  %v3852_v60 = vsel %vm1022_vm9, %v3795_v32, 0  ;;  %v4876_v13 = vsub.f32 %v16612_v46, %v12828_v33  ;;  %v16615_v33 = vld [vmem:[#allocation143_spill] sm:$0xff] }
 0x764   : > { %8363 = vmatmul.mubr.msk.bf16.vlgmr.msra.gmra.mxu0 %vm1022_vm9, %v12910_v35  ;;  %v9450_v25 = vpop.eup %9449  ;;  %v13284_v35 = vpop.f32.mrf.mxu1  ;;  %9471 = vpow2.f32 %v4980_v16 }
 0x765   : > { %8401 = vmatpush3.bf16.xpose.msra.mxu0 %v3855_v48  ;;  %8364 = vmatprep.mubr.msk.bf16.mxu0 %vm1022_vm9, %v13229_v47  ;;  %16603 = vst [vmem:[#allocation78_spill] sm:$0xff] %v13284_v35  ;;  %v9452_v43 = vpop.eup %9451  ;;  %v16608_v48 = vld [vmem:[#allocation190_spill] sm:$0xff]  ;;  %v3735_v19 = vmul.f32 %v9450_v25, %v16610_v22  ;;  %v3802_v16 = vpack.c.bf16 %v3752_v36, %v3751_v2  ;;  %v16617_v22 = vld [vmem:[#allocation32_spill] sm:$0xff] }
 0x766   : > { %8893 = vmatprep.subr.msk.bf16.mxu0 %vm1022_vm9, %v3803_v29  ;;  %4780 = vmax.xlane.f32.xlu1 %v4779_v41  ;;  %9473 = vrcp.f32 %v16608_v48  ;;  %v13292_v29 = vpop.f32.mrf.mxu1  ;;  %v16609_v41 = vld [vmem:[#allocation191_spill] sm:$0xff]  ;;  %v3736_v31 = vmul.f32 %v9452_v43, %v16611_v5  ;;  %v16613_v25 = vld [vmem:[#allocation186_spill] sm:$0xff]  ;;  %v4877_v36 = vsub.f32 %v16615_v33, %v12838_v53  ;;  %v16622_v53 = vld [vmem:[#allocation109_spill] sm:$0xff] }
 0x767   : > { %9475 = vrcp.f32 %v16609_v41  ;;  %v4827_v43 = vsel %vm1022_vm9, %v16613_v25, -inf  ;;  %v16616_v48 = vld [vmem:[#allocation35_spill] sm:$0xff] }
 0x768   : > { %v9454_v37 = vpop.eup %9453  ;;  %9477 = vpow2.f32 %v4982_v50  ;;  %v3794_v32 = vpack.c.bf16 %v3736_v31, %v3735_v19  ;;  %v16623_v31 = vld [vmem:[#allocation142_spill] sm:$0xff] }
 0x769   : > { %v9456_v11 = vpop.eup %9455  ;;  %9479 = vrcp.f32 %v12680_v21  ;;  %v3749_v41 = vmul.f32 %v9454_v37, %v16616_v48  ;;  %v16620_v21 = vld [vmem:[#allocation200_spill] sm:$0xff]  ;;  %v4946_v48 = vmul.f32 1.442695, %v4877_v36  ;;  %v16629_v36 = vld [vmem:[#allocation130_spill] sm:$0xff] }
 0x76a   : > { %4825 = vmax.xlane.f32.xlu1 %v4824_v1  ;;  %v13308_v50 = vpop.eup %9457  ;;  %v13311_v1 = vpop.f32.mrf.mxu1  ;;  %9481 = vrcp.f32 %v12696_v59  ;;  %v3750_v5 = vmul.f32 %v9456_v11, %v16617_v22  ;;  %v16624_v11 = vld [vmem:[#allocation70_spill] sm:$0xff] }
 0x76b   : > { %16614 = vst [vmem:[#allocation148_spill] sm:$0xff] %v13308_v50  ;;  %9483 = vrcp.f32 %v16620_v21 }
 0x76c   : > { %8365 = vmatmul.mubr.msk.bf16.gmra.mxu0 %vm1022_vm9, %v13229_v47  ;;  %v9460_v47 = vpop.eup %9459  ;;  %v13326_v19 = vpop.f32.mrf.mxu1  ;;  %9485 = vrcp.f32 %v16622_v53 }
 0x76d   : > { %8403 = vmatpush3.bf16.xpose.msra.mxu0 %v3852_v60  ;;  %8416 = vmatprep.mubr.msk.bf16.mxu0 %vm1022_vm9, %v13297_v63  ;;  %v9462_v2 = vpop.eup %9461  ;;  %v4944_v60 = vmul.f32 1.442695, %v4876_v13  ;;  %16621 = vst [vmem:[#allocation165_spill] sm:$0xff] %v13326_v19  ;;  %v3733_v37 = vmul.f32 %v9460_v47, %v16623_v31  ;;  %v16630_v31 = vld [vmem:[#allocation65_spill] sm:$0xff] }
 0x76e   : > { %8894 = vmatprep.subr.msk.bf16.mxu0 %vm1022_vm9, %v3802_v16  ;;  %4828 = vmax.xlane.f32.xlu1 %v4827_v43  ;;  %v16618_v16 = vld [vmem:[#allocation135_spill] sm:$0xff]  ;;  %v5082_v43 = vsel %vm1022_vm9, %v13308_v50, 0.0  ;;  %v13323_v25 = vpop.eup %9463  ;;  %v3734_v13 = vmul.f32 %v9462_v2, %v16624_v11  ;;  %v3801_v50 = vpack.c.bf16 %v3750_v5, %v3749_v41  ;;  %v13341_v2 = vpop.f32.mrf.mxu1 }
 0x76f   : > { %v4892_v46 = vsub.f32 %v16618_v16, %v12836_v56  ;;  %16619 = vst [vmem:[#allocation152_spill] sm:$0xff] %v13323_v25  ;;  %v9466_v59 = vpop.eup %9465  ;;  %v16625_v56 = vld [vmem:[#allocation75_spill] sm:$0xff]  ;;  %v3849_v16 = vsel %vm1022_vm9, %v3794_v32, 0  ;;  %9487 = vpow2.f32 %v4944_v60  ;;  %v5085_v21 = vsel %vm1022_vm9, %v13323_v25, 0.0  ;;  %16628 = vst [vmem:[#allocation162_spill] sm:$0xff] %v13341_v2  ;;  %v16644_v25 = vld [vmem:[#allocation33_spill] sm:$0xff] }
 0x770   : > { %v9468_v33 = vpop.eup %9467  ;;  %v4893_v22 = vsub.f32 %v16625_v56, %v12848_v7  ;;  %9489 = vrcp.f32 %v12734_v45  ;;  %v3793_v32 = vpack.c.bf16 %v3734_v13, %v3733_v37  ;;  %v3747_v41 = vmul.f32 %v9466_v59, %v16629_v36  ;;  %v13355_v37 = vpop.f32.mrf.mxu1  ;;  %v16633_v59 = vld [vmem:[#allocation208_spill] sm:$0xff] }
 0x771   : > { %v13334_v34 = vpop.eup %9469  ;;  %9491 = vpow2.f32 %v4946_v48  ;;  %v3748_v11 = vmul.f32 %v9468_v33, %v16630_v31  ;;  %16632 = vst [vmem:[#allocation177_spill] sm:$0xff] %v13355_v37  ;;  %v16634_v48 = vld [vmem:[#allocation127_spill] sm:$0xff]  ;;  %v16637_v31 = vld [vmem:[#allocation126_spill] sm:$0xff] }
 0x772   : > { %5083 = vadd.xlane.f32.xlu1 %v5082_v43  ;;  %16626 = vst [vmem:[#allocation166_spill] sm:$0xff] %v13334_v34  ;;  %v4976_v43 = vmul.f32 1.442695, %v4892_v46  ;;  %v13338_v53 = vpop.eup %9471  ;;  %v4978_v60 = vmul.f32 1.442695, %v4893_v22  ;;  %v5136_v46 = vsel %vm1022_vm9, %v13334_v34, 0.0 }
 0x773   : > { %16627 = vst [vmem:[#allocation161_spill] sm:$0xff] %v13338_v53  ;;  %v9474_v47 = vpop.eup %9473  ;;  %v5130_v45 = vsel %vm1022_vm9, %v13338_v53, 0.0  ;;  %v16635_v22 = vld [vmem:[#allocation63_spill] sm:$0xff]  ;;  %v6351_v34 = vsel %vm1022_vm9, %v13341_v2, -inf }
 0x774   : > { %v9476_v5 = vpop.eup %9475  ;;  %9493 = vpow2.f32 %v4976_v43  ;;  %v3731_v56 = vmul.f32 %v9474_v47, %v16634_v48  ;;  %v3846_v43 = vsel %vm1022_vm9, %v3793_v32, 0  ;;  %v6303_v47 = vsel %vm1022_vm9, %v13151_v12, -inf  ;;  %v13371_v32 = vpop.f32.mrf.mxu1  ;;  %v16643_v12 = vld [vmem:[#allocation138_spill] sm:$0xff] }
 0x775   : > { %8405 = vmatpush3.bf16.xpose.msra.mxu0 %v3849_v16  ;;  %9495 = vrcp.f32 %v12722_v49  ;;  %v3732_v33 = vmul.f32 %v9476_v5, %v16635_v22  ;;  %v16639_v22 = vld [vmem:[#allocation214_spill] sm:$0xff] }
 0x776   : > { %8895 = vmatprep.subr.msk.bf16.mxu0 %vm1022_vm9, %v3801_v50  ;;  %5086 = vadd.xlane.f32.xlu1 %v5085_v21  ;;  %v13350_v50 = vpop.eup %9477  ;;  %9497 = vrcp.f32 %v16633_v59  ;;  %v3800_v21 = vpack.c.bf16 %v3748_v11, %v3747_v41 }
 0x777   : > { %v13344_v7 = vpop.xlane.xlu1 %3587  ;;  %16631 = vst [vmem:[#allocation176_spill] sm:$0xff] %v13350_v50  ;;  %v9480_v16 = vpop.eup %9479  ;;  %9499 = vpow2.f32 %v4978_v60  ;;  %v5133_v36 = vsel %vm1022_vm9, %v13350_v50, 0.0  ;;  %v6306_v60 = vsel %vm1022_vm9, %v13169_v4, -inf  ;;  %v3792_v11 = vpack.c.bf16 %v3732_v33, %v3731_v56  ;;  %v16645_v50 = vld [vmem:[#allocation102_spill] sm:$0xff]  ;;  %v16646_v56 = vld [vmem:[#allocation212_spill] sm:$0xff] }
 0x778   : > { %v9482_v49 = vpop.eup %9481  ;;  %v4890_v53 = vsub.f32 %v16645_v50, %v16644_v25  ;;  %v6354_v33 = vsel %vm1022_vm9, %v13371_v32, -inf  ;;  %v16649_v50 = vld [vmem:[#allocation24_spill] sm:$0xff] }
 0x779   : > { %5137 = vadd.xlane.f32.xlu0 %v5136_v46  ;;  %v16636_v46 = vld [vmem:[#allocation89_spill] sm:$0xff]  ;;  %v9484_v5 = vpop.eup %9483 }
 0x77a   : > { %5131 = vadd.xlane.f32.xlu1 %v5130_v45  ;;  %9501 = vrcp.f32 %v16636_v46  ;;  %v16638_v45 = vld [vmem:[#allocation71_spill] sm:$0xff]  ;;  %v9486_v48 = vpop.eup %9485 }
 0x77b   : > { %v13358_v13 = vpop.xlane.xlu1 %3629  ;;  %v4874_v59 = vsub.f32 %v16638_v45, %v16637_v31  ;;  %9503 = vrcp.f32 %v16639_v22  ;;  %v16642_v31 = vld [vmem:[#allocation58_spill] sm:$0xff]  ;;  %v16647_v22 = vld [vmem:[#allocation213_spill] sm:$0xff] }
 0x77c   : > { %v3745_v45 = vmul.f32 %v9480_v16, %v16642_v31  ;;  %v13386_v4 = vpop.eup %9487  ;;  %9505 = vrcp.f32 %v16646_v56  ;;  %v16651_v31 = vld [vmem:[#allocation232_spill] sm:$0xff]  ;;  %v16652_v56 = vld [vmem:[#allocation73_spill] sm:$0xff] }
 0x77d   : > { %8407 = vmatpush3.bf16.xpose.msra.mxu0 %v3846_v43  ;;  %5134 = vadd.xlane.f32.xlu0 %v5133_v36  ;;  %v16640_v43 = vld [vmem:[#allocation34_spill] sm:$0xff]  ;;  %v16641_v36 = vld [vmem:[#allocation141_spill] sm:$0xff]  ;;  %9507 = vrcp.f32 %v16647_v22  ;;  %v4972_v22 = vmul.f32 1.442695, %v4890_v53 }
 0x77e   : > { %8896 = vmatprep.subr.msk.bf16.mxu0 %vm1022_vm9, %v3800_v21  ;;  %6304 = vmax.xlane.f32.xlu1 %v6303_v47  ;;  %v4875_v46 = vsub.f32 %v16641_v36, %v16640_v43  ;;  %v3746_v21 = vmul.f32 %v9482_v49, %v16643_v12  ;;  %v4940_v47 = vmul.f32 1.442695, %v4874_v59  ;;  %v3843_v12 = vsel %vm1022_vm9, %v3792_v11, 0  ;;  %v16648_v49 = vld [vmem:[#allocation80_spill] sm:$0xff]  ;;  %v16650_v43 = vld [vmem:[#allocation210_spill] sm:$0xff] }
 0x77f   : > { %v13373_v41 = vpop.xlane.xlu1 %4816  ;;  %v3729_v25 = vmul.f32 %v9484_v5, %v16648_v49  ;;  %v3730_v59 = vmul.f32 %v9486_v48, %v16649_v50  ;;  %9509 = vrcp.f32 %v16650_v43  ;;  %v5076_v11 = vsel %vm1022_vm9, %v13386_v4, 0.0 }
 0x780   : > { %v4942_v36 = vmul.f32 1.442695, %v4875_v46  ;;  %v3799_v2 = vpack.c.bf16 %v3746_v21, %v3745_v45  ;;  %9511 = vpow2.f32 %v4940_v47  ;;  %v16654_v46 = vld [vmem:[#allocation220_spill] sm:$0xff] }
 0x781   : > { %6307 = vmax.xlane.f32.xlu0 %v6306_v60  ;;  %v9490_v60 = vpop.eup %9489  ;;  %9513 = vrcp.f32 %v16654_v46  ;;  %v3791_v45 = vpack.c.bf16 %v3730_v59, %v3729_v25  ;;  %v16658_v25 = vld [vmem:[#allocation90_spill] sm:$0xff] }
 0x782   : > { %6352 = vmax.xlane.f32.xlu1 %v6351_v34  ;;  %v4891_v34 = vsub.f32 %v16652_v56, %v16651_v31  ;;  %v13400_v20 = vpop.eup %9491  ;;  %9515 = vpow2.f32 %v4942_v36  ;;  %v13417_v31 = vpop.f32.mrf.mxu1  ;;  %v16657_v56 = vld [vmem:[#allocation218_spill] sm:$0xff]  ;;  %v16659_v36 = vld [vmem:[#allocation219_spill] sm:$0xff] }
 0x783   : > { %v13392_v16 = vpop.xlane.xlu1 %4864  ;;  %v13404_v5 = vpop.eup %9493  ;;  %v5079_v53 = vsel %vm1022_vm9, %v13400_v20, 0.0  ;;  %9517 = vpow2.f32 %v4972_v22  ;;  %16656 = vst [vmem:[#allocation173_spill] sm:$0xff] %v13417_v31  ;;  %v3840_v22 = vsel %vm1022_vm9, %v3791_v45, 0 }
 0x784   : > { %16653 = vst [vmem:[#allocation44_spill] sm:$0xff] %v13404_v5  ;;  %v9496_v48 = vpop.eup %9495  ;;  %v4974_v47 = vmul.f32 1.442695, %v4891_v34  ;;  %9519 = vrcp.f32 %v16657_v56 }
 0x785   : > { %8409 = vmatpush3.bf16.xpose.msra.mxu0 %v3843_v12  ;;  %6355 = vmax.xlane.f32.xlu0 %v6354_v33  ;;  %v9498_v21 = vpop.eup %9497  ;;  %v16655_v33 = vld [vmem:[#allocation83_spill] sm:$0xff]  ;;  %v3743_v59 = vmul.f32 %v9496_v48, %v16658_v25  ;;  %9521 = vrcp.f32 %v16659_v36  ;;  %v6297_v48 = vsel %vm1022_vm9, %v13159_v3, -inf  ;;  %v13433_v36 = vpop.f32.mrf.mxu1 }
 0x786   : > { %8897 = vmatprep.subr.msk.bf16.mxu0 %vm1022_vm9, %v3799_v2  ;;  %5077 = vadd.xlane.f32.xlu1 %v5076_v11  ;;  %v3744_v12 = vmul.f32 %v9490_v60, %v16655_v33  ;;  %v13413_v50 = vpop.eup %9499  ;;  %v5124_v2 = vsel %vm1022_vm9, %v13404_v5, 0.0  ;;  %v16660_v60 = vld [vmem:[#allocation81_spill] sm:$0xff]  ;;  %9523 = vpow2.f32 %v4974_v47  ;;  %v16661_v5 = vld [vmem:[#allocation140_spill] sm:$0xff]  ;;  %16663 = vst [vmem:[#allocation174_spill] sm:$0xff] %v13433_v36 }
 0x787   : > { %v13408_v49 = vpop.xlane.xlu1 %3575  ;;  %v9502_v43 = vpop.eup %9501  ;;  %v3728_v11 = vmul.f32 %v9498_v21, %v16660_v60  ;;  %v4872_v56 = vsub.f32 %v16661_v5, %v12913_v44  ;;  %v16664_v21 = vld [vmem:[#allocation216_spill] sm:$0xff]  ;;  %v16665_v44 = vld [vmem:[#allocation226_spill] sm:$0xff]  ;;  %v16666_v5 = vld [vmem:[#allocation67_spill] sm:$0xff] }
 0x788   : > { %v3798_v46 = vpack.c.bf16 %v3744_v12, %v3743_v59  ;;  %v9504_v33 = vpop.eup %9503  ;;  %9525 = vrcp.f32 %v16664_v21  ;;  %v4873_v60 = vsub.f32 %v16666_v5, %v12927_v58  ;;  %v16670_v36 = vld [vmem:[#allocation224_spill] sm:$0xff]  ;;  %v16671_v58 = vld [vmem:[#allocation79_spill] sm:$0xff] }
 0x789   : > { %5080 = vadd.xlane.f32.xlu0 %v5079_v53  ;;  %v5127_v53 = vsel %vm1022_vm9, %v13413_v50, 0.0  ;;  %v9506_v45 = vpop.eup %9505  ;;  %9527 = vrcp.f32 %v16665_v44  ;;  %v4936_v21 = vmul.f32 1.442695, %v4872_v56  ;;  %v13451_v44 = vpop.f32.mrf.mxu1 }
 0x78a   : > { %5125 = vadd.xlane.f32.xlu1 %v5124_v2  ;;  %v16662_v2 = vld [vmem:[#allocation66_spill] sm:$0xff]  ;;  %v9508_v59 = vpop.eup %9507  ;;  %16669 = vst [vmem:[#allocation61_spill] sm:$0xff] %v13451_v44  ;;  %9529 = vrcp.f32 %v16670_v36  ;;  %v3741_v5 = vmul.f32 %v9506_v45, %v16671_v58  ;;  %v4938_v44 = vmul.f32 1.442695, %v4873_v60  ;;  %v16675_v36 = vld [vmem:[#allocation88_spill] sm:$0xff] }
 0x78b   : > { %v13422_v34 = vpop.xlane.xlu1 %3623  ;;  %v3727_v25 = vmul.f32 %v9502_v43, %v16662_v2  ;;  %v6300_v43 = vsel %vm1022_vm9, %v13177_v14, -inf  ;;  %v16672_v14 = vld [vmem:[#allocation225_spill] sm:$0xff]  ;;  %v16676_v58 = vld [vmem:[#allocation74_spill] sm:$0xff] }
 0x78c   : > { %v9510_v2 = vpop.eup %9509  ;;  %9531 = vrcp.f32 %v16672_v14 }
 0x78d   : > { %8411 = vmatpush3.bf16.xpose.msra.mxu0 %v3840_v22  ;;  %5128 = vadd.xlane.f32.xlu0 %v5127_v53  ;;  %v3790_v12 = vpack.c.bf16 %v3728_v11, %v3727_v25  ;;  %v16667_v22 = vld [vmem:[#allocation26_spill] sm:$0xff]  ;;  %v6345_v11 = vsel %vm1022_vm9, %v13355_v37, -inf  ;;  %v13449_v25 = vpop.eup %9511 }
 0x78e   : > { %8898 = vmatprep.subr.msk.bf16.mxu0 %vm1022_vm9, %v3798_v46  ;;  %6298 = vmax.xlane.f32.xlu1 %v6297_v48  ;;  %v3742_v53 = vmul.f32 %v9504_v33, %v16667_v22  ;;  %v16668_v46 = vld [vmem:[#allocation100_spill] sm:$0xff]  ;;  %v16674_v37 = vld [vmem:[#allocation222_spill] sm:$0xff] }
 0x78f   : > { %v13437_v47 = vpop.xlane.xlu1 %4810  ;;  %v4888_v48 = vsub.f32 %v16668_v46, %v12933_v39  ;;  %v3837_v56 = vsel %vm1022_vm9, %v3790_v12, 0  ;;  %v6348_v39 = vsel %vm1022_vm9, %v13417_v31, -inf  ;;  %v9514_v46 = vpop.eup %9513  ;;  %9533 = vrcp.f32 %v16674_v37  ;;  %v16678_v37 = vld [vmem:[#allocation117_spill] sm:$0xff] }
 0x790   : > { %v3797_v3 = vpack.c.bf16 %v3742_v53, %v3741_v5  ;;  %v13465_v45 = vpop.eup %9515  ;;  %9535 = vpow2.f32 %v4936_v21  ;;  %v5070_v12 = vsel %vm1022_vm9, %v13449_v25, 0.0  ;;  %v3725_v31 = vmul.f32 %v9510_v2, %v16676_v58  ;;  %v16679_v2 = vld [vmem:[#allocation154_spill] sm:$0xff] }
 0x791   : > { %6301 = vmax.xlane.f32.xlu0 %v6300_v43  ;;  %v16673_v43 = vld [vmem:[#allocation62_spill] sm:$0xff]  ;;  %v4968_v14 = vmul.f32 1.442695, %v4888_v48  ;;  %9537 = vrcp.f32 %v16678_v37  ;;  %v5073_v5 = vsel %vm1022_vm9, %v13465_v45, 0.0 }
 0x792   : > { %6346 = vmax.xlane.f32.xlu1 %v6345_v11  ;;  %v3726_v22 = vmul.f32 %v9508_v59, %v16673_v43  ;;  %v4889_v11 = vsub.f32 %v16675_v36, %v12943_v54  ;;  %v13470_v59 = vpop.eup %9517  ;;  %v13472_v43 = vpop.f32.mrf.mxu1  ;;  %9539 = vpow2.f32 %v4938_v44 }
 0x793   : > { %v13456_v33 = vpop.xlane.xlu1 %4858  ;;  %16677 = vst [vmem:[#allocation29_spill] sm:$0xff] %v13472_v43  ;;  %v9520_v54 = vpop.eup %9519  ;;  %9541 = vpow2.f32 %v4968_v14  ;;  %v16691_v43 = vld [vmem:[#allocation164_spill] sm:$0xff] }
 0x794   : > { %v3789_v53 = vpack.c.bf16 %v3726_v22, %v3725_v31  ;;  %v9522_v21 = vpop.eup %9521  ;;  %v4970_v48 = vmul.f32 1.442695, %v4889_v11  ;;  %v13485_v36 = vpop.f32.mrf.mxu1  ;;  %v16682_v31 = vld [vmem:[#allocation151_spill] sm:$0xff] }
 0x795   : > { %8413 = vmatpush3.bf16.xpose.msra.mxu0 %v3837_v56  ;;  %6349 = vmax.xlane.f32.xlu0 %v6348_v39  ;;  %v3788_v56 = vmul.f32 %v9514_v46, %v16679_v2  ;;  %v13481_v39 = vpop.eup %9523  ;;  %16680 = vst [vmem:[#allocation53_spill] sm:$0xff] %v13485_v36  ;;  %v3787_v44 = vmul.f32 %v9520_v54, %v16682_v31  ;;  %v16683_v11 = vld [vmem:[#allocation231_spill] sm:$0xff]  ;;  %v6291_v54 = vsel %vm1022_vm9, %v13121_v27, -inf }
 0x796   : > { %8899 = vmatprep.subr.msk.bf16.mxu0 %vm1022_vm9, %v3797_v3  ;;  %5071 = vadd.xlane.f32.xlu1 %v5070_v12  ;;  %v5118_v3 = vsel %vm1022_vm9, %v13470_v59, 0.0  ;;  %v16681_v12 = vld [vmem:[#allocation230_spill] sm:$0xff]  ;;  %v9526_v22 = vpop.eup %9525  ;;  %v3834_v46 = vsel %vm1022_vm9, %v3789_v53, 0  ;;  %v5121_v37 = vsel %vm1022_vm9, %v13481_v39, 0.0  ;;  %v13500_v31 = vpop.f32.mrf.mxu1  ;;  %v16688_v53 = vld [vmem:[#allocation147_spill] sm:$0xff] }
 0x797   : > { %v13476_v60 = vpop.xlane.xlu1 %3569  ;;  %9543 = vrcp.f32 %v16681_v12  ;;  %v3820_v14 = vpack.c.bf16 %v3788_v56, %v3787_v44  ;;  %v9528_v36 = vpop.eup %9527  ;;  %v16685_v12 = vld [vmem:[#allocation167_spill] sm:$0xff]  ;;  %16686 = vst [vmem:[#allocation187_spill] sm:$0xff] %v13500_v31 }
 0x798   : > { %9545 = vrcp.f32 %v16683_v11  ;;  %v16687_v11 = vld [vmem:[#allocation228_spill] sm:$0xff]  ;;  %v9530_v56 = vpop.eup %9529 }
 0x799   : > { %5074 = vadd.xlane.f32.xlu0 %v5073_v5  ;;  %9547 = vpow2.f32 %v4970_v48  ;;  %v16684_v5 = vld [vmem:[#allocation149_spill] sm:$0xff]  ;;  %v3771_v48 = vmul.f32 %v9526_v22, %v16688_v53  ;;  %v9532_v44 = vpop.eup %9531  ;;  %v6339_v53 = vsel %vm1022_vm9, %v13284_v35, -inf }
 0x79a   : > { %5119 = vadd.xlane.f32.xlu1 %v5118_v3  ;;  %v3772_v2 = vmul.f32 %v9522_v21, %v16684_v5  ;;  %v4918_v3 = vsub.f32 %v16685_v12, %v12978_v26  ;;  %9549 = vrcp.f32 %v16687_v11  ;;  %v6294_v26 = vsel %vm1022_vm9, %v13139_v10, -inf  ;;  %v13519_v10 = vpop.f32.mrf.mxu1  ;;  %v16699_v35 = vld [vmem:[#allocation125_spill] sm:$0xff] }
 0x79b   : > { %v13490_v58 = vpop.xlane.xlu1 %3617  ;;  %v3786_v11 = vmul.f32 %v9528_v36, %v16691_v43  ;;  %16693 = vst [vmem:[#allocation188_spill] sm:$0xff] %v13519_v10  ;;  %v16697_v43 = vld [vmem:[#allocation204_spill] sm:$0xff] }
 0x79c   : > { %v3812_v12 = vpack.c.bf16 %v3772_v2, %v3771_v48  ;;  %v9534_v31 = vpop.eup %9533  ;;  %v16696_v48 = vld [vmem:[#allocation234_spill] sm:$0xff]  ;;  %v4935_v36 = vsub.f32 %v16697_v43, %v13006_v57 }
 0x79d   : > { %8415 = vmatpush3.bf16.xpose.msra.mxu0 %v3834_v46  ;;  %5122 = vadd.xlane.f32.xlu0 %v5121_v37  ;;  %v16689_v46 = vld [vmem:[#allocation133_spill] sm:$0xff]  ;;  %v16690_v37 = vld [vmem:[#allocation171_spill] sm:$0xff]  ;;  %v13517_v27 = vpop.eup %9535 }
 0x79e   : > { %8900 = vmatprep.subr.msk.bf16.mxu0 %vm1022_vm9, %v3820_v14  ;;  %6292 = vmax.xlane.f32.xlu1 %v6291_v54  ;;  %9551 = vrcp.f32 %v16689_v46  ;;  %v4919_v5 = vsub.f32 %v16690_v37, %v12986_v61  ;;  %v5028_v14 = vmul.f32 1.442695, %v4918_v3  ;;  %v16692_v54 = vld [vmem:[#allocation202_spill] sm:$0xff]  ;;  %v16695_v61 = vld [vmem:[#allocation160_spill] sm:$0xff] }
 0x79f   : > { %v13505_v21 = vpop.xlane.xlu1 %4804  ;;  %v4934_v22 = vsub.f32 %v16692_v54, %v12996_v17  ;;  %v16694_v46 = vld [vmem:[#allocation122_spill] sm:$0xff]  ;;  %v3785_v2 = vmul.f32 %v9530_v56, %v16695_v61  ;;  %v6342_v17 = vsel %vm1022_vm9, %v13311_v1, -inf  ;;  %v9538_v54 = vpop.eup %9537  ;;  %v3903_v56 = vsel %vm1022_vm9, %v3812_v12, 0 }
 0x7a0   : > { %9553 = vrcp.f32 %v16694_v46  ;;  %v5030_v10 = vmul.f32 1.442695, %v4919_v5  ;;  %v13535_v46 = vpop.eup %9539  ;;  %v5064_v61 = vsel %vm1022_vm9, %v13517_v27, 0.0  ;;  %v5062_v12 = vmul.f32 1.442695, %v4935_v36 }
 0x7a1   : > { %6295 = vmax.xlane.f32.xlu0 %v6294_v26  ;;  %9555 = vrcp.f32 %v16696_v48  ;;  %v16698_v26 = vld [vmem:[#allocation158_spill] sm:$0xff]  ;;  %v5060_v57 = vmul.f32 1.442695, %v4934_v22  ;;  %v13540_v43 = vpop.eup %9541 }
 0x7a2   : > { %6340 = vmax.xlane.f32.xlu1 %v6339_v53  ;;  %v3770_v37 = vmul.f32 %v9532_v44, %v16698_v26  ;;  %9557 = vrcp.f32 %v16699_v35  ;;  %v3819_v53 = vpack.c.bf16 %v3786_v11, %v3785_v2  ;;  %v16700_v44 = vld [vmem:[#allocation157_spill] sm:$0xff]  ;;  %v13542_v35 = vpop.f32.mrf.mxu1  ;;  %v5067_v2 = vsel %vm1022_vm9, %v13535_v46, 0.0 }
 0x7a3   : > { %v13526_v3 = vpop.xlane.xlu1 %4852  ;;  %9559 = vpow2.f32 %v5028_v14  ;;  %v3769_v48 = vmul.f32 %v9534_v31, %v16700_v44  ;;  %v16701_v31 = vld [vmem:[#allocation175_spill] sm:$0xff]  ;;  %v16703_v44 = vld [vmem:[#allocation170_spill] sm:$0xff] }
 0x7a4   : > { %8417 = vmatmul.mubr.msk.bf16.vlgmr.msra.gmra.mxu0 %vm1022_vm9, %v13297_v63  ;;  %v9544_v5 = vpop.eup %9543  ;;  %9561 = vrcp.f32 %v12968_v55  ;;  %v16702_v55 = vld [vmem:[#allocation172_spill] sm:$0xff] }
 0x7a5   : > { %8421 = vmatpush3.bf16.xpose.msra.mxu0 %v3903_v56  ;;  %6343 = vmax.xlane.f32.xlu0 %v6342_v17  ;;  %v3811_v14 = vpack.c.bf16 %v3770_v37, %v3769_v48  ;;  %v9546_v22 = vpop.eup %9545  ;;  %9563 = vpow2.f32 %v5030_v10  ;;  %v3784_v17 = vmul.f32 %v9538_v54, %v16701_v31  ;;  %v5112_v56 = vsel %vm1022_vm9, %v13540_v43, 0.0 }
 0x7a6   : > { %8901 = vmatprep.subr.msk.bf16.mxu0 %vm1022_vm9, %v3819_v53  ;;  %5065 = vadd.xlane.f32.xlu1 %v5064_v61  ;;  %v13551_v26 = vpop.eup %9547  ;;  %9565 = vpow2.f32 %v5060_v57  ;;  %v13555_v53 = vpop.f32.mrf.mxu1  ;;  %v3783_v36 = vmul.f32 %v9544_v5, %v16702_v55  ;;  %v3768_v48 = vmul.f32 %v9546_v22, %v16703_v44  ;;  %v6285_v5 = vsel %vm1022_vm9, %v13131_v9, -inf  ;;  %v16707_v44 = vld [vmem:[#allocation203_spill] sm:$0xff] }
 0x7a7   : > { %v13546_v11 = vpop.xlane.xlu1 %5110  ;;  %9567 = vrcp.f32 %v12962_v42  ;;  %v9550_v10 = vpop.eup %9549  ;;  %v3900_v54 = vsel %vm1022_vm9, %v3811_v14, 0  ;;  %v5115_v61 = vsel %vm1022_vm9, %v13551_v26, 0.0  ;;  %v16704_v42 = vld [vmem:[#allocation168_spill] sm:$0xff]  ;;  %v4917_v22 = vsub.f32 %v12540_v24, %v13373_v41 }
 0x7a8   : > { %9569 = vpow2.f32 %v5062_v12  ;;  %v3818_v57 = vpack.c.bf16 %v3784_v17, %v3783_v36  ;;  %v4916_v31 = vsub.f32 %v16704_v42, %v13044_v51  ;;  %v13570_v12 = vpop.f32.mrf.mxu1  ;;  %v6288_v55 = vsel %vm1022_vm9, %v13145_v30, -inf }
 0x7a9   : > { %5068 = vadd.xlane.f32.xlu0 %v5067_v2  ;;  %9571 = vrcp.f32 %v13344_v7  ;;  %v16705_v7 = vld [vmem:[#allocation169_spill] sm:$0xff]  ;;  %v6333_v24 = vsel %vm1022_vm9, %v13292_v29, -inf }
 0x7aa   : > { %5113 = vadd.xlane.f32.xlu1 %v5112_v56  ;;  %9573 = vrcp.f32 %v12954_v0  ;;  %v3767_v14 = vmul.f32 %v9550_v10, %v16705_v7  ;;  %v4932_v10 = vsub.f32 %v16707_v44, %v13053_v23  ;;  %v13589_v42 = vpop.f32.mrf.mxu1 }
 0x7ab   : > { %v13559_v37 = vpop.xlane.xlu1 %5158  ;;  %v9552_v2 = vpop.eup %9551  ;;  %9575 = vrcp.f32 %v13358_v13  ;;  %v16709_v13 = vld [vmem:[#allocation181_spill] sm:$0xff] }
 0x7ac   : > { %v3810_v36 = vpack.c.bf16 %v3768_v48, %v3767_v14  ;;  %9577 = vrcp.f32 %v13036_v18  ;;  %v6336_v18 = vsel %vm1022_vm9, %v13326_v19, -inf }
 0x7ad   : > { %8423 = vmatpush3.bf16.xpose.msra.mxu0 %v3900_v54  ;;  %5116 = vadd.xlane.f32.xlu0 %v5115_v61  ;;  %v9554_v17 = vpop.eup %9553  ;;  %v16706_v54 = vld [vmem:[#allocation93_spill] sm:$0xff]  ;;  %9579 = vrcp.f32 %v13026_v15  ;;  %v5056_v15 = vmul.f32 1.442695, %v4932_v10 }
 0x7ae   : > { %8902 = vmatprep.subr.msk.bf16.mxu0 %vm1022_vm9, %v3818_v57  ;;  %6286 = vmax.xlane.f32.xlu1 %v6285_v5  ;;  %v9556_v51 = vpop.eup %9555  ;;  %v3782_v0 = vmul.f32 %v9552_v2, %v16706_v54  ;;  %v5024_v57 = vmul.f32 1.442695, %v4916_v31  ;;  %v3781_v48 = vmul.f32 %v9554_v17, %v16709_v13  ;;  %v5026_v2 = vmul.f32 1.442695, %v4917_v22  ;;  %v16710_v5 = vld [vmem:[#allocation183_spill] sm:$0xff] }
 0x7af   : > { %v13577_v56 = vpop.xlane.xlu1 %4798  ;;  %v9558_v61 = vpop.eup %9557  ;;  %v4933_v31 = vsub.f32 %v13021_v28, %v13392_v16  ;;  %v3766_v7 = vmul.f32 %v9556_v51, %v16710_v5  ;;  %9581 = vrcp.f32 %v13016_v40  ;;  %v16712_v16 = vld [vmem:[#allocation180_spill] sm:$0xff] }
 0x7b0   : > { %v13587_v41 = vpop.eup %9559  ;;  %v3817_v54 = vpack.c.bf16 %v3782_v0, %v3781_v48  ;;  %9583 = vpow2.f32 %v5024_v57  ;;  %v3765_v22 = vmul.f32 %v9558_v61, %v16712_v16  ;;  %v13610_v40 = vpop.f32.mrf.mxu1 }
 0x7b1   : > { %6289 = vmax.xlane.f32.xlu0 %v6288_v55  ;;  %16708 = vst [vmem:[#allocation31_spill] sm:$0xff] %v13587_v41  ;;  %v9562_v14 = vpop.eup %9561  ;;  %v3897_v55 = vsel %vm1022_vm9, %v3810_v36, 0  ;;  %v5202_v28 = vsel %vm1022_vm9, %v13587_v41, 0.0  ;;  %9585 = vpow2.f32 %v5026_v2  ;;  %v5058_v0 = vmul.f32 1.442695, %v4933_v31  ;;  %v16716_v31 = vld [vmem:[#allocation197_spill] sm:$0xff] }
 0x7b2   : > { %6334 = vmax.xlane.f32.xlu1 %v6333_v24  ;;  %v13603_v17 = vpop.eup %9563  ;;  %v3809_v57 = vpack.c.bf16 %v3766_v7, %v3765_v22  ;;  %9587 = vrcp.f32 %v13422_v34  ;;  %v16715_v24 = vld [vmem:[#allocation94_spill] sm:$0xff]  ;;  %v13623_v2 = vpop.f32.mrf.mxu1 }
 0x7b3   : > { %v13596_v23 = vpop.xlane.xlu1 %4846  ;;  %16711 = vst [vmem:[#allocation112_spill] sm:$0xff] %v13603_v17  ;;  %v13608_v51 = vpop.eup %9565  ;;  %v5205_v61 = vsel %vm1022_vm9, %v13603_v17, 0.0  ;;  %v3780_v13 = vmul.f32 %v9562_v14, %v16715_v24  ;;  %9589 = vpow2.f32 %v5056_v15  ;;  %v16718_v22 = vld [vmem:[#allocation18_spill] sm:$0xff] }
 0x7b4   : > { %16713 = vst [vmem:[#allocation72_spill] sm:$0xff] %v13608_v51  ;;  %v9568_v36 = vpop.eup %9567  ;;  %v5250_v5 = vsel %vm1022_vm9, %v13608_v51, 0.0  ;;  %9591 = vrcp.f32 %v13069_v62  ;;  %v16717_v62 = vld [vmem:[#allocation155_spill] sm:$0xff]  ;;  %v16735_v51 = vld [vmem:[#allocation64_spill] sm:$0xff] }
 0x7b5   : > { %8425 = vmatpush3.bf16.xpose.msra.mxu0 %v3897_v55  ;;  %6337 = vmax.xlane.f32.xlu0 %v6336_v18  ;;  %v13615_v10 = vpop.eup %9569  ;;  %v3779_v7 = vmul.f32 %v9568_v36, %v16716_v31  ;;  %9593 = vpow2.f32 %v5058_v0  ;;  %v4914_v16 = vsub.f32 %v16717_v62, %v13077_v6  ;;  %v6279_v36 = vsel %vm1022_vm9, %v16718_v22, -inf  ;;  %v13638_v0 = vpop.f32.mrf.mxu1 }
 0x7b6   : > { %8903 = vmatprep.subr.msk.bf16.mxu0 %vm1022_vm9, %v3817_v54  ;;  %5203 = vadd.xlane.f32.xlu1 %v5202_v28  ;;  %16714 = vst [vmem:[#allocation69_spill] sm:$0xff] %v13615_v10  ;;  %v9572_v48 = vpop.eup %9571  ;;  %v3894_v54 = vsel %vm1022_vm9, %v3809_v57, 0  ;;  %9595 = vrcp.f32 %v13408_v49  ;;  %v5253_v18 = vsel %vm1022_vm9, %v13615_v10, 0.0  ;;  %16719 = vst [vmem:[#allocation59_spill] sm:$0xff] %v13638_v0  ;;  %v16720_v57 = vld [vmem:[#allocation136_spill] sm:$0xff]  ;;  %v16721_v49 = vld [vmem:[#allocation195_spill] sm:$0xff] }
 0x7b7   : > { %v13613_v44 = vpop.xlane.xlu1 %5104  ;;  %v9574_v55 = vpop.eup %9573  ;;  %v3816_v14 = vpack.c.bf16 %v3780_v13, %v3779_v7  ;;  %v3764_v15 = vmul.f32 %v9572_v48, %v12989_v52  ;;  %9597 = vrcp.f32 %v16720_v57  ;;  %v16722_v52 = vld [vmem:[#allocation159_spill] sm:$0xff]  ;;  %v16726_v57 = vld [vmem:[#allocation196_spill] sm:$0xff] }
 0x7b8   : > { %v9576_v28 = vpop.eup %9575  ;;  %v4915_v13 = vsub.f32 %v16722_v52, %v13437_v47  ;;  %9599 = vrcp.f32 %v13490_v58  ;;  %v13657_v22 = vpop.f32.mrf.mxu1  ;;  %v16730_v58 = vld [vmem:[#allocation95_spill] sm:$0xff] }
 0x7b9   : > { %5206 = vadd.xlane.f32.xlu0 %v5205_v61  ;;  %v3763_v61 = vmul.f32 %v9574_v55, %v16721_v49  ;;  %v9578_v24 = vpop.eup %9577  ;;  %v16727_v49 = vld [vmem:[#allocation104_spill] sm:$0xff]  ;;  %16729 = vst [vmem:[#allocation185_spill] sm:$0xff] %v13657_v22  ;;  %9601 = vrcp.f32 %v16730_v58 }
 0x7ba   : > { %5251 = vadd.xlane.f32.xlu1 %v5250_v5  ;;  %v9580_v6 = vpop.eup %9579  ;;  %v16723_v5 = vld [vmem:[#allocation118_spill] sm:$0xff]  ;;  %v6327_v47 = vsel %vm1022_vm9, %v16727_v49, -inf  ;;  %9603 = vrcp.f32 %v13476_v60  ;;  %v16739_v60 = vld [vmem:[#allocation51_spill] sm:$0xff] }
 0x7bb   : > { %v13627_v34 = vpop.xlane.xlu1 %5152  ;;  %v6282_v31 = vsel %vm1022_vm9, %v16723_v5, -inf  ;;  %v3808_v7 = vpack.c.bf16 %v3764_v15, %v3763_v61  ;;  %v16731_v5 = vld [vmem:[#allocation207_spill] sm:$0xff]  ;;  %v5022_v61 = vmul.f32 1.442695, %v4915_v13  ;;  %v16736_v13 = vld [vmem:[#allocation205_spill] sm:$0xff] }
 0x7bc   : > { %v9582_v62 = vpop.eup %9581  ;;  %v3777_v15 = vmul.f32 %v9578_v24, %v16731_v5 }
 0x7bd   : > { %8427 = vmatpush3.bf16.xpose.msra.mxu0 %v3894_v54  ;;  %5254 = vadd.xlane.f32.xlu0 %v5253_v18  ;;  %v16724_v54 = vld [vmem:[#allocation50_spill] sm:$0xff]  ;;  %v13655_v52 = vpop.eup %9583  ;;  %v3891_v49 = vsel %vm1022_vm9, %v3808_v7, 0 }
 0x7be   : > { %8904 = vmatprep.subr.msk.bf16.mxu0 %vm1022_vm9, %v3816_v14  ;;  %6280 = vmax.xlane.f32.xlu1 %v6279_v36  ;;  %v3778_v18 = vmul.f32 %v9576_v28, %v16724_v54  ;;  %v5020_v14 = vmul.f32 1.442695, %v4914_v16  ;;  %v16725_v36 = vld [vmem:[#allocation98_spill] sm:$0xff]  ;;  %16728 = vst [vmem:[#allocation184_spill] sm:$0xff] %v13655_v52  ;;  %v16732_v28 = vld [vmem:[#allocation199_spill] sm:$0xff] }
 0x7bf   : > { %v13645_v48 = vpop.xlane.xlu1 %4792  ;;  %v4930_v55 = vsub.f32 %v16726_v57, %v16725_v36  ;;  %v4931_v16 = vsub.f32 %v16732_v28, %v13456_v33  ;;  %v16733_v36 = vld [vmem:[#allocation206_spill] sm:$0xff]  ;;  %v13666_v57 = vpop.eup %9585  ;;  %v5196_v33 = vsel %vm1022_vm9, %v13655_v52, 0.0 }
 0x7c0   : > { %16734 = vst [vmem:[#allocation25_spill] sm:$0xff] %v13666_v57  ;;  %v3815_v10 = vpack.c.bf16 %v3778_v18, %v3777_v15  ;;  %v9588_v58 = vpop.eup %9587  ;;  %9605 = vpow2.f32 %v5020_v14  ;;  %v13677_v28 = vpop.f32.mrf.mxu1  ;;  %v16741_v15 = vld [vmem:[#allocation56_spill] sm:$0xff] }
 0x7c1   : > { %6283 = vmax.xlane.f32.xlu0 %v6282_v31  ;;  %v3762_v31 = vmul.f32 %v9580_v6, %v16733_v36  ;;  %v5052_v24 = vmul.f32 1.442695, %v4930_v55  ;;  %v3761_v6 = vmul.f32 %v9582_v62, %v16736_v13  ;;  %v13675_v5 = vpop.eup %9589  ;;  %16738 = vst [vmem:[#allocation57_spill] sm:$0xff] %v13677_v28  ;;  %9607 = vrcp.f32 %v16739_v60 }
 0x7c2   : > { %6328 = vmax.xlane.f32.xlu1 %v6327_v47  ;;  %v6330_v47 = vsel %vm1022_vm9, %v16735_v51, -inf  ;;  %16737 = vst [vmem:[#allocation60_spill] sm:$0xff] %v13675_v5  ;;  %v9592_v7 = vpop.eup %9591  ;;  %9609 = vpow2.f32 %v5022_v61  ;;  %v5054_v18 = vmul.f32 1.442695, %v4931_v16  ;;  %v5199_v62 = vsel %vm1022_vm9, %v13666_v57, 0.0  ;;  %v13691_v61 = vpop.f32.mrf.mxu1  ;;  %v16743_v16 = vld [vmem:[#allocation43_spill] sm:$0xff] }
 0x7c3   : > { %v13663_v54 = vpop.xlane.xlu1 %4840  ;;  %v3807_v55 = vpack.c.bf16 %v3762_v31, %v3761_v6  ;;  %9611 = vrcp.f32 %v13559_v37  ;;  %v3776_v36 = vmul.f32 %v9588_v58, %v16741_v15  ;;  %16742 = vst [vmem:[#allocation194_spill] sm:$0xff] %v13691_v61  ;;  %v16744_v31 = vld [vmem:[#allocation211_spill] sm:$0xff]  ;;  %v16746_v15 = vld [vmem:[#allocation128_spill] sm:$0xff]  ;;  %v16761_v57 = vld [vmem:[#allocation217_spill] sm:$0xff] }
 0x7c4   : > { %9613 = vpow2.f32 %v5052_v24  ;;  %v13698_v58 = vpop.f32.mrf.mxu1 }
 0x7c5   : > { %8429 = vmatpush3.bf16.xpose.msra.mxu0 %v3891_v49  ;;  %6331 = vmax.xlane.f32.xlu0 %v6330_v47  ;;  %v13683_v49 = vpop.eup %9593  ;;  %9615 = vrcp.f32 %v16743_v16  ;;  %v3888_v6 = vsel %vm1022_vm9, %v3807_v55, 0  ;;  %16745 = vst [vmem:[#allocation120_spill] sm:$0xff] %v13698_v58 }
 0x7c6   : > { %8905 = vmatprep.subr.msk.bf16.mxu0 %vm1022_vm9, %v3815_v10  ;;  %5197 = vadd.xlane.f32.xlu1 %v5196_v33  ;;  %16740 = vst [vmem:[#allocation193_spill] sm:$0xff] %v13683_v49  ;;  %v9596_v47 = vpop.eup %9595  ;;  %v5244_v10 = vsel %vm1022_vm9, %v13675_v5, 0.0  ;;  %v3775_v33 = vmul.f32 %v9592_v7, %v16744_v31  ;;  %9617 = vpow2.f32 %v5054_v18  ;;  %v16747_v7 = vld [vmem:[#allocation111_spill] sm:$0xff]  ;;  %v16748_v31 = vld [vmem:[#allocation156_spill] sm:$0xff]  ;;  %v16749_v5 = vld [vmem:[#allocation86_spill] sm:$0xff] }
 0x7c7   : > { %v13681_v14 = vpop.xlane.xlu1 %5098  ;;  %v9598_v13 = vpop.eup %9597  ;;  %9619 = vrcp.f32 %v13546_v11  ;;  %v4912_v18 = vsub.f32 %v16748_v31, %v16747_v7  ;;  %v16750_v11 = vld [vmem:[#allocation129_spill] sm:$0xff]  ;;  %v16756_v7 = vld [vmem:[#allocation131_spill] sm:$0xff] }
 0x7c8   : > { %v3814_v60 = vpack.c.bf16 %v3776_v36, %v3775_v33  ;;  %v9600_v16 = vpop.eup %9599  ;;  %9621 = vrcp.f32 %v16749_v5  ;;  %v6273_v55 = vsel %vm1022_vm9, %v16750_v11, -inf  ;;  %v16751_v36 = vld [vmem:[#allocation209_spill] sm:$0xff]  ;;  %v13721_v5 = vpop.f32.mrf.mxu1 }
 0x7c9   : > { %5200 = vadd.xlane.f32.xlu0 %v5199_v62  ;;  %v5247_v62 = vsel %vm1022_vm9, %v13683_v49, 0.0  ;;  %v3759_v33 = vmul.f32 %v9598_v13, %v16751_v36  ;;  %v9602_v49 = vpop.eup %9601  ;;  %16754 = vst [vmem:[#allocation132_spill] sm:$0xff] %v13721_v5  ;;  %9623 = vrcp.f32 %v13627_v34  ;;  %v3774_v31 = vmul.f32 %v9600_v16, %v16756_v7  ;;  %v16759_v5 = vld [vmem:[#allocation85_spill] sm:$0xff]  ;;  %v16760_v34 = vld [vmem:[#allocation87_spill] sm:$0xff] }
 0x7ca   : > { %5245 = vadd.xlane.f32.xlu1 %v5244_v10  ;;  %v3760_v10 = vmul.f32 %v9596_v47, %v16746_v15  ;;  %v16752_v47 = vld [vmem:[#allocation54_spill] sm:$0xff]  ;;  %v9604_v36 = vpop.eup %9603  ;;  %9625 = vrcp.f32 %v16759_v5  ;;  %v6321_v52 = vsel %vm1022_vm9, %v16760_v34, -inf  ;;  %v3773_v58 = vmul.f32 %v9602_v49, %v16761_v57  ;;  %v16787_v34 = vld [vmem:[#allocation229_spill] sm:$0xff] }
 0x7cb   : > { %v13695_v37 = vpop.xlane.xlu1 %5146  ;;  %v16753_v15 = vld [vmem:[#allocation198_spill] sm:$0xff]  ;;  %v6324_v16 = vsel %vm1022_vm9, %v13268_v8, -inf  ;;  %9627 = vrcp.f32 %v13613_v44  ;;  %v16767_v8 = vld [vmem:[#allocation144_spill] sm:$0xff] }
 0x7cc   : > { %v13701_v24 = vpop.permute.xlu0 %3825  ;;  %v4928_v51 = vsub.f32 %v16753_v15, %v16752_v47  ;;  %v16757_v47 = vld [vmem:[#allocation163_spill] sm:$0xff]  ;;  %v3813_v5 = vpack.c.bf16 %v3774_v31, %v3773_v58 }
 0x7cd   : > { %8431 = vmatpush3.bf16.xpose.msra.mxu0 %v3888_v6  ;;  %5248 = vadd.xlane.f32.xlu0 %v5247_v62  ;;  %v3806_v62 = vpack.c.bf16 %v3760_v10, %v3759_v33  ;;  %v4913_v15 = vsub.f32 %v16757_v47, %v13505_v21  ;;  %v13731_v11 = vpop.eup %9605  ;;  %v13743_v21 = vpop.f32.mrf.mxu1  ;;  %v16768_v58 = vld [vmem:[#allocation215_spill] sm:$0xff] }
 0x7ce   : > { %8906 = vmatprep.subr.msk.bf16.mxu0 %vm1022_vm9, %v3814_v60  ;;  %8418 = vmatprep.mubr.msk.bf16.mxu0 %vm1022_vm9, %v13701_v24  ;;  %v16755_v60 = vld [vmem:[#allocation22_spill] sm:$0xff]  ;;  %16758 = vst [vmem:[#allocation190_spill] sm:$0xff] %v13731_v11  ;;  %v9608_v19 = vpop.eup %9607  ;;  %16763 = vst [vmem:[#allocation116_spill] sm:$0xff] %v13743_v21  ;;  %v5190_v44 = vsel %vm1022_vm9, %v13731_v11, 0.0 }
 0x7cf   : > { %6274 = vmax.xlane.f32.xlu1 %v6273_v55  ;;  %8419 = vmatmul.mubr.msk.bf16.gmra.mxu0 %vm1022_vm9, %v13701_v24  ;;  %v13719_v6 = vpop.xlane.xlu1 %4783  ;;  %v6276_v13 = vsel %vm1022_vm9, %v16755_v60, -inf  ;;  %v5016_v55 = vmul.f32 1.442695, %v4912_v18  ;;  %v5048_v60 = vmul.f32 1.442695, %v4928_v51  ;;  %v13741_v18 = vpop.eup %9609  ;;  %v3885_v33 = vsel %vm1022_vm9, %v3806_v62, 0 }
 0x7d0   : > { %8436 = vmatprep.mubr.msk.bf16.mxu0 %vm1022_vm9, %v13297_v63  ;;  %16762 = vst [vmem:[#allocation191_spill] sm:$0xff] %v13741_v18  ;;  %v9612_v57 = vpop.eup %9611  ;;  %v5018_v51 = vmul.f32 1.442695, %v4913_v15  ;;  %v3757_v62 = vmul.f32 %v9608_v19, %v16768_v58 }
 0x7d1   : > { %6277 = vmax.xlane.f32.xlu0 %v6276_v13  ;;  %v16764_v13 = vld [vmem:[#allocation134_spill] sm:$0xff]  ;;  %9629 = vpow2.f32 %v5016_v55  ;;  %v13750_v47 = vpop.eup %9613 }
 0x7d2   : > { %v3758_v7 = vmul.f32 %v9604_v36, %v16764_v13  ;;  %16766 = vst [vmem:[#allocation113_spill] sm:$0xff] %v13750_v47  ;;  %9631 = vrcp.f32 %v16767_v8  ;;  %v9616_v31 = vpop.eup %9615  ;;  %v5193_v8 = vsel %vm1022_vm9, %v13741_v18, 0.0  ;;  %v5238_v13 = vsel %vm1022_vm9, %v13750_v47, 0.0  ;;  %v16786_v18 = vld [vmem:[#allocation145_spill] sm:$0xff] }
 0x7d3   : > { %6322 = vmax.xlane.f32.xlu1 %v6321_v52  ;;  %v13737_v10 = vpop.xlane.xlu1 %4786  ;;  %v16765_v52 = vld [vmem:[#allocation96_spill] sm:$0xff]  ;;  %9633 = vpow2.f32 %v5048_v60  ;;  %v13759_v55 = vpop.eup %9617  ;;  %v16772_v60 = vld [vmem:[#allocation121_spill] sm:$0xff] }
 0x7d4   : > { %v4929_v49 = vsub.f32 %v16765_v52, %v13526_v3  ;;  %16769 = vst [vmem:[#allocation84_spill] sm:$0xff] %v13759_v55  ;;  %v13761_v3 = vpop.f32.mrf.mxu1  ;;  %9635 = vrcp.f32 %v13695_v37  ;;  %v3805_v15 = vpack.c.bf16 %v3758_v7, %v3757_v62  ;;  %v16773_v52 = vld [vmem:[#allocation223_spill] sm:$0xff]  ;;  %v5241_v7 = vsel %vm1022_vm9, %v13759_v55, 0.0 }
 0x7d5   : > { %8433 = vmatpush3.bf16.xpose.msra.mxu0 %v3885_v33  ;;  %6325 = vmax.xlane.f32.xlu0 %v6324_v16  ;;  %16770 = vst [vmem:[#allocation143_spill] sm:$0xff] %v13761_v3  ;;  %v16771_v16 = vld [vmem:[#allocation46_spill] sm:$0xff]  ;;  %9637 = vpow2.f32 %v5018_v51  ;;  %v16778_v55 = vld [vmem:[#allocation99_spill] sm:$0xff] }
 0x7d6   : > { %8907 = vmatprep.subr.msk.bf16.mxu0 %vm1022_vm9, %v3813_v5  ;;  %v5351_v33 = vmul.f32 %v9612_v57, %v16771_v16  ;;  %v9620_v5 = vpop.eup %9619  ;;  %v5050_v19 = vmul.f32 1.442695, %v4929_v49  ;;  %9639 = vrcp.f32 %v16772_v60  ;;  %v13775_v62 = vpop.f32.mrf.mxu1  ;;  %v3882_v57 = vsel %vm1022_vm9, %v3805_v15, 0  ;;  %v16774_v49 = vld [vmem:[#allocation47_spill] sm:$0xff] }
 0x7d7   : > { %5191 = vadd.xlane.f32.xlu1 %v5190_v44  ;;  %v13757_v36 = vpop.xlane.xlu1 %4831  ;;  %v5350_v44 = vmul.f32 %v9616_v31, %v16773_v52  ;;  %v9622_v58 = vpop.eup %9621  ;;  %9641 = vrcp.f32 %v13681_v14  ;;  %v16775_v31 = vld [vmem:[#allocation36_spill] sm:$0xff]  ;;  %v16776_v60 = vld [vmem:[#allocation115_spill] sm:$0xff]  ;;  %v6267_v47 = vsel %vm1022_vm9, %v16778_v55, -inf  ;;  %v16779_v14 = vld [vmem:[#allocation221_spill] sm:$0xff]  ;;  %v6315_v55 = vsel %vm1022_vm9, %v16786_v18, -inf }
 0x7d8   : > { %v9624_v16 = vpop.eup %9623  ;;  %9643 = vpow2.f32 %v5050_v19  ;;  %v16777_v52 = vld [vmem:[#allocation107_spill] sm:$0xff]  ;;  %v5334_v3 = vmul.f32 %v9622_v58, %v16779_v14  ;;  %v16780_v19 = vld [vmem:[#allocation76_spill] sm:$0xff] }
 0x7d9   : > { %5194 = vadd.xlane.f32.xlu0 %v5193_v8  ;;  %v5399_v51 = vpack.c.bf16 %v5351_v33, %v5350_v44  ;;  %v5335_v8 = vmul.f32 %v9620_v5, %v16774_v49  ;;  %9645 = vrcp.f32 %v16777_v52  ;;  %v9626_v15 = vpop.eup %9625  ;;  %v13789_v5 = vpop.f32.mrf.mxu1  ;;  %v6270_v44 = vsel %vm1022_vm9, %v16780_v19, -inf  ;;  %v16784_v14 = vld [vmem:[#allocation91_spill] sm:$0xff] }
 0x7da   : > { %v5348_v21 = vmul.f32 %v9626_v15, %v16787_v34  ;;  %v16790_v34 = vld [vmem:[#allocation110_spill] sm:$0xff] }
 0x7db   : > { %5239 = vadd.xlane.f32.xlu1 %v5238_v13  ;;  %v13771_v37 = vpop.xlane.xlu1 %4834  ;;  %v4910_v13 = vsub.f32 %v16776_v60, %v16775_v31  ;;  %v9628_v31 = vpop.eup %9627  ;;  %v4927_v15 = vsub.f32 %v16790_v34, %v13596_v23 }
 0x7dd   : > { %8435 = vmatpush3.bf16.xpose.msra.mxu0 %v3882_v57  ;;  %5242 = vadd.xlane.f32.xlu0 %v5241_v7  ;;  %v5391_v7 = vpack.c.bf16 %v5335_v8, %v5334_v3  ;;  %v16781_v57 = vld [vmem:[#allocation139_spill] sm:$0xff]  ;;  %v5012_v58 = vmul.f32 1.442695, %v4910_v13 }
 0x7de   : > { %8908 = vmatprep.subr.msk.bf16.mxu0 %vm1022_vm9, %v5399_v51  ;;  %v5349_v49 = vmul.f32 %v9624_v16, %v16781_v57  ;;  %v16782_v51 = vld [vmem:[#allocation150_spill] sm:$0xff]  ;;  %v13796_v52 = vpop.eup %9629  ;;  %v13807_v16 = vpop.f32.mrf.mxu1 }
 0x7df   : > { %6268 = vmax.xlane.f32.xlu1 %v6267_v47  ;;  %v13787_v33 = vpop.xlane.xlu1 %5089  ;;  %v4911_v60 = vsub.f32 %v16782_v51, %v13577_v56  ;;  %16783 = vst [vmem:[#allocation35_spill] sm:$0xff] %v13796_v52  ;;  %v16785_v47 = vld [vmem:[#allocation189_spill] sm:$0xff]  ;;  %v9632_v19 = vpop.eup %9631  ;;  %v5444_v56 = vsel %vm1022_vm9, %v5391_v7, 0  ;;  %9647 = vpow2.f32 %v5012_v58  ;;  %v16793_v7 = vld [vmem:[#allocation227_spill] sm:$0xff]  ;;  %v16796_v58 = vld [vmem:[#allocation68_spill] sm:$0xff] }
 0x7e0   : > { %v4926_v11 = vsub.f32 %v16785_v47, %v16784_v14  ;;  %v13805_v8 = vpop.eup %9633  ;;  %v5398_v13 = vpack.c.bf16 %v5349_v49, %v5348_v21  ;;  %v5184_v21 = vsel %vm1022_vm9, %v13796_v52, 0.0  ;;  %v5332_v49 = vmul.f32 %v9632_v19, %v16793_v7  ;;  %v13829_v34 = vpop.f32.mrf.mxu1 }
 0x7e1   : > { %6271 = vmax.xlane.f32.xlu0 %v6270_v44  ;;  %16788 = vst [vmem:[#allocation32_spill] sm:$0xff] %v13805_v8  ;;  %v16789_v44 = vld [vmem:[#allocation42_spill] sm:$0xff]  ;;  %v9636_v51 = vpop.eup %9635  ;;  %v5014_v14 = vmul.f32 1.442695, %v4911_v60  ;;  %v16795_v60 = vld [vmem:[#allocation233_spill] sm:$0xff] }
 0x7e2   : > { %v5333_v57 = vmul.f32 %v9628_v31, %v16789_v44  ;;  %v13819_v18 = vpop.eup %9637  ;;  %v16794_v31 = vld [vmem:[#allocation146_spill] sm:$0xff]  ;;  %v5046_v52 = vmul.f32 1.442695, %v4927_v15 }
 0x7e3   : > { %6316 = vmax.xlane.f32.xlu1 %v6315_v55  ;;  %v13803_v3 = vpop.xlane.xlu1 %5092  ;;  %v16791_v55 = vld [vmem:[#allocation97_spill] sm:$0xff]  ;;  %16792 = vst [vmem:[#allocation135_spill] sm:$0xff] %v13819_v18  ;;  %v9640_v23 = vpop.eup %9639  ;;  %v954_v44 = vadd.f32 %v16795_v60, %v16794_v31  ;;  %9649 = vpow2.f32 %v5014_v14  ;;  %v5187_v19 = vsel %vm1022_vm9, %v13819_v18, 0.0  ;;  %v16800_v31 = vld [vmem:[#allocation55_spill] sm:$0xff] }
 0x7e4   : > { %8437 = vmatmul.mubr.msk.bf16.vlgmr.msra.gmra.mxu0 %vm1022_vm9, %v13297_v63  ;;  %v6318_v47 = vsel %vm1022_vm9, %v16791_v55, -inf  ;;  %v5044_v63 = vmul.f32 1.442695, %v4926_v11  ;;  %v5390_v55 = vpack.c.bf16 %v5333_v57, %v5332_v49  ;;  %v5347_v11 = vmul.f32 %v9636_v51, %v16796_v58  ;;  %v9642_v41 = vpop.eup %9641  ;;  %v13845_v14 = vpop.f32.mrf.mxu1  ;;  %v16801_v58 = vld [vmem:[#allocation106_spill] sm:$0xff] }
 0x7e5   : > { %8438 = vmatprep.mubr.msk.bf16.mxu0 %vm1022_vm9, %v13701_v24  ;;  %8475 = vmatpush3.bf16.xpose.msra.mxu0 %v5444_v56  ;;  %v13836_v7 = vpop.eup %9643  ;;  %v5346_v57 = vmul.f32 %v9640_v23, %v16800_v31  ;;  %v16802_v23 = vld [vmem:[#allocation119_spill] sm:$0xff]  ;;  %v16806_v31 = vld [vmem:[#allocation153_spill] sm:$0xff] }
 0x7e6   : > { %8909 = vmatprep.subr.msk.bf16.mxu0 %vm1022_vm9, %v5398_v13  ;;  %6319 = vmax.xlane.f32.xlu0 %v6318_v47  ;;  %v16797_v13 = vld [vmem:[#allocation82_spill] sm:$0xff]  ;;  %16799 = vst [vmem:[#allocation200_spill] sm:$0xff] %v13836_v7  ;;  %9651 = vpow2.f32 %v5044_v63  ;;  %v9646_v49 = vpop.eup %9645  ;;  %v5441_v15 = vsel %vm1022_vm9, %v5390_v55, 0 }
 0x7e7   : > { %5185 = vadd.xlane.f32.xlu1 %v5184_v21  ;;  %v13827_v56 = vpop.xlane.xlu1 %5140  ;;  %v16798_v47 = vld [vmem:[#allocation30_spill] sm:$0xff]  ;;  %v5232_v21 = vsel %vm1022_vm9, %v13805_v8, 0.0  ;;  %v5397_v63 = vpack.c.bf16 %v5347_v11, %v5346_v57  ;;  %9653 = vpow2.f32 %v5046_v52  ;;  %v16805_v11 = vld [vmem:[#allocation45_spill] sm:$0xff]  ;;  %v13863_v52 = vpop.f32.mrf.mxu1  ;;  %v4909_v57 = vsub.f32 %v16806_v31, %v13645_v48  ;;  %v16812_v31 = vld [vmem:[#allocation192_spill] sm:$0xff] }
 0x7e8   : > { %v958_v17 = vadd.f32 %v16798_v47, %v16797_v13  ;;  %v5331_v13 = vmul.f32 %v9642_v41, %v16801_v58  ;;  %v16813_v8 = vld [vmem:[#allocation124_spill] sm:$0xff] }
 0x7ea   : > { %5188 = vadd.xlane.f32.xlu0 %v5187_v19  ;;  %v13841_v51 = vpack.c.bf16 %v958_v17, %v954_v44  ;;  %v5235_v17 = vsel %vm1022_vm9, %v13836_v7, 0.0  ;;  %v16803_v44 = vld [vmem:[#allocation103_spill] sm:$0xff]  ;;  %v5330_v19 = vmul.f32 %v9646_v49, %v16805_v11  ;;  %v16810_v7 = vld [vmem:[#allocation114_spill] sm:$0xff] }
 0x7eb   : > { %5233 = vadd.xlane.f32.xlu1 %v5232_v21  ;;  %v13843_v60 = vpop.xlane.xlu1 %4777  ;;  %v4908_v47 = vsub.f32 %v16803_v44, %v16802_v23  ;;  %v6309_v49 = vsel %vm1022_vm9, %v16810_v7, -inf }
 0x7ec   : > { %8439 = vmatmul.mubr.msk.bf16.gmra.mxu0 %vm1022_vm9, %v13701_v24  ;;  %v16804_v24 = vld [vmem:[#allocation27_spill] sm:$0xff]  ;;  %v5389_v21 = vpack.c.bf16 %v5331_v13, %v5330_v19  ;;  %v13877_v13 = vpop.f32.mrf.mxu1  ;;  %v5010_v19 = vmul.f32 1.442695, %v4909_v57 }
 0x7ed   : > { %8477 = vmatpush3.bf16.xpose.msra.mxu0 %v5441_v15  ;;  %8490 = vmatprep.mubr.msk.bf16.mxu0 %vm1022_vm9, %v13841_v51  ;;  %v6261_v55 = vsel %vm1022_vm9, %v16804_v24, -inf  ;;  %v16807_v15 = vld [vmem:[#allocation21_spill] sm:$0xff]  ;;  %v5008_v23 = vmul.f32 1.442695, %v4908_v47  ;;  %v4925_v47 = vsub.f32 %v16812_v31, %v13663_v54 }
 0x7ee   : > { %8910 = vmatprep.subr.msk.bf16.mxu0 %vm1022_vm9, %v5397_v63  ;;  %5236 = vadd.xlane.f32.xlu0 %v5235_v17  ;;  %v6264_v58 = vsel %vm1022_vm9, %v16807_v15, -inf  ;;  %v16808_v63 = vld [vmem:[#allocation92_spill] sm:$0xff]  ;;  %v5438_v48 = vsel %vm1022_vm9, %v5389_v21, 0  ;;  %v13892_v57 = vpop.f32.mrf.mxu1 }
 0x7ef   : > { %6262 = vmax.xlane.f32.xlu1 %v6261_v55  ;;  %v13861_v41 = vpop.xlane.xlu1 %4780  ;;  %v16809_v17 = vld [vmem:[#allocation108_spill] sm:$0xff]  ;;  %v13873_v55 = vpop.eup %9647  ;;  %9655 = vpow2.f32 %v5008_v23  ;;  %v5042_v54 = vmul.f32 1.442695, %v4925_v47  ;;  %v16817_v23 = vld [vmem:[#allocation105_spill] sm:$0xff] }
 0x7f0   : > { %v4924_v44 = vsub.f32 %v16809_v17, %v16808_v63  ;;  %16811 = vst [vmem:[#allocation109_spill] sm:$0xff] %v13873_v55  ;;  %v13884_v63 = vpop.eup %9649  ;;  %9657 = vpow2.f32 %v5010_v19 }
 0x7f1   : > { %16814 = vst [vmem:[#allocation142_spill] sm:$0xff] %v13884_v63 }
 0x7f2   : > { %6265 = vmax.xlane.f32.xlu0 %v6264_v58  ;;  %v6312_v58 = vsel %vm1022_vm9, %v16813_v8, -inf  ;;  %v5040_v17 = vmul.f32 1.442695, %v4924_v44  ;;  %v4906_v44 = vsub.f32 %v16817_v23, %v13719_v6  ;;  %v6399_v6 = vsel %vm1022_vm9, %v13638_v0, -inf  ;;  %v16820_v23 = vld [vmem:[#allocation77_spill] sm:$0xff] }
 0x7f3   : > { %6310 = vmax.xlane.f32.xlu1 %v6309_v49  ;;  %v13875_v11 = vpop.xlane.xlu1 %4825  ;;  %v5178_v49 = vsel %vm1022_vm9, %v13873_v55, 0.0  ;;  %v13888_v18 = vpop.eup %9651 }
 0x7f4   : > { %16815 = vst [vmem:[#allocation70_spill] sm:$0xff] %v13888_v18  ;;  %v13896_v31 = vpop.eup %9653  ;;  %9659 = vpow2.f32 %v5040_v17  ;;  %v13902_v55 = vpop.f32.mrf.mxu1  ;;  %v5004_v47 = vmul.f32 1.442695, %v4906_v44 }
 0x7f5   : > { %8479 = vmatpush3.bf16.xpose.msra.mxu0 %v5438_v48  ;;  %v5181_v48 = vsel %vm1022_vm9, %v13884_v63, 0.0  ;;  %16816 = vst [vmem:[#allocation75_spill] sm:$0xff] %v13896_v31  ;;  %16818 = vst [vmem:[#allocation130_spill] sm:$0xff] %v13902_v55  ;;  %9661 = vrcp.f32 %v13803_v3  ;;  %v5229_v19 = vsel %vm1022_vm9, %v13896_v31, 0.0  ;;  %v6402_v3 = vsel %vm1022_vm9, %v13677_v28, -inf  ;;  %v16832_v28 = vld [vmem:[#allocation40_spill] sm:$0xff] }
 0x7f6   : > { %6313 = vmax.xlane.f32.xlu0 %v6312_v58  ;;  %v5226_v58 = vsel %vm1022_vm9, %v13888_v18, 0.0  ;;  %9663 = vpow2.f32 %v5042_v54  ;;  %v16821_v54 = vld [vmem:[#allocation178_spill] sm:$0xff]  ;;  %v6447_v44 = vsel %vm1022_vm9, %v13902_v55, -inf }
 0x7f7   : > { %5179 = vadd.xlane.f32.xlu1 %v5178_v49  ;;  %v13890_v21 = vpop.xlane.xlu1 %4828  ;;  %9665 = vrcp.f32 %v13787_v33  ;;  %v4922_v33 = vsub.f32 %v16821_v54, %v13757_v36 }
 0x7f8   : > { %9667 = vrcp.f32 %v13827_v56 }
 0x7f9   : > { %9669 = vpow2.f32 %v5004_v47  ;;  %v5036_v54 = vmul.f32 1.442695, %v4922_v33 }
 0x7fa   : > { %5182 = vadd.xlane.f32.xlu0 %v5181_v48  ;;  %v13910_v48 = vpop.f32.mrf.mxu1 }
 0x7fb   : > { %5227 = vadd.xlane.f32.xlu1 %v5226_v58  ;;  %v5084_v49 = vpop.xlane.xlu1 %5083  ;;  %16819 = vst [vmem:[#allocation65_spill] sm:$0xff] %v13910_v48  ;;  %v4907_v58 = vsub.f32 %v16820_v23, %v13737_v10  ;;  %v16824_v23 = vld [vmem:[#allocation182_spill] sm:$0xff]  ;;  %v6441_v7 = vsel %vm1022_vm9, %v13910_v48, -inf }
 0x7fc   : > { %v13923_v10 = vpop.f32.mrf.mxu1  ;;  %v4923_v47 = vsub.f32 %v16824_v23, %v13771_v37 }
 0x7fd   : > { %16823 = vst [vmem:[#allocation127_spill] sm:$0xff] %v13923_v10  ;;  %v5006_v56 = vmul.f32 1.442695, %v4907_v58  ;;  %v6450_v36 = vsel %vm1022_vm9, %v13923_v10, -inf }
 0x7fe   : > { %5230 = vadd.xlane.f32.xlu0 %v5229_v19 }
 0x7ff   : > { %6400 = vmax.xlane.f32.xlu1 %v6399_v6  ;;  %v5087_v17 = vpop.xlane.xlu1 %5086  ;;  %v13921_v6 = vpop.eup %9655 }
 0x800   : > { %16822 = vst [vmem:[#allocation208_spill] sm:$0xff] %v13921_v6 }
 0x802   : > { %6403 = vmax.xlane.f32.xlu0 %v6402_v3  ;;  %v5138_v19 = vpop.xlane.xlu0 %5137  ;;  %v13929_v3 = vpop.eup %9657 }
 0x803   : > { %6448 = vmax.xlane.f32.xlu1 %v6447_v44  ;;  %9671 = vrcp.f32 %v5138_v19  ;;  %v5132_v31 = vpop.xlane.xlu1 %5131  ;;  %16825 = vst [vmem:[#allocation63_spill] sm:$0xff] %v13929_v3  ;;  %v5172_v44 = vsel %vm1022_vm9, %v13921_v6, 0.0  ;;  %v13933_v18 = vpop.eup %9659  ;;  %v5175_v58 = vsel %vm1022_vm9, %v13929_v3, 0.0  ;;  %v16829_v3 = vld [vmem:[#allocation41_spill] sm:$0xff] }
 0x804   : > { %9673 = vrcp.f32 %v5087_v17  ;;  %16826 = vst [vmem:[#allocation89_spill] sm:$0xff] %v13933_v18  ;;  %v9662_v37 = vpop.eup %9661 }
 0x805   : > { %9675 = vrcp.f32 %v5132_v31  ;;  %v5038_v31 = vmul.f32 1.442695, %v4923_v47  ;;  %v13939_v23 = vpop.eup %9663 }
 0x806   : > { %9677 = vrcp.f32 %v5084_v49  ;;  %6451 = vmax.xlane.f32.xlu0 %v6450_v36  ;;  %v5135_v19 = vpop.xlane.xlu0 %5134  ;;  %16827 = vst [vmem:[#allocation126_spill] sm:$0xff] %v13939_v23  ;;  %v5220_v49 = vsel %vm1022_vm9, %v13933_v18, 0.0  ;;  %v9666_v36 = vpop.eup %9665 }
 0x807   : > { %5173 = vadd.xlane.f32.xlu1 %v5172_v44  ;;  %9679 = vrcp.f32 %v5135_v19  ;;  %v13935_v17 = vpop.xlane.xlu1 %6304  ;;  %v16828_v19 = vld [vmem:[#allocation28_spill] sm:$0xff]  ;;  %v9668_v47 = vpop.eup %9667 }
 0x808   : > { %9681 = vpow2.f32 %v5006_v56  ;;  %v5329_v6 = vmul.f32 %v9662_v37, %v16828_v19  ;;  %v5223_v56 = vsel %vm1022_vm9, %v13939_v23, 0.0  ;;  %v13957_v63 = vpop.eup %9669  ;;  %v13959_v19 = vpop.f32.mrf.mxu1  ;;  %v16830_v23 = vld [vmem:[#allocation101_spill] sm:$0xff]  ;;  %v5345_v0 = vmul.f32 %v9668_v47, %v16832_v28  ;;  %v16834_v47 = vld [vmem:[#allocation186_spill] sm:$0xff] }
 0x809   : > { %9683 = vpow2.f32 %v5036_v54  ;;  %v4904_v54 = vsub.f32 %v16594_v38, %v13843_v60  ;;  %v4905_v10 = vsub.f32 %v16830_v23, %v13861_v41  ;;  %v6396_v60 = vsel %vm1022_vm9, %v13691_v61, -inf }
 0x80a   : > { %5176 = vadd.xlane.f32.xlu0 %v5175_v58  ;;  %v13943_v33 = vpop.xlane.xlu0 %6307  ;;  %9685 = vpow2.f32 %v5038_v31  ;;  %v6393_v58 = vsel %vm1022_vm9, %v13657_v22, -inf  ;;  %v6444_v23 = vsel %vm1022_vm9, %v13959_v19, -inf }
 0x80b   : > { %5221 = vadd.xlane.f32.xlu1 %v5220_v49  ;;  %v13945_v44 = vpop.xlane.xlu1 %6352  ;;  %v5328_v49 = vmul.f32 %v9666_v36, %v16829_v3  ;;  %v5000_v36 = vmul.f32 1.442695, %v4904_v54  ;;  %v5002_v28 = vmul.f32 1.442695, %v4905_v10  ;;  %v4921_v54 = vsub.f32 %v16834_v47, %v13890_v21 }
 0x80d   : > { %v5388_v55 = vpack.c.bf16 %v5329_v6, %v5328_v49 }
 0x80e   : > { %5224 = vadd.xlane.f32.xlu0 %v5223_v56  ;;  %v13954_v18 = vpop.xlane.xlu0 %6355  ;;  %v16831_v56 = vld [vmem:[#allocation166_spill] sm:$0xff] }
 0x80f   : > { %6394 = vmax.xlane.f32.xlu1 %v6393_v58  ;;  %v5078_v37 = vpop.xlane.xlu1 %5077  ;;  %v16833_v58 = vld [vmem:[#allocation179_spill] sm:$0xff] }
 0x810   : > { %v9672_v31 = vpop.eup %9671  ;;  %v4920_v8 = vsub.f32 %v16833_v58, %v13875_v11  ;;  %9687 = vrcp.f32 %v5078_v37  ;;  %v5435_v11 = vsel %vm1022_vm9, %v5388_v55, 0  ;;  %v16836_v37 = vld [vmem:[#allocation176_spill] sm:$0xff] }
 0x811   : > { %v9674_v38 = vpop.eup %9673  ;;  %v5344_v22 = vmul.f32 %v9672_v31, %v16831_v56  ;;  %v16837_v58 = vld [vmem:[#allocation152_spill] sm:$0xff] }
 0x812   : > { %v9676_v3 = vpop.eup %9675  ;;  %6397 = vmax.xlane.f32.xlu0 %v6396_v60  ;;  %v5081_v15 = vpop.xlane.xlu0 %5080  ;;  %v16835_v60 = vld [vmem:[#allocation161_spill] sm:$0xff]  ;;  %v5327_v48 = vmul.f32 %v9674_v38, %v16837_v58  ;;  %v5034_v38 = vmul.f32 1.442695, %v4921_v54 }
 0x813   : > { %v9678_v41 = vpop.eup %9677  ;;  %6442 = vmax.xlane.f32.xlu1 %v6441_v7  ;;  %v5126_v6 = vpop.xlane.xlu1 %5125  ;;  %v5396_v49 = vpack.c.bf16 %v5345_v0, %v5344_v22  ;;  %9689 = vrcp.f32 %v5081_v15  ;;  %v5342_v56 = vmul.f32 %v9676_v3, %v16835_v60  ;;  %v5032_v22 = vmul.f32 1.442695, %v4920_v8  ;;  %v16838_v3 = vld [vmem:[#allocation148_spill] sm:$0xff] }
 0x814   : > { %v9680_v31 = vpop.eup %9679  ;;  %9691 = vrcp.f32 %v5126_v6  ;;  %v5166_v0 = vsel %vm1022_vm9, %v13957_v63, 0.0  ;;  %v5326_v6 = vmul.f32 %v9678_v41, %v16838_v3 }
 0x815   : > { %8911 = vmatprep.subr.msk.bf16.mxu0 %vm1022_vm9, %v5396_v49  ;;  %v5343_v7 = vmul.f32 %v9680_v31, %v16836_v37  ;;  %v13980_v61 = vpop.eup %9681  ;;  %9693 = vpow2.f32 %v5000_v36 }
 0x816   : > { %6445 = vmax.xlane.f32.xlu0 %v6444_v23  ;;  %v5129_v15 = vpop.xlane.xlu0 %5128  ;;  %8481 = vmatpush3.bf16.xpose.msra.mxu0 %v5435_v11  ;;  %v13984_v55 = vpop.eup %9683  ;;  %v5169_v8 = vsel %vm1022_vm9, %v13980_v61, 0.0  ;;  %v5387_v36 = vpack.c.bf16 %v5327_v48, %v5326_v6  ;;  %v16839_v48 = vld [vmem:[#allocation52_spill] sm:$0xff]  ;;  %v6387_v11 = vsel %vm1022_vm9, %v13570_v12, -inf  ;;  %v6435_v6 = vsel %vm1022_vm9, %v13845_v14, -inf }
 0x817   : > { %5167 = vadd.xlane.f32.xlu1 %v5166_v0  ;;  %9695 = vrcp.f32 %v5129_v15  ;;  %v13986_v21 = vpop.xlane.xlu1 %6298  ;;  %v5395_v10 = vpack.c.bf16 %v5343_v7, %v5342_v56  ;;  %v13992_v23 = vpop.eup %9685  ;;  %v5214_v49 = vsel %vm1022_vm9, %v13984_v55, 0.0  ;;  %v6467_v54 = vsub.f32 %v16839_v48, %v13935_v17  ;;  %v16840_v7 = vld [vmem:[#allocation39_spill] sm:$0xff]  ;;  %v16841_v17 = vld [vmem:[#allocation162_spill] sm:$0xff] }
 0x818   : > { %9697 = vpow2.f32 %v5002_v28  ;;  %v5217_v41 = vsel %vm1022_vm9, %v13992_v23, 0.0  ;;  %v5432_v28 = vsel %vm1022_vm9, %v5387_v36, 0  ;;  %v6468_v58 = vsub.f32 %v16840_v7, %v13943_v33 }
 0x819   : > { %8912 = vmatprep.subr.msk.bf16.mxu0 %vm1022_vm9, %v5395_v10  ;;  %9699 = vpow2.f32 %v5032_v22  ;;  %v6390_v0 = vsel %vm1022_vm9, %v13610_v40, -inf  ;;  %v6545_v10 = vmul.f32 1.442695, %v6467_v54  ;;  %v6483_v3 = vsub.f32 %v16841_v17, %v13945_v44  ;;  %v16842_v54 = vld [vmem:[#allocation44_spill] sm:$0xff] }
 0x81a   : > { %5170 = vadd.xlane.f32.xlu0 %v5169_v8  ;;  %v13996_v31 = vpop.xlane.xlu0 %6301  ;;  %9701 = vpow2.f32 %v5034_v38  ;;  %v6484_v48 = vsub.f32 %v13371_v32, %v13954_v18  ;;  %v6438_v44 = vsel %vm1022_vm9, %v13877_v13, -inf }
 0x81b   : > { %5215 = vadd.xlane.f32.xlu1 %v5214_v49  ;;  %v13998_v47 = vpop.xlane.xlu1 %6346 }
 0x81d   : > { %v9688_v37 = vpop.eup %9687 }
 0x81e   : > { %5218 = vadd.xlane.f32.xlu0 %v5217_v41  ;;  %v14007_v60 = vpop.xlane.xlu0 %6349  ;;  %8483 = vmatpush3.bf16.xpose.msra.mxu0 %v5432_v28  ;;  %v5324_v49 = vmul.f32 %v9688_v37, %v13386_v4  ;;  %v6547_v28 = vmul.f32 1.442695, %v6468_v58 }
 0x81f   : > { %6388 = vmax.xlane.f32.xlu1 %v6387_v11  ;;  %v5072_v56 = vpop.xlane.xlu1 %5071 }
 0x820   : > { %v9690_v22 = vpop.eup %9689  ;;  %9703 = vrcp.f32 %v5072_v56 }
 0x821   : > { %v9692_v15 = vpop.eup %9691  ;;  %v5325_v8 = vmul.f32 %v9690_v22, %v13400_v20  ;;  %v6577_v22 = vmul.f32 1.442695, %v6483_v3 }
 0x822   : > { %6391 = vmax.xlane.f32.xlu0 %v6390_v0  ;;  %v5075_v38 = vpop.xlane.xlu0 %5074  ;;  %v14018_v36 = vpop.eup %9693  ;;  %v5340_v11 = vmul.f32 %v9692_v15, %v16842_v54  ;;  %v6579_v0 = vmul.f32 1.442695, %v6484_v48 }
 0x823   : > { %6436 = vmax.xlane.f32.xlu1 %v6435_v6  ;;  %v5120_v33 = vpop.xlane.xlu1 %5119  ;;  %9705 = vrcp.f32 %v5075_v38  ;;  %v5386_v7 = vpack.c.bf16 %v5325_v8, %v5324_v49  ;;  %v5160_v4 = vsel %vm1022_vm9, %v14018_v36, 0.0  ;;  %v16843_v8 = vld [vmem:[#allocation38_spill] sm:$0xff]  ;;  %v6381_v49 = vsel %vm1022_vm9, %v13589_v42, -inf }
 0x824   : > { %v9696_v41 = vpop.eup %9695  ;;  %9707 = vrcp.f32 %v5120_v33  ;;  %v6465_v33 = vsub.f32 %v16843_v8, %v13986_v21  ;;  %v16845_v21 = vld [vmem:[#allocation177_spill] sm:$0xff] }
 0x825   : > { %v5341_v20 = vmul.f32 %v9696_v41, %v13413_v50  ;;  %v14027_v56 = vpop.eup %9697  ;;  %9709 = vpow2.f32 %v6545_v10  ;;  %v5429_v15 = vsel %vm1022_vm9, %v5386_v7, 0  ;;  %v16846_v8 = vld [vmem:[#allocation173_spill] sm:$0xff] }
 0x826   : > { %6439 = vmax.xlane.f32.xlu0 %v6438_v44  ;;  %v5123_v37 = vpop.xlane.xlu0 %5122  ;;  %v14031_v32 = vpop.eup %9699  ;;  %v5163_v50 = vsel %vm1022_vm9, %v14027_v56, 0.0  ;;  %v16844_v44 = vld [vmem:[#allocation37_spill] sm:$0xff] }
 0x827   : > { %5161 = vadd.xlane.f32.xlu1 %v5160_v4  ;;  %9711 = vrcp.f32 %v5123_v37  ;;  %v14033_v18 = vpop.xlane.xlu1 %6292  ;;  %v5394_v58 = vpack.c.bf16 %v5341_v20, %v5340_v11  ;;  %v14039_v10 = vpop.eup %9701  ;;  %v5208_v17 = vsel %vm1022_vm9, %v14031_v32, 0.0  ;;  %v6466_v54 = vsub.f32 %v16844_v44, %v13996_v31 }
 0x828   : > { %9713 = vpow2.f32 %v6547_v28  ;;  %v5211_v38 = vsel %vm1022_vm9, %v14039_v10, 0.0  ;;  %v6384_v20 = vsel %vm1022_vm9, %v13623_v2, -inf  ;;  %v6481_v4 = vsub.f32 %v16845_v21, %v13998_v47 }
 0x829   : > { %8913 = vmatprep.subr.msk.bf16.mxu0 %vm1022_vm9, %v5394_v58  ;;  %9715 = vpow2.f32 %v6577_v22  ;;  %v6541_v22 = vmul.f32 1.442695, %v6465_v33  ;;  %v6429_v37 = vsel %vm1022_vm9, %v13863_v52, -inf  ;;  %v6482_v33 = vsub.f32 %v16846_v8, %v14007_v60 }
 0x82a   : > { %5164 = vadd.xlane.f32.xlu0 %v5163_v50  ;;  %v14043_v3 = vpop.xlane.xlu0 %6295  ;;  %8485 = vmatpush3.bf16.xpose.msra.mxu0 %v5429_v15  ;;  %9717 = vpow2.f32 %v6579_v0  ;;  %v6432_v47 = vsel %vm1022_vm9, %v13892_v57, -inf }
 0x82b   : > { %5209 = vadd.xlane.f32.xlu1 %v5208_v17  ;;  %v14045_v6 = vpop.xlane.xlu1 %6340 }
 0x82d   : > { %v9704_v48 = vpop.eup %9703 }
 0x82e   : > { %5212 = vadd.xlane.f32.xlu0 %v5211_v38  ;;  %v14053_v41 = vpop.xlane.xlu0 %6343  ;;  %v5322_v15 = vmul.f32 %v9704_v48, %v13449_v25  ;;  %v6543_v38 = vmul.f32 1.442695, %v6466_v54 }
 0x82f   : > { %6382 = vmax.xlane.f32.xlu1 %v6381_v49  ;;  %v5066_v28 = vpop.xlane.xlu1 %5065 }
 0x830   : > { %v9706_v11 = vpop.eup %9705  ;;  %9719 = vrcp.f32 %v5066_v28 }
 0x831   : > { %v9708_v7 = vpop.eup %9707  ;;  %v5323_v0 = vmul.f32 %v9706_v11, %v13465_v45  ;;  %v6573_v11 = vmul.f32 1.442695, %v6481_v4 }
 0x832   : > { %6385 = vmax.xlane.f32.xlu0 %v6384_v20  ;;  %v5069_v58 = vpop.xlane.xlu0 %5068  ;;  %v14064_v50 = vpop.eup %9709  ;;  %v5338_v49 = vmul.f32 %v9708_v7, %v13470_v59  ;;  %v6575_v59 = vmul.f32 1.442695, %v6482_v33 }
 0x833   : > { %6430 = vmax.xlane.f32.xlu1 %v6429_v37  ;;  %v5114_v31 = vpop.xlane.xlu1 %5113  ;;  %9721 = vrcp.f32 %v5069_v58  ;;  %v5385_v44 = vpack.c.bf16 %v5323_v0, %v5322_v15  ;;  %v6687_v25 = vsel %vm1022_vm9, %v14064_v50, 0.0  ;;  %v16847_v0 = vld [vmem:[#allocation49_spill] sm:$0xff]  ;;  %v16848_v15 = vld [vmem:[#allocation187_spill] sm:$0xff] }
 0x834   : > { %v9712_v17 = vpop.eup %9711  ;;  %9723 = vrcp.f32 %v5114_v31  ;;  %v6463_v31 = vsub.f32 %v16847_v0, %v14033_v18  ;;  %v16850_v18 = vld [vmem:[#allocation78_spill] sm:$0xff] }
 0x835   : > { %v5339_v45 = vmul.f32 %v9712_v17, %v13481_v39  ;;  %v14073_v28 = vpop.eup %9713  ;;  %9725 = vpow2.f32 %v6541_v22  ;;  %v5426_v7 = vsel %vm1022_vm9, %v5385_v44, 0  ;;  %v6375_v17 = vsel %vm1022_vm9, %v16848_v15, -inf }
 0x836   : > { %6433 = vmax.xlane.f32.xlu0 %v6432_v47  ;;  %v5117_v48 = vpop.xlane.xlu0 %5116  ;;  %v14077_v60 = vpop.eup %9715  ;;  %v6690_v39 = vsel %vm1022_vm9, %v14073_v28, 0.0  ;;  %v16849_v47 = vld [vmem:[#allocation23_spill] sm:$0xff]  ;;  %v6378_v44 = vsel %vm1022_vm9, %v13542_v35, -inf }
 0x837   : > { %6688 = vadd.xlane.f32.xlu1 %v6687_v25  ;;  %9727 = vrcp.f32 %v5117_v48  ;;  %v14079_v54 = vpop.xlane.xlu1 %6286  ;;  %v5393_v20 = vpack.c.bf16 %v5339_v45, %v5338_v49  ;;  %v14085_v22 = vpop.eup %9717  ;;  %v6735_v21 = vsel %vm1022_vm9, %v14077_v60, 0.0  ;;  %v6464_v49 = vsub.f32 %v16849_v47, %v14043_v3 }
 0x838   : > { %9729 = vpow2.f32 %v6543_v38  ;;  %v6738_v58 = vsel %vm1022_vm9, %v14085_v22, 0.0  ;;  %v6537_v25 = vmul.f32 1.442695, %v6463_v31  ;;  %v6479_v48 = vsub.f32 %v16850_v18, %v14045_v6 }
 0x839   : > { %8914 = vmatprep.subr.msk.bf16.mxu0 %vm1022_vm9, %v5393_v20  ;;  %9731 = vpow2.f32 %v6573_v11  ;;  %v6423_v20 = vsel %vm1022_vm9, %v13775_v62, -inf  ;;  %v6539_v0 = vmul.f32 1.442695, %v6464_v49  ;;  %v6480_v31 = vsub.f32 %v13311_v1, %v14053_v41 }
 0x83a   : > { %6691 = vadd.xlane.f32.xlu0 %v6690_v39  ;;  %v14089_v4 = vpop.xlane.xlu0 %6289  ;;  %8487 = vmatpush3.bf16.xpose.msra.mxu0 %v5426_v7  ;;  %9733 = vpow2.f32 %v6575_v59  ;;  %v6426_v6 = vsel %vm1022_vm9, %v13807_v16, -inf }
 0x83b   : > { %6736 = vadd.xlane.f32.xlu1 %v6735_v21  ;;  %v14091_v37 = vpop.xlane.xlu1 %6334 }
 0x83d   : > { %v9720_v33 = vpop.eup %9719 }
 0x83e   : > { %6739 = vadd.xlane.f32.xlu0 %v6738_v58  ;;  %v14099_v38 = vpop.xlane.xlu0 %6337  ;;  %v5320_v21 = vmul.f32 %v9720_v33, %v13517_v27 }
 0x83f   : > { %6376 = vmax.xlane.f32.xlu1 %v6375_v17  ;;  %v5204_v8 = vpop.xlane.xlu1 %5203 }
 0x840   : > { %v9722_v45 = vpop.eup %9721  ;;  %9735 = vrcp.f32 %v5204_v8 }
 0x841   : > { %v9724_v11 = vpop.eup %9723  ;;  %v5321_v39 = vmul.f32 %v9722_v45, %v13535_v46  ;;  %v6569_v45 = vmul.f32 1.442695, %v6479_v48  ;;  %v967_v48 = vpop.f32.mrf.mxu0 }
 0x842   : > { %6379 = vmax.xlane.f32.xlu0 %v6378_v44  ;;  %v5207_v59 = vpop.xlane.xlu0 %5206  ;;  %v14110_v7 = vpop.eup %9725  ;;  %v5336_v17 = vmul.f32 %v9724_v11, %v13540_v43  ;;  %v6571_v43 = vmul.f32 1.442695, %v6480_v31  ;;  %v6461_v31 = vsub.f32 %v13131_v9, %v14079_v54 }
 0x843   : > { %6424 = vmax.xlane.f32.xlu1 %v6423_v20  ;;  %v5252_v3 = vpop.xlane.xlu1 %5251  ;;  %9737 = vrcp.f32 %v5207_v59  ;;  %v5384_v47 = vpack.c.bf16 %v5321_v39, %v5320_v21  ;;  %v6681_v27 = vsel %vm1022_vm9, %v14110_v7, 0.0  ;;  %v16852_v59 = vld [vmem:[#allocation137_spill] sm:$0xff] }
 0x844   : > { %v9728_v58 = vpop.eup %9727  ;;  %9739 = vrcp.f32 %v5252_v3  ;;  %v968_v39 = vadd.f32 %v967_v48, %v16852_v59  ;;  %v16853_v21 = vld [vmem:[#allocation201_spill] sm:$0xff]  ;;  %v6533_v54 = vmul.f32 1.442695, %v6461_v31  ;;  %v16860_v31 = vld [vmem:[#allocation72_spill] sm:$0xff] }
 0x845   : > { %v5337_v46 = vmul.f32 %v9728_v58, %v13551_v26  ;;  %v14119_v8 = vpop.eup %9729  ;;  %9741 = vpow2.f32 %v6537_v25  ;;  %v5423_v44 = vsel %vm1022_vm9, %v5384_v47, 0  ;;  %v16854_v58 = vld [vmem:[#allocation123_spill] sm:$0xff] }
 0x846   : > { %6427 = vmax.xlane.f32.xlu0 %v6426_v6  ;;  %v5255_v33 = vpop.xlane.xlu0 %5254  ;;  %v14123_v1 = vpop.eup %9731  ;;  %v6684_v26 = vsel %vm1022_vm9, %v14119_v8, 0.0  ;;  %v16855_v6 = vld [vmem:[#allocation188_spill] sm:$0xff] }
 0x847   : > { %6682 = vadd.xlane.f32.xlu1 %v6681_v27  ;;  %9743 = vrcp.f32 %v5255_v33  ;;  %v14125_v41 = vpop.xlane.xlu1 %6280  ;;  %v5392_v49 = vpack.c.bf16 %v5337_v46, %v5336_v17  ;;  %v14131_v11 = vpop.eup %9733  ;;  %v6729_v25 = vsel %vm1022_vm9, %v14123_v1, 0.0  ;;  %v6369_v17 = vsel %vm1022_vm9, %v16855_v6, -inf }
 0x848   : > { %9745 = vpow2.f32 %v6539_v0  ;;  %16851 = vst [vmem:[#allocation71_spill] sm:$0xff] %v14131_v11  ;;  %v6732_v3 = vsel %vm1022_vm9, %v14131_v11, 0.0  ;;  %v964_v0 = vadd.f32 %v16854_v58, %v16853_v21  ;;  %v6462_v33 = vsub.f32 %v13145_v30, %v14089_v4  ;;  %v16856_v30 = vld [vmem:[#allocation112_spill] sm:$0xff] }
 0x849   : > { %8915 = vmatprep.subr.msk.bf16.mxu0 %vm1022_vm9, %v5392_v49  ;;  %9747 = vpow2.f32 %v6569_v45 }
 0x84a   : > { %6685 = vadd.xlane.f32.xlu0 %v6684_v26  ;;  %v14135_v18 = vpop.xlane.xlu0 %6283  ;;  %8489 = vmatpush3.bf16.xpose.msra.mxu0 %v5423_v44  ;;  %9749 = vpow2.f32 %v6571_v43  ;;  %v14150_v27 = vpack.c.bf16 %v968_v39, %v964_v0  ;;  %v6372_v43 = vsel %vm1022_vm9, %v13555_v53, -inf  ;;  %v6477_v26 = vsub.f32 %v13292_v29, %v14091_v37  ;;  %v16858_v39 = vld [vmem:[#allocation31_spill] sm:$0xff]  ;;  %v16859_v29 = vld [vmem:[#allocation165_spill] sm:$0xff] }
 0x84b   : > { %6730 = vadd.xlane.f32.xlu1 %v6729_v25  ;;  %v14137_v20 = vpop.xlane.xlu1 %6328  ;;  %v6417_v44 = vsel %vm1022_vm9, %v13789_v5, -inf  ;;  %v6535_v58 = vmul.f32 1.442695, %v6462_v33  ;;  %v6478_v37 = vsub.f32 %v16859_v29, %v14099_v38  ;;  %v6420_v0 = vsel %vm1022_vm9, %v13829_v34, -inf  ;;  %v16865_v29 = vld [vmem:[#allocation18_spill] sm:$0xff] }
 0x84d   : > { %v9736_v45 = vpop.eup %9735 }
 0x84e   : > { %6733 = vadd.xlane.f32.xlu0 %v6732_v3  ;;  %v14148_v46 = vpop.xlane.xlu0 %6331  ;;  %v5366_v3 = vmul.f32 %v9736_v45, %v16858_v39 }
 0x84f   : > { %6370 = vmax.xlane.f32.xlu1 %v6369_v17  ;;  %v5198_v47 = vpop.xlane.xlu1 %5197 }
 0x850   : > { %v9738_v49 = vpop.eup %9737  ;;  %9751 = vrcp.f32 %v5198_v47 }
 0x851   : > { %8491 = vmatmul.mubr.msk.bf16.vlgmr.msra.gmra.mxu0 %vm1022_vm9, %v13841_v51  ;;  %v9740_v9 = vpop.eup %9739  ;;  %v5367_v4 = vmul.f32 %v9738_v49, %v16856_v30  ;;  %v16861_v49 = vld [vmem:[#allocation69_spill] sm:$0xff] }
 0x852   : > { %6373 = vmax.xlane.f32.xlu0 %v6372_v43  ;;  %v5201_v25 = vpop.xlane.xlu0 %5200  ;;  %8492 = vmatprep.mubr.msk.bf16.mxu0 %vm1022_vm9, %v14150_v27  ;;  %v14165_v48 = vpop.eup %9741  ;;  %v5382_v17 = vmul.f32 %v9740_v9, %v16860_v31  ;;  %v6567_v9 = vmul.f32 1.442695, %v6478_v37  ;;  %v6459_v37 = vsub.f32 %v16865_v29, %v14125_v41  ;;  %v16869_v41 = vld [vmem:[#allocation104_spill] sm:$0xff] }
 0x853   : > { %16857 = vst [vmem:[#allocation214_spill] sm:$0xff] %v14165_v48  ;;  %6418 = vmax.xlane.f32.xlu1 %v6417_v44  ;;  %v5246_v59 = vpop.xlane.xlu1 %5245  ;;  %9753 = vrcp.f32 %v5201_v25  ;;  %v5407_v30 = vpack.c.bf16 %v5367_v4, %v5366_v3  ;;  %v6565_v44 = vmul.f32 1.442695, %v6477_v26  ;;  %v6675_v45 = vsel %vm1022_vm9, %v14165_v48, 0.0 }
 0x854   : > { %v9744_v21 = vpop.eup %9743  ;;  %9755 = vrcp.f32 %v5246_v59 }
 0x855   : > { %v5383_v43 = vmul.f32 %v9744_v21, %v16861_v49  ;;  %v14174_v47 = vpop.eup %9745  ;;  %9757 = vpow2.f32 %v6533_v54  ;;  %v5492_v54 = vsel %vm1022_vm9, %v5407_v30, 0 }
 0x856   : > { %16862 = vst [vmem:[#allocation34_spill] sm:$0xff] %v14174_v47  ;;  %6421 = vmax.xlane.f32.xlu0 %v6420_v0  ;;  %v5249_v33 = vpop.xlane.xlu0 %5248  ;;  %v14178_v38 = vpop.eup %9747  ;;  %v6678_v4 = vsel %vm1022_vm9, %v14174_v47, 0.0  ;;  %v16866_v0 = vld [vmem:[#allocation174_spill] sm:$0xff] }
 0x857   : > { %16863 = vst [vmem:[#allocation141_spill] sm:$0xff] %v14178_v38  ;;  %6676 = vadd.xlane.f32.xlu1 %v6675_v45  ;;  %9759 = vrcp.f32 %v5249_v33  ;;  %v5415_v25 = vpack.c.bf16 %v5383_v43, %v5382_v17  ;;  %v14188_v26 = vpop.eup %9749  ;;  %v6723_v39 = vsel %vm1022_vm9, %v14178_v38, 0.0  ;;  %v6363_v31 = vsel %vm1022_vm9, %v16866_v0, -inf  ;;  %v16867_v43 = vld [vmem:[#allocation118_spill] sm:$0xff]  ;;  %v16868_v33 = vld [vmem:[#allocation29_spill] sm:$0xff] }
 0x858   : > { %v14180_v59 = vpop.xlane.xlu1 %6274  ;;  %9761 = vpow2.f32 %v6535_v58  ;;  %16864 = vst [vmem:[#allocation58_spill] sm:$0xff] %v14188_v26  ;;  %v6726_v58 = vsel %vm1022_vm9, %v14188_v26, 0.0  ;;  %v6460_v30 = vsub.f32 %v16867_v43, %v14135_v18  ;;  %v16873_v18 = vld [vmem:[#allocation184_spill] sm:$0xff] }
 0x859   : > { %8493 = vmatmul.mubr.msk.bf16.gmra.mxu0 %vm1022_vm9, %v14150_v27  ;;  %8916 = vmatprep.subr.msk.bf16.mxu0 %vm1022_vm9, %v5415_v25  ;;  %9763 = vpow2.f32 %v6565_v44  ;;  %v6366_v25 = vsel %vm1022_vm9, %v16868_v33, -inf }
 0x85a   : > { %6679 = vadd.xlane.f32.xlu0 %v6678_v4  ;;  %v14192_v3 = vpop.xlane.xlu0 %6277  ;;  %8495 = vmatpush3.bf16.xpose.msra.mxu0 %v5492_v54  ;;  %9765 = vpow2.f32 %v6567_v9  ;;  %v6529_v4 = vmul.f32 1.442695, %v6459_v37  ;;  %v6475_v54 = vsub.f32 %v16869_v41, %v14137_v20  ;;  %v6531_v33 = vmul.f32 1.442695, %v6460_v30  ;;  %v16874_v37 = vld [vmem:[#allocation64_spill] sm:$0xff]  ;;  %v16879_v30 = vld [vmem:[#allocation129_spill] sm:$0xff] }
 0x85b   : > { %6724 = vadd.xlane.f32.xlu1 %v6723_v39  ;;  %8510 = vmatprep.mubr.msk.bf16.mxu0 %vm1022_vm9, %v13841_v51  ;;  %v16870_v39 = vld [vmem:[#allocation120_spill] sm:$0xff]  ;;  %v6476_v47 = vsub.f32 %v16874_v37, %v14148_v46 }
 0x85c   : > { %v14196_v21 = vpop.xlane.xlu1 %6322 }
 0x85d   : > { %v9752_v49 = vpop.eup %9751 }
 0x85e   : > { %6727 = vadd.xlane.f32.xlu0 %v6726_v58  ;;  %v14204_v17 = vpop.xlane.xlu0 %6325  ;;  %v6411_v58 = vsel %vm1022_vm9, %v16870_v39, -inf  ;;  %v5364_v43 = vmul.f32 %v9752_v49, %v16873_v18  ;;  %v16876_v39 = vld [vmem:[#allocation60_spill] sm:$0xff]  ;;  %v6561_v49 = vmul.f32 1.442695, %v6475_v54  ;;  %v16882_v54 = vld [vmem:[#allocation87_spill] sm:$0xff] }
 0x85f   : > { %6364 = vmax.xlane.f32.xlu1 %v6363_v31  ;;  %v16871_v31 = vld [vmem:[#allocation25_spill] sm:$0xff] }
 0x860   : > { %v5192_v44 = vpop.xlane.xlu1 %5191  ;;  %v9754_v45 = vpop.eup %9753 }
 0x861   : > { %v9756_v9 = vpop.eup %9755  ;;  %v5365_v26 = vmul.f32 %v9754_v45, %v16871_v31  ;;  %9767 = vrcp.f32 %v5192_v44  ;;  %v16877_v45 = vld [vmem:[#allocation193_spill] sm:$0xff] }
 0x862   : > { %6367 = vmax.xlane.f32.xlu0 %v6366_v25  ;;  %v5195_v29 = vpop.xlane.xlu0 %5194  ;;  %v14215_v38 = vpop.eup %9757  ;;  %v16875_v25 = vld [vmem:[#allocation116_spill] sm:$0xff]  ;;  %v5380_v0 = vmul.f32 %v9756_v9, %v16876_v39 }
 0x863   : > { %16872 = vst [vmem:[#allocation138_spill] sm:$0xff] %v14215_v38  ;;  %6412 = vmax.xlane.f32.xlu1 %v6411_v58  ;;  %9769 = vrcp.f32 %v5195_v29  ;;  %v6414_v41 = vsel %vm1022_vm9, %v16875_v25, -inf  ;;  %v5406_v11 = vpack.c.bf16 %v5365_v26, %v5364_v43  ;;  %v6457_v58 = vsub.f32 %v16879_v30, %v14180_v59 }
 0x864   : > { %v9760_v48 = vpop.eup %9759  ;;  %v5240_v20 = vpop.xlane.xlu1 %5239  ;;  %v6669_v46 = vsel %vm1022_vm9, %v14215_v38, 0.0  ;;  %v6473_v43 = vsub.f32 %v16882_v54, %v14196_v21  ;;  %v16885_v21 = vld [vmem:[#allocation99_spill] sm:$0xff]  ;;  %v16896_v38 = vld [vmem:[#allocation84_spill] sm:$0xff] }
 0x865   : > { %9771 = vrcp.f32 %v5240_v20  ;;  %v5381_v31 = vmul.f32 %v9760_v48, %v16877_v45  ;;  %v14224_v44 = vpop.eup %9761  ;;  %v16881_v48 = vld [vmem:[#allocation22_spill] sm:$0xff]  ;;  %v5489_v37 = vsel %vm1022_vm9, %v5406_v11, 0 }
 0x866   : > { %16878 = vst [vmem:[#allocation33_spill] sm:$0xff] %v14224_v44  ;;  %9773 = vpow2.f32 %v6529_v4  ;;  %6415 = vmax.xlane.f32.xlu0 %v6414_v41  ;;  %v5243_v29 = vpop.xlane.xlu0 %5242  ;;  %v14230_v18 = vpop.eup %9763  ;;  %v6458_v26 = vsub.f32 %v16881_v48, %v14192_v3  ;;  %v6563_v4 = vmul.f32 1.442695, %v6476_v47  ;;  %v6672_v59 = vsel %vm1022_vm9, %v14224_v44, 0.0 }
 0x867   : > { %16880 = vst [vmem:[#allocation102_spill] sm:$0xff] %v14230_v18  ;;  %6670 = vadd.xlane.f32.xlu1 %v6669_v46  ;;  %9775 = vrcp.f32 %v5243_v29  ;;  %v5414_v9 = vpack.c.bf16 %v5381_v31, %v5380_v0  ;;  %v14240_v20 = vpop.eup %9765  ;;  %v6525_v0 = vmul.f32 1.442695, %v6457_v58  ;;  %v6717_v47 = vsel %vm1022_vm9, %v14230_v18, 0.0 }
 0x868   : > { %9777 = vpow2.f32 %v6531_v33  ;;  %v6269_v39 = vpop.xlane.xlu1 %6268  ;;  %16883 = vst [vmem:[#allocation212_spill] sm:$0xff] %v14240_v20  ;;  %v16884_v33 = vld [vmem:[#allocation48_spill] sm:$0xff]  ;;  %v6527_v31 = vmul.f32 1.442695, %v6458_v26  ;;  %v6557_v11 = vmul.f32 1.442695, %v6473_v43 }
 0x869   : > { %8917 = vmatprep.subr.msk.bf16.mxu0 %vm1022_vm9, %v5414_v9  ;;  %9779 = vpow2.f32 %v6561_v49  ;;  %v6474_v41 = vsub.f32 %v16884_v33, %v14204_v17  ;;  %v6455_v45 = vsub.f32 %v16885_v21, %v6269_v39  ;;  %v6720_v49 = vsel %vm1022_vm9, %v14240_v20, 0.0  ;;  %v16886_v17 = vld [vmem:[#allocation61_spill] sm:$0xff]  ;;  %v16887_v39 = vld [vmem:[#allocation76_spill] sm:$0xff]  ;;  %v16891_v21 = vld [vmem:[#allocation191_spill] sm:$0xff] }
 0x86a   : > { %6673 = vadd.xlane.f32.xlu0 %v6672_v59  ;;  %v6272_v3 = vpop.xlane.xlu0 %6271  ;;  %8497 = vmatpush3.bf16.xpose.msra.mxu0 %v5489_v37  ;;  %9781 = vpow2.f32 %v6563_v4  ;;  %v6357_v46 = vsel %vm1022_vm9, %v16886_v17, -inf  ;;  %v16888_v4 = vld [vmem:[#allocation53_spill] sm:$0xff] }
 0x86b   : > { %6718 = vadd.xlane.f32.xlu1 %v6717_v47  ;;  %9783 = vpow2.f32 %v6525_v0  ;;  %v6559_v58 = vmul.f32 1.442695, %v6474_v41  ;;  %v6521_v29 = vmul.f32 1.442695, %v6455_v45  ;;  %v6456_v54 = vsub.f32 %v16887_v39, %v6272_v3  ;;  %v16889_v0 = vld [vmem:[#allocation145_spill] sm:$0xff]  ;;  %v16890_v41 = vld [vmem:[#allocation132_spill] sm:$0xff] }
 0x86c   : > { %v6317_v30 = vpop.xlane.xlu1 %6316  ;;  %9785 = vpow2.f32 %v6527_v31  ;;  %v6360_v43 = vsel %vm1022_vm9, %v16888_v4, -inf  ;;  %v6405_v47 = vsel %vm1022_vm9, %v16890_v41, -inf  ;;  %v16892_v31 = vld [vmem:[#allocation190_spill] sm:$0xff]  ;;  %v16893_v20 = vld [vmem:[#allocation97_spill] sm:$0xff] }
 0x86d   : > { %9787 = vpow2.f32 %v6557_v11  ;;  %v6471_v33 = vsub.f32 %v16889_v0, %v6317_v30  ;;  %v6523_v39 = vmul.f32 1.442695, %v6456_v54  ;;  %v16894_v30 = vld [vmem:[#allocation143_spill] sm:$0xff] }
 0x86e   : > { %6721 = vadd.xlane.f32.xlu0 %v6720_v49  ;;  %v9768_v48 = vpop.eup %9767  ;;  %9789 = vpow2.f32 %v6559_v58 }
 0x86f   : > { %6358 = vmax.xlane.f32.xlu1 %v6357_v46  ;;  %v6320_v9 = vpop.xlane.xlu0 %6319  ;;  %9791 = vpow2.f32 %v6521_v29  ;;  %v5362_v11 = vmul.f32 %v9768_v48, %v16892_v31  ;;  %v6553_v44 = vmul.f32 1.442695, %v6471_v33 }
 0x870   : > { %v5186_v26 = vpop.xlane.xlu1 %5185  ;;  %v9770_v59 = vpop.eup %9769  ;;  %v6472_v18 = vsub.f32 %v16893_v20, %v6320_v9 }
 0x871   : > { %v5363_v45 = vmul.f32 %v9770_v59, %v16891_v21  ;;  %9793 = vrcp.f32 %v5186_v26  ;;  %v16895_v59 = vld [vmem:[#allocation113_spill] sm:$0xff] }
 0x872   : > { %v9772_v37 = vpop.eup %9771  ;;  %6361 = vmax.xlane.f32.xlu0 %v6360_v43  ;;  %v6408_v43 = vsel %vm1022_vm9, %v16894_v30, -inf }
 0x873   : > { %v14258_v49 = vpop.eup %9773  ;;  %6406 = vmax.xlane.f32.xlu1 %v6405_v47  ;;  %v5189_v3 = vpop.xlane.xlu0 %5188  ;;  %v5378_v21 = vmul.f32 %v9772_v37, %v16895_v59  ;;  %v5405_v47 = vpack.c.bf16 %v5363_v45, %v5362_v11  ;;  %v6555_v37 = vmul.f32 1.442695, %v6472_v18  ;;  %v16898_v18 = vld [vmem:[#allocation21_spill] sm:$0xff]  ;;  %v16900_v59 = vld [vmem:[#allocation114_spill] sm:$0xff] }
 0x874   : > { %v9776_v46 = vpop.eup %9775  ;;  %v5234_v58 = vpop.xlane.xlu1 %5233  ;;  %9795 = vrcp.f32 %v5189_v3  ;;  %v6663_v48 = vsel %vm1022_vm9, %v14258_v49, 0.0 }
 0x875   : > { %v14264_v0 = vpop.eup %9777  ;;  %v5379_v29 = vmul.f32 %v9776_v46, %v16896_v38  ;;  %9797 = vrcp.f32 %v5234_v58  ;;  %v5486_v33 = vsel %vm1022_vm9, %v5405_v47, 0 }
 0x876   : > { %6409 = vmax.xlane.f32.xlu0 %v6408_v43  ;;  %v14270_v20 = vpop.eup %9779  ;;  %v6666_v3 = vsel %vm1022_vm9, %v14264_v0, 0.0 }
 0x877   : > { %6664 = vadd.xlane.f32.xlu1 %v6663_v48  ;;  %v5237_v9 = vpop.xlane.xlu0 %5236  ;;  %v5413_v54 = vpack.c.bf16 %v5379_v29, %v5378_v21  ;;  %v14277_v45 = vpop.eup %9781  ;;  %v6711_v31 = vsel %vm1022_vm9, %v14270_v20, 0.0 }
 0x878   : > { %9799 = vrcp.f32 %v5237_v9  ;;  %v6263_v26 = vpop.xlane.xlu1 %6262  ;;  %v14281_v11 = vpop.eup %9783 }
 0x879   : > { %9801 = vpow2.f32 %v6523_v39  ;;  %v6453_v38 = vsub.f32 %v16804_v24, %v6263_v26  ;;  %8918 = vmatprep.subr.msk.bf16.mxu0 %vm1022_vm9, %v5413_v54  ;;  %16897 = vst [vmem:[#allocation213_spill] sm:$0xff] %v14281_v11  ;;  %v14284_v43 = vpop.eup %9785  ;;  %v6657_v48 = vsel %vm1022_vm9, %v14281_v11, 0.0 }
 0x87a   : > { %9803 = vpow2.f32 %v6553_v44  ;;  %6667 = vadd.xlane.f32.xlu0 %v6666_v3  ;;  %8499 = vmatpush3.bf16.xpose.msra.mxu0 %v5486_v33  ;;  %16899 = vst [vmem:[#allocation80_spill] sm:$0xff] %v14284_v43  ;;  %v6714_v44 = vsel %vm1022_vm9, %v14277_v45, 0.0  ;;  %v14289_v29 = vpop.eup %9787 }
 0x87b   : > { %v6517_v46 = vmul.f32 1.442695, %v6453_v38  ;;  %6712 = vadd.xlane.f32.xlu1 %v6711_v31  ;;  %v6266_v39 = vpop.xlane.xlu0 %6265  ;;  %9805 = vpow2.f32 %v6555_v37  ;;  %16901 = vst [vmem:[#allocation24_spill] sm:$0xff] %v14289_v29  ;;  %v14293_v9 = vpop.eup %9789  ;;  %v16904_v37 = vld [vmem:[#allocation124_spill] sm:$0xff] }
 0x87c   : > { %v6454_v58 = vsub.f32 %v16898_v18, %v6266_v39  ;;  %v6311_v24 = vpop.xlane.xlu1 %6310  ;;  %16902 = vst [vmem:[#allocation210_spill] sm:$0xff] %v14293_v9  ;;  %v14295_v3 = vpop.eup %9791 }
 0x87d   : > { %v6469_v21 = vsub.f32 %v16900_v59, %v6311_v24  ;;  %9807 = vpow2.f32 %v6517_v46  ;;  %16903 = vst [vmem:[#allocation232_spill] sm:$0xff] %v14295_v3  ;;  %v6660_v46 = vsel %vm1022_vm9, %v14284_v43, 0.0 }
 0x87e   : > { %v6519_v47 = vmul.f32 1.442695, %v6454_v58  ;;  %6715 = vadd.xlane.f32.xlu0 %v6714_v44  ;;  %v9794_v31 = vpop.eup %9793  ;;  %v6705_v58 = vsel %vm1022_vm9, %v14289_v29, 0.0  ;;  %v16909_v29 = vld [vmem:[#allocation200_spill] sm:$0xff] }
 0x87f   : > { %v6549_v54 = vmul.f32 1.442695, %v6469_v21  ;;  %6658 = vadd.xlane.f32.xlu1 %v6657_v48  ;;  %v6314_v26 = vpop.xlane.xlu0 %6313  ;;  %v16905_v21 = vld [vmem:[#allocation135_spill] sm:$0xff] }
 0x880   : > { %v6470_v38 = vsub.f32 %v16904_v37, %v6314_v26  ;;  %v5180_v33 = vpop.xlane.xlu1 %5179  ;;  %9809 = vpow2.f32 %v6519_v47  ;;  %v16906_v26 = vld [vmem:[#allocation35_spill] sm:$0xff] }
 0x881   : > { %v9796_v39 = vpop.eup %9795  ;;  %9811 = vpow2.f32 %v6549_v54  ;;  %v5360_v47 = vmul.f32 %v9794_v31, %v16906_v26  ;;  %v6708_v54 = vsel %vm1022_vm9, %v14293_v9, 0.0  ;;  %v16911_v9 = vld [vmem:[#allocation59_spill] sm:$0xff] }
 0x882   : > { %v6551_v18 = vmul.f32 1.442695, %v6470_v38  ;;  %6661 = vadd.xlane.f32.xlu0 %v6660_v46  ;;  %v9798_v24 = vpop.eup %9797  ;;  %9813 = vrcp.f32 %v5180_v33  ;;  %v5361_v44 = vmul.f32 %v9796_v39, %v16905_v21  ;;  %v6651_v38 = vsel %vm1022_vm9, %v14295_v3, 0.0  ;;  %v16908_v33 = vld [vmem:[#allocation32_spill] sm:$0xff] }
 0x883   : > { %6706 = vadd.xlane.f32.xlu1 %v6705_v58  ;;  %v5183_v59 = vpop.xlane.xlu0 %5182  ;;  %v5376_v58 = vmul.f32 %v9798_v24, %v16908_v33 }
 0x884   : > { %9815 = vpow2.f32 %v6551_v18  ;;  %v5228_v48 = vpop.xlane.xlu1 %5227  ;;  %v5404_v18 = vpack.c.bf16 %v5361_v44, %v5360_v47 }
 0x885   : > { %v9800_v37 = vpop.eup %9799  ;;  %9817 = vrcp.f32 %v5183_v59 }
 0x886   : > { %v14308_v46 = vpop.eup %9801  ;;  %9819 = vrcp.f32 %v5228_v48  ;;  %6709 = vadd.xlane.f32.xlu0 %v6708_v54  ;;  %v5377_v39 = vmul.f32 %v9800_v37, %v16909_v29  ;;  %v5483_v24 = vsel %vm1022_vm9, %v5404_v18, 0 }
 0x887   : > { %16907 = vst [vmem:[#allocation73_spill] sm:$0xff] %v14308_v46  ;;  %v14312_v21 = vpop.eup %9803  ;;  %6652 = vadd.xlane.f32.xlu1 %v6651_v38  ;;  %v5231_v31 = vpop.xlane.xlu0 %5230  ;;  %v6654_v3 = vsel %vm1022_vm9, %v14308_v46, 0.0  ;;  %v16915_v38 = vld [vmem:[#allocation130_spill] sm:$0xff] }
 0x888   : > { %16910 = vst [vmem:[#allocation220_spill] sm:$0xff] %v14312_v21  ;;  %9821 = vrcp.f32 %v5231_v31  ;;  %v6401_v59 = vpop.xlane.xlu1 %6400  ;;  %v5412_v26 = vpack.c.bf16 %v5377_v39, %v5376_v58  ;;  %v14317_v43 = vpop.eup %9805  ;;  %v6699_v29 = vsel %vm1022_vm9, %v14312_v21, 0.0 }
 0x889   : > { %v6499_v11 = vsub.f32 %v16911_v9, %v6401_v59  ;;  %16912 = vst [vmem:[#allocation83_spill] sm:$0xff] %v14317_v43  ;;  %v16914_v9 = vld [vmem:[#allocation57_spill] sm:$0xff] }
 0x88a   : > { %6655 = vadd.xlane.f32.xlu0 %v6654_v3  ;;  %8919 = vmatprep.subr.msk.bf16.mxu0 %vm1022_vm9, %v5412_v26  ;;  %v14323_v44 = vpop.eup %9807  ;;  %v6702_v3 = vsel %vm1022_vm9, %v14317_v43, 0.0 }
 0x88b   : > { %16913 = vst [vmem:[#allocation218_spill] sm:$0xff] %v14323_v44  ;;  %v6609_v48 = vmul.f32 1.442695, %v6499_v11  ;;  %6700 = vadd.xlane.f32.xlu1 %v6699_v29  ;;  %v6404_v47 = vpop.xlane.xlu0 %6403  ;;  %8501 = vmatpush3.bf16.xpose.msra.mxu0 %v5483_v24  ;;  %v6645_v18 = vsel %vm1022_vm9, %v14323_v44, 0.0  ;;  %v16918_v29 = vld [vmem:[#allocation127_spill] sm:$0xff] }
 0x88c   : > { %v6500_v37 = vsub.f32 %v16914_v9, %v6404_v47  ;;  %v6449_v54 = vpop.xlane.xlu1 %6448 }
 0x88d   : > { %9823 = vpow2.f32 %v6609_v48  ;;  %v6515_v33 = vsub.f32 %v16915_v38, %v6449_v54  ;;  %v14329_v58 = vpop.eup %9809 }
 0x88e   : > { %16916 = vst [vmem:[#allocation90_spill] sm:$0xff] %v14329_v58  ;;  %v6611_v39 = vmul.f32 1.442695, %v6500_v37  ;;  %6703 = vadd.xlane.f32.xlu0 %v6702_v3  ;;  %v14333_v11 = vpop.eup %9811  ;;  %v6648_v9 = vsel %vm1022_vm9, %v14329_v58, 0.0 }
 0x88f   : > { %16917 = vst [vmem:[#allocation219_spill] sm:$0xff] %v14333_v11  ;;  %v6641_v31 = vmul.f32 1.442695, %v6515_v33  ;;  %6646 = vadd.xlane.f32.xlu1 %v6645_v18  ;;  %v6452_v59 = vpop.xlane.xlu0 %6451  ;;  %v9814_v26 = vpop.eup %9813  ;;  %v6693_v38 = vsel %vm1022_vm9, %v14333_v11, 0.0  ;;  %v16922_v11 = vld [vmem:[#allocation75_spill] sm:$0xff] }
 0x890   : > { %9825 = vpow2.f32 %v6611_v39  ;;  %v6516_v24 = vsub.f32 %v16918_v29, %v6452_v59  ;;  %v5174_v48 = vpop.xlane.xlu1 %5173  ;;  %v16919_v39 = vld [vmem:[#allocation142_spill] sm:$0xff]  ;;  %v16920_v29 = vld [vmem:[#allocation109_spill] sm:$0xff] }
 0x891   : > { %v14336_v47 = vpop.eup %9815  ;;  %9827 = vpow2.f32 %v6641_v31  ;;  %v5358_v44 = vmul.f32 %v9814_v26, %v16920_v29 }
 0x892   : > { %v9818_v37 = vpop.eup %9817  ;;  %v6643_v54 = vmul.f32 1.442695, %v6516_v24  ;;  %6649 = vadd.xlane.f32.xlu0 %v6648_v9  ;;  %9829 = vrcp.f32 %v5174_v48  ;;  %v6696_v58 = vsel %vm1022_vm9, %v14336_v47, 0.0  ;;  %v16921_v24 = vld [vmem:[#allocation70_spill] sm:$0xff] }
 0x893   : > { %v9820_v33 = vpop.eup %9819  ;;  %6694 = vadd.xlane.f32.xlu1 %v6693_v38  ;;  %v5177_v3 = vpop.xlane.xlu0 %5176  ;;  %v5359_v18 = vmul.f32 %v9818_v37, %v16919_v39 }
 0x894   : > { %9831 = vpow2.f32 %v6643_v54  ;;  %v5222_v59 = vpop.xlane.xlu1 %5221  ;;  %v5374_v9 = vmul.f32 %v9820_v33, %v16921_v24  ;;  %v16923_v54 = vld [vmem:[#allocation185_spill] sm:$0xff] }
 0x895   : > { %v9822_v31 = vpop.eup %9821  ;;  %9833 = vrcp.f32 %v5177_v3  ;;  %v5403_v48 = vpack.c.bf16 %v5359_v18, %v5358_v44 }
 0x896   : > { %9835 = vrcp.f32 %v5222_v59  ;;  %6697 = vadd.xlane.f32.xlu0 %v6696_v58  ;;  %v5375_v43 = vmul.f32 %v9822_v31, %v16922_v11  ;;  %v16925_v11 = vld [vmem:[#allocation194_spill] sm:$0xff] }
 0x897   : > { %v5225_v38 = vpop.xlane.xlu0 %5224  ;;  %v5480_v26 = vsel %vm1022_vm9, %v5403_v48, 0 }
 0x898   : > { %9837 = vrcp.f32 %v5225_v38  ;;  %v6395_v21 = vpop.xlane.xlu1 %6394  ;;  %v5411_v37 = vpack.c.bf16 %v5375_v43, %v5374_v9  ;;  %v16927_v43 = vld [vmem:[#allocation65_spill] sm:$0xff] }
 0x899   : > { %v6497_v39 = vsub.f32 %v16923_v54, %v6395_v21 }
 0x89a   : > { %v14349_v46 = vpop.eup %9823  ;;  %8920 = vmatprep.subr.msk.bf16.mxu0 %vm1022_vm9, %v5411_v37 }
 0x89b   : > { %16924 = vst [vmem:[#allocation81_spill] sm:$0xff] %v14349_v46  ;;  %v6605_v3 = vmul.f32 1.442695, %v6497_v39  ;;  %v6398_v59 = vpop.xlane.xlu0 %6397  ;;  %8503 = vmatpush3.bf16.xpose.msra.mxu0 %v5480_v26  ;;  %v6783_v58 = vsel %vm1022_vm9, %v14349_v46, 0.0 }
 0x89c   : > { %v6498_v44 = vsub.f32 %v16925_v11, %v6398_v59  ;;  %6784 = vadd.xlane.f32.xlu1 %v6783_v58  ;;  %v6443_v33 = vpop.xlane.xlu1 %6442 }
 0x89d   : > { %v14356_v18 = vpop.eup %9825  ;;  %9839 = vpow2.f32 %v6605_v3  ;;  %v6513_v21 = vsub.f32 %v16927_v43, %v6443_v33  ;;  %v16930_v33 = vld [vmem:[#allocation63_spill] sm:$0xff] }
 0x89e   : > { %16926 = vst [vmem:[#allocation140_spill] sm:$0xff] %v14356_v18  ;;  %v14359_v29 = vpop.eup %9827  ;;  %v6607_v31 = vmul.f32 1.442695, %v6498_v44  ;;  %v6786_v24 = vsel %vm1022_vm9, %v14356_v18, 0.0 }
 0x89f   : > { %16928 = vst [vmem:[#allocation66_spill] sm:$0xff] %v14359_v29  ;;  %v6637_v9 = vmul.f32 1.442695, %v6513_v21  ;;  %6787 = vadd.xlane.f32.xlu0 %v6786_v24  ;;  %v6446_v48 = vpop.xlane.xlu0 %6445  ;;  %v6831_v38 = vsel %vm1022_vm9, %v14359_v29, 0.0  ;;  %v9830_v37 = vpop.eup %9829 }
 0x8a0   : > { %9841 = vpow2.f32 %v6607_v31  ;;  %v6514_v54 = vsub.f32 %v13959_v19, %v6446_v48  ;;  %6832 = vadd.xlane.f32.xlu1 %v6831_v38  ;;  %v5168_v39 = vpop.xlane.xlu1 %5167  ;;  %v16931_v31 = vld [vmem:[#allocation208_spill] sm:$0xff]  ;;  %v16932_v48 = vld [vmem:[#allocation89_spill] sm:$0xff]  ;;  %v16933_v38 = vld [vmem:[#allocation126_spill] sm:$0xff] }
 0x8a1   : > { %v14366_v26 = vpop.eup %9831  ;;  %9843 = vpow2.f32 %v6637_v9  ;;  %v5356_v19 = vmul.f32 %v9830_v37, %v16931_v31 }
 0x8a2   : > { %16929 = vst [vmem:[#allocation216_spill] sm:$0xff] %v14366_v26  ;;  %v9834_v3 = vpop.eup %9833  ;;  %v6639_v59 = vmul.f32 1.442695, %v6514_v54  ;;  %v6834_v58 = vsel %vm1022_vm9, %v14366_v26, 0.0  ;;  %9845 = vrcp.f32 %v5168_v39 }
 0x8a3   : > { %v9836_v11 = vpop.eup %9835  ;;  %6835 = vadd.xlane.f32.xlu0 %v6834_v58  ;;  %v5171_v44 = vpop.xlane.xlu0 %5170  ;;  %v5357_v43 = vmul.f32 %v9834_v3, %v16930_v33 }
 0x8a4   : > { %9847 = vpow2.f32 %v6639_v59  ;;  %v5216_v21 = vpop.xlane.xlu1 %5215  ;;  %v5372_v9 = vmul.f32 %v9836_v11, %v16932_v48 }
 0x8a5   : > { %v9838_v24 = vpop.eup %9837  ;;  %9849 = vrcp.f32 %v5171_v44  ;;  %v5402_v29 = vpack.c.bf16 %v5357_v43, %v5356_v19 }
 0x8a6   : > { %9851 = vrcp.f32 %v5216_v21  ;;  %v5373_v54 = vmul.f32 %v9838_v24, %v16933_v38 }
 0x8a7   : > { %v5219_v46 = vpop.xlane.xlu0 %5218  ;;  %v5477_v37 = vsel %vm1022_vm9, %v5402_v29, 0 }
 0x8a8   : > { %9853 = vrcp.f32 %v5219_v46  ;;  %v6389_v26 = vpop.xlane.xlu1 %6388  ;;  %v5410_v39 = vpack.c.bf16 %v5373_v54, %v5372_v9 }
 0x8a9   : > { %v6495_v58 = vsub.f32 %v13570_v12, %v6389_v26 }
 0x8aa   : > { %v14375_v18 = vpop.eup %9839  ;;  %8921 = vmatprep.subr.msk.bf16.mxu0 %vm1022_vm9, %v5410_v39 }
 0x8ab   : > { %v6601_v3 = vmul.f32 1.442695, %v6495_v58  ;;  %v6392_v59 = vpop.xlane.xlu0 %6391  ;;  %8505 = vmatpush3.bf16.xpose.msra.mxu0 %v5477_v37  ;;  %v6777_v11 = vsel %vm1022_vm9, %v14375_v18, 0.0 }
 0x8ac   : > { %v6496_v44 = vsub.f32 %v13610_v40, %v6392_v59  ;;  %6778 = vadd.xlane.f32.xlu1 %v6777_v11  ;;  %v6437_v46 = vpop.xlane.xlu1 %6436 }
 0x8ad   : > { %v14382_v33 = vpop.eup %9841  ;;  %9855 = vpow2.f32 %v6601_v3  ;;  %v6511_v12 = vsub.f32 %v13845_v14, %v6437_v46 }
 0x8ae   : > { %v14385_v26 = vpop.eup %9843  ;;  %v6603_v43 = vmul.f32 1.442695, %v6496_v44  ;;  %v6780_v29 = vsel %vm1022_vm9, %v14382_v33, 0.0 }
 0x8af   : > { %v6633_v21 = vmul.f32 1.442695, %v6511_v12  ;;  %6781 = vadd.xlane.f32.xlu0 %v6780_v29  ;;  %v6440_v31 = vpop.xlane.xlu0 %6439  ;;  %v6825_v19 = vsel %vm1022_vm9, %v14385_v26, 0.0  ;;  %v9846_v40 = vpop.eup %9845 }
 0x8b0   : > { %9857 = vpow2.f32 %v6603_v43  ;;  %v6512_v24 = vsub.f32 %v13877_v13, %v6440_v31  ;;  %6826 = vadd.xlane.f32.xlu1 %v6825_v19  ;;  %v5162_v48 = vpop.xlane.xlu1 %5161  ;;  %v5354_v13 = vmul.f32 %v9846_v40, %v13957_v63 }
 0x8b1   : > { %v14392_v9 = vpop.eup %9847  ;;  %9859 = vpow2.f32 %v6633_v21 }
 0x8b2   : > { %v9850_v14 = vpop.eup %9849  ;;  %v6635_v38 = vmul.f32 1.442695, %v6512_v24  ;;  %v6828_v54 = vsel %vm1022_vm9, %v14392_v9, 0.0  ;;  %9861 = vrcp.f32 %v5162_v48 }
 0x8b3   : > { %v9852_v39 = vpop.eup %9851  ;;  %6829 = vadd.xlane.f32.xlu0 %v6828_v54  ;;  %v5165_v58 = vpop.xlane.xlu0 %5164  ;;  %v5355_v37 = vmul.f32 %v9850_v14, %v13980_v61 }
 0x8b4   : > { %9863 = vpow2.f32 %v6635_v38  ;;  %v5210_v3 = vpop.xlane.xlu1 %5209  ;;  %v5370_v11 = vmul.f32 %v9852_v39, %v13984_v55 }
 0x8b5   : > { %v9854_v59 = vpop.eup %9853  ;;  %9865 = vrcp.f32 %v5165_v58  ;;  %v5401_v46 = vpack.c.bf16 %v5355_v37, %v5354_v13 }
 0x8b6   : > { %9867 = vrcp.f32 %v5210_v3  ;;  %v5371_v44 = vmul.f32 %v9854_v59, %v13992_v23 }
 0x8b7   : > { %v5213_v12 = vpop.xlane.xlu0 %5212  ;;  %v5474_v61 = vsel %vm1022_vm9, %v5401_v46, 0 }
 0x8b8   : > { %9869 = vrcp.f32 %v5213_v12  ;;  %v6383_v43 = vpop.xlane.xlu1 %6382  ;;  %v5409_v29 = vpack.c.bf16 %v5371_v44, %v5370_v11 }
 0x8b9   : > { %v6493_v21 = vsub.f32 %v13589_v42, %v6383_v43 }
 0x8ba   : > { %v14401_v31 = vpop.eup %9855  ;;  %8922 = vmatprep.subr.msk.bf16.mxu0 %vm1022_vm9, %v5409_v29 }
 0x8bb   : > { %v6597_v63 = vmul.f32 1.442695, %v6493_v21  ;;  %v6386_v19 = vpop.xlane.xlu0 %6385  ;;  %8507 = vmatpush3.bf16.xpose.msra.mxu0 %v5474_v61  ;;  %v6771_v55 = vsel %vm1022_vm9, %v14401_v31, 0.0 }
 0x8bc   : > { %v6494_v23 = vsub.f32 %v13623_v2, %v6386_v19  ;;  %6772 = vadd.xlane.f32.xlu1 %v6771_v55  ;;  %v6431_v40 = vpop.xlane.xlu1 %6430 }
 0x8bd   : > { %v14408_v24 = vpop.eup %9857  ;;  %9871 = vpow2.f32 %v6597_v63  ;;  %v6509_v42 = vsub.f32 %v13863_v52, %v6431_v40 }
 0x8be   : > { %v14411_v48 = vpop.eup %9859  ;;  %v6599_v14 = vmul.f32 1.442695, %v6494_v23  ;;  %v6774_v38 = vsel %vm1022_vm9, %v14408_v24, 0.0 }
 0x8bf   : > { %v6629_v54 = vmul.f32 1.442695, %v6509_v42  ;;  %6775 = vadd.xlane.f32.xlu0 %v6774_v38  ;;  %v6434_v39 = vpop.xlane.xlu0 %6433  ;;  %v6819_v58 = vsel %vm1022_vm9, %v14411_v48, 0.0  ;;  %v9862_v2 = vpop.eup %9861 }
 0x8c0   : > { %9873 = vpow2.f32 %v6599_v14  ;;  %v6510_v37 = vsub.f32 %v13892_v57, %v6434_v39  ;;  %6820 = vadd.xlane.f32.xlu1 %v6819_v58  ;;  %v6689_v3 = vpop.xlane.xlu1 %6688  ;;  %v5352_v57 = vmul.f32 %v9862_v2, %v14018_v36 }
 0x8c1   : > { %v14418_v13 = vpop.eup %9863  ;;  %9875 = vpow2.f32 %v6629_v54 }
 0x8c2   : > { %v9866_v52 = vpop.eup %9865  ;;  %v6631_v59 = vmul.f32 1.442695, %v6510_v37  ;;  %v6822_v11 = vsel %vm1022_vm9, %v14418_v13, 0.0  ;;  %9877 = vrcp.f32 %v6689_v3 }
 0x8c3   : > { %v9868_v44 = vpop.eup %9867  ;;  %6823 = vadd.xlane.f32.xlu0 %v6822_v11  ;;  %v6692_v46 = vpop.xlane.xlu0 %6691  ;;  %v5353_v12 = vmul.f32 %v9866_v52, %v14027_v56 }
 0x8c4   : > { %9879 = vpow2.f32 %v6631_v59  ;;  %v6737_v43 = vpop.xlane.xlu1 %6736  ;;  %v5368_v21 = vmul.f32 %v9868_v44, %v14031_v32 }
 0x8c5   : > { %v9870_v29 = vpop.eup %9869  ;;  %9881 = vrcp.f32 %v6692_v46  ;;  %v5400_v63 = vpack.c.bf16 %v5353_v12, %v5352_v57 }
 0x8c6   : > { %9883 = vrcp.f32 %v6737_v43  ;;  %v5369_v61 = vmul.f32 %v9870_v29, %v14039_v10 }
 0x8c7   : > { %v6740_v19 = vpop.xlane.xlu0 %6739  ;;  %v5471_v36 = vsel %vm1022_vm9, %v5400_v63, 0 }
 0x8c8   : > { %9885 = vrcp.f32 %v6740_v19  ;;  %v6377_v55 = vpop.xlane.xlu1 %6376  ;;  %v5408_v23 = vpack.c.bf16 %v5369_v61, %v5368_v21 }
 0x8c9   : > { %v6491_v40 = vsub.f32 %v16848_v15, %v6377_v55 }
 0x8ca   : > { %v14427_v42 = vpop.eup %9871  ;;  %8923 = vmatprep.subr.msk.bf16.mxu0 %vm1022_vm9, %v5408_v23 }
 0x8cb   : > { %v6593_v56 = vmul.f32 1.442695, %v6491_v40  ;;  %v6380_v14 = vpop.xlane.xlu0 %6379  ;;  %8509 = vmatpush3.bf16.xpose.msra.mxu0 %v5471_v36  ;;  %v6765_v32 = vsel %vm1022_vm9, %v14427_v42, 0.0 }
 0x8cc   : > { %v6492_v10 = vsub.f32 %v13542_v35, %v6380_v14  ;;  %6766 = vadd.xlane.f32.xlu1 %v6765_v32  ;;  %v6425_v38 = vpop.xlane.xlu1 %6424 }
 0x8cd   : > { %v14434_v54 = vpop.eup %9873  ;;  %9887 = vpow2.f32 %v6593_v56  ;;  %v6507_v15 = vsub.f32 %v13775_v62, %v6425_v38 }
 0x8ce   : > { %v14437_v39 = vpop.eup %9875  ;;  %v6595_v58 = vmul.f32 1.442695, %v6492_v10  ;;  %v6768_v2 = vsel %vm1022_vm9, %v14434_v54, 0.0 }
 0x8cf   : > { %v6625_v37 = vmul.f32 1.442695, %v6507_v15  ;;  %6769 = vadd.xlane.f32.xlu0 %v6768_v2  ;;  %v6428_v3 = vpop.xlane.xlu0 %6427  ;;  %v6813_v52 = vsel %vm1022_vm9, %v14437_v39, 0.0  ;;  %v9878_v35 = vpop.eup %9877 }
 0x8d0   : > { %9889 = vpow2.f32 %v6595_v58  ;;  %v6508_v59 = vsub.f32 %v13807_v16, %v6428_v3  ;;  %6814 = vadd.xlane.f32.xlu1 %v6813_v52  ;;  %v6683_v11 = vpop.xlane.xlu1 %6682  ;;  %v6915_v21 = vmul.f32 %v9878_v35, %v14064_v50 }
 0x8d1   : > { %v14444_v44 = vpop.eup %9879  ;;  %9891 = vpow2.f32 %v6625_v37 }
 0x8d2   : > { %v9882_v62 = vpop.eup %9881  ;;  %v6627_v46 = vmul.f32 1.442695, %v6508_v59  ;;  %8511 = vmatmul.mubr.msk.bf16.vlgmr.msra.gmra.mxu0 %vm1022_vm9, %v13841_v51  ;;  %v6816_v12 = vsel %vm1022_vm9, %v14444_v44, 0.0  ;;  %9893 = vrcp.f32 %v6683_v11 }
 0x8d3   : > { %v9884_v43 = vpop.eup %9883  ;;  %6817 = vadd.xlane.f32.xlu0 %v6816_v12  ;;  %v6686_v57 = vpop.xlane.xlu0 %6685  ;;  %8512 = vmatprep.mubr.msk.bf16.mxu0 %vm1022_vm9, %v14150_v27  ;;  %v6916_v16 = vmul.f32 %v9882_v62, %v14073_v28 }
 0x8d4   : > { %9895 = vpow2.f32 %v6627_v46  ;;  %v6731_v29 = vpop.xlane.xlu1 %6730  ;;  %v6931_v63 = vmul.f32 %v9884_v43, %v14077_v60 }
 0x8d5   : > { %v9886_v61 = vpop.eup %9885  ;;  %9897 = vrcp.f32 %v6686_v57  ;;  %v6972_v55 = vpack.c.bf16 %v6916_v16, %v6915_v21 }
 0x8d6   : > { %9899 = vrcp.f32 %v6731_v29  ;;  %v6932_v19 = vmul.f32 %v9886_v61, %v14085_v22  ;;  %v16934_v61 = vld [vmem:[#allocation71_spill] sm:$0xff] }
 0x8d7   : > { %v6734_v23 = vpop.xlane.xlu0 %6733  ;;  %v7031_v50 = vsel %vm1022_vm9, %v6972_v55, 0 }
 0x8d8   : > { %9901 = vrcp.f32 %v6734_v23  ;;  %v6371_v40 = vpop.xlane.xlu1 %6370  ;;  %v6980_v36 = vpack.c.bf16 %v6932_v19, %v6931_v63 }
 0x8d9   : > { %v6489_v56 = vsub.f32 %v16855_v6, %v6371_v40 }
 0x8da   : > { %v14457_v14 = vpop.eup %9887  ;;  %8513 = vmatmul.mubr.msk.bf16.gmra.mxu0 %vm1022_vm9, %v14150_v27  ;;  %8924 = vmatprep.subr.msk.bf16.mxu0 %vm1022_vm9, %v6980_v36  ;;  %v16935_v36 = vld [vmem:[#allocation174_spill] sm:$0xff] }
 0x8db   : > { %v6589_v28 = vmul.f32 1.442695, %v6489_v56  ;;  %v6374_v60 = vpop.xlane.xlu0 %6373  ;;  %8549 = vmatpush3.bf16.xpose.msra.mxu0 %v7031_v50  ;;  %v6759_v22 = vsel %vm1022_vm9, %v14457_v14, 0.0 }
 0x8dc   : > { %v6490_v32 = vsub.f32 %v13555_v53, %v6374_v60  ;;  %6760 = vadd.xlane.f32.xlu1 %v6759_v22  ;;  %v6419_v10 = vpop.xlane.xlu1 %6418 }
 0x8dd   : > { %v14466_v6 = vpop.eup %9889  ;;  %9903 = vpow2.f32 %v6589_v28  ;;  %v6505_v38 = vsub.f32 %v13789_v5, %v6419_v10 }
 0x8de   : > { %v14469_v15 = vpop.eup %9891  ;;  %v6591_v58 = vmul.f32 1.442695, %v6490_v32  ;;  %v6762_v2 = vsel %vm1022_vm9, %v14466_v6, 0.0  ;;  %v16936_v32 = vld [vmem:[#allocation120_spill] sm:$0xff] }
 0x8df   : > { %v6621_v37 = vmul.f32 1.442695, %v6505_v38  ;;  %6763 = vadd.xlane.f32.xlu0 %v6762_v2  ;;  %v6422_v3 = vpop.xlane.xlu0 %6421  ;;  %v6807_v52 = vsel %vm1022_vm9, %v14469_v15, 0.0  ;;  %v9894_v53 = vpop.eup %9893 }
 0x8e0   : > { %9905 = vpow2.f32 %v6591_v58  ;;  %v6506_v35 = vsub.f32 %v13829_v34, %v6422_v3  ;;  %6808 = vadd.xlane.f32.xlu1 %v6807_v52  ;;  %v6677_v59 = vpop.xlane.xlu1 %6676  ;;  %v6913_v29 = vmul.f32 %v9894_v53, %v14110_v7 }
 0x8e1   : > { %v14476_v11 = vpop.eup %9895  ;;  %9907 = vpow2.f32 %v6621_v37 }
 0x8e2   : > { %v9898_v5 = vpop.eup %9897  ;;  %v6810_v62 = vsel %vm1022_vm9, %v14476_v11, 0.0  ;;  %v6623_v12 = vmul.f32 1.442695, %v6506_v35  ;;  %9909 = vrcp.f32 %v6677_v59 }
 0x8e3   : > { %v9900_v46 = vpop.eup %9899  ;;  %6811 = vadd.xlane.f32.xlu0 %v6810_v62  ;;  %v6680_v43 = vpop.xlane.xlu0 %6679  ;;  %v6914_v57 = vmul.f32 %v9898_v5, %v14119_v8 }
 0x8e4   : > { %v6725_v16 = vpop.xlane.xlu1 %6724  ;;  %9911 = vrcp.f32 %v6680_v43  ;;  %v6929_v21 = vmul.f32 %v9900_v46, %v14123_v1 }
 0x8e5   : > { %v9902_v34 = vpop.eup %9901  ;;  %9913 = vrcp.f32 %v6725_v16  ;;  %v6971_v19 = vpack.c.bf16 %v6914_v57, %v6913_v29  ;;  %v16938_v16 = vld [vmem:[#allocation214_spill] sm:$0xff] }
 0x8e6   : > { %v6930_v63 = vmul.f32 %v9902_v34, %v16934_v61  ;;  %9915 = vpow2.f32 %v6623_v12  ;;  %v16937_v12 = vld [vmem:[#allocation34_spill] sm:$0xff] }
 0x8e7   : > { %v6728_v55 = vpop.xlane.xlu0 %6727  ;;  %v7028_v7 = vsel %vm1022_vm9, %v6971_v19, 0  ;;  %v16940_v61 = vld [vmem:[#allocation58_spill] sm:$0xff] }
 0x8e8   : > { %9917 = vrcp.f32 %v6728_v55  ;;  %v6365_v23 = vpop.xlane.xlu1 %6364  ;;  %v6979_v40 = vpack.c.bf16 %v6930_v63, %v6929_v21 }
 0x8e9   : > { %v6487_v56 = vsub.f32 %v16935_v36, %v6365_v23 }
 0x8ea   : > { %v14485_v8 = vpop.eup %9903  ;;  %8925 = vmatprep.subr.msk.bf16.mxu0 %vm1022_vm9, %v6979_v40 }
 0x8eb   : > { %v6585_v50 = vmul.f32 1.442695, %v6487_v56  ;;  %v6368_v28 = vpop.xlane.xlu0 %6367  ;;  %8551 = vmatpush3.bf16.xpose.msra.mxu0 %v7028_v7  ;;  %v6753_v1 = vsel %vm1022_vm9, %v14485_v8, 0.0 }
 0x8ec   : > { %v6413_v60 = vpop.xlane.xlu1 %6412  ;;  %6754 = vadd.xlane.f32.xlu0 %v6753_v1 }
 0x8ed   : > { %v14491_v22 = vpop.eup %9905  ;;  %9919 = vpow2.f32 %v6585_v50  ;;  %v6503_v10 = vsub.f32 %v16936_v32, %v6413_v60  ;;  %v16941_v50 = vld [vmem:[#allocation29_spill] sm:$0xff] }
 0x8ee   : > { %v6756_v38 = vsel %vm1022_vm9, %v14491_v22, 0.0  ;;  %v14496_v37 = vpop.eup %9907  ;;  %v6488_v1 = vsub.f32 %v16941_v50, %v6368_v28 }
 0x8ef   : > { %v6617_v58 = vmul.f32 1.442695, %v6503_v10  ;;  %v6416_v2 = vpop.xlane.xlu0 %6415  ;;  %v9910_v53 = vpop.eup %9909  ;;  %v6801_v46 = vsel %vm1022_vm9, %v14496_v37, 0.0 }
 0x8f0   : > { %v6504_v3 = vsub.f32 %v16875_v25, %v6416_v2  ;;  %v6671_v52 = vpop.xlane.xlu1 %6670  ;;  %6757 = vadd.xlane.f32.xlu0 %v6756_v38  ;;  %v6911_v29 = vmul.f32 %v9910_v53, %v16938_v16  ;;  %v6587_v28 = vmul.f32 1.442695, %v6488_v1 }
 0x8f1   : > { %9921 = vpow2.f32 %v6617_v58  ;;  %6999 = vrot.lane.b32.xlu1 %v13841_v51, %s10109_s29  ;;  %v9912_v35 = vpop.eup %9911  ;;  %v16939_v51 = vld [vmem:[#allocation141_spill] sm:$0xff] }
 0x8f2   : > { %v6619_v59 = vmul.f32 1.442695, %v6504_v3  ;;  %v9914_v5 = vpop.eup %9913  ;;  %9923 = vrcp.f32 %v6671_v52  ;;  %v6912_v43 = vmul.f32 %v9912_v35, %v16937_v12 }
 0x8f3   : > { %v6674_v62 = vpop.xlane.xlu0 %6673  ;;  %v14504_v57 = vpop.eup %9915  ;;  %v6927_v21 = vmul.f32 %v9914_v5, %v16939_v51 }
 0x8f4   : > { %9925 = vpow2.f32 %v6619_v59  ;;  %v6719_v25 = vpop.xlane.xlu1 %6718  ;;  %6802 = vadd.xlane.f32.xlu0 %v6801_v46  ;;  %v6970_v19 = vpack.c.bf16 %v6912_v43, %v6911_v29  ;;  %v6804_v23 = vsel %vm1022_vm9, %v14504_v57, 0.0  ;;  %v16942_v29 = vld [vmem:[#allocation33_spill] sm:$0xff] }
 0x8f5   : > { %v9918_v34 = vpop.eup %9917  ;;  %9927 = vrcp.f32 %v6674_v62 }
 0x8f6   : > { %9929 = vrcp.f32 %v6719_v25  ;;  %v6928_v63 = vmul.f32 %v9918_v34, %v16940_v61  ;;  %v7025_v60 = vsel %vm1022_vm9, %v6970_v19, 0 }
 0x8f7   : > { %v6722_v55 = vpop.xlane.xlu0 %6721 }
 0x8f8   : > { %9931 = vrcp.f32 %v6722_v55  ;;  %v6359_v40 = vpop.xlane.xlu1 %6358  ;;  %6805 = vadd.xlane.f32.xlu0 %v6804_v23  ;;  %v6978_v36 = vpack.c.bf16 %v6928_v63, %v6927_v21  ;;  %v16943_v21 = vld [vmem:[#allocation138_spill] sm:$0xff]  ;;  %v16945_v55 = vld [vmem:[#allocation212_spill] sm:$0xff] }
 0x8f9   : > { %v6485_v56 = vsub.f32 %v16886_v17, %v6359_v40  ;;  %v16944_v63 = vld [vmem:[#allocation102_spill] sm:$0xff] }
 0x8fa   : > { %v14512_v7 = vpop.eup %9919  ;;  %8926 = vmatprep.subr.msk.bf16.mxu0 %vm1022_vm9, %v6978_v36 }
 0x8fb   : > { %v6581_v32 = vmul.f32 1.442695, %v6485_v56  ;;  %v6362_v10 = vpop.xlane.xlu0 %6361  ;;  %8553 = vmatpush3.bf16.xpose.msra.mxu0 %v7025_v60  ;;  %v6747_v38 = vsel %vm1022_vm9, %v14512_v7, 0.0 }
 0x8fc   : > { %v6486_v58 = vsub.f32 %v16888_v4, %v6362_v10  ;;  %v6407_v2 = vpop.xlane.xlu1 %6406  ;;  %6748 = vadd.xlane.f32.xlu0 %v6747_v38 }
 0x8fd   : > { %9933 = vpow2.f32 %v6581_v32  ;;  %v6501_v17 = vsub.f32 %v16890_v41, %v6407_v2 }
 0x8fe   : > { %v14521_v3 = vpop.eup %9921  ;;  %v6583_v52 = vmul.f32 1.442695, %v6486_v58 }
 0x8ff   : > { %v6613_v53 = vmul.f32 1.442695, %v6501_v17  ;;  %v6410_v35 = vpop.xlane.xlu0 %6409  ;;  %v6795_v59 = vsel %vm1022_vm9, %v14521_v3, 0.0  ;;  %v9924_v5 = vpop.eup %9923 }
 0x900   : > { %9935 = vpow2.f32 %v6583_v52  ;;  %v6502_v62 = vsub.f32 %v16894_v30, %v6410_v35  ;;  %v6665_v46 = vpop.xlane.xlu1 %6664  ;;  %6796 = vadd.xlane.f32.xlu0 %v6795_v59  ;;  %v6909_v30 = vmul.f32 %v9924_v5, %v16943_v21 }
 0x901   : > { %v14526_v4 = vpop.eup %9925  ;;  %9937 = vpow2.f32 %v6587_v28 }
 0x902   : > { %v9928_v12 = vpop.eup %9927  ;;  %v6798_v41 = vsel %vm1022_vm9, %v14526_v4, 0.0  ;;  %9939 = vpow2.f32 %v6613_v53  ;;  %v6615_v25 = vmul.f32 1.442695, %v6502_v62 }
 0x903   : > { %v9930_v43 = vpop.eup %9929  ;;  %v6668_v16 = vpop.xlane.xlu0 %6667  ;;  %v6910_v34 = vmul.f32 %v9928_v12, %v16942_v29  ;;  %9941 = vrcp.f32 %v6665_v46 }
 0x904   : > { %v6713_v51 = vpop.xlane.xlu1 %6712  ;;  %6799 = vadd.xlane.f32.xlu0 %v6798_v41  ;;  %9943 = vrcp.f32 %v6668_v16  ;;  %v6925_v19 = vmul.f32 %v9930_v43, %v16944_v63 }
 0x905   : > { %v9932_v61 = vpop.eup %9931  ;;  %9945 = vrcp.f32 %v6713_v51  ;;  %v6969_v40 = vpack.c.bf16 %v6910_v34, %v6909_v30 }
 0x906   : > { %v6926_v23 = vmul.f32 %v9932_v61, %v16945_v55  ;;  %9947 = vpow2.f32 %v6615_v25 }
 0x907   : > { %v6716_v36 = vpop.xlane.xlu0 %6715  ;;  %v7022_v60 = vsel %vm1022_vm9, %v6969_v40, 0 }
 0x908   : > { %9949 = vrcp.f32 %v6716_v36  ;;  %v6659_v56 = vpop.xlane.xlu1 %6658  ;;  %v6977_v50 = vpack.c.bf16 %v6926_v23, %v6925_v19  ;;  %v16946_v23 = vld [vmem:[#allocation80_spill] sm:$0xff] }
 0x909   : > { %9951 = vrcp.f32 %v6659_v56  ;;  %v16947_v56 = vld [vmem:[#allocation213_spill] sm:$0xff] }
 0x90a   : > { %v14534_v1 = vpop.eup %9933  ;;  %8927 = vmatprep.subr.msk.bf16.mxu0 %vm1022_vm9, %v6977_v50 }
 0x90b   : > { %v6662_v32 = vpop.xlane.xlu0 %6661  ;;  %8555 = vmatpush3.bf16.xpose.msra.mxu0 %v7022_v60  ;;  %v6741_v10 = vsel %vm1022_vm9, %v14534_v1, 0.0 }
 0x90c   : > { %9953 = vrcp.f32 %v6662_v32  ;;  %v6707_v38 = vpop.xlane.xlu1 %6706  ;;  %6742 = vadd.xlane.f32.xlu0 %v6741_v10  ;;  %v16948_v32 = vld [vmem:[#allocation24_spill] sm:$0xff] }
 0x90d   : > { %v14540_v58 = vpop.eup %9935  ;;  %9955 = vrcp.f32 %v6707_v38  ;;  %v16949_v38 = vld [vmem:[#allocation210_spill] sm:$0xff] }
 0x90e   : > { %v6744_v2 = vsel %vm1022_vm9, %v14540_v58, 0.0  ;;  %v14544_v17 = vpop.eup %9937 }
 0x90f   : > { %v6710_v28 = vpop.xlane.xlu0 %6709  ;;  %v14546_v52 = vpop.eup %9939  ;;  %v6750_v25 = vsel %vm1022_vm9, %v14544_v17, 0.0 }
 0x910   : > { %9957 = vrcp.f32 %v6710_v28  ;;  %v6653_v53 = vpop.xlane.xlu1 %6652  ;;  %6745 = vadd.xlane.f32.xlu0 %v6744_v2  ;;  %v9942_v35 = vpop.eup %9941  ;;  %v6789_v46 = vsel %vm1022_vm9, %v14546_v52, 0.0 }
 0x911   : > { %v9944_v59 = vpop.eup %9943  ;;  %9959 = vrcp.f32 %v6653_v53  ;;  %v6907_v16 = vmul.f32 %v9942_v35, %v14258_v49 }
 0x912   : > { %v9946_v5 = vpop.eup %9945  ;;  %v6908_v12 = vmul.f32 %v9944_v59, %v14264_v0 }
 0x913   : > { %v6656_v62 = vpop.xlane.xlu0 %6655  ;;  %v14551_v41 = vpop.eup %9947  ;;  %v6923_v34 = vmul.f32 %v9946_v5, %v14270_v20 }
 0x914   : > { %9961 = vrcp.f32 %v6656_v62  ;;  %v6701_v43 = vpop.xlane.xlu1 %6700  ;;  %6790 = vadd.xlane.f32.xlu0 %v6789_v46  ;;  %v6968_v21 = vpack.c.bf16 %v6908_v12, %v6907_v16  ;;  %v6792_v0 = vsel %vm1022_vm9, %v14551_v41, 0.0  ;;  %v16950_v46 = vld [vmem:[#allocation73_spill] sm:$0xff] }
 0x915   : > { %v9950_v29 = vpop.eup %9949  ;;  %6751 = vadd.xlane.f32.xlu1 %v6750_v25  ;;  %9963 = vrcp.f32 %v6701_v43  ;;  %v16951_v25 = vld [vmem:[#allocation232_spill] sm:$0xff] }
 0x916   : > { %v6924_v51 = vmul.f32 %v9950_v29, %v14277_v45  ;;  %v9952_v61 = vpop.eup %9951  ;;  %v7019_v49 = vsel %vm1022_vm9, %v6968_v21, 0 }
 0x917   : > { %v6704_v30 = vpop.xlane.xlu0 %6703  ;;  %v6905_v50 = vmul.f32 %v9952_v61, %v16947_v56 }
 0x918   : > { %9965 = vrcp.f32 %v6704_v30  ;;  %v6647_v63 = vpop.xlane.xlu1 %6646  ;;  %6793 = vadd.xlane.f32.xlu0 %v6792_v0  ;;  %v6976_v19 = vpack.c.bf16 %v6924_v51, %v6923_v34  ;;  %v16952_v51 = vld [vmem:[#allocation220_spill] sm:$0xff]  ;;  %v16953_v30 = vld [vmem:[#allocation83_spill] sm:$0xff] }
 0x919   : > { %v9954_v55 = vpop.eup %9953  ;;  %9967 = vrcp.f32 %v6647_v63 }
 0x91a   : > { %8928 = vmatprep.subr.msk.bf16.mxu0 %vm1022_vm9, %v6976_v19  ;;  %v6906_v40 = vmul.f32 %v9954_v55, %v16946_v23  ;;  %v9956_v20 = vpop.eup %9955 }
 0x91b   : > { %v6650_v45 = vpop.xlane.xlu0 %6649  ;;  %8557 = vmatpush3.bf16.xpose.msra.mxu0 %v7019_v49  ;;  %v6921_v10 = vmul.f32 %v9956_v20, %v16948_v32  ;;  %v16954_v20 = vld [vmem:[#allocation90_spill] sm:$0xff] }
 0x91c   : > { %9969 = vrcp.f32 %v6650_v45  ;;  %v6695_v36 = vpop.xlane.xlu1 %6694  ;;  %v6967_v28 = vpack.c.bf16 %v6906_v40, %v6905_v50  ;;  %v16955_v50 = vld [vmem:[#allocation218_spill] sm:$0xff] }
 0x91d   : > { %v9958_v60 = vpop.eup %9957  ;;  %9971 = vrcp.f32 %v6695_v36 }
 0x91e   : > { %v6922_v2 = vmul.f32 %v9958_v60, %v16949_v38  ;;  %v9960_v35 = vpop.eup %9959  ;;  %v7016_v62 = vsel %vm1022_vm9, %v6967_v28, 0 }
 0x91f   : > { %v6698_v53 = vpop.xlane.xlu0 %6697  ;;  %v6903_v16 = vmul.f32 %v9960_v35, %v16951_v25 }
 0x920   : > { %9973 = vrcp.f32 %v6698_v53  ;;  %v6975_v59 = vpack.c.bf16 %v6922_v2, %v6921_v10  ;;  %v16956_v10 = vld [vmem:[#allocation219_spill] sm:$0xff] }
 0x921   : > { %v9962_v5 = vpop.eup %9961 }
 0x922   : > { %8929 = vmatprep.subr.msk.bf16.mxu0 %vm1022_vm9, %v6975_v59  ;;  %v6904_v12 = vmul.f32 %v9962_v5, %v16950_v46  ;;  %v9964_v43 = vpop.eup %9963  ;;  %v16957_v46 = vld [vmem:[#allocation140_spill] sm:$0xff] }
 0x923   : > { %8559 = vmatpush3.bf16.xpose.msra.mxu0 %v7016_v62  ;;  %v6919_v21 = vmul.f32 %v9964_v43, %v16952_v51 }
 0x924   : > { %v6966_v61 = vpack.c.bf16 %v6904_v12, %v6903_v16  ;;  %v16958_v16 = vld [vmem:[#allocation81_spill] sm:$0xff] }
 0x925   : > { %v9966_v29 = vpop.eup %9965  ;;  %v6785_v34 = vpop.xlane.xlu1 %6784 }
 0x926   : > { %v6920_v0 = vmul.f32 %v9966_v29, %v16953_v30  ;;  %v9968_v63 = vpop.eup %9967  ;;  %9975 = vrcp.f32 %v6785_v34  ;;  %v7013_v40 = vsel %vm1022_vm9, %v6966_v61, 0  ;;  %v16959_v34 = vld [vmem:[#allocation66_spill] sm:$0xff] }
 0x927   : > { %v6901_v60 = vmul.f32 %v9968_v63, %v16955_v50 }
 0x928   : > { %v6788_v19 = vpop.xlane.xlu0 %6787  ;;  %v6974_v55 = vpack.c.bf16 %v6920_v0, %v6919_v21  ;;  %v16960_v21 = vld [vmem:[#allocation216_spill] sm:$0xff] }
 0x929   : > { %v9970_v49 = vpop.eup %9969  ;;  %9977 = vrcp.f32 %v6788_v19  ;;  %v6833_v23 = vpop.xlane.xlu1 %6832 }
 0x92a   : > { %8930 = vmatprep.subr.msk.bf16.mxu0 %vm1022_vm9, %v6974_v55  ;;  %v6902_v45 = vmul.f32 %v9970_v49, %v16954_v20  ;;  %v9972_v36 = vpop.eup %9971  ;;  %9979 = vrcp.f32 %v6833_v23 }
 0x92b   : > { %8561 = vmatpush3.bf16.xpose.msra.mxu0 %v7013_v40  ;;  %v6917_v38 = vmul.f32 %v9972_v36, %v16956_v10 }
 0x92c   : > { %v6836_v56 = vpop.xlane.xlu0 %6835  ;;  %v6965_v28 = vpack.c.bf16 %v6902_v45, %v6901_v60 }
 0x92d   : > { %v9974_v32 = vpop.eup %9973  ;;  %9981 = vrcp.f32 %v6836_v56 }
 0x92e   : > { %7001 = vrot.lane.b32.xlu0 %v14150_v27, %s10109_s29  ;;  %v6918_v2 = vmul.f32 %v9974_v32, %v14336_v47  ;;  %v7010_v35 = vsel %vm1022_vm9, %v6965_v28, 0 }
 0x930   : > { %v6973_v53 = vpack.c.bf16 %v6918_v2, %v6917_v38 }
 0x932   : > { %8931 = vmatprep.subr.msk.bf16.mxu0 %vm1022_vm9, %v6973_v53 }
 0x933   : > { %8563 = vmatpush3.bf16.xpose.msra.mxu0 %v7010_v35  ;;  %v9976_v59 = vpop.eup %9975 }
 0x934   : > { %v6947_v29 = vmul.f32 %v9976_v59, %v16958_v16 }
 0x935   : > { %v6779_v5 = vpop.xlane.xlu1 %6778 }
 0x936   : > { %v9978_v62 = vpop.eup %9977  ;;  %9983 = vrcp.f32 %v6779_v5 }
 0x937   : > { %v6948_v12 = vmul.f32 %v9978_v62, %v16957_v46  ;;  %v9980_v43 = vpop.eup %9979 }
 0x938   : > { %v6782_v25 = vpop.xlane.xlu0 %6781  ;;  %v6963_v51 = vmul.f32 %v9980_v43, %v16959_v34 }
 0x939   : > { %9985 = vrcp.f32 %v6782_v25  ;;  %v6827_v27 = vpop.xlane.xlu1 %6826  ;;  %v6988_v0 = vpack.c.bf16 %v6948_v12, %v6947_v29 }
 0x93a   : > { %v9982_v47 = vpop.eup %9981  ;;  %9987 = vrcp.f32 %v6827_v27 }
 0x93b   : > { %v6964_v30 = vmul.f32 %v9982_v47, %v16960_v21  ;;  %v14589_v19 = vsel %vm1022_vm9, %v6988_v0, 0 }
 0x93c   : > { %v6830_v61 = vpop.xlane.xlu0 %6829 }
 0x93d   : > { %9989 = vrcp.f32 %v6830_v61  ;;  %v6996_v63 = vpack.c.bf16 %v6964_v30, %v6963_v51 }
 0x93f   : > { %8932 = vmatprep.subr.msk.bf16.mxu0 %vm1022_vm9, %v6996_v63  ;;  %8933 = vmatprep.subr.msk.bf16.mxu1 %vm1022_vm9, %v6996_v63 }
 0x940   : > { %8868 = vmatpush3.bf16.xpose.msra.mxu1 %v14589_v19 }
 0x943   : > { %v9984_v55 = vpop.eup %9983 }
 0x944   : > { %v6945_v56 = vmul.f32 %v9984_v55, %v14375_v18 }
 0x945   : > { %v6773_v49 = vpop.xlane.xlu1 %6772 }
 0x946   : > { %v9986_v23 = vpop.eup %9985  ;;  %9991 = vrcp.f32 %v6773_v49 }
 0x947   : > { %v6946_v40 = vmul.f32 %v9986_v23, %v14382_v33  ;;  %v9988_v20 = vpop.eup %9987 }
 0x948   : > { %v6776_v45 = vpop.xlane.xlu0 %6775  ;;  %v6961_v60 = vmul.f32 %v9988_v20, %v14385_v26 }
 0x949   : > { %9993 = vrcp.f32 %v6776_v45  ;;  %v6821_v36 = vpop.xlane.xlu1 %6820  ;;  %v6987_v10 = vpack.c.bf16 %v6946_v40, %v6945_v56 }
 0x94a   : > { %v9990_v50 = vpop.eup %9989  ;;  %9995 = vrcp.f32 %v6821_v36 }
 0x94b   : > { %v6962_v32 = vmul.f32 %v9990_v50, %v14392_v9  ;;  %v7076_v33 = vsel %vm1022_vm9, %v6987_v10, 0 }
 0x94c   : > { %v6824_v38 = vpop.xlane.xlu0 %6823 }
 0x94d   : > { %9997 = vrcp.f32 %v6824_v38  ;;  %v6995_v2 = vpack.c.bf16 %v6962_v32, %v6961_v60 }
 0x94f   : > { %8935 = vmatprep.subr.msk.bf16.mxu1 %vm1022_vm9, %v6995_v2 }
 0x950   : > { %8869 = vmatpush3.bf16.xpose.msra.mxu1 %v7076_v33 }
 0x953   : > { %v9992_v28 = vpop.eup %9991 }
 0x954   : > { %v6943_v9 = vmul.f32 %v9992_v28, %v14401_v31 }
 0x955   : > { %v6767_v53 = vpop.xlane.xlu1 %6766 }
 0x956   : > { %v9994_v35 = vpop.eup %9993  ;;  %9999 = vrcp.f32 %v6767_v53 }
 0x957   : > { %v6944_v18 = vmul.f32 %v9994_v35, %v14408_v24  ;;  %v9996_v59 = vpop.eup %9995 }
 0x958   : > { %v6770_v5 = vpop.xlane.xlu0 %6769  ;;  %v6959_v46 = vmul.f32 %v9996_v59, %v14411_v48 }
 0x959   : > { %10001 = vrcp.f32 %v6770_v5  ;;  %v6815_v26 = vpop.xlane.xlu1 %6814  ;;  %v6986_v43 = vpack.c.bf16 %v6944_v18, %v6943_v9 }
 0x95a   : > { %v9998_v62 = vpop.eup %9997  ;;  %10003 = vrcp.f32 %v6815_v26 }
 0x95b   : > { %v6960_v12 = vmul.f32 %v9998_v62, %v14418_v13  ;;  %v7073_v24 = vsel %vm1022_vm9, %v6986_v43, 0 }
 0x95c   : > { %v6818_v25 = vpop.xlane.xlu0 %6817 }
 0x95d   : > { %10005 = vrcp.f32 %v6818_v25  ;;  %v6994_v27 = vpack.c.bf16 %v6960_v12, %v6959_v46 }
 0x95f   : > { %8937 = vmatprep.subr.msk.bf16.mxu1 %vm1022_vm9, %v6994_v27 }
 0x960   : > { %8870 = vmatpush3.bf16.xpose.msra.mxu1 %v7073_v24 }
 0x963   : > { %v10000_v16 = vpop.eup %9999 }
 0x964   : > { %v6941_v13 = vmul.f32 %v10000_v16, %v14427_v42 }
 0x965   : > { %v6761_v29 = vpop.xlane.xlu1 %6760 }
 0x966   : > { %v10002_v47 = vpop.eup %10001  ;;  %10007 = vrcp.f32 %v6761_v29 }
 0x967   : > { %v6942_v31 = vmul.f32 %v10002_v47, %v14434_v54  ;;  %v10004_v34 = vpop.eup %10003 }
 0x968   : > { %v6764_v51 = vpop.xlane.xlu0 %6763  ;;  %v6957_v30 = vmul.f32 %v10004_v34, %v14437_v39 }
 0x969   : > { %10009 = vrcp.f32 %v6764_v51  ;;  %v6809_v48 = vpop.xlane.xlu1 %6808  ;;  %v6985_v61 = vpack.c.bf16 %v6942_v31, %v6941_v13 }
 0x96a   : > { %v10006_v21 = vpop.eup %10005  ;;  %10011 = vrcp.f32 %v6809_v48 }
 0x96b   : > { %v6958_v0 = vmul.f32 %v10006_v21, %v14444_v44  ;;  %v7070_v42 = vsel %vm1022_vm9, %v6985_v61, 0 }
 0x96c   : > { %v6812_v63 = vpop.xlane.xlu0 %6811 }
 0x96d   : > { %10013 = vrcp.f32 %v6812_v63  ;;  %v14608_v55 = vpop.permute.xlu1 %6999  ;;  %v6993_v49 = vpack.c.bf16 %v6958_v0, %v6957_v30 }
 0x96e   : > { %8564 = vmatprep.mubr.msk.bf16.mxu0 %vm1022_vm9, %v14608_v55 }
 0x96f   : > { %8565 = vmatmul.mubr.msk.bf16.vlgmr.msra.gmra.mxu0 %vm1022_vm9, %v14608_v55  ;;  %8939 = vmatprep.subr.msk.bf16.mxu1 %vm1022_vm9, %v6993_v49 }
 0x970   : > { %8569 = vmatpush3.bf16.xpose.msra.mxu0 %v14589_v19  ;;  %8871 = vmatpush3.bf16.xpose.msra.mxu1 %v7070_v42 }
 0x971   : > { %8934 = vmatprep.subr.msk.bf16.mxu0 %vm1022_vm9, %v6995_v2 }
 0x973   : > { %v10008_v54 = vpop.eup %10007 }
 0x974   : > { %v6939_v45 = vmul.f32 %v10008_v54, %v14457_v14 }
 0x975   : > { %v6755_v39 = vpop.xlane.xlu0 %6754 }
 0x976   : > { %v10010_v44 = vpop.eup %10009 }
 0x977   : > { %v6940_v23 = vmul.f32 %v10010_v44, %v14466_v6  ;;  %v10012_v40 = vpop.eup %10011 }
 0x978   : > { %8571 = vmatpush3.bf16.xpose.msra.mxu0 %v7076_v33  ;;  %v6955_v56 = vmul.f32 %v10012_v40, %v14469_v15 }
 0x979   : > { %8936 = vmatprep.subr.msk.bf16.mxu0 %vm1022_vm9, %v6994_v27  ;;  %v6758_v20 = vpop.xlane.xlu0 %6757  ;;  %v6984_v50 = vpack.c.bf16 %v6940_v23, %v6939_v45 }
 0x97a   : > { %v10014_v36 = vpop.eup %10013  ;;  %10015 = vrcp.f32 %v6758_v20 }
 0x97b   : > { %v6956_v19 = vmul.f32 %v10014_v36, %v14476_v11  ;;  %10017 = vrcp.f32 %v6755_v39  ;;  %v7067_v6 = vsel %vm1022_vm9, %v6984_v50, 0 }
 0x97d   : > { %v6803_v60 = vpop.xlane.xlu0 %6802  ;;  %v6992_v32 = vpack.c.bf16 %v6956_v19, %v6955_v56 }
 0x97e   : > { %10019 = vrcp.f32 %v6803_v60 }
 0x97f   : > { %8941 = vmatprep.subr.msk.bf16.mxu1 %vm1022_vm9, %v6992_v32 }
 0x980   : > { %8573 = vmatpush3.bf16.xpose.msra.mxu0 %v7073_v24  ;;  %8872 = vmatpush3.bf16.xpose.msra.mxu1 %v7067_v6 }
 0x981   : > { %8938 = vmatprep.subr.msk.bf16.mxu0 %vm1022_vm9, %v6993_v49  ;;  %v6806_v14 = vpop.xlane.xlu0 %6805 }
 0x982   : > { %10021 = vrcp.f32 %v6806_v14 }
 0x985   : > { %v6749_v10 = vpop.xlane.xlu0 %6748 }
 0x987   : > { %v10016_v15 = vpop.eup %10015 }
 0x988   : > { %8575 = vmatpush3.bf16.xpose.msra.mxu0 %v7070_v42  ;;  %v10018_v38 = vpop.eup %10017  ;;  %v6938_v2 = vmul.f32 %v10016_v15, %v14491_v22 }
 0x989   : > { %8940 = vmatprep.subr.msk.bf16.mxu0 %vm1022_vm9, %v6992_v32  ;;  %v6797_v11 = vpop.xlane.xlu0 %6796  ;;  %v6937_v53 = vmul.f32 %v10018_v38, %v14485_v8 }
 0x98a   : > { %10023 = vrcp.f32 %v6797_v11 }
 0x98b   : > { %v10020_v33 = vpop.eup %10019  ;;  %v6983_v5 = vpack.c.bf16 %v6938_v2, %v6937_v53 }
 0x98c   : > { %v6953_v18 = vmul.f32 %v10020_v33, %v14496_v37 }
 0x98d   : > { %v6800_v28 = vpop.xlane.xlu0 %6799  ;;  %v7064_v9 = vsel %vm1022_vm9, %v6983_v5, 0 }
 0x98e   : > { %10025 = vrcp.f32 %v6800_v28 }
 0x98f   : > { %v10022_v35 = vpop.eup %10021  ;;  %10027 = vrcp.f32 %v6749_v10 }
 0x990   : > { %8577 = vmatpush3.bf16.xpose.msra.mxu0 %v7067_v6  ;;  %v6954_v59 = vmul.f32 %v10022_v35, %v14504_v57 }
 0x992   : > { %v6991_v26 = vpack.c.bf16 %v6954_v59, %v6953_v18 }
 0x994   : > { %8942 = vmatprep.subr.msk.bf16.mxu0 %vm1022_vm9, %v6991_v26  ;;  %8943 = vmatprep.subr.msk.bf16.mxu1 %vm1022_vm9, %v6991_v26 }
 0x995   : > { %8873 = vmatpush3.bf16.xpose.msra.mxu1 %v7064_v9  ;;  %v6743_v22 = vpop.xlane.xlu0 %6742 }
 0x997   : > { %v10024_v62 = vpop.eup %10023 }
 0x998   : > { %8579 = vmatpush3.bf16.xpose.msra.mxu0 %v7064_v9  ;;  %v6951_v12 = vmul.f32 %v10024_v62, %v14521_v3  ;;  %v14640_v3 = vpop.f32.mrf.mxu0 }
 0x999   : > { %v6746_v46 = vpop.xlane.xlu0 %6745 }
 0x99a   : > { %v14645_v16 = vpop.f32.mrf.mxu0 }
 0x99b   : > { %v10026_v8 = vpop.eup %10025 }
 0x99c   : > { %v6952_v37 = vmul.f32 %v10026_v8, %v14526_v4  ;;  %v10028_v4 = vpop.eup %10027  ;;  %v14649_v13 = vpop.f32.mrf.mxu0 }
 0x99d   : > { %v6791_v57 = vpop.xlane.xlu0 %6790  ;;  %v6935_v31 = vmul.f32 %v10028_v4, %v14512_v7 }
 0x99e   : > { %v6752_v43 = vpop.xlane.xlu1 %6751  ;;  %v6990_v25 = vpack.c.bf16 %v6952_v37, %v6951_v12  ;;  %v14655_v7 = vpop.f32.mrf.mxu0 }
 0x99f   : > { %10029 = vrcp.f32 %v6752_v43  ;;  %16961 = vst [vmem:[#allocation226_spill] sm:$0xff] %v14655_v7 }
 0x9a0   : > { %10031 = vrcp.f32 %v6791_v57  ;;  %8944 = vmatprep.subr.msk.bf16.mxu0 %vm1022_vm9, %v6990_v25  ;;  %8945 = vmatprep.subr.msk.bf16.mxu1 %vm1022_vm9, %v6990_v25  ;;  %v14660_v54 = vpop.f32.mrf.mxu0 }
 0x9a1   : > { %10033 = vrcp.f32 %v6746_v46  ;;  %v6794_v27 = vpop.xlane.xlu0 %6793 }
 0x9a2   : > { %10035 = vrcp.f32 %v6794_v27  ;;  %v14662_v39 = vpop.f32.mrf.mxu0 }
 0x9a3   : > { %10037 = vrcp.f32 %v6743_v22 }
 0x9a5   : > { %v7002_v24 = vpop.permute.xlu0 %7001 }
 0x9a6   : > { %8566 = vmatprep.mubr.msk.bf16.mxu0 %vm1022_vm9, %v7002_v24  ;;  %8586 = vmatprep.mubr.msk.bf16.mxu1 %vm1022_vm9, %v7002_v24 }
 0x9a7   : > { %8567 = vmatmul.mubr.msk.bf16.gmra.mxu0 %vm1022_vm9, %v7002_v24 }
 0x9a8   : > { %8584 = vmatprep.mubr.msk.bf16.mxu0 %vm1022_vm9, %v14608_v55 }
 0x9ac   : > { %v10030_v29 = vpop.eup %10029 }
 0x9ad   : > { %v10032_v47 = vpop.eup %10031  ;;  %v6936_v34 = vmul.f32 %v10030_v29, %v14544_v17 }
 0x9ae   : > { %v10034_v51 = vpop.eup %10033  ;;  %v6949_v0 = vmul.f32 %v10032_v47, %v14546_v52 }
 0x9af   : > { %v10036_v48 = vpop.eup %10035  ;;  %v6982_v21 = vpack.c.bf16 %v6936_v34, %v6935_v31  ;;  %v6934_v49 = vmul.f32 %v10034_v51, %v14540_v58  ;;  %v14665_v58 = vpop.f32.mrf.mxu0 }
 0x9b0   : > { %v10038_v30 = vpop.eup %10037  ;;  %v6950_v61 = vmul.f32 %v10036_v48, %v14551_v41 }
 0x9b1   : > { %v7061_v63 = vsel %vm1022_vm9, %v6982_v21, 0  ;;  %v6933_v17 = vmul.f32 %v10038_v30, %v14534_v1  ;;  %v14667_v44 = vpop.f32.mrf.mxu0  ;;  %v16962_v1 = vmov 0  }
 0x9b2   : > { %8581 = vmatpush3.bf16.xpose.msra.mxu0 %v7061_v63  ;;  %8874 = vmatpush3.bf16.xpose.msra.mxu1 %v7061_v63  ;;  %v6989_v42 = vpack.c.bf16 %v6950_v61, %v6949_v0 }
 0x9b3   : > { %v6981_v52 = vpack.c.bf16 %v6934_v49, %v6933_v17  ;;  %v14674_v23 = vpop.f32.mrf.mxu0 }
 0x9b4   : > { %8946 = vmatprep.subr.msk.bf16.mxu0 %vm1022_vm9, %v6989_v42  ;;  %8947 = vmatprep.subr.msk.bf16.mxu1 %vm1022_vm9, %v6989_v42  ;;  %v16972_v42 = vld [vmem:[#allocation12_spill] sm:$0xff] }
 0x9b5   : > { %v7058_v41 = vsel %vm1022_vm9, %v6981_v52, 0  ;;  %v14676_v40 = vpop.f32.mrf.mxu0 }
 0x9b6   : > { %16963 = vst [vmem:[#allocation67_spill] sm:$0xff] %v14676_v40 }
 0x9b7   : > { %v14678_v20 = vpop.f32.mrf.mxu0 }
 0x9b9   : > { %v14680_v45 = vpop.f32.mrf.mxu0 }
 0x9ba   : > { %8583 = vmatpush3.bf16.xpose.msra.mxu0 %v7058_v41  ;;  %8875 = vmatpush3.bf16.xpose.msra.mxu1 %v7058_v41  ;;  %16964 = vst [vmem:[#allocation26_spill] sm:$0xff] %v14680_v45 }
 0x9bb   : > { %v14682_v36 = vpop.f32.mrf.mxu0 }
 0x9bc   : > { %16965 = vst [vmem:[#allocation100_spill] sm:$0xff] %v14682_v36 }
 0x9bd   : > { %v14684_v56 = vpop.f32.mrf.mxu0 }
 0x9bf   : > { %v14686_v19 = vpop.f32.mrf.mxu0 }
 0x9c1   : > { %8585 = vmatmul.mubr.msk.bf16.vlgmr.msra.gmra.mxu0 %vm1022_vm9, %v14608_v55  ;;  %8587 = vmatmul.mubr.msk.bf16.vlgmr.msra.gmra.mxu1 %vm1022_vm9, %v7002_v24  ;;  %v14688_v55 = vpop.f32.mrf.mxu0 }
 0x9c2   : > { %7455 = vmatprep.mubr.bf16.mxu1 %v16962_v1  ;;  %7692 = vmatprep.mubr.bf16.mxu0 %v16962_v1  ;;  %16966 = vst [vmem:[#allocation224_spill] sm:$0xff] %v14688_v55  ;;  %v16976_v1 = vld [vmem:[#allocation19_spill] sm:$0xff] }
 0x9c3   : > { %v14690_v50 = vpop.f32.mrf.mxu0 }
 0x9c5   : > { %v14692_v60 = vpop.f32.mrf.mxu0 }
 0x9c7   : > { %v3967_v32 = vpop.f32.mrf.mxu0 }
 0x9c9   : > { %v14694_v6 = vpop.f32.mrf.mxu0 }
 0x9ca   : > { %16967 = vst [vmem:[#allocation79_spill] sm:$0xff] %v14694_v6 }
 0x9cb   : > { %v3973_v14 = vpop.f32.mrf.mxu0 }
 0x9cc   : > { %v14752_v61 = vmul.f32 0.0, %v3973_v14 }
 0x9cd   : > { %v3975_v10 = vpop.f32.mrf.mxu0 }
 0x9cf   : > { %v3977_v15 = vpop.f32.mrf.mxu0 }
 0x9d0   : > { %v14760_v49 = vmul.f32 0.0, %v3977_v15  ;;  %v4039_v15 = vmul.f32 %v16972_v42, %v14690_v50 }
 0x9d1   : > { %v3979_v11 = vpop.f32.mrf.mxu0 }
 0x9d3   : > { %v14696_v38 = vpop.f32.mrf.mxu0 }
 0x9d5   : > { %v14698_v2 = vpop.f32.mrf.mxu0 }
 0x9d7   : > { %v14700_v33 = vpop.f32.mrf.mxu0 }
 0x9d9   : > { %v14702_v28 = vpop.f32.mrf.mxu0 }
 0x9db   : > { %v14704_v53 = vpop.f32.mrf.mxu0 }
 0x9dd   : > { %v14706_v35 = vpop.f32.mrf.mxu0 }
 0x9df   : > { %v14708_v18 = vpop.f32.mrf.mxu0 }
 0x9e1   : > { %v14710_v59 = vpop.f32.mrf.mxu0 }
 0x9e3   : > { %v14712_v5 = vpop.f32.mrf.mxu0 }
 0x9e5   : > { %v14714_v26 = vpop.f32.mrf.mxu0 }
 0x9e7   : > { %v14716_v9 = vpop.f32.mrf.mxu0 }
 0x9e9   : > { %v14718_v22 = vpop.f32.mrf.mxu0 }
 0x9eb   : > { %v14720_v62 = vpop.f32.mrf.mxu0 }
 0x9ed   : > { %v14722_v46 = vpop.f32.mrf.mxu0 }
 0x9ef   : > { %v14724_v8 = vpop.f32.mrf.mxu0 }
 0x9f1   : > { %v14726_v12 = vpop.f32.mrf.mxu0 }
 0x9f3   : > { %v14728_v37 = vpop.f32.mrf.mxu0 }
 0x9f5   : > { %v14730_v57 = vpop.f32.mrf.mxu0 }
 0x9f6   : > { %16968 = vst [vmem:[#allocation225_spill] sm:$0xff] %v14730_v57 }
 0x9f7   : > { %v14732_v43 = vpop.f32.mrf.mxu0 }
 0x9f9   : > { %v14734_v25 = vpop.f32.mrf.mxu0 }
 0x9fa   : > { %16969 = vst [vmem:[#allocation62_spill] sm:$0xff] %v14734_v25 }
 0x9fb   : > { %v14736_v27 = vpop.f32.mrf.mxu0 }
 0x9fc   : > { %16970 = vst [vmem:[#allocation222_spill] sm:$0xff] %v14736_v27 }
 0x9fd   : > { %v14738_v24 = vpop.f32.mrf.mxu0 }
 0x9ff   : > { %v14740_v4 = vpop.f32.mrf.mxu0 }
 0xa01   : > { %v14742_v29 = vpop.f32.mrf.mxu0 }
 0xa02   : > { %16971 = vst [vmem:[#allocation88_spill] sm:$0xff] %v14742_v29 }
 0xa2f   : > { %v14744_v47 = vpop.f32.mrf.mxu0 }
 0xa30   : > { %v7215_v17 = vmul.f32 %v16972_v42, %v14744_v47 }
 0xa31   : > { %v7141_v31 = vpop.f32.mrf.mxu0 }
 0xa33   : > { %v7143_v34 = vpop.f32.mrf.mxu0 }
 0xa34   : > { %v14767_v52 = vmul.f32 0.0, %v7143_v34  ;;  %v14782_v34 = vmul.f32 0.0, %v3967_v32 }
 0xa35   : > { %v14746_v51 = vpop.f32.mrf.mxu0 }
 0xa36   : > { %16973 = vst [vmem:[#allocation74_spill] sm:$0xff] %v14782_v34 }
 0xa67   : > { %v7149_v48 = vpop.f32.mrf.mxu0 }
 0xa68   : > { %v14748_v21 = vmul.f32 0.0, %v7149_v48 }
 0xa69   : > { %v7151_v30 = vpop.f32.mrf.mxu0 }
 0xa6a   : > { %7227 = vrot.lane.b32.xlu1 %v14748_v21, %s10109_s29  ;;  %v14769_v41 = vmul.f32 0.0, %v7151_v30  ;;  %v14784_v30 = vmul.f32 0.0, %v3975_v10  ;;  %v16975_v10 = vld [vmem:[#allocation13_spill] sm:$0xff] }
 0xa6b   : > { %v7153_v0 = vpop.f32.mrf.mxu0  ;;  %v4072_v57 = vmul.f32 %v16975_v10, %v14694_v6 }
 0xa6c   : > { %v14754_v63 = vmul.f32 0.0, %v7153_v0  ;;  %v14790_v0 = vmul.f32 0.0, %v3979_v11  ;;  %v14807_v11 = vmul.f32 0.0, %v14692_v60  ;;  %v14822_v60 = vmul.f32 0.0, %v14708_v18  ;;  %v16979_v18 = vld [vmem:[#allocation20_spill] sm:$0xff] }
 0xa6d   : > { %v7155_v14 = vpop.f32.mrf.mxu0 }
 0xa6e   : > { %4051 = vrot.lane.b32.xlu1 %v14752_v61, %s10109_s29  ;;  %7229 = vrot.lane.b32.xlu0 %v14754_v63, %s10109_s29  ;;  %v14777_v48 = vmul.f32 0.0, %v7155_v14  ;;  %16977 = vst [vmem:[#allocation154_spill] sm:$0xff] %v14807_v11 }
 0xa72   : > { %7223 = vrot.lane.b32.xlu1 %v7215_v17, %s10109_s29  ;;  %4053 = vrot.lane.b32.xlu0 %v14760_v49, %s10109_s29  ;;  %v14792_v17 = vmul.f32 0.0, %v7141_v31 }
 0xa74   : > { %16974 = vst [vmem:[#allocation117_spill] sm:$0xff] %v14792_v17 }
 0xa76   : > { %7259 = vrot.lane.b32.xlu1 %v14769_v41, %s10109_s29  ;;  %7225 = vrot.lane.b32.xlu0 %v14767_v52, %s10109_s29 }
 0xa7a   : > { %4047 = vrot.lane.b32.xlu1 %v4039_v15, %s10109_s29  ;;  %7261 = vrot.lane.b32.xlu0 %v14777_v48, %s10109_s29  ;;  %v7248_v15 = vmul.f32 %v16975_v10, %v14746_v51 }
 0xa7e   : > { %4083 = vrot.lane.b32.xlu1 %v14784_v30, %s10109_s29  ;;  %4049 = vrot.lane.b32.xlu0 %v14782_v34, %s10109_s29 }
 0xa81   : > { %v14794_v14 = vpop.f32.mrf.mxu1  ;;  %v7192_v40 = vpop.f32.mrf.mxu0 }
 0xa82   : > { %7255 = vrot.lane.b32.xlu1 %v14792_v17, %s10109_s29  ;;  %4085 = vrot.lane.b32.xlu0 %v14790_v0, %s10109_s29  ;;  %v7281_v45 = vmul.f32 %v16976_v1, %v14794_v14 }
 0xa83   : > { %v7204_v32 = vpop.f32.mrf.mxu1  ;;  %v7194_v34 = vpop.f32.mrf.mxu0 }
 0xa85   : > { %v7206_v25 = vpop.f32.mrf.mxu1 }
 0xa86   : > { %7291 = vrot.lane.b32.xlu1 %v7281_v45, %s10109_s29  ;;  %7257 = vrot.lane.b32.xlu0 %v7248_v15, %s10109_s29  ;;  %v14809_v31 = vmul.f32 0.0, %v7206_v25  ;;  %v4105_v45 = vmul.f32 %v16976_v1, %v14704_v53  ;;  %v14824_v25 = vmul.f32 0.0, %v7192_v40  ;;  %v7196_v15 = vpop.f32.mrf.mxu0  ;;  %v14841_v40 = vmul.f32 0.0, %v14696_v38 }
 0xa87   : > { %v14832_v6 = vmul.f32 0.0, %v7196_v15  ;;  %v14834_v17 = vpop.f32.mrf.mxu1  ;;  %v4138_v38 = vmul.f32 %v16979_v18, %v14710_v59  ;;  %v14860_v15 = vmul.f32 0.0, %v7194_v34  ;;  %v14875_v34 = vmul.f32 0.0, %v14702_v28 }
 0xa88   : > { %16978 = vst [vmem:[#allocation230_spill] sm:$0xff] %v14841_v40  ;;  %v14895_v28 = vmul.f32 0.0, %v14665_v58  ;;  %v2452_v58 = vmul.f32 %v16972_v42, %v14640_v3 }
 0xa8a   : > { %4079 = vrot.lane.b32.xlu1 %v14807_v11, %s10109_s29  ;;  %7293 = vrot.lane.b32.xlu0 %v14809_v31, %s10109_s29  ;;  %v14830_v11 = vmul.f32 0.0, %v7204_v32  ;;  %v14849_v32 = vmul.f32 0.0, %v14700_v33  ;;  %v14866_v33 = vmul.f32 0.0, %v14698_v2  ;;  %v14885_v2 = vmul.f32 0.0, %v14660_v54  ;;  %16983 = vst [vmem:[#allocation167_spill] sm:$0xff] %v14895_v28 }
 0xa8b   : > { %v14903_v54 = vmul.f32 0.0, %v14716_v9  ;;  %v14921_v9 = vmul.f32 0.0, %v14649_v13  ;;  %v5661_v13 = vmul.f32 %v16975_v10, %v14718_v22 }
 0xa8c   : > { %16981 = vst [vmem:[#allocation231_spill] sm:$0xff] %v14885_v2 }
 0xa8d   : > { %16986 = vst [vmem:[#allocation133_spill] sm:$0xff] %v14921_v9 }
 0xa8e   : > { %4115 = vrot.lane.b32.xlu1 %v4105_v45, %s10109_s29  ;;  %4081 = vrot.lane.b32.xlu0 %v4072_v57, %s10109_s29  ;;  %v7314_v57 = vmul.f32 %v16979_v18, %v14834_v17  ;;  %v14852_v45 = vmul.f32 0.0, %v14706_v35 }
 0xa92   : > { %4117 = vrot.lane.b32.xlu0 %v14822_v60, %s10109_s29  ;;  %7287 = vrot.lane.b32.xlu1 %v14824_v25, %s10109_s29 }
 0xa96   : > { %7323 = vrot.lane.b32.xlu1 %v14830_v11, %s10109_s29  ;;  %7289 = vrot.lane.b32.xlu0 %v14832_v6, %s10109_s29 }
 0xa9a   : > { %4111 = vrot.lane.b32.xlu1 %v14841_v40, %s10109_s29  ;;  %7325 = vrot.lane.b32.xlu0 %v7314_v57, %s10109_s29  ;;  %v7198_v40 = vpop.f32.mrf.mxu0  ;;  %v14878_v57 = vmul.f32 0.0, %v14720_v62  ;;  %v5628_v62 = vmul.f32 %v16972_v42, %v14712_v5  ;;  %v14934_v42 = vmul.f32 0.0, %v14714_v26  ;;  %v14950_v26 = vmul.f32 0.0, %v14740_v4 }
 0xa9b   : > { %v14868_v35 = vmul.f32 0.0, %v7198_v40  ;;  %v14888_v40 = vmul.f32 0.0, %v14724_v8  ;;  %v14906_v8 = vmul.f32 0.0, %v14722_v46  ;;  %v14924_v46 = vmul.f32 0.0, %v14662_v39 }
 0xa9c   : > { %16980 = vst [vmem:[#allocation151_spill] sm:$0xff] %v14878_v57  ;;  %v5694_v39 = vmul.f32 %v16976_v1, %v14736_v27  ;;  %16989 = vst [vmem:[#allocation202_spill] sm:$0xff] %v14950_v26  ;;  %v14966_v4 = vmul.f32 0.0, %v14728_v37  ;;  %v5727_v37 = vmul.f32 %v16979_v18, %v14742_v29 }
 0xa9d   : > { %16982 = vst [vmem:[#allocation149_spill] sm:$0xff] %v14888_v40  ;;  %16984 = vst [vmem:[#allocation228_spill] sm:$0xff] %v14906_v8 }
 0xa9e   : > { %4147 = vrot.lane.b32.xlu1 %v14852_v45, %s10109_s29  ;;  %4113 = vrot.lane.b32.xlu0 %v14849_v32, %s10109_s29  ;;  %16987 = vst [vmem:[#allocation171_spill] sm:$0xff] %v14924_v46 }
 0xaa2   : > { %7319 = vrot.lane.b32.xlu1 %v14860_v15, %s10109_s29  ;;  %4149 = vrot.lane.b32.xlu0 %v4138_v38, %s10109_s29  ;;  %v14915_v38 = vmul.f32 0.0, %v14726_v12  ;;  %v14931_v12 = vmul.f32 0.0, %v14667_v44  ;;  %v14947_v44 = vmul.f32 0.0, %v14645_v16  ;;  %v14963_v16 = vmul.f32 0.0, %v14686_v19 }
 0xaa3   : > { %v14983_v19 = vmul.f32 0.0, %v14674_v23  ;;  %v2551_v23 = vmul.f32 %v16979_v18, %v14688_v55 }
 0xaa4   : > { %16985 = vst [vmem:[#allocation147_spill] sm:$0xff] %v14915_v38  ;;  %16988 = vst [vmem:[#allocation164_spill] sm:$0xff] %v14931_v12 }
 0xaa5   : > { %16990 = vst [vmem:[#allocation122_spill] sm:$0xff] %v14963_v16  ;;  %16993 = vst [vmem:[#allocation204_spill] sm:$0xff] %v14983_v19 }
 0xaa6   : > { %4143 = vrot.lane.b32.xlu1 %v14866_v33, %s10109_s29  ;;  %7321 = vrot.lane.b32.xlu0 %v14868_v35, %s10109_s29 }
 0xaaa   : > { %5640 = vrot.lane.b32.xlu1 %v14878_v57, %s10109_s29  ;;  %4145 = vrot.lane.b32.xlu0 %v14875_v34, %s10109_s29 }
 0xaae   : > { %2464 = vrot.lane.b32.xlu1 %v14885_v2, %s10109_s29  ;;  %5642 = vrot.lane.b32.xlu0 %v14888_v40, %s10109_s29  ;;  %v16996_v40 = vld [vmem:[#allocation16_spill] sm:$0xff] }
 0xaaf   : > { %v7273_v57 = vmul.f32 %v16996_v40, %v14794_v14 }
 0xab2   : > { %5636 = vrot.lane.b32.xlu1 %v5628_v62, %s10109_s29  ;;  %2466 = vrot.lane.b32.xlu0 %v14895_v28, %s10109_s29  ;;  %v2485_v62 = vmul.f32 %v16975_v10, %v14655_v7  ;;  %v14973_v10 = vmul.f32 0.0, %v14732_v43  ;;  %v14991_v43 = vmul.f32 0.0, %v14678_v20 }
 0xab4   : > { %16991 = vst [vmem:[#allocation160_spill] sm:$0xff] %v14973_v10  ;;  %16994 = vst [vmem:[#allocation158_spill] sm:$0xff] %v14991_v43 }
 0xab6   : > { %5672 = vrot.lane.b32.xlu1 %v14906_v8, %s10109_s29  ;;  %5638 = vrot.lane.b32.xlu0 %v14903_v54, %s10109_s29 }
 0xaba   : > { %2460 = vrot.lane.b32.xlu1 %v2452_v58, %s10109_s29  ;;  %5674 = vrot.lane.b32.xlu0 %v14915_v38, %s10109_s29  ;;  %v2518_v58 = vmul.f32 %v16976_v1, %v14682_v36  ;;  %v14976_v1 = vmul.f32 0.0, %v14738_v24  ;;  %v14994_v24 = vmul.f32 0.0, %v14684_v56 }
 0xabc   : > { %16992 = vst [vmem:[#allocation234_spill] sm:$0xff] %v14976_v1  ;;  %16995 = vst [vmem:[#allocation125_spill] sm:$0xff] %v14994_v24 }
 0xabe   : > { %2496 = vrot.lane.b32.xlu1 %v14924_v46, %s10109_s29  ;;  %2462 = vrot.lane.b32.xlu0 %v14921_v9, %s10109_s29 }
 0xac2   : > { %5668 = vrot.lane.b32.xlu1 %v14934_v42, %s10109_s29  ;;  %2498 = vrot.lane.b32.xlu0 %v14931_v12, %s10109_s29 }
 0xac6   : > { %5704 = vrot.lane.b32.xlu1 %v5694_v39, %s10109_s29  ;;  %5670 = vrot.lane.b32.xlu0 %v5661_v13, %s10109_s29 }
 0xaca   : > { %2492 = vrot.lane.b32.xlu1 %v14947_v44, %s10109_s29  ;;  %5706 = vrot.lane.b32.xlu0 %v14950_v26, %s10109_s29 }
 0xace   : > { %2528 = vrot.lane.b32.xlu1 %v2518_v58, %s10109_s29  ;;  %2494 = vrot.lane.b32.xlu0 %v2485_v62, %s10109_s29 }
 0xad2   : > { %5700 = vrot.lane.b32.xlu1 %v14966_v4, %s10109_s29  ;;  %2530 = vrot.lane.b32.xlu0 %v14963_v16, %s10109_s29 }
 0xad6   : > { %5736 = vrot.lane.b32.xlu1 %v14976_v1, %s10109_s29  ;;  %5702 = vrot.lane.b32.xlu0 %v14973_v10, %s10109_s29 }
 0xada   : > { %2524 = vrot.lane.b32.xlu1 %v14983_v19, %s10109_s29  ;;  %5738 = vrot.lane.b32.xlu0 %v5727_v37, %s10109_s29 }
 0xadc   : > { %v7228_v13 = vpop.permute.xlu1 %7227 }
 0xade   : > { %2560 = vrot.lane.b32.xlu1 %v14994_v24, %s10109_s29  ;;  %2526 = vrot.lane.b32.xlu0 %v14991_v43, %s10109_s29  ;;  %v7237_v43 = vadd.f32 %v7228_v13, %v14748_v21  ;;  %v16997_v21 = vld [vmem:[#allocation14_spill] sm:$0xff] }
 0xae0   : > { %v4052_v39 = vpop.permute.xlu1 %4051  ;;  %v7230_v62 = vpop.permute.xlu0 %7229 }
 0xae1   : > { %v7238_v18 = vadd.f32 %v7230_v62, %v14754_v63  ;;  %v4061_v8 = vadd.f32 %v4052_v39, %v14752_v61  ;;  %v7211_v63 = vmul.f32 %v16997_v21, %v14744_v47 }
 0xae2   : > { %2562 = vrot.lane.b32.xlu0 %v2551_v23, %s10109_s29  ;;  %v7245_v23 = vadd.f32 %v14769_v41, %v7237_v43 }
 0xae3   : > { %v7246_v26 = vadd.f32 %v14777_v48, %v7238_v18  ;;  %v4069_v43 = vadd.f32 %v14784_v30, %v4061_v8  ;;  %v17000_v30 = vld [vmem:[#allocation117_spill] sm:$0xff] }
 0xae4   : > { %v7224_v58 = vpop.permute.xlu1 %7223  ;;  %v4054_v20 = vpop.permute.xlu0 %4053 }
 0xae5   : > { %v4062_v19 = vadd.f32 %v4054_v20, %v14760_v49  ;;  %v7235_v48 = vadd.f32 %v7224_v58, %v7211_v63  ;;  %v4035_v49 = vmul.f32 %v16997_v21, %v14690_v50  ;;  %v17003_v63 = vld [vmem:[#allocation154_spill] sm:$0xff] }
 0xae7   : > { %v4070_v61 = vadd.f32 %v14790_v0, %v4062_v19  ;;  %v17001_v0 = vld [vmem:[#allocation74_spill] sm:$0xff] }
 0xae8   : > { %v7260_v37 = vpop.permute.xlu1 %7259  ;;  %v7226_v7 = vpop.permute.xlu0 %7225 }
 0xae9   : > { %v7269_v2 = vadd.f32 %v7260_v37, %v7245_v23  ;;  %v16998_v37 = vld [vmem:[#allocation15_spill] sm:$0xff] }
 0xaeb   : > { %v7277_v10 = vadd.f32 %v7273_v57, %v7269_v2  ;;  %v7240_v57 = vmul.f32 %v16998_v37, %v14746_v51 }
 0xaec   : > { %v4048_v56 = vpop.permute.xlu1 %4047  ;;  %v7262_v9 = vpop.permute.xlu0 %7261 }
 0xaed   : > { %v7270_v38 = vadd.f32 %v7262_v9, %v7246_v26  ;;  %v7236_v9 = vadd.f32 %v7226_v7, %v14767_v52  ;;  %v4097_v7 = vmul.f32 %v16996_v40, %v14704_v53  ;;  %v4059_v52 = vadd.f32 %v4048_v56, %v4035_v49 }
 0xaef   : > { %v7278_v41 = vadd.f32 %v14809_v31, %v7270_v38  ;;  %v16999_v31 = vld [vmem:[#allocation17_spill] sm:$0xff] }
 0xaf0   : > { %v4084_v16 = vpop.permute.xlu1 %4083  ;;  %v4050_v1 = vpop.permute.xlu0 %4049  ;;  %v7306_v2 = vmul.f32 %v16999_v31, %v14834_v17 }
 0xaf1   : > { %v4093_v14 = vadd.f32 %v4084_v16, %v4069_v43  ;;  %v4060_v8 = vadd.f32 %v4050_v1, %v17001_v0 }
 0xaf3   : > { %v4101_v58 = vadd.f32 %v4097_v7, %v4093_v14  ;;  %v17004_v14 = vld [vmem:[#allocation225_spill] sm:$0xff] }
 0xaf4   : > { %v7256_v36 = vpop.permute.xlu1 %7255  ;;  %v4086_v24 = vpop.permute.xlu0 %4085 }
 0xaf5   : > { %v4094_v38 = vadd.f32 %v4086_v24, %v4070_v61 }
 0xaf7   : > { %v4102_v23 = vadd.f32 %v14822_v60, %v4094_v38  ;;  %v17005_v38 = vld [vmem:[#allocation230_spill] sm:$0xff] }
 0xaf8   : > { %v7292_v29 = vpop.permute.xlu1 %7291  ;;  %v7258_v12 = vpop.permute.xlu0 %7257 }
 0xaf9   : > { %v7301_v26 = vadd.f32 %v7292_v29, %v7277_v10  ;;  %v7243_v29 = vadd.f32 %v17000_v30, %v7235_v48  ;;  %v17002_v10 = vld [vmem:[#allocation79_spill] sm:$0xff] }
 0xafa   : > { %v4064_v19 = vmul.f32 %v16998_v37, %v17002_v10 }
 0xafb   : > { %v7309_v50 = vadd.f32 %v14830_v11, %v7301_v26  ;;  %v7267_v51 = vadd.f32 %v7256_v36, %v7243_v29  ;;  %v4130_v36 = vmul.f32 %v16999_v31, %v14710_v59 }
 0xafc   : > { %v4080_v55 = vpop.permute.xlu1 %4079  ;;  %v7294_v46 = vpop.permute.xlu0 %7293  ;;  %v4068_v1 = vadd.f32 %v4064_v19, %v4060_v8 }
 0xafd   : > { %v7302_v39 = vadd.f32 %v7294_v46, %v7278_v41  ;;  %v7244_v46 = vadd.f32 %v7240_v57, %v7236_v9  ;;  %v4067_v41 = vadd.f32 %v17003_v63, %v4059_v52  ;;  %v7275_v11 = vadd.f32 %v14824_v25, %v7267_v51 }
 0xaff   : > { %v7310_v16 = vadd.f32 %v7306_v2, %v7302_v39  ;;  %v7268_v24 = vadd.f32 %v7258_v12, %v7244_v46  ;;  %v4091_v39 = vadd.f32 %v4080_v55, %v4067_v41 }
 0xb00   : > { %v4116_v27 = vpop.permute.xlu1 %4115  ;;  %v4082_v28 = vpop.permute.xlu0 %4081 }
 0xb01   : > { %v4125_v48 = vadd.f32 %v4116_v27, %v4101_v58  ;;  %v4092_v49 = vadd.f32 %v4082_v28, %v4068_v1  ;;  %v7276_v12 = vadd.f32 %v14832_v6, %v7268_v24  ;;  %v4099_v7 = vadd.f32 %v17005_v38, %v4091_v39  ;;  %v17006_v6 = vld [vmem:[#allocation67_spill] sm:$0xff]  ;;  %v17008_v24 = vld [vmem:[#allocation26_spill] sm:$0xff]  ;;  %v7384_v1 = vld [vmem:[%s15465_s6 + $0x8] sm:$0xff] }
 0xb02   : > { %v15046_v28 = vmul.f32 0.0, %v17006_v6  ;;  %v7582_v39 = vld [vmem:[%s15467_s8 + $0x10] sm:$0xff]  ;;  %v5624_v38 = vmul.f32 %v16997_v21, %v14712_v5  ;;  %v7581_v6 = vld [vmem:[%s15467_s8 + $0x8] sm:$0xff] }
 0xb03   : > { %v4100_v55 = vadd.f32 %v14849_v32, %v4092_v49  ;;  %v17007_v32 = vld [vmem:[#allocation62_spill] sm:$0xff]  ;;  %v7587_v49 = vld [vmem:[%s15467_s8 + $0x38] sm:$0xff]  ;;  %v7890_v5 = vld [vmem:[%s15469_s10 + $0x8] sm:$0xff] }
 0xb04   : > { %v4118_v13 = vpop.permute.xlu0 %4117  ;;  %v7288_v62 = vpop.permute.xlu1 %7287 }
 0xb05   : > { %v4126_v43 = vadd.f32 %v4118_v13, %v4102_v23  ;;  %v7299_v60 = vadd.f32 %v7288_v62, %v7275_v11  ;;  %v4133_v13 = vadd.f32 %v14852_v45, %v4125_v48  ;;  %v15067_v23 = vmul.f32 0.0, %v17008_v24  ;;  %v7586_v48 = vld [vmem:[%s15467_s8 + $0x30] sm:$0xff]  ;;  %v7584_v11 = vld [vmem:[%s15467_s8 + $0x20] sm:$0xff] }
 0xb07   : > { %v4134_v57 = vadd.f32 %v4130_v36, %v4126_v43  ;;  %v7307_v62 = vadd.f32 %v14860_v15, %v7299_v60 }
 0xb08   : > { %v7324_v20 = vpop.permute.xlu1 %7323  ;;  %v7290_v47 = vpop.permute.xlu0 %7289 }
 0xb09   : > { %v7333_v53 = vadd.f32 %v7324_v20, %v7309_v50  ;;  %v15038_v20 = vmul.f32 0.0, %v17004_v14  ;;  %v7300_v27 = vadd.f32 %v7290_v47, %v7276_v12  ;;  %v7580_v14 = vld [vmem:[%s15467_s8] sm:$0xff] }
 0xb0b   : > { %v7308_v29 = vadd.f32 %v14868_v35, %v7300_v27  ;;  %v7585_v27 = vld [vmem:[%s15467_s8 + $0x28] sm:$0xff] }
 0xb0c   : > { %v4112_v18 = vpop.permute.xlu1 %4111  ;;  %v7326_v17 = vpop.permute.xlu0 %7325 }
 0xb0d   : > { %v7334_v56 = vadd.f32 %v7326_v17, %v7310_v16  ;;  %v4123_v47 = vadd.f32 %v4112_v18, %v4099_v7  ;;  %v15054_v16 = vmul.f32 0.0, %v17007_v32  ;;  %v7383_v17 = vld [vmem:[%s15465_s6] sm:$0xff] }
 0xb0f   : > { %v8977_v9 = vpack.i.bf16 %v7334_v56, %v7333_v53  ;;  %v4131_v10 = vadd.f32 %v14866_v33, %v4123_v47  ;;  %v7385_v56 = vld [vmem:[%s15465_s6 + $0x10] sm:$0xff] }
 0xb10   : > { %v4148_v61 = vpop.permute.xlu1 %4147  ;;  %v4114_v26 = vpop.permute.xlu0 %4113 }
 0xb11   : > { %8978 = vrot.lane.b32.xlu1 %v8977_v9, %s10109_s29  ;;  %v4157_v52 = vadd.f32 %v4148_v61, %v4133_v13  ;;  %v4124_v30 = vadd.f32 %v4114_v26, %v4100_v55  ;;  %v7386_v61 = vld [vmem:[%s15465_s6 + $0x18] sm:$0xff] }
 0xb13   : > { %v4132_v19 = vadd.f32 %v14875_v34, %v4124_v30 }
 0xb14   : > { %v7320_v25 = vpop.permute.xlu1 %7319  ;;  %v4150_v2 = vpop.permute.xlu0 %4149 }
 0xb15   : > { %v4158_v59 = vadd.f32 %v4150_v2, %v4134_v57  ;;  %5732 = vrot.lane.b32.xlu1 %v15038_v20, %s10109_s29  ;;  %v7331_v46 = vadd.f32 %v7320_v25, %v7307_v62  ;;  %v7889_v25 = vld [vmem:[%s15469_s10] sm:$0xff]  ;;  %v7583_v2 = vld [vmem:[%s15467_s8 + $0x18] sm:$0xff] }
 0xb17   : > { %v8982_v45 = vpack.i.bf16 %v4158_v59, %v4157_v52  ;;  %v7891_v59 = vld [vmem:[%s15469_s10 + $0x10] sm:$0xff] }
 0xb18   : > { %v4144_v0 = vpop.permute.xlu1 %4143  ;;  %v7322_v8 = vpop.permute.xlu0 %7321 }
 0xb19   : > { %v7332_v50 = vadd.f32 %v7322_v8, %v7308_v29  ;;  %2556 = vrot.lane.b32.xlu1 %v15046_v28, %s10109_s29  ;;  %8983 = vrot.lane.b32.xlu0 %v8982_v45, %s10109_s29  ;;  %v4155_v58 = vadd.f32 %v4144_v0, %v4131_v10  ;;  %v2448_v29 = vmul.f32 %v16997_v21, %v14640_v3 }
 0xb1a   : > { %v5653_v0 = vmul.f32 %v16998_v37, %v14718_v22 }
 0xb1b   : > { %v8987_v15 = vpack.i.bf16 %v7332_v50, %v7331_v46 }
 0xb1c   : > { %v15058_v51 = vpop.permute.xlu1 %5640  ;;  %v4146_v35 = vpop.permute.xlu0 %4145 }
 0xb1d   : > { %v4156_v18 = vadd.f32 %v4146_v35, %v4132_v19  ;;  %8988 = vrot.lane.b32.xlu1 %v8987_v15, %s10109_s29  ;;  %5734 = vrot.lane.b32.xlu0 %v15054_v16, %s10109_s29 }
 0xb1f   : > { %v8992_v33 = vpack.i.bf16 %v4156_v18, %v4155_v58  ;;  %v17009_v58 = vld [vmem:[#allocation160_spill] sm:$0xff] }
 0xb20   : > { %v15069_v53 = vpop.permute.xlu1 %2464  ;;  %v15071_v34 = vpop.permute.xlu0 %5642 }
 0xb21   : > { %7389 = vperm.xlu1 %8976, %v7383_v17   ;;  %2558 = vrot.lane.b32.xlu0 %v15067_v23, %s10109_s29 }
 0xb24   : > { %v5637_v63 = vpop.permute.xlu1 %5636  ;;  %v15078_v41 = vpop.permute.xlu0 %2466 }
 0xb25   : > { %7399 = vperm.xlu1 %8976, %v7385_v56   ;;  %8993 = vrot.lane.b32.xlu0 %v8992_v33, %s10109_s29  ;;  %v5648_v55 = vadd.f32 %v5637_v63, %v5624_v38  ;;  %v17010_v63 = vld [vmem:[#allocation204_spill] sm:$0xff]  ;;  %v17016_v38 = vld [vmem:[#allocation167_spill] sm:$0xff] }
 0xb27   : > { %v5656_v45 = vadd.f32 %v14934_v42, %v5648_v55  ;;  %v7892_v42 = vld [vmem:[%s15469_s10 + $0x18] sm:$0xff] }
 0xb28   : > { %v15087_v43 = vpop.permute.xlu1 %5672  ;;  %v5639_v9 = vpop.permute.xlu0 %5638 }
 0xb29   : > { %7620 = vperm.xlu1 %8976, %v7586_v48   ;;  %7394 = vperm.xlu0 %8975, %v7384_v1   ;;  %v5649_v30 = vadd.f32 %v5639_v9, %v14903_v54 }
 0xb2b   : > { %v5657_v54 = vadd.f32 %v5653_v0, %v5649_v30 }
 0xb2c   : > { %v2461_v26 = vpop.permute.xlu1 %2460  ;;  %v15095_v36 = vpop.permute.xlu0 %5674 }
 0xb2d   : > { %7610 = vperm.xlu1 %8976, %v7584_v11   ;;  %7404 = vperm.xlu0 %8975, %v7386_v61   ;;  %v2472_v32 = vadd.f32 %v2461_v26, %v2448_v29  ;;  %v17011_v11 = vld [vmem:[#allocation151_spill] sm:$0xff]  ;;  %v17012_v26 = vld [vmem:[#allocation149_spill] sm:$0xff] }
 0xb2e   : > { %v5650_v61 = vadd.f32 %v15058_v51, %v17011_v11 }
 0xb2f   : > { %v2480_v3 = vadd.f32 %v14947_v44, %v2472_v32  ;;  %v17022_v32 = vld [vmem:[#allocation100_spill] sm:$0xff] }
 0xb30   : > { %v15103_v12 = vpop.permute.xlu1 %2496  ;;  %v15105_v60 = vpop.permute.xlu0 %2462 }
 0xb31   : > { %7600 = vperm.xlu1 %8976, %v7582_v39   ;;  %7625 = vperm.xlu0 %8975, %v7587_v49   ;;  %v17013_v39 = vld [vmem:[#allocation228_spill] sm:$0xff] }
 0xb32   : > { %v5658_v49 = vadd.f32 %v17013_v39, %v5650_v61 }
 0xb34   : > { %v5669_v13 = vpop.permute.xlu1 %5668  ;;  %v15113_v57 = vpop.permute.xlu0 %2498 }
 0xb35   : > { %7590 = vperm.xlu1 %8976, %v7580_v14   ;;  %7615 = vperm.xlu0 %8975, %v7585_v27   ;;  %v5680_v8 = vadd.f32 %v5669_v13, %v5656_v45  ;;  %v17014_v14 = vld [vmem:[#allocation147_spill] sm:$0xff]  ;;  %v5682_v13 = vadd.f32 %v15087_v43, %v5658_v49  ;;  %v17020_v45 = vld [vmem:[#allocation164_spill] sm:$0xff]  ;;  %v17028_v49 = vld [vmem:[#allocation125_spill] sm:$0xff] }
 0xb37   : > { %v5688_v15 = vadd.f32 %v14966_v4, %v5680_v8  ;;  %v17021_v8 = vld [vmem:[#allocation88_spill] sm:$0xff] }
 0xb38   : > { %v5705_v7 = vpop.permute.xlu1 %5704  ;;  %v5671_v52 = vpop.permute.xlu0 %5670 }
 0xb39   : > { %7895 = vperm.xlu1 %8976, %v7889_v25   ;;  %7605 = vperm.xlu0 %8975, %v7583_v2   ;;  %v5681_v10 = vadd.f32 %v5671_v52, %v5657_v54  ;;  %v17015_v25 = vld [vmem:[#allocation231_spill] sm:$0xff]  ;;  %v17017_v52 = vld [vmem:[#allocation222_spill] sm:$0xff]  ;;  %v2510_v54 = vmul.f32 %v16996_v40, %v17022_v32 }
 0xb3a   : > { %v2474_v2 = vadd.f32 %v15069_v53, %v17015_v25  ;;  %v5686_v51 = vmul.f32 %v16996_v40, %v17017_v52 }
 0xb3b   : > { %v5689_v18 = vadd.f32 %v17009_v58, %v5681_v10  ;;  %v17023_v10 = vld [vmem:[#allocation234_spill] sm:$0xff] }
 0xb3c   : > { %v2493_v62 = vpop.permute.xlu1 %2492  ;;  %v5707_v47 = vpop.permute.xlu0 %5706 }
 0xb3d   : > { %7905 = vperm.xlu1 %8976, %v7891_v59   ;;  %7595 = vperm.xlu0 %8975, %v7581_v6   ;;  %v2504_v22 = vadd.f32 %v2493_v62, %v2480_v3  ;;  %v5690_v59 = vadd.f32 %v5686_v51, %v5682_v13  ;;  %v17019_v62 = vld [vmem:[#allocation171_spill] sm:$0xff] }
 0xb3e   : > { %v2482_v30 = vadd.f32 %v17019_v62, %v2474_v2 }
 0xb3f   : > { %v2512_v48 = vadd.f32 %v17010_v63, %v2504_v22  ;;  %v5714_v43 = vadd.f32 %v5705_v7, %v5690_v59 }
 0xb40   : > { %v2529_v46 = vpop.permute.xlu1 %2528  ;;  %v15138_v50 = vpop.permute.xlu0 %2494 }
 0xb41   : > { %7900 = vperm.xlu0 %8975, %v7890_v5  }
 0xb44   : > { %v5701_v19 = vpop.permute.xlu1 %5700  ;;  %v2531_v35 = vpop.permute.xlu0 %2530 }
 0xb45   : > { %v5712_v21 = vadd.f32 %v5701_v19, %v5688_v15  ;;  %7910 = vperm.xlu0 %8975, %v7892_v42   ;;  %v5722_v15 = vadd.f32 %v17023_v10, %v5714_v43 }
 0xb47   : > { %v15147_v17 = vadd.f32 %v15038_v20, %v5712_v21  ;;  %v5651_v20 = vadd.f32 %v15071_v34, %v17012_v26  ;;  %v17018_v34 = vld [vmem:[#allocation202_spill] sm:$0xff] }
 0xb48   : > { %v5737_v24 = vpop.permute.xlu1 %5736  ;;  %v5703_v33 = vpop.permute.xlu0 %5702  ;;  %v17024_v21 = vld [vmem:[#allocation122_spill] sm:$0xff] }
 0xb49   : > { %v5713_v56 = vadd.f32 %v5703_v33, %v5689_v18  ;;  %v5659_v27 = vadd.f32 %v17014_v14, %v5651_v20  ;;  %v17027_v20 = vld [vmem:[#allocation224_spill] sm:$0xff] }
 0xb4b   : > { %v15151_v1 = vadd.f32 %v15054_v16, %v5713_v56  ;;  %v5683_v16 = vadd.f32 %v15095_v36, %v5659_v27  ;;  %v2506_v36 = vadd.f32 %v15103_v12, %v2482_v30 }
 0xb4c   : > { %v2525_v4 = vpop.permute.xlu1 %2524  ;;  %v5739_v55 = vpop.permute.xlu0 %5738 }
 0xb4d   : > { %v2536_v9 = vadd.f32 %v2525_v4, %v2512_v48  ;;  %v5691_v6 = vadd.f32 %v17018_v34, %v5683_v16  ;;  %v2514_v3 = vadd.f32 %v2510_v54, %v2506_v36  ;;  %v17026_v4 = vld [vmem:[#allocation226_spill] sm:$0xff]  ;;  %v9003_v54 = vld [vmem:[%s15464_s5] sm:$0xff]  }
 0xb4f   : > { %v15154_v44 = vadd.f32 %v15046_v28, %v2536_v9  ;;  %v2475_v28 = vadd.f32 %v15078_v41, %v17016_v38  ;;  %v5715_v29 = vadd.f32 %v5707_v47, %v5691_v6  ;;  %v5719_v41 = vmul.f32 %v16999_v31, %v17021_v8 }
 0xb50   : > { %v2561_v0 = vpop.permute.xlu1 %2560  ;;  %v2527_v42 = vpop.permute.xlu0 %2526  ;;  %v5746_v47 = vadd.f32 %v5737_v24, %v5722_v15  ;;  %v2538_v56 = vadd.f32 %v2529_v46, %v2514_v3  ;;  %v2477_v9 = vmul.f32 %v16998_v37, %v17026_v4  ;;  %v2543_v24 = vmul.f32 %v16999_v31, %v17027_v20  ;;  %v10077_v4 = vld [vmem:[%s10243_s23 + $0x18] sm:$0xff] }
 0xb51   : > { %v2483_v5 = vadd.f32 %v17020_v45, %v2475_v28  ;;  %v5723_v19 = vadd.f32 %v5719_v41, %v5715_v29  ;;  %v17029_v28 = vld [vmem:[#allocation158_spill] sm:$0xff] }
 0xb52   : > { %v2546_v14 = vadd.f32 %v17028_v49, %v2538_v56 }
 0xb53   : > { %v2507_v53 = vadd.f32 %v15113_v57, %v2483_v5  ;;  %v5747_v58 = vadd.f32 %v5739_v55, %v5723_v19  ;;  %v17025_v57 = vld [vmem:[#allocation133_spill] sm:$0xff] }
 0xb54   : > { %v2473_v33 = vadd.f32 %v15105_v60, %v17025_v57  ;;  %v2563_v11 = vpop.permute.xlu0 %2562  ;;  %v2570_v13 = vadd.f32 %v2561_v0, %v2546_v14  ;;  %v10075_v57 = vld [vmem:[%s10243_s23 + $0x10] sm:$0xff] }
 0xb55   : > { %v2515_v22 = vadd.f32 %v17024_v21, %v2507_v53 }
 0xb56   : > { %v2481_v39 = vadd.f32 %v2477_v9, %v2473_v33 }
 0xb57   : > { %v2539_v63 = vadd.f32 %v2531_v35, %v2515_v22 }
 0xb58   : > { %v2505_v46 = vadd.f32 %v15138_v50, %v2481_v39  ;;  %v10079_v39 = vld [vmem:[%s10243_s23 + $0x8] sm:$0xff] }
 0xb59   : > { %v2547_v60 = vadd.f32 %v2543_v24, %v2539_v63 }
 0xb5a   : > { %v2513_v52 = vadd.f32 %v17029_v28, %v2505_v46 }
 0xb5b   : > { %v2571_v16 = vadd.f32 %v2563_v11, %v2547_v60  ;;  %v10078_v11 = vld [vmem:[%s10243_s23 + $0x20] sm:$0xff]  ;;  %v10080_v60 = vld [vmem:[%s10243_s23 + $0x28] sm:$0xff] }
 0xb5c   : > { %v2537_v62 = vadd.f32 %v2527_v42, %v2513_v52  ;;  %v17030_v42 = vmov 0   ;;  %v10082_v52 = vld [vmem:[%s10243_s23 + $0x38] sm:$0xff] }
 0xb5e   : > { %v2545_v29 = vadd.f32 %v15067_v23, %v2537_v62  ;;  %v9004_v23 = vld [vmem:[%s15464_s5 + $0x8] sm:$0xff]  }
 0xb83   : > { %v8979_v7 = vpop.permute.xlu1 %8978 }
 0xb84   : > { %v8981_v12 = vunpack.i.h.bf16 %v8979_v7  ;;  %v8980_v18 = vunpack.i.l.bf16 %v8979_v7 }
 0xb86   : > { %v7373_v48 = vsel %vm1022_vm9, %v5746_v47, %v8980_v18  ;;  %v7374_v40 = vsel %vm1022_vm9, %v5747_v58, %v8981_v12 }
 0xb87   : > { %v5733_v61 = vpop.permute.xlu1 %5732  ;;  %v7382_v26 = vpack.c.bf16 %v7374_v40, %v7373_v48  ;;  %v10076_v48 = vld [vmem:[%s10243_s23] sm:$0xff] }
 0xb88   : > { %v5744_v59 = vadd.f32 %v5733_v61, %v15147_v17 }
 0xb89   : > { %7435 = vmatprep.subr.bf16.mxu1 %v7382_v26 }
 0xb8b   : > { %v2557_v35 = vpop.permute.xlu1 %2556  ;;  %v8984_v27 = vpop.permute.xlu0 %8983 }
 0xb8c   : > { %v8986_v25 = vunpack.i.h.bf16 %v8984_v27  ;;  %v8985_v2 = vunpack.i.l.bf16 %v8984_v27  ;;  %v2568_v53 = vadd.f32 %v2557_v35, %v15154_v44 }
 0xb8e   : > { %v7369_v37 = vsel %vm1022_vm9, %v2570_v13, %v8985_v2  ;;  %v7370_v38 = vsel %vm1022_vm9, %v2571_v16, %v8986_v25  ;;  %v10081_v25 = vld [vmem:[%s10243_s23 + $0x30] sm:$0xff]  ;;  %s15417_s23 = scalar_lea.vmem [#allocation3], %s10228_s30  ;;  %s8291_s30 = sshll.u32 (%p10200_p5), %s8095_s20, 4 }
 0xb8f   : > { %v7381_v31 = vpack.c.bf16 %v7370_v38, %v7369_v37  ;;  %v8989_v51 = vpop.permute.xlu1 %8988  ;;  %v5735_v55 = vpop.permute.xlu0 %5734  ;;  %s8007_s26 = scalar_lea.vmem (%p10200_p5), %s15470_s11, %s8291_s30 }
 0xb90   : > { %v8991_v34 = vunpack.i.h.bf16 %v8989_v51  ;;  %v8990_v6 = vunpack.i.l.bf16 %v8989_v51  ;;  %v5745_v50 = vadd.f32 %v5735_v55, %v15151_v1 }
 0xb91   : > { %7436 = vmatpush1.bf16.msra.mxu1 %v7381_v31 }
 0xb92   : > { %v7371_v30 = vsel %vm1022_vm9, %v5744_v59, %v8990_v6  ;;  %v7372_v45 = vsel %vm1022_vm9, %v5745_v50, %v8991_v34 }
 0xb93   : > { %v2559_v5 = vpop.permute.xlu0 %2558  ;;  %v7380_v43 = vpack.c.bf16 %v7372_v45, %v7371_v30 }
 0xb94   : > { %v2569_v0 = vadd.f32 %v2559_v5, %v2545_v29 }
 0xb95   : > { %7437 = vmatprep.subr.bf16.mxu1 %v7380_v43 }
 0xb97   : > { %v8994_v36 = vpop.permute.xlu0 %8993 }
 0xb98   : > { %v8996_v17 = vunpack.i.h.bf16 %v8994_v36  ;;  %v8995_v8 = vunpack.i.l.bf16 %v8994_v36 }
 0xb9a   : > { %v7368_v41 = vsel %vm1022_vm9, %v2569_v0, %v8996_v17  ;;  %v7367_v1 = vsel %vm1022_vm9, %v2568_v53, %v8995_v8 }
 0xb9b   : > { %v7379_v32 = vpack.c.bf16 %v7368_v41, %v7367_v1 }
 0xb9c   : > { %v7390_v10 = vpop.permute.xlu1 %7389 }
 0xb9d   : > { %7438 = vmatpush1.bf16.msra.mxu1 %v7379_v32 }
 0xba0   : > { %8271 = vmatmul.mubr.msk.bf16.vlgmr.msra.gmra.mxu1 %vm858_vm0, %v9003_v54  ;;  %v7400_v58 = vpop.permute.xlu1 %7399 }
 0xba1   : > { %7465 = vmatprep.mubr.bf16.mxu1 %v17030_v42 }
 0xba4   : > { %v7395_v19 = vpop.permute.xlu0 %7394 }
 0xba8   : > { %8272 = vmatmul.mubr.msk.bf16.gmra.mxu1 %vm858_vm0, %v9004_v23  ;;  %v7405_v20 = vpop.permute.xlu0 %7404 }
 0xba9   : > { %7961 = vmatprep.mubr.bf16.mxu1 %v17030_v42 }
 0xc60   : > { %v7457_v44 = vpop.f32.mrf.mxu1 }
 0xc61   : > { %v7458_v7 = vadd.f32 %v7457_v44, %v7390_v10 }
 0xc62   : > { %v7459_v15 = vpop.f32.mrf.mxu1 }
 0xc63   : > { %v7460_v18 = vadd.f32 %v7459_v15, %v7390_v10  ;;  %v15216_v40 = vadd.f32 %v10076_v48, %v7458_v7 }
 0xc64   : > { %v7461_v3 = vpop.f32.mrf.mxu1 }
 0xc65   : > { %v7462_v21 = vadd.f32 %v7461_v3, %v7395_v19  ;;  %v15225_v49 = vadd.f32 %v10079_v39, %v7460_v18 }
 0xc66   : > { %v7463_v22 = vpop.f32.mrf.mxu1 }
 0xc67   : > { %v7464_v47 = vadd.f32 %v7463_v22, %v7395_v19  ;;  %v15213_v33 = vadd.f32 %v10075_v57, %v7462_v21 }
 0xc68   : > { %v7467_v12 = vpop.f32.mrf.mxu1 }
 0xc69   : > { %v7468_v56 = vadd.f32 %v7467_v12, %v7400_v58  ;;  %v15219_v9 = vadd.f32 %v10077_v4, %v7464_v47  ;;  %v7484_v14 = vadd.f32 %v15213_v33, %v15216_v40 }
 0xc6a   : > { %v7469_v63 = vpop.f32.mrf.mxu1 }
 0xc6b   : > { %v15222_v61 = vadd.f32 %v10078_v11, %v7468_v56  ;;  %v7470_v26 = vadd.f32 %v7469_v63, %v7400_v58  ;;  %v7493_v13 = vadd.f32 %v15219_v9, %v15225_v49 }
 0xc6c   : > { %v7471_v24 = vpop.f32.mrf.mxu1 }
 0xc6d   : > { %v15230_v46 = vadd.f32 %v10080_v60, %v7470_v26  ;;  %v7472_v35 = vadd.f32 %v7471_v24, %v7405_v20  ;;  %v7485_v16 = vadd.f32 %v7484_v14, %v15222_v61 }
 0xc6e   : > { %v7473_v27 = vpop.f32.mrf.mxu1 }
 0xc6f   : > { %v15236_v2 = vadd.f32 %v10081_v25, %v7472_v35  ;;  %v7474_v37 = vadd.f32 %v7473_v27, %v7405_v20  ;;  %v7494_v38 = vadd.f32 %v7493_v13, %v15230_v46 }
 0xc71   : > { %v7486_v28 = vadd.f32 %v7485_v16, %v15236_v2  ;;  %v15241_v31 = vadd.f32 %v10082_v52, %v7474_v37 }
 0xc73   : > { %v7487_v51 = vrot.slane %v7486_v28, 4  ;;  %v7495_v55 = vadd.f32 %v7494_v38, %v15241_v31 }
 0xc75   : > { %v7488_v59 = vadd.f32 %v7487_v51, %v7486_v28  ;;  %v7496_v34 = vrot.slane %v7495_v55, 4 }
 0xc77   : > { %v7489_v6 = vrot.slane %v7488_v59, 2  ;;  %v7497_v50 = vadd.f32 %v7496_v34, %v7495_v55 }
 0xc79   : > { %v7490_v62 = vadd.f32 %v7489_v6, %v7488_v59  ;;  %v7498_v30 = vrot.slane %v7497_v50, 2  ;;  %v17031_v59 = vld [vmem:[#allocation7_spill] sm:$0xff]  ;;  %v17032_v6 = vld [vmem:[#allocation5_spill] sm:$0xff] }
 0xc7b   : > { %v7491_v45 = vrot.slane %v7490_v62, 1  ;;  %v7499_v5 = vadd.f32 %v7498_v30, %v7497_v50 }
 0xc7d   : > { %v7492_v43 = vadd.f32 %v7491_v45, %v7490_v62  ;;  %v7500_v29 = vrot.slane %v7499_v5, 1 }
 0xc7f   : > { %v7502_v36 = vmul.f32 0.03125, %v7492_v43  ;;  %v7501_v53 = vadd.f32 %v7500_v29, %v7499_v5 }
 0xc81   : > { %v7504_v0 = vsub.f32 %v15216_v40, %v7502_v36  ;;  %v7506_v17 = vsub.f32 %v15213_v33, %v7502_v36  ;;  %v7508_v8 = vsub.f32 %v15222_v61, %v7502_v36  ;;  %v7503_v41 = vmul.f32 0.03125, %v7501_v53 }
 0xc82   : > { %v7510_v1 = vsub.f32 %v15236_v2, %v7502_v36 }
 0xc83   : > { %v7512_v32 = vmul.f32 %v7504_v0, %v7504_v0  ;;  %v7514_v54 = vmul.f32 %v7506_v17, %v7506_v17  ;;  %v7505_v23 = vsub.f32 %v15225_v49, %v7503_v41  ;;  %v7507_v44 = vsub.f32 %v15219_v9, %v7503_v41 }
 0xc84   : > { %v7509_v10 = vsub.f32 %v15230_v46, %v7503_v41  ;;  %v7516_v15 = vmul.f32 %v7508_v8, %v7508_v8  ;;  %v7511_v3 = vsub.f32 %v15241_v31, %v7503_v41  ;;  %v7518_v7 = vmul.f32 %v7510_v1, %v7510_v1  ;;  %v17033_v41 = vld [vmem:[#allocation9_spill] sm:$0xff] }
 0xc85   : > { %v7520_v19 = vadd.f32 %v7514_v54, %v7512_v32  ;;  %v7513_v21 = vmul.f32 %v7505_v23, %v7505_v23  ;;  %v7515_v22 = vmul.f32 %v7507_v44, %v7507_v44  ;;  %v17034_v54 = vld [vmem:[#allocation8_spill] sm:$0xff] }
 0xc86   : > { %v7517_v58 = vmul.f32 %v7509_v10, %v7509_v10  ;;  %v7519_v57 = vmul.f32 %v7511_v3, %v7511_v3 }
 0xc87   : > { %v7521_v47 = vadd.f32 %v7520_v19, %v7516_v15  ;;  %v7529_v12 = vadd.f32 %v7515_v22, %v7513_v21  ;;  %v17036_v19 = vld [vmem:[#allocation6_spill] sm:$0xff] }
 0xc89   : > { %v7522_v18 = vadd.f32 %v7521_v47, %v7518_v7  ;;  %v7530_v56 = vadd.f32 %v7529_v12, %v7517_v58 }
 0xc8b   : > { %v7523_v63 = vrot.slane %v7522_v18, 4  ;;  %v7531_v48 = vadd.f32 %v7530_v56, %v7519_v57 }
 0xc8d   : > { %v7524_v4 = vadd.f32 %v7523_v63, %v7522_v18  ;;  %v7532_v11 = vrot.slane %v7531_v48, 4  ;;  %v9005_v63 = vld [vmem:[%s15466_s7] sm:$0xff]  }
 0xc8f   : > { %v7525_v26 = vrot.slane %v7524_v4, 2  ;;  %v7533_v20 = vadd.f32 %v7532_v11, %v7531_v48  ;;  %v9006_v48 = vld [vmem:[%s15466_s7 + $0x8] sm:$0xff]   ;;  %v9008_v11 = vld [vmem:[%s15466_s7 + $0x18] sm:$0xff]  }
 0xc91   : > { %v7526_v24 = vadd.f32 %v7525_v26, %v7524_v4  ;;  %v7534_v39 = vrot.slane %v7533_v20, 2  ;;  %v9007_v4 = vld [vmem:[%s15466_s7 + $0x10] sm:$0xff]   ;;  %v7621_v26 = vpop.permute.xlu1 %7620 }
 0xc93   : > { %v7527_v14 = vrot.slane %v7526_v24, 1  ;;  %v7535_v60 = vadd.f32 %v7534_v39, %v7533_v20  ;;  %v15287_v20 = vpop.permute.xlu0 %7625 }
 0xc95   : > { %v7528_v35 = vadd.f32 %v7527_v14, %v7526_v24  ;;  %v7536_v27 = vrot.slane %v7535_v60, 1  ;;  %v7611_v39 = vpop.permute.xlu1 %7610 }
 0xc97   : > { %v7538_v13 = vmul.f32 0.03125, %v7528_v35  ;;  %v7537_v16 = vadd.f32 %v7536_v27, %v7535_v60  ;;  %v7616_v60 = vpop.permute.xlu0 %7615 }
 0xc99   : > { %v7540_v25 = vadd.f32 1e-05, %v7538_v13  ;;  %v7539_v37 = vmul.f32 0.03125, %v7537_v16  ;;  %v7601_v13 = vpop.permute.xlu1 %7600 }
 0xc9b   : > { %10039 = vrsqrt.f32 %v7540_v25  ;;  %v7541_v38 = vadd.f32 1e-05, %v7539_v37  ;;  %v7606_v25 = vpop.permute.xlu0 %7605 }
 0xc9d   : > { %10041 = vrsqrt.f32 %v7541_v38 }
 0xca8   : > { %v10040_v28 = vpop.eup %10039 }
 0xca9   : > { %v7550_v52 = vmul.f32 %v10040_v28, %v7510_v1  ;;  %v7548_v51 = vmul.f32 %v10040_v28, %v7508_v8  ;;  %v7544_v62 = vmul.f32 %v10040_v28, %v7504_v0  ;;  %v7546_v30 = vmul.f32 %v10040_v28, %v7506_v17  ;;  %v17035_v8 = vld [vmem:[#allocation4_spill] sm:$0xff]  ;;  %v7591_v28 = vpop.permute.xlu1 %7590 }
 0xcaa   : > { %v10042_v55 = vpop.eup %10041 }
 0xcab   : > { %v7558_v34 = vmul.f32 %v7550_v52, %v17031_v59  ;;  %v7556_v50 = vmul.f32 %v7548_v51, %v17032_v6  ;;  %v7551_v45 = vmul.f32 %v10042_v55, %v7511_v3  ;;  %v7549_v5 = vmul.f32 %v10042_v55, %v7509_v10  ;;  %v17038_v3 = vld [vmem:[#allocation10_spill] sm:$0xff] }
 0xcac   : > { %v7545_v43 = vmul.f32 %v10042_v55, %v7505_v23  ;;  %v7547_v29 = vmul.f32 %v10042_v55, %v7507_v44  ;;  %v7552_v22 = vmul.f32 %v7544_v62, %v17033_v41  ;;  %v7554_v0 = vmul.f32 %v7546_v30, %v17034_v54  ;;  %v17037_v44 = vld [vmem:[#allocation11_spill] sm:$0xff]  ;;  %v7596_v55 = vpop.permute.xlu0 %7595 }
 0xcad   : > { %v7557_v36 = vmul.f32 %v7549_v5, %v17032_v6  ;;  %v7559_v53 = vmul.f32 %v7551_v45, %v17031_v59  ;;  %v7564_v15 = vadd.f32 %v7556_v50, %v17035_v8  ;;  %v7566_v21 = vadd.f32 %v7558_v34, %v17036_v19 }
 0xcae   : > { %v7553_v32 = vmul.f32 %v7545_v43, %v17033_v41  ;;  %v7555_v1 = vmul.f32 %v7547_v29, %v17034_v54  ;;  %v7560_v12 = vadd.f32 %v7552_v22, %v17037_v44  ;;  %v7562_v18 = vadd.f32 %v7554_v0, %v17038_v3 }
 0xcaf   : > { %v7565_v17 = vadd.f32 %v7557_v36, %v17035_v8  ;;  %v7567_v23 = vadd.f32 %v7559_v53, %v17036_v19  ;;  %v7570_v58 = vpack.c.bf16 %v7566_v21, %v7564_v15 }
 0xcb0   : > { %v7561_v10 = vadd.f32 %v7553_v32, %v17037_v44  ;;  %v7563_v7 = vadd.f32 %v7555_v1, %v17038_v3  ;;  %v7568_v56 = vpack.c.bf16 %v7562_v18, %v7560_v12 }
 0xcb1   : > { %v7571_v47 = vpack.c.bf16 %v7567_v23, %v7565_v17 }
 0xcb2   : > { %v7569_v57 = vpack.c.bf16 %v7563_v7, %v7561_v10 }
 0xcb3   : > { %7672 = vmatprep.subr.bf16.mxu0 %v7571_v47 }
 0xcb4   : > { %7673 = vmatpush1.bf16.msra.mxu0 %v7570_v58 }
 0xcb5   : > { %7674 = vmatprep.subr.bf16.mxu0 %v7569_v57 }
 0xcb8   : > { %7675 = vmatpush1.bf16.msra.mxu0 %v7568_v56 }
 0xcbb   : > { %8277 = vmatmul.mubr.msk.bf16.vlgmr.msra.gmra.mxu0 %vm858_vm0, %v9005_v63 }
 0xcbc   : > { %7702 = vmatprep.mubr.bf16.mxu0 %v17030_v42 }
 0xcc3   : > { %8278 = vmatmul.mubr.msk.bf16.gmra.mxu0 %vm858_vm0, %v9006_v48 }
 0xcc4   : > { %7712 = vmatprep.mubr.bf16.mxu0 %v17030_v42 }
 0xccb   : > { %8279 = vmatmul.mubr.msk.bf16.gmra.mxu0 %vm858_vm0, %v9007_v4 }
 0xccc   : > { %7722 = vmatprep.mubr.bf16.mxu0 %v17030_v42 }
 0xcd3   : > { %8280 = vmatmul.mubr.msk.bf16.gmra.mxu0 %vm858_vm0, %v9008_v11 }
 0xd7b   : > { %v7694_v24 = vpop.f32.mrf.mxu0 }
 0xd7c   : > { %v15295_v50 = vadd.f32 %v7694_v24, %v7591_v28 }
 0xd7d   : > { %v7696_v14 = vpop.f32.mrf.mxu0 }
 0xd7e   : > { %v15289_v52 = vadd.f32 %v7696_v14, %v7591_v28  ;;  %v7749_v54 = vmul.f32 0.044715, %v15295_v50 }
 0xd7f   : > { %v7698_v35 = vpop.f32.mrf.mxu0 }
 0xd80   : > { %v7750_v30 = vmul.f32 0.044715, %v15289_v52  ;;  %v15299_v45 = vadd.f32 %v7698_v35, %v7596_v55  ;;  %v7765_v12 = vmul.f32 %v7749_v54, %v15295_v50 }
 0xd81   : > { %v7700_v27 = vpop.f32.mrf.mxu0 }
 0xd82   : > { %v15293_v34 = vadd.f32 %v7700_v27, %v7596_v55  ;;  %v7766_v15 = vmul.f32 %v7750_v30, %v15289_v52  ;;  %v7751_v19 = vmul.f32 0.044715, %v15299_v45 }
 0xd83   : > { %v7704_v16 = vpop.f32.mrf.mxu0 }
 0xd84   : > { %v7752_v36 = vmul.f32 0.044715, %v15293_v34  ;;  %v15315_v21 = vadd.f32 %v7704_v16, %v7601_v13  ;;  %v15332_v63 = vmul.f32 %v7766_v15, %v15289_v52 }
 0xd85   : > { %v7706_v37 = vpop.f32.mrf.mxu0 }
 0xd86   : > { %v15301_v43 = vadd.f32 %v7706_v37, %v7601_v13  ;;  %v7768_v3 = vmul.f32 %v7752_v36, %v15293_v34  ;;  %v7753_v48 = vmul.f32 0.044715, %v15315_v21 }
 0xd87   : > { %v7708_v38 = vpop.f32.mrf.mxu0 }
 0xd88   : > { %v15317_v22 = vadd.f32 %v7708_v38, %v7606_v25  ;;  %v7754_v17 = vmul.f32 0.044715, %v15301_v43  ;;  %v7784_v27 = vmul.f32 %v7768_v3, %v15293_v34 }
 0xd89   : > { %v7710_v51 = vpop.f32.mrf.mxu0 }
 0xd8a   : > { %v15291_v59 = vadd.f32 %v7710_v51, %v7606_v25  ;;  %v7755_v4 = vmul.f32 0.044715, %v15317_v22  ;;  %v7770_v14 = vmul.f32 %v7754_v17, %v15301_v43 }
 0xd8b   : > { %v7714_v6 = vpop.f32.mrf.mxu0 }
 0xd8c   : > { %v7756_v62 = vmul.f32 0.044715, %v15291_v59  ;;  %v15307_v41 = vadd.f32 %v7714_v6, %v7611_v39  ;;  %v7771_v6 = vmul.f32 %v7755_v4, %v15317_v22  ;;  %v7786_v36 = vmul.f32 %v7770_v14, %v15301_v43 }
 0xd8d   : > { %v7716_v5 = vpop.f32.mrf.mxu0 }
 0xd8e   : > { %v15303_v29 = vadd.f32 %v7716_v5, %v7611_v39  ;;  %v7772_v53 = vmul.f32 %v7756_v62, %v15291_v59  ;;  %v7757_v47 = vmul.f32 0.044715, %v15307_v41  ;;  %v7767_v39 = vmul.f32 %v7751_v19, %v15299_v45 }
 0xd8f   : > { %v7718_v32 = vpop.f32.mrf.mxu0 }
 0xd90   : > { %v7758_v1 = vmul.f32 0.044715, %v15303_v29  ;;  %v15311_v8 = vadd.f32 %v7718_v32, %v7616_v60  ;;  %v7788_v7 = vmul.f32 %v7772_v53, %v15291_v59  ;;  %v7773_v13 = vmul.f32 %v7757_v47, %v15307_v41 }
 0xd91   : > { %v7720_v0 = vpop.f32.mrf.mxu0 }
 0xd92   : > { %v7774_v23 = vmul.f32 %v7758_v1, %v15303_v29  ;;  %v7759_v44 = vmul.f32 0.044715, %v15311_v8  ;;  %v15322_v10 = vadd.f32 %v7720_v0, %v7616_v60  ;;  %v7804_v37 = vadd.f32 %v7788_v7, %v15291_v59 }
 0xd93   : > { %v7724_v58 = vpop.f32.mrf.mxu0  ;;  %v7789_v1 = vmul.f32 %v7773_v13, %v15307_v41  ;;  %v7787_v7 = vmul.f32 %v7771_v6, %v15317_v22 }
 0xd94   : > { %v7790_v18 = vmul.f32 %v7774_v23, %v15303_v29  ;;  %v7775_v57 = vmul.f32 %v7759_v44, %v15311_v8  ;;  %v7760_v56 = vmul.f32 0.044715, %v15322_v10  ;;  %v15336_v11 = vadd.f32 %v7724_v58, %v7621_v26 }
 0xd95   : > { %v7726_v24 = vpop.f32.mrf.mxu0  ;;  %v7820_v0 = vmul.f32 0.7978846, %v7804_v37  ;;  %v7805_v4 = vadd.f32 %v7789_v1, %v15307_v41  ;;  %v7803_v37 = vadd.f32 %v7787_v7, %v15317_v22 }
 0xd96   : > { %v7776_v60 = vmul.f32 %v7760_v56, %v15322_v10  ;;  %v15341_v35 = vadd.f32 %v7726_v24, %v7621_v26  ;;  %v7761_v16 = vmul.f32 0.044715, %v15336_v11  ;;  %v7791_v38 = vmul.f32 %v7775_v57, %v15311_v8 }
 0xd97   : > { %v7728_v25 = vpop.f32.mrf.mxu0  ;;  %v7806_v55 = vadd.f32 %v7790_v18, %v15303_v29  ;;  %v7769_v26 = vmul.f32 %v7753_v48, %v15315_v21  ;;  %v7802_v48 = vadd.f32 %v7786_v36, %v15301_v43  ;;  %10043 = vtanh.f32 %v7820_v0 }
 0xd98   : > { %v7792_v28 = vmul.f32 %v7776_v60, %v15322_v10  ;;  %v7762_v51 = vmul.f32 0.044715, %v15341_v35  ;;  %v7777_v62 = vmul.f32 %v7761_v16, %v15336_v11  ;;  %v15355_v30 = vadd.f32 %v7728_v25, %v15287_v20 }
 0xd99   : > { %v7730_v5 = vpop.f32.mrf.mxu0  ;;  %v7807_v17 = vadd.f32 %v7791_v38, %v15311_v8  ;;  %v7822_v3 = vmul.f32 0.7978846, %v7806_v55  ;;  %v7785_v18 = vmul.f32 %v7769_v26, %v15315_v21  ;;  %v7783_v25 = vmul.f32 %v7767_v39, %v15299_v45 }
 0xd9a   : > { %v7778_v53 = vmul.f32 %v7762_v51, %v15341_v35  ;;  %v15360_v32 = vadd.f32 %v7730_v5, %v15287_v20  ;;  %v7808_v54 = vadd.f32 %v7792_v28, %v15322_v10  ;;  %v7793_v15 = vmul.f32 %v7777_v62, %v15336_v11 }
 0xd9b   : > { %v7763_v19 = vmul.f32 0.044715, %v15355_v30  ;;  %v7823_v60 = vmul.f32 0.7978846, %v7807_v17  ;;  %10045 = vtanh.f32 %v7822_v3  ;;  %v7781_v28 = vmul.f32 %v7765_v12, %v15295_v50 }
 0xd9c   : > { %v7794_v23 = vmul.f32 %v7778_v53, %v15341_v35  ;;  %v7764_v44 = vmul.f32 0.044715, %v15360_v32  ;;  %v7809_v20 = vadd.f32 %v7793_v15, %v15336_v11  ;;  %v7824_v58 = vmul.f32 0.7978846, %v7808_v54 }
 0xd9d   : > { %v7779_v47 = vmul.f32 %v7763_v19, %v15355_v30  ;;  %v7800_v55 = vadd.f32 %v7784_v27, %v15293_v34  ;;  %v7801_v26 = vadd.f32 %v7785_v18, %v15315_v21  ;;  %v7821_v6 = vmul.f32 0.7978846, %v7805_v4 }
 0xd9e   : > { %v7780_v57 = vmul.f32 %v7764_v44, %v15360_v32  ;;  %v7810_v56 = vadd.f32 %v7794_v23, %v15341_v35  ;;  %v7825_v24 = vmul.f32 0.7978846, %v7809_v20  ;;  %10047 = vtanh.f32 %v7824_v58 }
 0xd9f   : > { %v7795_v14 = vmul.f32 %v7779_v47, %v15355_v30  ;;  %v7818_v39 = vmul.f32 0.7978846, %v7802_v48  ;;  %v7798_v36 = vadd.f32 %v15332_v63, %v15289_v52  ;;  %v7799_v53 = vadd.f32 %v7783_v25, %v15299_v45 }
 0xda0   : > { %v7796_v13 = vmul.f32 %v7780_v57, %v15360_v32  ;;  %v7826_v16 = vmul.f32 0.7978846, %v7810_v56  ;;  %v7819_v54 = vmul.f32 0.7978846, %v7803_v37  ;;  %v7816_v12 = vmul.f32 0.7978846, %v7800_v55 }
 0xda1   : > { %v7811_v38 = vadd.f32 %v7795_v14, %v15355_v30  ;;  %v7797_v1 = vadd.f32 %v7781_v28, %v15295_v50  ;;  %v7817_v27 = vmul.f32 0.7978846, %v7801_v26  ;;  %v7814_v15 = vmul.f32 0.7978846, %v7798_v36 }
 0xda2   : > { %v7812_v51 = vadd.f32 %v7796_v13, %v15360_v32  ;;  %10049 = vtanh.f32 %v7826_v16  ;;  %v7815_v19 = vmul.f32 0.7978846, %v7799_v53  ;;  %v7747_v57 = vmul.f32 0.5, %v15355_v30 }
 0xda3   : > { %10051 = vtanh.f32 %v7825_v24  ;;  %v7827_v62 = vmul.f32 0.7978846, %v7811_v38  ;;  %v7813_v0 = vmul.f32 0.7978846, %v7797_v1  ;;  %v7744_v4 = vmul.f32 0.5, %v15322_v10 }
 0xda4   : > { %10053 = vtanh.f32 %v7823_v60  ;;  %v7828_v5 = vmul.f32 0.7978846, %v7812_v51  ;;  %v10044_v17 = vpop.eup %10043  ;;  %v7746_v14 = vmul.f32 0.5, %v15341_v35  ;;  %v7748_v60 = vmul.f32 0.5, %v15360_v32 }
 0xda5   : > { %10055 = vtanh.f32 %v7827_v62  ;;  %v7745_v37 = vmul.f32 0.5, %v15336_v11  ;;  %v7742_v28 = vmul.f32 0.5, %v15303_v29  ;;  %v7852_v62 = vadd.f32 1.0, %v10044_v17 }
 0xda6   : > { %10057 = vtanh.f32 %v7828_v5  ;;  %v7743_v35 = vmul.f32 0.5, %v15311_v8  ;;  %v7741_v29 = vmul.f32 0.5, %v15307_v41  ;;  %v7738_v17 = vmul.f32 0.5, %v15301_v43 }
 0xda7   : > { %10059 = vtanh.f32 %v7821_v6  ;;  %v7734_v43 = vmul.f32 0.5, %v15289_v52  ;;  %v9009_v52 = vld [vmem:[%s15468_s9] sm:$0xff]  }
 0xda8   : > { %10061 = vtanh.f32 %v7818_v39  ;;  %v10046_v63 = vpop.eup %10045 }
 0xda9   : > { %10063 = vtanh.f32 %v7819_v54  ;;  %v7854_v16 = vadd.f32 1.0, %v10046_v63  ;;  %v7740_v54 = vmul.f32 0.5, %v15291_v59 }
 0xdaa   : > { %10065 = vtanh.f32 %v7816_v12 }
 0xdab   : > { %10067 = vtanh.f32 %v7817_v27  ;;  %v10048_v23 = vpop.eup %10047  ;;  %v7870_v53 = vmul.f32 %v7854_v16, %v7742_v28  ;;  %v7868_v63 = vmul.f32 %v7852_v62, %v7740_v54 }
 0xdac   : > { %10069 = vtanh.f32 %v7814_v15  ;;  %v7856_v58 = vadd.f32 1.0, %v10048_v23 }
 0xdad   : > { %10071 = vtanh.f32 %v7815_v19 }
 0xdae   : > { %10073 = vtanh.f32 %v7813_v0  ;;  %v7872_v6 = vmul.f32 %v7856_v58, %v7744_v4  ;;  %v7737_v58 = vmul.f32 0.5, %v15315_v21 }
 0xdaf   : > { %v10050_v44 = vpop.eup %10049 }
 0xdb0   : > { %v10052_v3 = vpop.eup %10051  ;;  %v7858_v47 = vadd.f32 1.0, %v10050_v44  ;;  %v7886_v0 = vpack.c.bf16 %v7872_v6, %v7870_v53  ;;  %v7739_v44 = vmul.f32 0.5, %v15317_v22  ;;  %v7735_v22 = vmul.f32 0.5, %v15299_v45  ;;  %v7896_v45 = vpop.permute.xlu1 %7895 }
 0xdb1   : > { %v10054_v7 = vpop.eup %10053  ;;  %v7857_v56 = vadd.f32 1.0, %v10052_v3 }
 0xdb2   : > { %v10056_v20 = vpop.eup %10055  ;;  %v7855_v51 = vadd.f32 1.0, %v10054_v7  ;;  %v7874_v30 = vmul.f32 %v7858_v47, %v7746_v14 }
 0xdb3   : > { %v10058_v18 = vpop.eup %10057  ;;  %v7859_v48 = vadd.f32 1.0, %v10056_v20  ;;  %v7873_v5 = vmul.f32 %v7857_v56, %v7745_v37  ;;  %v7736_v20 = vmul.f32 0.5, %v15293_v34  ;;  %v7733_v34 = vmul.f32 0.5, %v15295_v50  ;;  %v9010_v50 = vld [vmem:[%s15468_s9 + $0x8] sm:$0xff]  }
 0xdb4   : > { %v10060_v24 = vpop.eup %10059  ;;  %v7860_v13 = vadd.f32 1.0, %v10058_v18  ;;  %v7871_v27 = vmul.f32 %v7855_v51, %v7743_v35 }
 0xdb5   : > { %v10062_v25 = vpop.eup %10061  ;;  %v7875_v38 = vmul.f32 %v7859_v48, %v7747_v57  ;;  %v7853_v39 = vadd.f32 1.0, %v10060_v24 }
 0xdb6   : > { %v10064_v55 = vpop.eup %10063  ;;  %v7876_v26 = vmul.f32 %v7860_v13, %v7748_v60  ;;  %v7850_v11 = vadd.f32 1.0, %v10062_v25 }
 0xdb7   : > { %v10066_v10 = vpop.eup %10065  ;;  %v7887_v1 = vpack.c.bf16 %v7875_v38, %v7873_v5  ;;  %v7851_v15 = vadd.f32 1.0, %v10064_v55  ;;  %v7869_v23 = vmul.f32 %v7853_v39, %v7741_v29 }
 0xdb8   : > { %v10068_v32 = vpop.eup %10067  ;;  %v7888_v36 = vpack.c.bf16 %v7876_v26, %v7874_v30  ;;  %v7848_v8 = vadd.f32 1.0, %v10066_v10  ;;  %v7866_v7 = vmul.f32 %v7850_v11, %v7738_v17  ;;  %v7901_v30 = vpop.permute.xlu0 %7900 }
 0xdb9   : > { %v10070_v12 = vpop.eup %10069  ;;  %v7849_v3 = vadd.f32 1.0, %v10068_v32  ;;  %v7885_v47 = vpack.c.bf16 %v7871_v27, %v7869_v23  ;;  %v7867_v18 = vmul.f32 %v7851_v15, %v7739_v44 }
 0xdba   : > { %v10072_v19 = vpop.eup %10071  ;;  %7937 = vmatprep.subr.bf16.mxu1 %v7888_v36  ;;  %v7846_v41 = vadd.f32 1.0, %v10070_v12  ;;  %v7884_v56 = vpack.c.bf16 %v7868_v63, %v7866_v7  ;;  %v7864_v48 = vmul.f32 %v7848_v8, %v7736_v20 }
 0xdbb   : > { %7938 = vmatpush1.bf16.msra.mxu1 %v7887_v1  ;;  %v10074_v59 = vpop.eup %10073  ;;  %v7847_v57 = vadd.f32 1.0, %v10072_v19  ;;  %v7865_v4 = vmul.f32 %v7849_v3, %v7737_v58 }
 0xdbc   : > { %7939 = vmatprep.subr.bf16.mxu1 %v7886_v0  ;;  %v7845_v24 = vadd.f32 1.0, %v10074_v59  ;;  %v7862_v14 = vmul.f32 %v7846_v41, %v7734_v43  ;;  %v7911_v54 = vpop.permute.xlu0 %7910 }
 0xdbd   : > { %v7883_v60 = vpack.c.bf16 %v7867_v18, %v7865_v4  ;;  %v7863_v13 = vmul.f32 %v7847_v57, %v7735_v22 }
 0xdbe   : > { %v7882_v16 = vpack.c.bf16 %v7864_v48, %v7862_v14  ;;  %v7861_v21 = vmul.f32 %v7845_v24, %v7733_v34 }
 0xdbf   : > { %7940 = vmatpush1.bf16.msra.mxu1 %v7885_v47 }
 0xdc0   : > { %7941 = vmatprep.subr.bf16.mxu1 %v7884_v56  ;;  %v7881_v25 = vpack.c.bf16 %v7863_v13, %v7861_v21 }
 0xdc3   : > { %7942 = vmatpush1.bf16.msra.mxu1 %v7883_v60 }
 0xdc4   : > { %7943 = vmatprep.subr.bf16.mxu1 %v7882_v16 }
 0xdc7   : > { %7944 = vmatpush1.bf16.msra.mxu1 %v7881_v25 }
 0xdca   : > { %8283 = vmatmul.mubr.msk.bf16.vlgmr.msra.gmra.mxu1 %vm1022_vm9, %v9009_v52 }
 0xdcb   : > { %7971 = vmatprep.mubr.bf16.mxu1 %v17030_v42 }
 0xdd2   : > { %8284 = vmatmul.mubr.msk.bf16.gmra.mxu1 %vm1022_vm9, %v9010_v50 }
 0xe8a   : > { %v7963_v37 = vpop.f32.mrf.mxu1 }
 0xe8b   : > { %v7964_v38 = vadd.f32 %v7963_v37, %v7896_v45 }
 0xe8c   : > { %v7965_v28 = vpop.f32.mrf.mxu1 }
 0xe8d   : > { %v7982_v51 = vadd.f32 %v7964_v38, %v15216_v40  ;;  %v7966_v55 = vadd.f32 %v7965_v28, %v7896_v45  ;;  %v7906_v40 = vpop.permute.xlu1 %7905 }
 0xe8e   : > { %v7967_v26 = vpop.f32.mrf.mxu1 }
 0xe8f   : > { %7990 = vst [vmem:[%s15417_s23] sm:$0xff] %v7982_v51  ;;  %v7983_v42 = vadd.f32 %v7966_v55, %v15225_v49  ;;  %v7968_v6 = vadd.f32 %v7967_v26, %v7901_v30 }
 0xe90   : > { %v7969_v62 = vpop.f32.mrf.mxu1 }
 0xe91   : > { %7991 = vst [vmem:[%s15417_s23 + $0x8] sm:$0xff] %v7983_v42  ;;  %v7984_v10 = vadd.f32 %v7968_v6, %v15213_v33  ;;  %v7970_v5 = vadd.f32 %v7969_v62, %v7901_v30 }
 0xe92   : > { %v7973_v35 = vpop.f32.mrf.mxu1 }
 0xe93   : > { %7992 = vst [vmem:[%s15417_s23 + $0x10] sm:$0xff] %v7984_v10  ;;  %v7985_v39 = vadd.f32 %v7970_v5, %v15219_v9  ;;  %v7974_v32 = vadd.f32 %v7973_v35, %v7906_v40 }
 0xe94   : > { %v7975_v36 = vpop.f32.mrf.mxu1 }
 0xe95   : > { %7993 = vst [vmem:[%s15417_s23 + $0x18] sm:$0xff] %v7985_v39  ;;  %v7986_v49 = vadd.f32 %v7974_v32, %v15222_v61  ;;  %v7976_v53 = vadd.f32 %v7975_v36, %v7906_v40 }
 0xe96   : > { %v7977_v11 = vpop.f32.mrf.mxu1  ;;  %v8020_v61 = vld [vmem:[%s15417_s23] sm:$0xff] (%p10200_p5) }
 0xe97   : > { %7994 = vst [vmem:[%s15417_s23 + $0x20] sm:$0xff] %v7986_v49  ;;  %v7987_v33 = vadd.f32 %v7976_v53, %v15230_v46  ;;  %v7978_v12 = vadd.f32 %v7977_v11, %v7911_v54  ;;  %8021 = vst [vmem:[%s8007_s26] sm:$0xff] (%p10200_p5), %v8020_v61 }
 0xe98   : > { %v7979_v1 = vpop.f32.mrf.mxu1  ;;  %v8022_v46 = vld [vmem:[%s15417_s23 + $0x8] sm:$0xff] (%p10200_p5) }
 0xe99   : > { %7995 = vst [vmem:[%s15417_s23 + $0x28] sm:$0xff] %v7987_v33  ;;  %v7988_v29 = vadd.f32 %v7978_v12, %v15236_v2  ;;  %v7980_v27 = vadd.f32 %v7979_v1, %v7911_v54  ;;  %8004 = sbr.rel (!%p10200_p5) target bundleno = 3750 (0xea6), region = 91  ;;  %8023 = vst [vmem:[%s8007_s26 + $0x8] sm:$0xff] (%p10200_p5), %v8022_v46 }
 0xe9a   : > { %v8024_v2 = vld [vmem:[%s15417_s23 + $0x10] sm:$0xff] (%p10200_p5) }
 0xe9b   : > { %7996 = vst [vmem:[%s15417_s23 + $0x30] sm:$0xff] %v7988_v29  ;;  %v7989_v9 = vadd.f32 %v7980_v27, %v15241_v31  ;;  %8025 = vst [vmem:[%s8007_s26 + $0x20] sm:$0xff] (%p10200_p5), %v8024_v2 }
 0xe9c   : > { %v8026_v31 = vld [vmem:[%s15417_s23 + $0x18] sm:$0xff] (%p10200_p5) }
 0xe9d   : > { %7997 = vst [vmem:[%s15417_s23 + $0x38] sm:$0xff] %v7989_v9  ;;  %8027 = vst [vmem:[%s8007_s26 + $0x28] sm:$0xff] (%p10200_p5), %v8026_v31 }
 0xe9e   : > { %v8028_v15 = vld [vmem:[%s15417_s23 + $0x20] sm:$0xff] }
 0xe9f   : > { %8029 = vst [vmem:[%s8007_s26 + $0x40] sm:$0xff] %v8028_v15 }
 0xea0   : > { %v8030_v19 = vld [vmem:[%s15417_s23 + $0x28] sm:$0xff] }
 0xea1   : > { %8031 = vst [vmem:[%s8007_s26 + $0x48] sm:$0xff] %v8030_v19 }
 0xea2   : > { %v8032_v0 = vld [vmem:[%s15417_s23 + $0x30] sm:$0xff] }
 0xea3   : > { %8033 = vst [vmem:[%s8007_s26 + $0x60] sm:$0xff] %v8032_v0 }
 0xea4   : > { %v8034_v17 = vld [vmem:[%s15417_s23 + $0x38] sm:$0xff] }
 0xea5   : > { %8035 = vst [vmem:[%s8007_s26 + $0x68] sm:$0xff] %v8034_v17 }
 0xea6 PF: > { %p18_p10 = scmp.ge.s32.totalorder %s10187_s21, 4   ;;  %s17039_s17 = smov %s10101_s18 }
 0xea7   : > { %s17040_s18 = smov %s10198_s24  ;;  %s17041_s19 = smov %s10187_s21 }
 0xea8   :  { %20 = sbr.rel (!%p18_p10) target bundleno = 2 (0x2), region = 145 }

</bundles_post_ra>
